<compile_context>
chip_gen: v7x
topology: tpu7x:2x2x1
jax: 0.10.0
libtpu: 0.0.40
codegen_flags: <defaults>
</compile_context>

<pallas_src>
import numpy as np
import jax
import jax.numpy as jnp
from jax import lax
from jax.experimental import pallas as pl
from jax.experimental.pallas import tpu as pltpu

EPS = 1e-5  # PyTorch BatchNorm default eps


# --------------------------------------------------------------------------- #
# In-kernel building blocks (activations = list of per-channel (1, Ntot) rows)
# --------------------------------------------------------------------------- #

def _conv3x3_bn_relu(rows, w_ref, sh_ref, mask_rows, stride, W0, Ntot):
    """3x3 'same' conv (+ folded BN + ReLU) on packed (1, Ntot) channel rows.

    rows      : list of Cin values, each (1, Ntot); valid data at stride-aligned
                positions of the packed (b, h, w) layout.
    w_ref     : SMEM (Cout, Cin*9) folded weights, column index = cin*9 + ky*3 + kx.
    sh_ref    : SMEM (Cout,) folded BatchNorm shifts.
    mask_rows : list of 8 (1, Ntot) {0,1} rows (non-center taps) realizing the
                zero padding at the current (pooled) resolution.
    stride    : dilation of the tap offsets (2**layer) -- folds the earlier pools.
    """
    cin = len(rows)
    cout = w_ref.shape[0]
    # Shifted + masked taps, assembled once per input channel, reused for all cout.
    taps = []
    for ci in range(cin):
        per = []
        for ky in range(3):
            for kx in range(3):
                t = ky * 3 + kx
                d = ((ky - 1) * W0 + (kx - 1)) * stride
                if d == 0:                      # center tap: always in bounds
                    per.append(rows[ci])
                else:
                    m = t if t < 4 else t - 1
                    shifted = pltpu.roll(rows[ci], (-d) % Ntot, axis=1)
                    per.append(shifted * mask_rows[m])   # mask kills pad + wrap reads
        taps.append(per)
    outs = []
    for co in range(cout):
        acc = None
        for ci in range(cin):
            for t in range(9):
                term = w_ref[co, ci * 9 + t] * taps[ci][t]   # scalar-broadcast FMA (VPU)
                acc = term if acc is None else acc + term
        outs.append(jnp.maximum(acc + sh_ref[co], 0.0))
    return outs


def _avg_pool_2x2(rows, stride, W0, Ntot):
    """2x2 average pool via rolls; output is valid at 2*stride-aligned positions."""
    d1, d2, d3 = stride, stride * W0, stride * W0 + stride
    out = []
    for r in rows:
        out.append(0.25 * (r
                           + pltpu.roll(r, (-d1) % Ntot, axis=1)
                           + pltpu.roll(r, (-d2) % Ntot, axis=1)
                           + pltpu.roll(r, (-d3) % Ntot, axis=1)))
    return out


# --------------------------------------------------------------------------- #
# Host-side parameter folding (runs ONCE in build_querynet, outside the jit path)
# --------------------------------------------------------------------------- #

def _fold_conv_bn(w, bn):
    """Fold inference BatchNorm into the conv weights / shift used by the VPU FMAs."""
    gamma, beta, mean, var = (jnp.asarray(t, jnp.float32) for t in bn)
    w = jnp.asarray(w, jnp.float32)
    s = gamma * lax.rsqrt(var + EPS)                             # (Cout,)
    cout, cin = w.shape[0], w.shape[1]
    w_flat = (w * s[:, None, None, None]).reshape(cout, cin * 9)  # [co, ci*9 + ky*3+kx]
    shift = beta - mean * s                                       # (Cout,)
    return w_flat, shift


def _tap_masks_packed(batch, H0, W0, stride):
    """(8, batch*H0*W0) {0,1} masks for the 8 non-center taps at the given dilation."""
    y, x = np.meshgrid(np.arange(H0), np.arange(W0), indexing="ij")
    rows = []
    for ky in range(3):
        for kx in range(3):
            if ky == 1 and kx == 1:
                continue
            ok = ((y + (ky - 1) * stride >= 0) & (y + (ky - 1) * stride < H0) &
                  (x + (kx - 1) * stride >= 0) & (x + (kx - 1) * stride < W0))
            rows.append(np.tile(ok.reshape(-1), batch))
    return jnp.asarray(np.stack(rows).astype(np.float32))


def _fold_bottom(bottom_w, bottom_b, c_last, H0, W0, S, pnum):
    """Fold the final-pool gather + transpose(-1,-2).flatten(1,2) + pointwise Conv1d."""
    Tp, Fp = H0 // S, W0 // S
    N0 = H0 * W0
    sel = np.zeros((N0, Tp, Fp), np.float32)          # picks the S-aligned positions
    for t in range(Tp):
        for f in range(Fp):
            sel[t * S * W0 + f * S, t, f] = 1.0
    wb = jnp.asarray(bottom_w, jnp.float32).reshape(pnum, c_last, Fp)   # [p, c, f]
    g = jnp.einsum("pcf,mtf->cmpt", wb, jnp.asarray(sel))
    g = g.reshape(c_last * N0, pnum * Tp)                               # row c*N0+m, col p*Tp+t
    bias_row = jnp.repeat(jnp.asarray(bottom_b, jnp.float32), Tp).reshape(1, pnum * Tp)
    avg = np.zeros((pnum * Tp, pnum), np.float32)                       # mean over time axis
    for p in range(pnum):
        avg[p * Tp:(p + 1) * Tp, p] = 1.0 / Tp
    return g, bias_row, jnp.asarray(avg)


# --------------------------------------------------------------------------- #
# Build the fused forward (one pallas_call, no grid, everything VMEM/SMEM resident)
# --------------------------------------------------------------------------- #

def build_querynet(params, *, batch, time_frames, freq_bins):
    """Fold parameters once and return a jittable forward: (B,1,T,F) -> (B, pnum)."""
    L = len(params["layers"])
    sc = 2 ** L
    Tc = time_frames // sc * sc                      # align(): drop trailing frames
    assert Tc >= sc, "time axis too short for blocks_num"
    assert freq_bins % sc == 0, "frequency axis must be divisible by 2**blocks_num"
    H0, W0 = Tc, freq_bins
    N0 = H0 * W0
    Ntot = batch * N0
    pnum = int(params["bottom_b"].shape[0])
    c_last = int(params["layers"][-1]["w2"].shape[0])
    Tp = H0 // sc

    # bn0 = BatchNorm2d(1): a single scalar affine over the whole spectrogram.
    g0, b0, m0, v0 = (jnp.asarray(t, jnp.float32).reshape(()) for t in params["bn0"])
    s0 = g0 * lax.rsqrt(v0 + EPS)
    bn0_ss = jnp.stack([s0, b0 - m0 * s0])           # (2,): scale, shift

    operands = [bn0_ss]
    in_specs = [pl.BlockSpec(memory_space=pltpu.MemorySpace.SMEM)]
    strides = []
    s = 1
    for layer in params["layers"]:
        masks = _tap_masks_packed(batch, H0, W0, s)                  # (8, Ntot)
        w1m, sh1 = _fold_conv_bn(layer["w1"], layer["bn1"])
        w2m, sh2 = _fold_conv_bn(layer["w2"], layer["bn2"])
        operands += [masks, w1m, sh1, w2m, sh2]
        in_specs += [pl.BlockSpec(memory_space=pltpu.MemorySpace.VMEM),
                     pl.BlockSpec(memory_space=pltpu.MemorySpace.SMEM),
                     pl.BlockSpec(memory_space=pltpu.MemorySpace.SMEM),
                     pl.BlockSpec(memory_space=pltpu.MemorySpace.SMEM),
                     pl.BlockSpec(memory_space=pltpu.MemorySpace.SMEM)]
        strides.append(s)
        s *= 2

    g, bias_row, avg = _fold_bottom(params["bottom_w"], params["bottom_b"],
                                    c_last, H0, W0, sc, pnum)
    operands += [g, bias_row, avg]
    in_specs += [pl.BlockSpec(memory_space=pltpu.MemorySpace.VMEM)] * 3
    n_const = len(operands)

    def kernel(x_ref, *refs):
        ins, o_ref = refs[:n_const], refs[n_const]
        bn0_ref = ins[0]
        # bn0 (scalar affine); activations stay as packed (1, B*H0*W0) lane rows.
        rows = [x_ref[...] * bn0_ref[0] + bn0_ref[1]]
        i = 1
        for st in strides:
            masks_ref = ins[i]
            w1, sh1, w2, sh2 = ins[i + 1], ins[i + 2], ins[i + 3], ins[i + 4]
            i += 5
            mask_rows = [masks_ref[m:m + 1, :] for m in range(8)]
            rows = _conv3x3_bn_relu(rows, w1, sh1, mask_rows, st, W0, Ntot)
            rows = _conv3x3_bn_relu(rows, w2, sh2, mask_rows, st, W0, Ntot)
            rows = _avg_pool_2x2(rows, st, W0, Ntot)
        g_ref, bias_ref, avg_ref = ins[i], ins[i + 1], ins[i + 2]
        # Present the final activation as one (B, c_last*N0) row block (aligned
        # 128-lane slices + concats), then a single fused bottom matmul.
        act = jnp.concatenate(
            [jnp.concatenate([rows[c][:, b * N0:(b + 1) * N0] for c in range(c_last)],
                             axis=1) for b in range(batch)],
            axis=0)                                                       # (B, c_last*N0)
        pre = jnp.dot(act, g_ref[...], preferred_element_type=jnp.float32) + bias_ref[...]
        o_ref[...] = jnp.dot(jnp.tanh(pre), avg_ref[...],
                             preferred_element_type=jnp.float32)          # (B, pnum)

    call = pl.pallas_call(
        kernel,
        out_shape=jax.ShapeDtypeStruct((batch, pnum), jnp.float32),
        in_specs=[pl.BlockSpec(memory_space=pltpu.MemorySpace.VMEM)] + in_specs,
        out_specs=pl.BlockSpec(memory_space=pltpu.MemorySpace.VMEM),
    )

    def forward(x_nchw):
        assert tuple(x_nchw.shape) == (batch, 1, time_frames, freq_bins), x_nchw.shape
        x_packed = x_nchw[:, 0, :Tc, :].astype(jnp.float32).reshape(1, Ntot)
        return call(x_packed, *operands)

    return forward


# --------------------------------------------------------------------------- #
# Pure-JAX reference (same ConvBlock / LinearBlock1D assumptions) for validation
# --------------------------------------------------------------------------- #

def querynet_reference(x, params):
    L = len(params["layers"])
    sc = 2 ** L
    Tc = x.shape[2] // sc * sc
    a = x[:, :, :Tc, :].astype(jnp.float32)
    g0, b0, m0, v0 = (jnp.asarray(t, jnp.float32) for t in params["bn0"])
    a = (a - m0) * (g0 * lax.rsqrt(v0 + EPS)) + b0
    for layer in params["layers"]:
        for w, bn in ((layer["w1"], layer["bn1"]), (layer["w2"], layer["bn2"])):
            a = lax.conv_general_dilated(a, jnp.asarray(w, jnp.float32),
                                         window_strides=(1, 1),
                                         padding=((1, 1), (1, 1)),
                                         dimension_numbers=("NCHW", "OIHW", "NCHW"))
            gm, bt, mu, vr = (jnp.asarray(t, jnp.float32) for t in bn)
            sccl = (gm * lax.rsqrt(vr + EPS))[None, :, None, None]
            a = jnp.maximum(a * sccl + (bt - mu * gm * lax.rsqrt(vr + EPS))[None, :, None, None], 0.0)
        B_, C, H, W = a.shape
        a = a.reshape(B_, C, H // 2, 2, W // 2, 2).mean(axis=(3, 5))
    B_, C, Tp, Fp = a.shape
    a = jnp.transpose(a, (0, 1, 3, 2)).reshape(B_, C * Fp, Tp)
    pre = jnp.einsum("pk,bkt->bpt", jnp.asarray(params["bottom_w"], jnp.float32), a)
    pre = pre + jnp.asarray(params["bottom_b"], jnp.float32)[None, :, None]
    return jnp.tanh(pre).mean(-1)


# --------------------------------------------------------------------------- #
# Deterministic parameter construction (mirrors the PyTorch module)
# --------------------------------------------------------------------------- #

def init_params(key, *, input_channels_num=1, input_size=16, blocks_num=2, pnum=8):
    params = {"bn0": (1.1, 0.05, -0.02, 0.9)}   # gamma, beta, running_mean, running_var
    layers = []
    cin, cout = input_channels_num, 2

    def bn_params(k, n):
        kg, kb, km, kv = jax.random.split(k, 4)
        return (1.0 + 0.1 * jax.random.normal(kg, (n,), jnp.float32),
                0.1 * jax.random.normal(kb, (n,), jnp.float32),
                0.1 * jax.random.normal(km, (n,), jnp.float32),
                0.5 + jax.random.uniform(kv, (n,), jnp.float32))

    for _ in range(blocks_num):
        key, k1, k2, k3, k4 = jax.random.split(key, 5)
        w1 = jax.random.normal(k1, (cout, cin, 3, 3), jnp.float32) * 0.1
        w2 = jax.random.normal(k2, (cout, cout, 3, 3), jnp.float32) * 0.1
        layers.append({"w1": w1, "bn1": bn_params(k3, cout),
                       "w2": w2, "bn2": bn_params(k4, cout)})
        cin, cout = cout, cout * 2
    out_size = input_size // (2 ** blocks_num)
    key, kw, kb = jax.random.split(key, 3)
    params["layers"] = layers
    params["bottom_w"] = jax.random.normal(kw, (pnum, cin * out_size), jnp.float32) * 0.1
    params["bottom_b"] = jax.random.normal(kb, (pnum,), jnp.float32) * 0.1
    return params


# --------------------------------------------------------------------------- #

if __name__ == "__main__":
    B, T, F = 2, 19, 16                      # T=19 exercises align() truncation to 16
    blocks_num, pnum = 2, 8

    key = jax.random.PRNGKey(0)
    key, kx = jax.random.split(key)
    x = jax.random.normal(kx, (B, 1, T, F), jnp.float32)   # PyTorch-style NCHW input

    params = init_params(key, input_channels_num=1, input_size=F,
                         blocks_num=blocks_num, pnum=pnum)

    fwd = jax.jit(build_querynet(params, batch=B, time_frames=T, freq_bins=F))
    out = jax.block_until_ready(fwd(x))

    ref = jax.block_until_ready(querynet_reference(x, params))

    assert out.shape == (B, pnum), out.shape
    assert bool(jnp.all(jnp.isfinite(out)))
    assert bool(jnp.all(jnp.abs(out) <= 1.0 + 1e-6))       # tanh-mean stays in [-1, 1]
    max_err = float(jnp.max(jnp.abs(out - ref)))
    assert max_err < 1e-3, f"kernel/reference mismatch: max abs err = {max_err}"
    print("KERNEL_OK")
</pallas_src>

<mosaic_0001>
module attributes {stable_mosaic.version = 11 : i64} {
  func.func @kernel(%arg0: memref<1x512xf32, #tpu.memory_space<vmem>>, %arg1: memref<2xf32, #tpu.memory_space<smem>>, %arg2: memref<8x512xf32, #tpu.memory_space<vmem>>, %arg3: memref<2x9xf32, #tpu.memory_space<smem>>, %arg4: memref<2xf32, #tpu.memory_space<smem>>, %arg5: memref<2x18xf32, #tpu.memory_space<smem>>, %arg6: memref<2xf32, #tpu.memory_space<smem>>, %arg7: memref<8x512xf32, #tpu.memory_space<vmem>>, %arg8: memref<4x18xf32, #tpu.memory_space<smem>>, %arg9: memref<4xf32, #tpu.memory_space<smem>>, %arg10: memref<4x36xf32, #tpu.memory_space<smem>>, %arg11: memref<4xf32, #tpu.memory_space<smem>>, %arg12: memref<1024x32xf32, #tpu.memory_space<vmem>>, %arg13: memref<1x32xf32, #tpu.memory_space<vmem>>, %arg14: memref<32x8xf32, #tpu.memory_space<vmem>>, %arg15: memref<2x8xf32, #tpu.memory_space<vmem>>) attributes {dimension_semantics = [], scalar_prefetch = 0 : i64, scratch_operands = 0 : i64, tpu.core_type = #tpu.core_type<tc>} {
    %c0 = arith.constant 0 : index
    %c0_0 = arith.constant 0 : index
    %0 = vector.load %arg0[%c0, %c0_0] : memref<1x512xf32, #tpu.memory_space<vmem>>, vector<1x512xf32>
    %c0_1 = arith.constant 0 : index
    %1 = memref.load %arg1[%c0_1] : memref<2xf32, #tpu.memory_space<smem>>
    %2 = vector.broadcast %1 : f32 to vector<1x512xf32>
    %3 = arith.mulf %0, %2 : vector<1x512xf32>
    %c1 = arith.constant 1 : index
    %4 = memref.load %arg1[%c1] : memref<2xf32, #tpu.memory_space<smem>>
    %5 = vector.broadcast %4 : f32 to vector<1x512xf32>
    %6 = arith.addf %3, %5 : vector<1x512xf32>
    %c0_2 = arith.constant 0 : index
    %c0_3 = arith.constant 0 : index
    %7 = vector.load %arg2[%c0_2, %c0_3] : memref<8x512xf32, #tpu.memory_space<vmem>>, vector<1x512xf32>
    %c1_4 = arith.constant 1 : index
    %c0_5 = arith.constant 0 : index
    %8 = vector.load %arg2[%c1_4, %c0_5] : memref<8x512xf32, #tpu.memory_space<vmem>>, vector<1x512xf32>
    %c2 = arith.constant 2 : index
    %c0_6 = arith.constant 0 : index
    %9 = vector.load %arg2[%c2, %c0_6] : memref<8x512xf32, #tpu.memory_space<vmem>>, vector<1x512xf32>
    %c3 = arith.constant 3 : index
    %c0_7 = arith.constant 0 : index
    %10 = vector.load %arg2[%c3, %c0_7] : memref<8x512xf32, #tpu.memory_space<vmem>>, vector<1x512xf32>
    %c4 = arith.constant 4 : index
    %c0_8 = arith.constant 0 : index
    %11 = vector.load %arg2[%c4, %c0_8] : memref<8x512xf32, #tpu.memory_space<vmem>>, vector<1x512xf32>
    %c5 = arith.constant 5 : index
    %c0_9 = arith.constant 0 : index
    %12 = vector.load %arg2[%c5, %c0_9] : memref<8x512xf32, #tpu.memory_space<vmem>>, vector<1x512xf32>
    %c6 = arith.constant 6 : index
    %c0_10 = arith.constant 0 : index
    %13 = vector.load %arg2[%c6, %c0_10] : memref<8x512xf32, #tpu.memory_space<vmem>>, vector<1x512xf32>
    %c7 = arith.constant 7 : index
    %c0_11 = arith.constant 0 : index
    %14 = vector.load %arg2[%c7, %c0_11] : memref<8x512xf32, #tpu.memory_space<vmem>>, vector<1x512xf32>
    %c17_i32 = arith.constant 17 : i32
    %15 = tpu.dynamic_rotate %6 by %c17_i32 dim 1 : vector<1x512xf32>, i32 -> vector<1x512xf32>
    %16 = arith.mulf %15, %7 : vector<1x512xf32>
    %c16_i32 = arith.constant 16 : i32
    %17 = tpu.dynamic_rotate %6 by %c16_i32 dim 1 : vector<1x512xf32>, i32 -> vector<1x512xf32>
    %18 = arith.mulf %17, %8 : vector<1x512xf32>
    %c15_i32 = arith.constant 15 : i32
    %19 = tpu.dynamic_rotate %6 by %c15_i32 dim 1 : vector<1x512xf32>, i32 -> vector<1x512xf32>
    %20 = arith.mulf %19, %9 : vector<1x512xf32>
    %c1_i32 = arith.constant 1 : i32
    %21 = tpu.dynamic_rotate %6 by %c1_i32 dim 1 : vector<1x512xf32>, i32 -> vector<1x512xf32>
    %22 = arith.mulf %21, %10 : vector<1x512xf32>
    %c511_i32 = arith.constant 511 : i32
    %23 = tpu.dynamic_rotate %6 by %c511_i32 dim 1 : vector<1x512xf32>, i32 -> vector<1x512xf32>
    %24 = arith.mulf %23, %11 : vector<1x512xf32>
    %c497_i32 = arith.constant 497 : i32
    %25 = tpu.dynamic_rotate %6 by %c497_i32 dim 1 : vector<1x512xf32>, i32 -> vector<1x512xf32>
    %26 = arith.mulf %25, %12 : vector<1x512xf32>
    %c496_i32 = arith.constant 496 : i32
    %27 = tpu.dynamic_rotate %6 by %c496_i32 dim 1 : vector<1x512xf32>, i32 -> vector<1x512xf32>
    %28 = arith.mulf %27, %13 : vector<1x512xf32>
    %c495_i32 = arith.constant 495 : i32
    %29 = tpu.dynamic_rotate %6 by %c495_i32 dim 1 : vector<1x512xf32>, i32 -> vector<1x512xf32>
    %30 = arith.mulf %29, %14 : vector<1x512xf32>
    %c0_12 = arith.constant 0 : index
    %c0_13 = arith.constant 0 : index
    %31 = memref.load %arg3[%c0_12, %c0_13] : memref<2x9xf32, #tpu.memory_space<smem>>
    %32 = vector.broadcast %31 : f32 to vector<1x512xf32>
    %33 = arith.mulf %32, %16 : vector<1x512xf32>
    %c0_14 = arith.constant 0 : index
    %c1_15 = arith.constant 1 : index
    %34 = memref.load %arg3[%c0_14, %c1_15] : memref<2x9xf32, #tpu.memory_space<smem>>
    %35 = vector.broadcast %34 : f32 to vector<1x512xf32>
    %36 = arith.mulf %35, %18 : vector<1x512xf32>
    %37 = arith.addf %33, %36 : vector<1x512xf32>
    %c0_16 = arith.constant 0 : index
    %c2_17 = arith.constant 2 : index
    %38 = memref.load %arg3[%c0_16, %c2_17] : memref<2x9xf32, #tpu.memory_space<smem>>
    %39 = vector.broadcast %38 : f32 to vector<1x512xf32>
    %40 = arith.mulf %39, %20 : vector<1x512xf32>
    %41 = arith.addf %37, %40 : vector<1x512xf32>
    %c0_18 = arith.constant 0 : index
    %c3_19 = arith.constant 3 : index
    %42 = memref.load %arg3[%c0_18, %c3_19] : memref<2x9xf32, #tpu.memory_space<smem>>
    %43 = vector.broadcast %42 : f32 to vector<1x512xf32>
    %44 = arith.mulf %43, %22 : vector<1x512xf32>
    %45 = arith.addf %41, %44 : vector<1x512xf32>
    %c0_20 = arith.constant 0 : index
    %c4_21 = arith.constant 4 : index
    %46 = memref.load %arg3[%c0_20, %c4_21] : memref<2x9xf32, #tpu.memory_space<smem>>
    %47 = vector.broadcast %46 : f32 to vector<1x512xf32>
    %48 = arith.mulf %47, %6 : vector<1x512xf32>
    %49 = arith.addf %45, %48 : vector<1x512xf32>
    %c0_22 = arith.constant 0 : index
    %c5_23 = arith.constant 5 : index
    %50 = memref.load %arg3[%c0_22, %c5_23] : memref<2x9xf32, #tpu.memory_space<smem>>
    %51 = vector.broadcast %50 : f32 to vector<1x512xf32>
    %52 = arith.mulf %51, %24 : vector<1x512xf32>
    %53 = arith.addf %49, %52 : vector<1x512xf32>
    %c0_24 = arith.constant 0 : index
    %c6_25 = arith.constant 6 : index
    %54 = memref.load %arg3[%c0_24, %c6_25] : memref<2x9xf32, #tpu.memory_space<smem>>
    %55 = vector.broadcast %54 : f32 to vector<1x512xf32>
    %56 = arith.mulf %55, %26 : vector<1x512xf32>
    %57 = arith.addf %53, %56 : vector<1x512xf32>
    %c0_26 = arith.constant 0 : index
    %c7_27 = arith.constant 7 : index
    %58 = memref.load %arg3[%c0_26, %c7_27] : memref<2x9xf32, #tpu.memory_space<smem>>
    %59 = vector.broadcast %58 : f32 to vector<1x512xf32>
    %60 = arith.mulf %59, %28 : vector<1x512xf32>
    %61 = arith.addf %57, %60 : vector<1x512xf32>
    %c0_28 = arith.constant 0 : index
    %c8 = arith.constant 8 : index
    %62 = memref.load %arg3[%c0_28, %c8] : memref<2x9xf32, #tpu.memory_space<smem>>
    %63 = vector.broadcast %62 : f32 to vector<1x512xf32>
    %64 = arith.mulf %63, %30 : vector<1x512xf32>
    %65 = arith.addf %61, %64 : vector<1x512xf32>
    %c0_29 = arith.constant 0 : index
    %66 = memref.load %arg4[%c0_29] : memref<2xf32, #tpu.memory_space<smem>>
    %67 = vector.broadcast %66 : f32 to vector<1x512xf32>
    %68 = arith.addf %65, %67 : vector<1x512xf32>
    %cst = arith.constant 0.000000e+00 : f32
    %69 = vector.broadcast %cst : f32 to vector<1x512xf32>
    %70 = arith.maximumf %68, %69 : vector<1x512xf32>
    %c1_30 = arith.constant 1 : index
    %c0_31 = arith.constant 0 : index
    %71 = memref.load %arg3[%c1_30, %c0_31] : memref<2x9xf32, #tpu.memory_space<smem>>
    %72 = vector.broadcast %71 : f32 to vector<1x512xf32>
    %73 = arith.mulf %72, %16 : vector<1x512xf32>
    %c1_32 = arith.constant 1 : index
    %c1_33 = arith.constant 1 : index
    %74 = memref.load %arg3[%c1_32, %c1_33] : memref<2x9xf32, #tpu.memory_space<smem>>
    %75 = vector.broadcast %74 : f32 to vector<1x512xf32>
    %76 = arith.mulf %75, %18 : vector<1x512xf32>
    %77 = arith.addf %73, %76 : vector<1x512xf32>
    %c1_34 = arith.constant 1 : index
    %c2_35 = arith.constant 2 : index
    %78 = memref.load %arg3[%c1_34, %c2_35] : memref<2x9xf32, #tpu.memory_space<smem>>
    %79 = vector.broadcast %78 : f32 to vector<1x512xf32>
    %80 = arith.mulf %79, %20 : vector<1x512xf32>
    %81 = arith.addf %77, %80 : vector<1x512xf32>
    %c1_36 = arith.constant 1 : index
    %c3_37 = arith.constant 3 : index
    %82 = memref.load %arg3[%c1_36, %c3_37] : memref<2x9xf32, #tpu.memory_space<smem>>
    %83 = vector.broadcast %82 : f32 to vector<1x512xf32>
    %84 = arith.mulf %83, %22 : vector<1x512xf32>
    %85 = arith.addf %81, %84 : vector<1x512xf32>
    %c1_38 = arith.constant 1 : index
    %c4_39 = arith.constant 4 : index
    %86 = memref.load %arg3[%c1_38, %c4_39] : memref<2x9xf32, #tpu.memory_space<smem>>
    %87 = vector.broadcast %86 : f32 to vector<1x512xf32>
    %88 = arith.mulf %87, %6 : vector<1x512xf32>
    %89 = arith.addf %85, %88 : vector<1x512xf32>
    %c1_40 = arith.constant 1 : index
    %c5_41 = arith.constant 5 : index
    %90 = memref.load %arg3[%c1_40, %c5_41] : memref<2x9xf32, #tpu.memory_space<smem>>
    %91 = vector.broadcast %90 : f32 to vector<1x512xf32>
    %92 = arith.mulf %91, %24 : vector<1x512xf32>
    %93 = arith.addf %89, %92 : vector<1x512xf32>
    %c1_42 = arith.constant 1 : index
    %c6_43 = arith.constant 6 : index
    %94 = memref.load %arg3[%c1_42, %c6_43] : memref<2x9xf32, #tpu.memory_space<smem>>
    %95 = vector.broadcast %94 : f32 to vector<1x512xf32>
    %96 = arith.mulf %95, %26 : vector<1x512xf32>
    %97 = arith.addf %93, %96 : vector<1x512xf32>
    %c1_44 = arith.constant 1 : index
    %c7_45 = arith.constant 7 : index
    %98 = memref.load %arg3[%c1_44, %c7_45] : memref<2x9xf32, #tpu.memory_space<smem>>
    %99 = vector.broadcast %98 : f32 to vector<1x512xf32>
    %100 = arith.mulf %99, %28 : vector<1x512xf32>
    %101 = arith.addf %97, %100 : vector<1x512xf32>
    %c1_46 = arith.constant 1 : index
    %c8_47 = arith.constant 8 : index
    %102 = memref.load %arg3[%c1_46, %c8_47] : memref<2x9xf32, #tpu.memory_space<smem>>
    %103 = vector.broadcast %102 : f32 to vector<1x512xf32>
    %104 = arith.mulf %103, %30 : vector<1x512xf32>
    %105 = arith.addf %101, %104 : vector<1x512xf32>
    %c1_48 = arith.constant 1 : index
    %106 = memref.load %arg4[%c1_48] : memref<2xf32, #tpu.memory_space<smem>>
    %107 = vector.broadcast %106 : f32 to vector<1x512xf32>
    %108 = arith.addf %105, %107 : vector<1x512xf32>
    %cst_49 = arith.constant 0.000000e+00 : f32
    %109 = vector.broadcast %cst_49 : f32 to vector<1x512xf32>
    %110 = arith.maximumf %108, %109 : vector<1x512xf32>
    %c17_i32_50 = arith.constant 17 : i32
    %111 = tpu.dynamic_rotate %70 by %c17_i32_50 dim 1 : vector<1x512xf32>, i32 -> vector<1x512xf32>
    %112 = arith.mulf %111, %7 : vector<1x512xf32>
    %c16_i32_51 = arith.constant 16 : i32
    %113 = tpu.dynamic_rotate %70 by %c16_i32_51 dim 1 : vector<1x512xf32>, i32 -> vector<1x512xf32>
    %114 = arith.mulf %113, %8 : vector<1x512xf32>
    %c15_i32_52 = arith.constant 15 : i32
    %115 = tpu.dynamic_rotate %70 by %c15_i32_52 dim 1 : vector<1x512xf32>, i32 -> vector<1x512xf32>
    %116 = arith.mulf %115, %9 : vector<1x512xf32>
    %c1_i32_53 = arith.constant 1 : i32
    %117 = tpu.dynamic_rotate %70 by %c1_i32_53 dim 1 : vector<1x512xf32>, i32 -> vector<1x512xf32>
    %118 = arith.mulf %117, %10 : vector<1x512xf32>
    %c511_i32_54 = arith.constant 511 : i32
    %119 = tpu.dynamic_rotate %70 by %c511_i32_54 dim 1 : vector<1x512xf32>, i32 -> vector<1x512xf32>
    %120 = arith.mulf %119, %11 : vector<1x512xf32>
    %c497_i32_55 = arith.constant 497 : i32
    %121 = tpu.dynamic_rotate %70 by %c497_i32_55 dim 1 : vector<1x512xf32>, i32 -> vector<1x512xf32>
    %122 = arith.mulf %121, %12 : vector<1x512xf32>
    %c496_i32_56 = arith.constant 496 : i32
    %123 = tpu.dynamic_rotate %70 by %c496_i32_56 dim 1 : vector<1x512xf32>, i32 -> vector<1x512xf32>
    %124 = arith.mulf %123, %13 : vector<1x512xf32>
    %c495_i32_57 = arith.constant 495 : i32
    %125 = tpu.dynamic_rotate %70 by %c495_i32_57 dim 1 : vector<1x512xf32>, i32 -> vector<1x512xf32>
    %126 = arith.mulf %125, %14 : vector<1x512xf32>
    %c17_i32_58 = arith.constant 17 : i32
    %127 = tpu.dynamic_rotate %110 by %c17_i32_58 dim 1 : vector<1x512xf32>, i32 -> vector<1x512xf32>
    %128 = arith.mulf %127, %7 : vector<1x512xf32>
    %c16_i32_59 = arith.constant 16 : i32
    %129 = tpu.dynamic_rotate %110 by %c16_i32_59 dim 1 : vector<1x512xf32>, i32 -> vector<1x512xf32>
    %130 = arith.mulf %129, %8 : vector<1x512xf32>
    %c15_i32_60 = arith.constant 15 : i32
    %131 = tpu.dynamic_rotate %110 by %c15_i32_60 dim 1 : vector<1x512xf32>, i32 -> vector<1x512xf32>
    %132 = arith.mulf %131, %9 : vector<1x512xf32>
    %c1_i32_61 = arith.constant 1 : i32
    %133 = tpu.dynamic_rotate %110 by %c1_i32_61 dim 1 : vector<1x512xf32>, i32 -> vector<1x512xf32>
    %134 = arith.mulf %133, %10 : vector<1x512xf32>
    %c511_i32_62 = arith.constant 511 : i32
    %135 = tpu.dynamic_rotate %110 by %c511_i32_62 dim 1 : vector<1x512xf32>, i32 -> vector<1x512xf32>
    %136 = arith.mulf %135, %11 : vector<1x512xf32>
    %c497_i32_63 = arith.constant 497 : i32
    %137 = tpu.dynamic_rotate %110 by %c497_i32_63 dim 1 : vector<1x512xf32>, i32 -> vector<1x512xf32>
    %138 = arith.mulf %137, %12 : vector<1x512xf32>
    %c496_i32_64 = arith.constant 496 : i32
    %139 = tpu.dynamic_rotate %110 by %c496_i32_64 dim 1 : vector<1x512xf32>, i32 -> vector<1x512xf32>
    %140 = arith.mulf %139, %13 : vector<1x512xf32>
    %c495_i32_65 = arith.constant 495 : i32
    %141 = tpu.dynamic_rotate %110 by %c495_i32_65 dim 1 : vector<1x512xf32>, i32 -> vector<1x512xf32>
    %142 = arith.mulf %141, %14 : vector<1x512xf32>
    %c0_66 = arith.constant 0 : index
    %c0_67 = arith.constant 0 : index
    %143 = memref.load %arg5[%c0_66, %c0_67] : memref<2x18xf32, #tpu.memory_space<smem>>
    %144 = vector.broadcast %143 : f32 to vector<1x512xf32>
    %145 = arith.mulf %144, %112 : vector<1x512xf32>
    %c0_68 = arith.constant 0 : index
    %c1_69 = arith.constant 1 : index
    %146 = memref.load %arg5[%c0_68, %c1_69] : memref<2x18xf32, #tpu.memory_space<smem>>
    %147 = vector.broadcast %146 : f32 to vector<1x512xf32>
    %148 = arith.mulf %147, %114 : vector<1x512xf32>
    %149 = arith.addf %145, %148 : vector<1x512xf32>
    %c0_70 = arith.constant 0 : index
    %c2_71 = arith.constant 2 : index
    %150 = memref.load %arg5[%c0_70, %c2_71] : memref<2x18xf32, #tpu.memory_space<smem>>
    %151 = vector.broadcast %150 : f32 to vector<1x512xf32>
    %152 = arith.mulf %151, %116 : vector<1x512xf32>
    %153 = arith.addf %149, %152 : vector<1x512xf32>
    %c0_72 = arith.constant 0 : index
    %c3_73 = arith.constant 3 : index
    %154 = memref.load %arg5[%c0_72, %c3_73] : memref<2x18xf32, #tpu.memory_space<smem>>
    %155 = vector.broadcast %154 : f32 to vector<1x512xf32>
    %156 = arith.mulf %155, %118 : vector<1x512xf32>
    %157 = arith.addf %153, %156 : vector<1x512xf32>
    %c0_74 = arith.constant 0 : index
    %c4_75 = arith.constant 4 : index
    %158 = memref.load %arg5[%c0_74, %c4_75] : memref<2x18xf32, #tpu.memory_space<smem>>
    %159 = vector.broadcast %158 : f32 to vector<1x512xf32>
    %160 = arith.mulf %159, %70 : vector<1x512xf32>
    %161 = arith.addf %157, %160 : vector<1x512xf32>
    %c0_76 = arith.constant 0 : index
    %c5_77 = arith.constant 5 : index
    %162 = memref.load %arg5[%c0_76, %c5_77] : memref<2x18xf32, #tpu.memory_space<smem>>
    %163 = vector.broadcast %162 : f32 to vector<1x512xf32>
    %164 = arith.mulf %163, %120 : vector<1x512xf32>
    %165 = arith.addf %161, %164 : vector<1x512xf32>
    %c0_78 = arith.constant 0 : index
    %c6_79 = arith.constant 6 : index
    %166 = memref.load %arg5[%c0_78, %c6_79] : memref<2x18xf32, #tpu.memory_space<smem>>
    %167 = vector.broadcast %166 : f32 to vector<1x512xf32>
    %168 = arith.mulf %167, %122 : vector<1x512xf32>
    %169 = arith.addf %165, %168 : vector<1x512xf32>
    %c0_80 = arith.constant 0 : index
    %c7_81 = arith.constant 7 : index
    %170 = memref.load %arg5[%c0_80, %c7_81] : memref<2x18xf32, #tpu.memory_space<smem>>
    %171 = vector.broadcast %170 : f32 to vector<1x512xf32>
    %172 = arith.mulf %171, %124 : vector<1x512xf32>
    %173 = arith.addf %169, %172 : vector<1x512xf32>
    %c0_82 = arith.constant 0 : index
    %c8_83 = arith.constant 8 : index
    %174 = memref.load %arg5[%c0_82, %c8_83] : memref<2x18xf32, #tpu.memory_space<smem>>
    %175 = vector.broadcast %174 : f32 to vector<1x512xf32>
    %176 = arith.mulf %175, %126 : vector<1x512xf32>
    %177 = arith.addf %173, %176 : vector<1x512xf32>
    %c0_84 = arith.constant 0 : index
    %c9 = arith.constant 9 : index
    %178 = memref.load %arg5[%c0_84, %c9] : memref<2x18xf32, #tpu.memory_space<smem>>
    %179 = vector.broadcast %178 : f32 to vector<1x512xf32>
    %180 = arith.mulf %179, %128 : vector<1x512xf32>
    %181 = arith.addf %177, %180 : vector<1x512xf32>
    %c0_85 = arith.constant 0 : index
    %c10 = arith.constant 10 : index
    %182 = memref.load %arg5[%c0_85, %c10] : memref<2x18xf32, #tpu.memory_space<smem>>
    %183 = vector.broadcast %182 : f32 to vector<1x512xf32>
    %184 = arith.mulf %183, %130 : vector<1x512xf32>
    %185 = arith.addf %181, %184 : vector<1x512xf32>
    %c0_86 = arith.constant 0 : index
    %c11 = arith.constant 11 : index
    %186 = memref.load %arg5[%c0_86, %c11] : memref<2x18xf32, #tpu.memory_space<smem>>
    %187 = vector.broadcast %186 : f32 to vector<1x512xf32>
    %188 = arith.mulf %187, %132 : vector<1x512xf32>
    %189 = arith.addf %185, %188 : vector<1x512xf32>
    %c0_87 = arith.constant 0 : index
    %c12 = arith.constant 12 : index
    %190 = memref.load %arg5[%c0_87, %c12] : memref<2x18xf32, #tpu.memory_space<smem>>
    %191 = vector.broadcast %190 : f32 to vector<1x512xf32>
    %192 = arith.mulf %191, %134 : vector<1x512xf32>
    %193 = arith.addf %189, %192 : vector<1x512xf32>
    %c0_88 = arith.constant 0 : index
    %c13 = arith.constant 13 : index
    %194 = memref.load %arg5[%c0_88, %c13] : memref<2x18xf32, #tpu.memory_space<smem>>
    %195 = vector.broadcast %194 : f32 to vector<1x512xf32>
    %196 = arith.mulf %195, %110 : vector<1x512xf32>
    %197 = arith.addf %193, %196 : vector<1x512xf32>
    %c0_89 = arith.constant 0 : index
    %c14 = arith.constant 14 : index
    %198 = memref.load %arg5[%c0_89, %c14] : memref<2x18xf32, #tpu.memory_space<smem>>
    %199 = vector.broadcast %198 : f32 to vector<1x512xf32>
    %200 = arith.mulf %199, %136 : vector<1x512xf32>
    %201 = arith.addf %197, %200 : vector<1x512xf32>
    %c0_90 = arith.constant 0 : index
    %c15 = arith.constant 15 : index
    %202 = memref.load %arg5[%c0_90, %c15] : memref<2x18xf32, #tpu.memory_space<smem>>
    %203 = vector.broadcast %202 : f32 to vector<1x512xf32>
    %204 = arith.mulf %203, %138 : vector<1x512xf32>
    %205 = arith.addf %201, %204 : vector<1x512xf32>
    %c0_91 = arith.constant 0 : index
    %c16 = arith.constant 16 : index
    %206 = memref.load %arg5[%c0_91, %c16] : memref<2x18xf32, #tpu.memory_space<smem>>
    %207 = vector.broadcast %206 : f32 to vector<1x512xf32>
    %208 = arith.mulf %207, %140 : vector<1x512xf32>
    %209 = arith.addf %205, %208 : vector<1x512xf32>
    %c0_92 = arith.constant 0 : index
    %c17 = arith.constant 17 : index
    %210 = memref.load %arg5[%c0_92, %c17] : memref<2x18xf32, #tpu.memory_space<smem>>
    %211 = vector.broadcast %210 : f32 to vector<1x512xf32>
    %212 = arith.mulf %211, %142 : vector<1x512xf32>
    %213 = arith.addf %209, %212 : vector<1x512xf32>
    %c0_93 = arith.constant 0 : index
    %214 = memref.load %arg6[%c0_93] : memref<2xf32, #tpu.memory_space<smem>>
    %215 = vector.broadcast %214 : f32 to vector<1x512xf32>
    %216 = arith.addf %213, %215 : vector<1x512xf32>
    %cst_94 = arith.constant 0.000000e+00 : f32
    %217 = vector.broadcast %cst_94 : f32 to vector<1x512xf32>
    %218 = arith.maximumf %216, %217 : vector<1x512xf32>
    %c1_95 = arith.constant 1 : index
    %c0_96 = arith.constant 0 : index
    %219 = memref.load %arg5[%c1_95, %c0_96] : memref<2x18xf32, #tpu.memory_space<smem>>
    %220 = vector.broadcast %219 : f32 to vector<1x512xf32>
    %221 = arith.mulf %220, %112 : vector<1x512xf32>
    %c1_97 = arith.constant 1 : index
    %c1_98 = arith.constant 1 : index
    %222 = memref.load %arg5[%c1_97, %c1_98] : memref<2x18xf32, #tpu.memory_space<smem>>
    %223 = vector.broadcast %222 : f32 to vector<1x512xf32>
    %224 = arith.mulf %223, %114 : vector<1x512xf32>
    %225 = arith.addf %221, %224 : vector<1x512xf32>
    %c1_99 = arith.constant 1 : index
    %c2_100 = arith.constant 2 : index
    %226 = memref.load %arg5[%c1_99, %c2_100] : memref<2x18xf32, #tpu.memory_space<smem>>
    %227 = vector.broadcast %226 : f32 to vector<1x512xf32>
    %228 = arith.mulf %227, %116 : vector<1x512xf32>
    %229 = arith.addf %225, %228 : vector<1x512xf32>
    %c1_101 = arith.constant 1 : index
    %c3_102 = arith.constant 3 : index
    %230 = memref.load %arg5[%c1_101, %c3_102] : memref<2x18xf32, #tpu.memory_space<smem>>
    %231 = vector.broadcast %230 : f32 to vector<1x512xf32>
    %232 = arith.mulf %231, %118 : vector<1x512xf32>
    %233 = arith.addf %229, %232 : vector<1x512xf32>
    %c1_103 = arith.constant 1 : index
    %c4_104 = arith.constant 4 : index
    %234 = memref.load %arg5[%c1_103, %c4_104] : memref<2x18xf32, #tpu.memory_space<smem>>
    %235 = vector.broadcast %234 : f32 to vector<1x512xf32>
    %236 = arith.mulf %235, %70 : vector<1x512xf32>
    %237 = arith.addf %233, %236 : vector<1x512xf32>
    %c1_105 = arith.constant 1 : index
    %c5_106 = arith.constant 5 : index
    %238 = memref.load %arg5[%c1_105, %c5_106] : memref<2x18xf32, #tpu.memory_space<smem>>
    %239 = vector.broadcast %238 : f32 to vector<1x512xf32>
    %240 = arith.mulf %239, %120 : vector<1x512xf32>
    %241 = arith.addf %237, %240 : vector<1x512xf32>
    %c1_107 = arith.constant 1 : index
    %c6_108 = arith.constant 6 : index
    %242 = memref.load %arg5[%c1_107, %c6_108] : memref<2x18xf32, #tpu.memory_space<smem>>
    %243 = vector.broadcast %242 : f32 to vector<1x512xf32>
    %244 = arith.mulf %243, %122 : vector<1x512xf32>
    %245 = arith.addf %241, %244 : vector<1x512xf32>
    %c1_109 = arith.constant 1 : index
    %c7_110 = arith.constant 7 : index
    %246 = memref.load %arg5[%c1_109, %c7_110] : memref<2x18xf32, #tpu.memory_space<smem>>
    %247 = vector.broadcast %246 : f32 to vector<1x512xf32>
    %248 = arith.mulf %247, %124 : vector<1x512xf32>
    %249 = arith.addf %245, %248 : vector<1x512xf32>
    %c1_111 = arith.constant 1 : index
    %c8_112 = arith.constant 8 : index
    %250 = memref.load %arg5[%c1_111, %c8_112] : memref<2x18xf32, #tpu.memory_space<smem>>
    %251 = vector.broadcast %250 : f32 to vector<1x512xf32>
    %252 = arith.mulf %251, %126 : vector<1x512xf32>
    %253 = arith.addf %249, %252 : vector<1x512xf32>
    %c1_113 = arith.constant 1 : index
    %c9_114 = arith.constant 9 : index
    %254 = memref.load %arg5[%c1_113, %c9_114] : memref<2x18xf32, #tpu.memory_space<smem>>
    %255 = vector.broadcast %254 : f32 to vector<1x512xf32>
    %256 = arith.mulf %255, %128 : vector<1x512xf32>
    %257 = arith.addf %253, %256 : vector<1x512xf32>
    %c1_115 = arith.constant 1 : index
    %c10_116 = arith.constant 10 : index
    %258 = memref.load %arg5[%c1_115, %c10_116] : memref<2x18xf32, #tpu.memory_space<smem>>
    %259 = vector.broadcast %258 : f32 to vector<1x512xf32>
    %260 = arith.mulf %259, %130 : vector<1x512xf32>
    %261 = arith.addf %257, %260 : vector<1x512xf32>
    %c1_117 = arith.constant 1 : index
    %c11_118 = arith.constant 11 : index
    %262 = memref.load %arg5[%c1_117, %c11_118] : memref<2x18xf32, #tpu.memory_space<smem>>
    %263 = vector.broadcast %262 : f32 to vector<1x512xf32>
    %264 = arith.mulf %263, %132 : vector<1x512xf32>
    %265 = arith.addf %261, %264 : vector<1x512xf32>
    %c1_119 = arith.constant 1 : index
    %c12_120 = arith.constant 12 : index
    %266 = memref.load %arg5[%c1_119, %c12_120] : memref<2x18xf32, #tpu.memory_space<smem>>
    %267 = vector.broadcast %266 : f32 to vector<1x512xf32>
    %268 = arith.mulf %267, %134 : vector<1x512xf32>
    %269 = arith.addf %265, %268 : vector<1x512xf32>
    %c1_121 = arith.constant 1 : index
    %c13_122 = arith.constant 13 : index
    %270 = memref.load %arg5[%c1_121, %c13_122] : memref<2x18xf32, #tpu.memory_space<smem>>
    %271 = vector.broadcast %270 : f32 to vector<1x512xf32>
    %272 = arith.mulf %271, %110 : vector<1x512xf32>
    %273 = arith.addf %269, %272 : vector<1x512xf32>
    %c1_123 = arith.constant 1 : index
    %c14_124 = arith.constant 14 : index
    %274 = memref.load %arg5[%c1_123, %c14_124] : memref<2x18xf32, #tpu.memory_space<smem>>
    %275 = vector.broadcast %274 : f32 to vector<1x512xf32>
    %276 = arith.mulf %275, %136 : vector<1x512xf32>
    %277 = arith.addf %273, %276 : vector<1x512xf32>
    %c1_125 = arith.constant 1 : index
    %c15_126 = arith.constant 15 : index
    %278 = memref.load %arg5[%c1_125, %c15_126] : memref<2x18xf32, #tpu.memory_space<smem>>
    %279 = vector.broadcast %278 : f32 to vector<1x512xf32>
    %280 = arith.mulf %279, %138 : vector<1x512xf32>
    %281 = arith.addf %277, %280 : vector<1x512xf32>
    %c1_127 = arith.constant 1 : index
    %c16_128 = arith.constant 16 : index
    %282 = memref.load %arg5[%c1_127, %c16_128] : memref<2x18xf32, #tpu.memory_space<smem>>
    %283 = vector.broadcast %282 : f32 to vector<1x512xf32>
    %284 = arith.mulf %283, %140 : vector<1x512xf32>
    %285 = arith.addf %281, %284 : vector<1x512xf32>
    %c1_129 = arith.constant 1 : index
    %c17_130 = arith.constant 17 : index
    %286 = memref.load %arg5[%c1_129, %c17_130] : memref<2x18xf32, #tpu.memory_space<smem>>
    %287 = vector.broadcast %286 : f32 to vector<1x512xf32>
    %288 = arith.mulf %287, %142 : vector<1x512xf32>
    %289 = arith.addf %285, %288 : vector<1x512xf32>
    %c1_131 = arith.constant 1 : index
    %290 = memref.load %arg6[%c1_131] : memref<2xf32, #tpu.memory_space<smem>>
    %291 = vector.broadcast %290 : f32 to vector<1x512xf32>
    %292 = arith.addf %289, %291 : vector<1x512xf32>
    %cst_132 = arith.constant 0.000000e+00 : f32
    %293 = vector.broadcast %cst_132 : f32 to vector<1x512xf32>
    %294 = arith.maximumf %292, %293 : vector<1x512xf32>
    %c511_i32_133 = arith.constant 511 : i32
    %295 = tpu.dynamic_rotate %218 by %c511_i32_133 dim 1 : vector<1x512xf32>, i32 -> vector<1x512xf32>
    %296 = arith.addf %218, %295 : vector<1x512xf32>
    %c496_i32_134 = arith.constant 496 : i32
    %297 = tpu.dynamic_rotate %218 by %c496_i32_134 dim 1 : vector<1x512xf32>, i32 -> vector<1x512xf32>
    %298 = arith.addf %296, %297 : vector<1x512xf32>
    %c495_i32_135 = arith.constant 495 : i32
    %299 = tpu.dynamic_rotate %218 by %c495_i32_135 dim 1 : vector<1x512xf32>, i32 -> vector<1x512xf32>
    %300 = arith.addf %298, %299 : vector<1x512xf32>
    %cst_136 = arith.constant 2.500000e-01 : f32
    %301 = vector.broadcast %cst_136 : f32 to vector<1x512xf32>
    %302 = arith.mulf %301, %300 : vector<1x512xf32>
    %c511_i32_137 = arith.constant 511 : i32
    %303 = tpu.dynamic_rotate %294 by %c511_i32_137 dim 1 : vector<1x512xf32>, i32 -> vector<1x512xf32>
    %304 = arith.addf %294, %303 : vector<1x512xf32>
    %c496_i32_138 = arith.constant 496 : i32
    %305 = tpu.dynamic_rotate %294 by %c496_i32_138 dim 1 : vector<1x512xf32>, i32 -> vector<1x512xf32>
    %306 = arith.addf %304, %305 : vector<1x512xf32>
    %c495_i32_139 = arith.constant 495 : i32
    %307 = tpu.dynamic_rotate %294 by %c495_i32_139 dim 1 : vector<1x512xf32>, i32 -> vector<1x512xf32>
    %308 = arith.addf %306, %307 : vector<1x512xf32>
    %cst_140 = arith.constant 2.500000e-01 : f32
    %309 = vector.broadcast %cst_140 : f32 to vector<1x512xf32>
    %310 = arith.mulf %309, %308 : vector<1x512xf32>
    %c0_141 = arith.constant 0 : index
    %c0_142 = arith.constant 0 : index
    %311 = vector.load %arg7[%c0_141, %c0_142] : memref<8x512xf32, #tpu.memory_space<vmem>>, vector<1x512xf32>
    %c1_143 = arith.constant 1 : index
    %c0_144 = arith.constant 0 : index
    %312 = vector.load %arg7[%c1_143, %c0_144] : memref<8x512xf32, #tpu.memory_space<vmem>>, vector<1x512xf32>
    %c2_145 = arith.constant 2 : index
    %c0_146 = arith.constant 0 : index
    %313 = vector.load %arg7[%c2_145, %c0_146] : memref<8x512xf32, #tpu.memory_space<vmem>>, vector<1x512xf32>
    %c3_147 = arith.constant 3 : index
    %c0_148 = arith.constant 0 : index
    %314 = vector.load %arg7[%c3_147, %c0_148] : memref<8x512xf32, #tpu.memory_space<vmem>>, vector<1x512xf32>
    %c4_149 = arith.constant 4 : index
    %c0_150 = arith.constant 0 : index
    %315 = vector.load %arg7[%c4_149, %c0_150] : memref<8x512xf32, #tpu.memory_space<vmem>>, vector<1x512xf32>
    %c5_151 = arith.constant 5 : index
    %c0_152 = arith.constant 0 : index
    %316 = vector.load %arg7[%c5_151, %c0_152] : memref<8x512xf32, #tpu.memory_space<vmem>>, vector<1x512xf32>
    %c6_153 = arith.constant 6 : index
    %c0_154 = arith.constant 0 : index
    %317 = vector.load %arg7[%c6_153, %c0_154] : memref<8x512xf32, #tpu.memory_space<vmem>>, vector<1x512xf32>
    %c7_155 = arith.constant 7 : index
    %c0_156 = arith.constant 0 : index
    %318 = vector.load %arg7[%c7_155, %c0_156] : memref<8x512xf32, #tpu.memory_space<vmem>>, vector<1x512xf32>
    %c34_i32 = arith.constant 34 : i32
    %319 = tpu.dynamic_rotate %302 by %c34_i32 dim 1 : vector<1x512xf32>, i32 -> vector<1x512xf32>
    %320 = arith.mulf %319, %311 : vector<1x512xf32>
    %c32_i32 = arith.constant 32 : i32
    %321 = tpu.dynamic_rotate %302 by %c32_i32 dim 1 : vector<1x512xf32>, i32 -> vector<1x512xf32>
    %322 = arith.mulf %321, %312 : vector<1x512xf32>
    %c30_i32 = arith.constant 30 : i32
    %323 = tpu.dynamic_rotate %302 by %c30_i32 dim 1 : vector<1x512xf32>, i32 -> vector<1x512xf32>
    %324 = arith.mulf %323, %313 : vector<1x512xf32>
    %c2_i32 = arith.constant 2 : i32
    %325 = tpu.dynamic_rotate %302 by %c2_i32 dim 1 : vector<1x512xf32>, i32 -> vector<1x512xf32>
    %326 = arith.mulf %325, %314 : vector<1x512xf32>
    %c510_i32 = arith.constant 510 : i32
    %327 = tpu.dynamic_rotate %302 by %c510_i32 dim 1 : vector<1x512xf32>, i32 -> vector<1x512xf32>
    %328 = arith.mulf %327, %315 : vector<1x512xf32>
    %c482_i32 = arith.constant 482 : i32
    %329 = tpu.dynamic_rotate %302 by %c482_i32 dim 1 : vector<1x512xf32>, i32 -> vector<1x512xf32>
    %330 = arith.mulf %329, %316 : vector<1x512xf32>
    %c480_i32 = arith.constant 480 : i32
    %331 = tpu.dynamic_rotate %302 by %c480_i32 dim 1 : vector<1x512xf32>, i32 -> vector<1x512xf32>
    %332 = arith.mulf %331, %317 : vector<1x512xf32>
    %c478_i32 = arith.constant 478 : i32
    %333 = tpu.dynamic_rotate %302 by %c478_i32 dim 1 : vector<1x512xf32>, i32 -> vector<1x512xf32>
    %334 = arith.mulf %333, %318 : vector<1x512xf32>
    %c34_i32_157 = arith.constant 34 : i32
    %335 = tpu.dynamic_rotate %310 by %c34_i32_157 dim 1 : vector<1x512xf32>, i32 -> vector<1x512xf32>
    %336 = arith.mulf %335, %311 : vector<1x512xf32>
    %c32_i32_158 = arith.constant 32 : i32
    %337 = tpu.dynamic_rotate %310 by %c32_i32_158 dim 1 : vector<1x512xf32>, i32 -> vector<1x512xf32>
    %338 = arith.mulf %337, %312 : vector<1x512xf32>
    %c30_i32_159 = arith.constant 30 : i32
    %339 = tpu.dynamic_rotate %310 by %c30_i32_159 dim 1 : vector<1x512xf32>, i32 -> vector<1x512xf32>
    %340 = arith.mulf %339, %313 : vector<1x512xf32>
    %c2_i32_160 = arith.constant 2 : i32
    %341 = tpu.dynamic_rotate %310 by %c2_i32_160 dim 1 : vector<1x512xf32>, i32 -> vector<1x512xf32>
    %342 = arith.mulf %341, %314 : vector<1x512xf32>
    %c510_i32_161 = arith.constant 510 : i32
    %343 = tpu.dynamic_rotate %310 by %c510_i32_161 dim 1 : vector<1x512xf32>, i32 -> vector<1x512xf32>
    %344 = arith.mulf %343, %315 : vector<1x512xf32>
    %c482_i32_162 = arith.constant 482 : i32
    %345 = tpu.dynamic_rotate %310 by %c482_i32_162 dim 1 : vector<1x512xf32>, i32 -> vector<1x512xf32>
    %346 = arith.mulf %345, %316 : vector<1x512xf32>
    %c480_i32_163 = arith.constant 480 : i32
    %347 = tpu.dynamic_rotate %310 by %c480_i32_163 dim 1 : vector<1x512xf32>, i32 -> vector<1x512xf32>
    %348 = arith.mulf %347, %317 : vector<1x512xf32>
    %c478_i32_164 = arith.constant 478 : i32
    %349 = tpu.dynamic_rotate %310 by %c478_i32_164 dim 1 : vector<1x512xf32>, i32 -> vector<1x512xf32>
    %350 = arith.mulf %349, %318 : vector<1x512xf32>
    %c0_165 = arith.constant 0 : index
    %c0_166 = arith.constant 0 : index
    %351 = memref.load %arg8[%c0_165, %c0_166] : memref<4x18xf32, #tpu.memory_space<smem>>
    %352 = vector.broadcast %351 : f32 to vector<1x512xf32>
    %353 = arith.mulf %352, %320 : vector<1x512xf32>
    %c0_167 = arith.constant 0 : index
    %c1_168 = arith.constant 1 : index
    %354 = memref.load %arg8[%c0_167, %c1_168] : memref<4x18xf32, #tpu.memory_space<smem>>
    %355 = vector.broadcast %354 : f32 to vector<1x512xf32>
    %356 = arith.mulf %355, %322 : vector<1x512xf32>
    %357 = arith.addf %353, %356 : vector<1x512xf32>
    %c0_169 = arith.constant 0 : index
    %c2_170 = arith.constant 2 : index
    %358 = memref.load %arg8[%c0_169, %c2_170] : memref<4x18xf32, #tpu.memory_space<smem>>
    %359 = vector.broadcast %358 : f32 to vector<1x512xf32>
    %360 = arith.mulf %359, %324 : vector<1x512xf32>
    %361 = arith.addf %357, %360 : vector<1x512xf32>
    %c0_171 = arith.constant 0 : index
    %c3_172 = arith.constant 3 : index
    %362 = memref.load %arg8[%c0_171, %c3_172] : memref<4x18xf32, #tpu.memory_space<smem>>
    %363 = vector.broadcast %362 : f32 to vector<1x512xf32>
    %364 = arith.mulf %363, %326 : vector<1x512xf32>
    %365 = arith.addf %361, %364 : vector<1x512xf32>
    %c0_173 = arith.constant 0 : index
    %c4_174 = arith.constant 4 : index
    %366 = memref.load %arg8[%c0_173, %c4_174] : memref<4x18xf32, #tpu.memory_space<smem>>
    %367 = vector.broadcast %366 : f32 to vector<1x512xf32>
    %368 = arith.mulf %367, %302 : vector<1x512xf32>
    %369 = arith.addf %365, %368 : vector<1x512xf32>
    %c0_175 = arith.constant 0 : index
    %c5_176 = arith.constant 5 : index
    %370 = memref.load %arg8[%c0_175, %c5_176] : memref<4x18xf32, #tpu.memory_space<smem>>
    %371 = vector.broadcast %370 : f32 to vector<1x512xf32>
    %372 = arith.mulf %371, %328 : vector<1x512xf32>
    %373 = arith.addf %369, %372 : vector<1x512xf32>
    %c0_177 = arith.constant 0 : index
    %c6_178 = arith.constant 6 : index
    %374 = memref.load %arg8[%c0_177, %c6_178] : memref<4x18xf32, #tpu.memory_space<smem>>
    %375 = vector.broadcast %374 : f32 to vector<1x512xf32>
    %376 = arith.mulf %375, %330 : vector<1x512xf32>
    %377 = arith.addf %373, %376 : vector<1x512xf32>
    %c0_179 = arith.constant 0 : index
    %c7_180 = arith.constant 7 : index
    %378 = memref.load %arg8[%c0_179, %c7_180] : memref<4x18xf32, #tpu.memory_space<smem>>
    %379 = vector.broadcast %378 : f32 to vector<1x512xf32>
    %380 = arith.mulf %379, %332 : vector<1x512xf32>
    %381 = arith.addf %377, %380 : vector<1x512xf32>
    %c0_181 = arith.constant 0 : index
    %c8_182 = arith.constant 8 : index
    %382 = memref.load %arg8[%c0_181, %c8_182] : memref<4x18xf32, #tpu.memory_space<smem>>
    %383 = vector.broadcast %382 : f32 to vector<1x512xf32>
    %384 = arith.mulf %383, %334 : vector<1x512xf32>
    %385 = arith.addf %381, %384 : vector<1x512xf32>
    %c0_183 = arith.constant 0 : index
    %c9_184 = arith.constant 9 : index
    %386 = memref.load %arg8[%c0_183, %c9_184] : memref<4x18xf32, #tpu.memory_space<smem>>
    %387 = vector.broadcast %386 : f32 to vector<1x512xf32>
    %388 = arith.mulf %387, %336 : vector<1x512xf32>
    %389 = arith.addf %385, %388 : vector<1x512xf32>
    %c0_185 = arith.constant 0 : index
    %c10_186 = arith.constant 10 : index
    %390 = memref.load %arg8[%c0_185, %c10_186] : memref<4x18xf32, #tpu.memory_space<smem>>
    %391 = vector.broadcast %390 : f32 to vector<1x512xf32>
    %392 = arith.mulf %391, %338 : vector<1x512xf32>
    %393 = arith.addf %389, %392 : vector<1x512xf32>
    %c0_187 = arith.constant 0 : index
    %c11_188 = arith.constant 11 : index
    %394 = memref.load %arg8[%c0_187, %c11_188] : memref<4x18xf32, #tpu.memory_space<smem>>
    %395 = vector.broadcast %394 : f32 to vector<1x512xf32>
    %396 = arith.mulf %395, %340 : vector<1x512xf32>
    %397 = arith.addf %393, %396 : vector<1x512xf32>
    %c0_189 = arith.constant 0 : index
    %c12_190 = arith.constant 12 : index
    %398 = memref.load %arg8[%c0_189, %c12_190] : memref<4x18xf32, #tpu.memory_space<smem>>
    %399 = vector.broadcast %398 : f32 to vector<1x512xf32>
    %400 = arith.mulf %399, %342 : vector<1x512xf32>
    %401 = arith.addf %397, %400 : vector<1x512xf32>
    %c0_191 = arith.constant 0 : index
    %c13_192 = arith.constant 13 : index
    %402 = memref.load %arg8[%c0_191, %c13_192] : memref<4x18xf32, #tpu.memory_space<smem>>
    %403 = vector.broadcast %402 : f32 to vector<1x512xf32>
    %404 = arith.mulf %403, %310 : vector<1x512xf32>
    %405 = arith.addf %401, %404 : vector<1x512xf32>
    %c0_193 = arith.constant 0 : index
    %c14_194 = arith.constant 14 : index
    %406 = memref.load %arg8[%c0_193, %c14_194] : memref<4x18xf32, #tpu.memory_space<smem>>
    %407 = vector.broadcast %406 : f32 to vector<1x512xf32>
    %408 = arith.mulf %407, %344 : vector<1x512xf32>
    %409 = arith.addf %405, %408 : vector<1x512xf32>
    %c0_195 = arith.constant 0 : index
    %c15_196 = arith.constant 15 : index
    %410 = memref.load %arg8[%c0_195, %c15_196] : memref<4x18xf32, #tpu.memory_space<smem>>
    %411 = vector.broadcast %410 : f32 to vector<1x512xf32>
    %412 = arith.mulf %411, %346 : vector<1x512xf32>
    %413 = arith.addf %409, %412 : vector<1x512xf32>
    %c0_197 = arith.constant 0 : index
    %c16_198 = arith.constant 16 : index
    %414 = memref.load %arg8[%c0_197, %c16_198] : memref<4x18xf32, #tpu.memory_space<smem>>
    %415 = vector.broadcast %414 : f32 to vector<1x512xf32>
    %416 = arith.mulf %415, %348 : vector<1x512xf32>
    %417 = arith.addf %413, %416 : vector<1x512xf32>
    %c0_199 = arith.constant 0 : index
    %c17_200 = arith.constant 17 : index
    %418 = memref.load %arg8[%c0_199, %c17_200] : memref<4x18xf32, #tpu.memory_space<smem>>
    %419 = vector.broadcast %418 : f32 to vector<1x512xf32>
    %420 = arith.mulf %419, %350 : vector<1x512xf32>
    %421 = arith.addf %417, %420 : vector<1x512xf32>
    %c0_201 = arith.constant 0 : index
    %422 = memref.load %arg9[%c0_201] : memref<4xf32, #tpu.memory_space<smem>>
    %423 = vector.broadcast %422 : f32 to vector<1x512xf32>
    %424 = arith.addf %421, %423 : vector<1x512xf32>
    %cst_202 = arith.constant 0.000000e+00 : f32
    %425 = vector.broadcast %cst_202 : f32 to vector<1x512xf32>
    %426 = arith.maximumf %424, %425 : vector<1x512xf32>
    %c1_203 = arith.constant 1 : index
    %c0_204 = arith.constant 0 : index
    %427 = memref.load %arg8[%c1_203, %c0_204] : memref<4x18xf32, #tpu.memory_space<smem>>
    %428 = vector.broadcast %427 : f32 to vector<1x512xf32>
    %429 = arith.mulf %428, %320 : vector<1x512xf32>
    %c1_205 = arith.constant 1 : index
    %c1_206 = arith.constant 1 : index
    %430 = memref.load %arg8[%c1_205, %c1_206] : memref<4x18xf32, #tpu.memory_space<smem>>
    %431 = vector.broadcast %430 : f32 to vector<1x512xf32>
    %432 = arith.mulf %431, %322 : vector<1x512xf32>
    %433 = arith.addf %429, %432 : vector<1x512xf32>
    %c1_207 = arith.constant 1 : index
    %c2_208 = arith.constant 2 : index
    %434 = memref.load %arg8[%c1_207, %c2_208] : memref<4x18xf32, #tpu.memory_space<smem>>
    %435 = vector.broadcast %434 : f32 to vector<1x512xf32>
    %436 = arith.mulf %435, %324 : vector<1x512xf32>
    %437 = arith.addf %433, %436 : vector<1x512xf32>
    %c1_209 = arith.constant 1 : index
    %c3_210 = arith.constant 3 : index
    %438 = memref.load %arg8[%c1_209, %c3_210] : memref<4x18xf32, #tpu.memory_space<smem>>
    %439 = vector.broadcast %438 : f32 to vector<1x512xf32>
    %440 = arith.mulf %439, %326 : vector<1x512xf32>
    %441 = arith.addf %437, %440 : vector<1x512xf32>
    %c1_211 = arith.constant 1 : index
    %c4_212 = arith.constant 4 : index
    %442 = memref.load %arg8[%c1_211, %c4_212] : memref<4x18xf32, #tpu.memory_space<smem>>
    %443 = vector.broadcast %442 : f32 to vector<1x512xf32>
    %444 = arith.mulf %443, %302 : vector<1x512xf32>
    %445 = arith.addf %441, %444 : vector<1x512xf32>
    %c1_213 = arith.constant 1 : index
    %c5_214 = arith.constant 5 : index
    %446 = memref.load %arg8[%c1_213, %c5_214] : memref<4x18xf32, #tpu.memory_space<smem>>
    %447 = vector.broadcast %446 : f32 to vector<1x512xf32>
    %448 = arith.mulf %447, %328 : vector<1x512xf32>
    %449 = arith.addf %445, %448 : vector<1x512xf32>
    %c1_215 = arith.constant 1 : index
    %c6_216 = arith.constant 6 : index
    %450 = memref.load %arg8[%c1_215, %c6_216] : memref<4x18xf32, #tpu.memory_space<smem>>
    %451 = vector.broadcast %450 : f32 to vector<1x512xf32>
    %452 = arith.mulf %451, %330 : vector<1x512xf32>
    %453 = arith.addf %449, %452 : vector<1x512xf32>
    %c1_217 = arith.constant 1 : index
    %c7_218 = arith.constant 7 : index
    %454 = memref.load %arg8[%c1_217, %c7_218] : memref<4x18xf32, #tpu.memory_space<smem>>
    %455 = vector.broadcast %454 : f32 to vector<1x512xf32>
    %456 = arith.mulf %455, %332 : vector<1x512xf32>
    %457 = arith.addf %453, %456 : vector<1x512xf32>
    %c1_219 = arith.constant 1 : index
    %c8_220 = arith.constant 8 : index
    %458 = memref.load %arg8[%c1_219, %c8_220] : memref<4x18xf32, #tpu.memory_space<smem>>
    %459 = vector.broadcast %458 : f32 to vector<1x512xf32>
    %460 = arith.mulf %459, %334 : vector<1x512xf32>
    %461 = arith.addf %457, %460 : vector<1x512xf32>
    %c1_221 = arith.constant 1 : index
    %c9_222 = arith.constant 9 : index
    %462 = memref.load %arg8[%c1_221, %c9_222] : memref<4x18xf32, #tpu.memory_space<smem>>
    %463 = vector.broadcast %462 : f32 to vector<1x512xf32>
    %464 = arith.mulf %463, %336 : vector<1x512xf32>
    %465 = arith.addf %461, %464 : vector<1x512xf32>
    %c1_223 = arith.constant 1 : index
    %c10_224 = arith.constant 10 : index
    %466 = memref.load %arg8[%c1_223, %c10_224] : memref<4x18xf32, #tpu.memory_space<smem>>
    %467 = vector.broadcast %466 : f32 to vector<1x512xf32>
    %468 = arith.mulf %467, %338 : vector<1x512xf32>
    %469 = arith.addf %465, %468 : vector<1x512xf32>
    %c1_225 = arith.constant 1 : index
    %c11_226 = arith.constant 11 : index
    %470 = memref.load %arg8[%c1_225, %c11_226] : memref<4x18xf32, #tpu.memory_space<smem>>
    %471 = vector.broadcast %470 : f32 to vector<1x512xf32>
    %472 = arith.mulf %471, %340 : vector<1x512xf32>
    %473 = arith.addf %469, %472 : vector<1x512xf32>
    %c1_227 = arith.constant 1 : index
    %c12_228 = arith.constant 12 : index
    %474 = memref.load %arg8[%c1_227, %c12_228] : memref<4x18xf32, #tpu.memory_space<smem>>
    %475 = vector.broadcast %474 : f32 to vector<1x512xf32>
    %476 = arith.mulf %475, %342 : vector<1x512xf32>
    %477 = arith.addf %473, %476 : vector<1x512xf32>
    %c1_229 = arith.constant 1 : index
    %c13_230 = arith.constant 13 : index
    %478 = memref.load %arg8[%c1_229, %c13_230] : memref<4x18xf32, #tpu.memory_space<smem>>
    %479 = vector.broadcast %478 : f32 to vector<1x512xf32>
    %480 = arith.mulf %479, %310 : vector<1x512xf32>
    %481 = arith.addf %477, %480 : vector<1x512xf32>
    %c1_231 = arith.constant 1 : index
    %c14_232 = arith.constant 14 : index
    %482 = memref.load %arg8[%c1_231, %c14_232] : memref<4x18xf32, #tpu.memory_space<smem>>
    %483 = vector.broadcast %482 : f32 to vector<1x512xf32>
    %484 = arith.mulf %483, %344 : vector<1x512xf32>
    %485 = arith.addf %481, %484 : vector<1x512xf32>
    %c1_233 = arith.constant 1 : index
    %c15_234 = arith.constant 15 : index
    %486 = memref.load %arg8[%c1_233, %c15_234] : memref<4x18xf32, #tpu.memory_space<smem>>
    %487 = vector.broadcast %486 : f32 to vector<1x512xf32>
    %488 = arith.mulf %487, %346 : vector<1x512xf32>
    %489 = arith.addf %485, %488 : vector<1x512xf32>
    %c1_235 = arith.constant 1 : index
    %c16_236 = arith.constant 16 : index
    %490 = memref.load %arg8[%c1_235, %c16_236] : memref<4x18xf32, #tpu.memory_space<smem>>
    %491 = vector.broadcast %490 : f32 to vector<1x512xf32>
    %492 = arith.mulf %491, %348 : vector<1x512xf32>
    %493 = arith.addf %489, %492 : vector<1x512xf32>
    %c1_237 = arith.constant 1 : index
    %c17_238 = arith.constant 17 : index
    %494 = memref.load %arg8[%c1_237, %c17_238] : memref<4x18xf32, #tpu.memory_space<smem>>
    %495 = vector.broadcast %494 : f32 to vector<1x512xf32>
    %496 = arith.mulf %495, %350 : vector<1x512xf32>
    %497 = arith.addf %493, %496 : vector<1x512xf32>
    %c1_239 = arith.constant 1 : index
    %498 = memref.load %arg9[%c1_239] : memref<4xf32, #tpu.memory_space<smem>>
    %499 = vector.broadcast %498 : f32 to vector<1x512xf32>
    %500 = arith.addf %497, %499 : vector<1x512xf32>
    %cst_240 = arith.constant 0.000000e+00 : f32
    %501 = vector.broadcast %cst_240 : f32 to vector<1x512xf32>
    %502 = arith.maximumf %500, %501 : vector<1x512xf32>
    %c2_241 = arith.constant 2 : index
    %c0_242 = arith.constant 0 : index
    %503 = memref.load %arg8[%c2_241, %c0_242] : memref<4x18xf32, #tpu.memory_space<smem>>
    %504 = vector.broadcast %503 : f32 to vector<1x512xf32>
    %505 = arith.mulf %504, %320 : vector<1x512xf32>
    %c2_243 = arith.constant 2 : index
    %c1_244 = arith.constant 1 : index
    %506 = memref.load %arg8[%c2_243, %c1_244] : memref<4x18xf32, #tpu.memory_space<smem>>
    %507 = vector.broadcast %506 : f32 to vector<1x512xf32>
    %508 = arith.mulf %507, %322 : vector<1x512xf32>
    %509 = arith.addf %505, %508 : vector<1x512xf32>
    %c2_245 = arith.constant 2 : index
    %c2_246 = arith.constant 2 : index
    %510 = memref.load %arg8[%c2_245, %c2_246] : memref<4x18xf32, #tpu.memory_space<smem>>
    %511 = vector.broadcast %510 : f32 to vector<1x512xf32>
    %512 = arith.mulf %511, %324 : vector<1x512xf32>
    %513 = arith.addf %509, %512 : vector<1x512xf32>
    %c2_247 = arith.constant 2 : index
    %c3_248 = arith.constant 3 : index
    %514 = memref.load %arg8[%c2_247, %c3_248] : memref<4x18xf32, #tpu.memory_space<smem>>
    %515 = vector.broadcast %514 : f32 to vector<1x512xf32>
    %516 = arith.mulf %515, %326 : vector<1x512xf32>
    %517 = arith.addf %513, %516 : vector<1x512xf32>
    %c2_249 = arith.constant 2 : index
    %c4_250 = arith.constant 4 : index
    %518 = memref.load %arg8[%c2_249, %c4_250] : memref<4x18xf32, #tpu.memory_space<smem>>
    %519 = vector.broadcast %518 : f32 to vector<1x512xf32>
    %520 = arith.mulf %519, %302 : vector<1x512xf32>
    %521 = arith.addf %517, %520 : vector<1x512xf32>
    %c2_251 = arith.constant 2 : index
    %c5_252 = arith.constant 5 : index
    %522 = memref.load %arg8[%c2_251, %c5_252] : memref<4x18xf32, #tpu.memory_space<smem>>
    %523 = vector.broadcast %522 : f32 to vector<1x512xf32>
    %524 = arith.mulf %523, %328 : vector<1x512xf32>
    %525 = arith.addf %521, %524 : vector<1x512xf32>
    %c2_253 = arith.constant 2 : index
    %c6_254 = arith.constant 6 : index
    %526 = memref.load %arg8[%c2_253, %c6_254] : memref<4x18xf32, #tpu.memory_space<smem>>
    %527 = vector.broadcast %526 : f32 to vector<1x512xf32>
    %528 = arith.mulf %527, %330 : vector<1x512xf32>
    %529 = arith.addf %525, %528 : vector<1x512xf32>
    %c2_255 = arith.constant 2 : index
    %c7_256 = arith.constant 7 : index
    %530 = memref.load %arg8[%c2_255, %c7_256] : memref<4x18xf32, #tpu.memory_space<smem>>
    %531 = vector.broadcast %530 : f32 to vector<1x512xf32>
    %532 = arith.mulf %531, %332 : vector<1x512xf32>
    %533 = arith.addf %529, %532 : vector<1x512xf32>
    %c2_257 = arith.constant 2 : index
    %c8_258 = arith.constant 8 : index
    %534 = memref.load %arg8[%c2_257, %c8_258] : memref<4x18xf32, #tpu.memory_space<smem>>
    %535 = vector.broadcast %534 : f32 to vector<1x512xf32>
    %536 = arith.mulf %535, %334 : vector<1x512xf32>
    %537 = arith.addf %533, %536 : vector<1x512xf32>
    %c2_259 = arith.constant 2 : index
    %c9_260 = arith.constant 9 : index
    %538 = memref.load %arg8[%c2_259, %c9_260] : memref<4x18xf32, #tpu.memory_space<smem>>
    %539 = vector.broadcast %538 : f32 to vector<1x512xf32>
    %540 = arith.mulf %539, %336 : vector<1x512xf32>
    %541 = arith.addf %537, %540 : vector<1x512xf32>
    %c2_261 = arith.constant 2 : index
    %c10_262 = arith.constant 10 : index
    %542 = memref.load %arg8[%c2_261, %c10_262] : memref<4x18xf32, #tpu.memory_space<smem>>
    %543 = vector.broadcast %542 : f32 to vector<1x512xf32>
    %544 = arith.mulf %543, %338 : vector<1x512xf32>
    %545 = arith.addf %541, %544 : vector<1x512xf32>
    %c2_263 = arith.constant 2 : index
    %c11_264 = arith.constant 11 : index
    %546 = memref.load %arg8[%c2_263, %c11_264] : memref<4x18xf32, #tpu.memory_space<smem>>
    %547 = vector.broadcast %546 : f32 to vector<1x512xf32>
    %548 = arith.mulf %547, %340 : vector<1x512xf32>
    %549 = arith.addf %545, %548 : vector<1x512xf32>
    %c2_265 = arith.constant 2 : index
    %c12_266 = arith.constant 12 : index
    %550 = memref.load %arg8[%c2_265, %c12_266] : memref<4x18xf32, #tpu.memory_space<smem>>
    %551 = vector.broadcast %550 : f32 to vector<1x512xf32>
    %552 = arith.mulf %551, %342 : vector<1x512xf32>
    %553 = arith.addf %549, %552 : vector<1x512xf32>
    %c2_267 = arith.constant 2 : index
    %c13_268 = arith.constant 13 : index
    %554 = memref.load %arg8[%c2_267, %c13_268] : memref<4x18xf32, #tpu.memory_space<smem>>
    %555 = vector.broadcast %554 : f32 to vector<1x512xf32>
    %556 = arith.mulf %555, %310 : vector<1x512xf32>
    %557 = arith.addf %553, %556 : vector<1x512xf32>
    %c2_269 = arith.constant 2 : index
    %c14_270 = arith.constant 14 : index
    %558 = memref.load %arg8[%c2_269, %c14_270] : memref<4x18xf32, #tpu.memory_space<smem>>
    %559 = vector.broadcast %558 : f32 to vector<1x512xf32>
    %560 = arith.mulf %559, %344 : vector<1x512xf32>
    %561 = arith.addf %557, %560 : vector<1x512xf32>
    %c2_271 = arith.constant 2 : index
    %c15_272 = arith.constant 15 : index
    %562 = memref.load %arg8[%c2_271, %c15_272] : memref<4x18xf32, #tpu.memory_space<smem>>
    %563 = vector.broadcast %562 : f32 to vector<1x512xf32>
    %564 = arith.mulf %563, %346 : vector<1x512xf32>
    %565 = arith.addf %561, %564 : vector<1x512xf32>
    %c2_273 = arith.constant 2 : index
    %c16_274 = arith.constant 16 : index
    %566 = memref.load %arg8[%c2_273, %c16_274] : memref<4x18xf32, #tpu.memory_space<smem>>
    %567 = vector.broadcast %566 : f32 to vector<1x512xf32>
    %568 = arith.mulf %567, %348 : vector<1x512xf32>
    %569 = arith.addf %565, %568 : vector<1x512xf32>
    %c2_275 = arith.constant 2 : index
    %c17_276 = arith.constant 17 : index
    %570 = memref.load %arg8[%c2_275, %c17_276] : memref<4x18xf32, #tpu.memory_space<smem>>
    %571 = vector.broadcast %570 : f32 to vector<1x512xf32>
    %572 = arith.mulf %571, %350 : vector<1x512xf32>
    %573 = arith.addf %569, %572 : vector<1x512xf32>
    %c2_277 = arith.constant 2 : index
    %574 = memref.load %arg9[%c2_277] : memref<4xf32, #tpu.memory_space<smem>>
    %575 = vector.broadcast %574 : f32 to vector<1x512xf32>
    %576 = arith.addf %573, %575 : vector<1x512xf32>
    %cst_278 = arith.constant 0.000000e+00 : f32
    %577 = vector.broadcast %cst_278 : f32 to vector<1x512xf32>
    %578 = arith.maximumf %576, %577 : vector<1x512xf32>
    %c3_279 = arith.constant 3 : index
    %c0_280 = arith.constant 0 : index
    %579 = memref.load %arg8[%c3_279, %c0_280] : memref<4x18xf32, #tpu.memory_space<smem>>
    %580 = vector.broadcast %579 : f32 to vector<1x512xf32>
    %581 = arith.mulf %580, %320 : vector<1x512xf32>
    %c3_281 = arith.constant 3 : index
    %c1_282 = arith.constant 1 : index
    %582 = memref.load %arg8[%c3_281, %c1_282] : memref<4x18xf32, #tpu.memory_space<smem>>
    %583 = vector.broadcast %582 : f32 to vector<1x512xf32>
    %584 = arith.mulf %583, %322 : vector<1x512xf32>
    %585 = arith.addf %581, %584 : vector<1x512xf32>
    %c3_283 = arith.constant 3 : index
    %c2_284 = arith.constant 2 : index
    %586 = memref.load %arg8[%c3_283, %c2_284] : memref<4x18xf32, #tpu.memory_space<smem>>
    %587 = vector.broadcast %586 : f32 to vector<1x512xf32>
    %588 = arith.mulf %587, %324 : vector<1x512xf32>
    %589 = arith.addf %585, %588 : vector<1x512xf32>
    %c3_285 = arith.constant 3 : index
    %c3_286 = arith.constant 3 : index
    %590 = memref.load %arg8[%c3_285, %c3_286] : memref<4x18xf32, #tpu.memory_space<smem>>
    %591 = vector.broadcast %590 : f32 to vector<1x512xf32>
    %592 = arith.mulf %591, %326 : vector<1x512xf32>
    %593 = arith.addf %589, %592 : vector<1x512xf32>
    %c3_287 = arith.constant 3 : index
    %c4_288 = arith.constant 4 : index
    %594 = memref.load %arg8[%c3_287, %c4_288] : memref<4x18xf32, #tpu.memory_space<smem>>
    %595 = vector.broadcast %594 : f32 to vector<1x512xf32>
    %596 = arith.mulf %595, %302 : vector<1x512xf32>
    %597 = arith.addf %593, %596 : vector<1x512xf32>
    %c3_289 = arith.constant 3 : index
    %c5_290 = arith.constant 5 : index
    %598 = memref.load %arg8[%c3_289, %c5_290] : memref<4x18xf32, #tpu.memory_space<smem>>
    %599 = vector.broadcast %598 : f32 to vector<1x512xf32>
    %600 = arith.mulf %599, %328 : vector<1x512xf32>
    %601 = arith.addf %597, %600 : vector<1x512xf32>
    %c3_291 = arith.constant 3 : index
    %c6_292 = arith.constant 6 : index
    %602 = memref.load %arg8[%c3_291, %c6_292] : memref<4x18xf32, #tpu.memory_space<smem>>
    %603 = vector.broadcast %602 : f32 to vector<1x512xf32>
    %604 = arith.mulf %603, %330 : vector<1x512xf32>
    %605 = arith.addf %601, %604 : vector<1x512xf32>
    %c3_293 = arith.constant 3 : index
    %c7_294 = arith.constant 7 : index
    %606 = memref.load %arg8[%c3_293, %c7_294] : memref<4x18xf32, #tpu.memory_space<smem>>
    %607 = vector.broadcast %606 : f32 to vector<1x512xf32>
    %608 = arith.mulf %607, %332 : vector<1x512xf32>
    %609 = arith.addf %605, %608 : vector<1x512xf32>
    %c3_295 = arith.constant 3 : index
    %c8_296 = arith.constant 8 : index
    %610 = memref.load %arg8[%c3_295, %c8_296] : memref<4x18xf32, #tpu.memory_space<smem>>
    %611 = vector.broadcast %610 : f32 to vector<1x512xf32>
    %612 = arith.mulf %611, %334 : vector<1x512xf32>
    %613 = arith.addf %609, %612 : vector<1x512xf32>
    %c3_297 = arith.constant 3 : index
    %c9_298 = arith.constant 9 : index
    %614 = memref.load %arg8[%c3_297, %c9_298] : memref<4x18xf32, #tpu.memory_space<smem>>
    %615 = vector.broadcast %614 : f32 to vector<1x512xf32>
    %616 = arith.mulf %615, %336 : vector<1x512xf32>
    %617 = arith.addf %613, %616 : vector<1x512xf32>
    %c3_299 = arith.constant 3 : index
    %c10_300 = arith.constant 10 : index
    %618 = memref.load %arg8[%c3_299, %c10_300] : memref<4x18xf32, #tpu.memory_space<smem>>
    %619 = vector.broadcast %618 : f32 to vector<1x512xf32>
    %620 = arith.mulf %619, %338 : vector<1x512xf32>
    %621 = arith.addf %617, %620 : vector<1x512xf32>
    %c3_301 = arith.constant 3 : index
    %c11_302 = arith.constant 11 : index
    %622 = memref.load %arg8[%c3_301, %c11_302] : memref<4x18xf32, #tpu.memory_space<smem>>
    %623 = vector.broadcast %622 : f32 to vector<1x512xf32>
    %624 = arith.mulf %623, %340 : vector<1x512xf32>
    %625 = arith.addf %621, %624 : vector<1x512xf32>
    %c3_303 = arith.constant 3 : index
    %c12_304 = arith.constant 12 : index
    %626 = memref.load %arg8[%c3_303, %c12_304] : memref<4x18xf32, #tpu.memory_space<smem>>
    %627 = vector.broadcast %626 : f32 to vector<1x512xf32>
    %628 = arith.mulf %627, %342 : vector<1x512xf32>
    %629 = arith.addf %625, %628 : vector<1x512xf32>
    %c3_305 = arith.constant 3 : index
    %c13_306 = arith.constant 13 : index
    %630 = memref.load %arg8[%c3_305, %c13_306] : memref<4x18xf32, #tpu.memory_space<smem>>
    %631 = vector.broadcast %630 : f32 to vector<1x512xf32>
    %632 = arith.mulf %631, %310 : vector<1x512xf32>
    %633 = arith.addf %629, %632 : vector<1x512xf32>
    %c3_307 = arith.constant 3 : index
    %c14_308 = arith.constant 14 : index
    %634 = memref.load %arg8[%c3_307, %c14_308] : memref<4x18xf32, #tpu.memory_space<smem>>
    %635 = vector.broadcast %634 : f32 to vector<1x512xf32>
    %636 = arith.mulf %635, %344 : vector<1x512xf32>
    %637 = arith.addf %633, %636 : vector<1x512xf32>
    %c3_309 = arith.constant 3 : index
    %c15_310 = arith.constant 15 : index
    %638 = memref.load %arg8[%c3_309, %c15_310] : memref<4x18xf32, #tpu.memory_space<smem>>
    %639 = vector.broadcast %638 : f32 to vector<1x512xf32>
    %640 = arith.mulf %639, %346 : vector<1x512xf32>
    %641 = arith.addf %637, %640 : vector<1x512xf32>
    %c3_311 = arith.constant 3 : index
    %c16_312 = arith.constant 16 : index
    %642 = memref.load %arg8[%c3_311, %c16_312] : memref<4x18xf32, #tpu.memory_space<smem>>
    %643 = vector.broadcast %642 : f32 to vector<1x512xf32>
    %644 = arith.mulf %643, %348 : vector<1x512xf32>
    %645 = arith.addf %641, %644 : vector<1x512xf32>
    %c3_313 = arith.constant 3 : index
    %c17_314 = arith.constant 17 : index
    %646 = memref.load %arg8[%c3_313, %c17_314] : memref<4x18xf32, #tpu.memory_space<smem>>
    %647 = vector.broadcast %646 : f32 to vector<1x512xf32>
    %648 = arith.mulf %647, %350 : vector<1x512xf32>
    %649 = arith.addf %645, %648 : vector<1x512xf32>
    %c3_315 = arith.constant 3 : index
    %650 = memref.load %arg9[%c3_315] : memref<4xf32, #tpu.memory_space<smem>>
    %651 = vector.broadcast %650 : f32 to vector<1x512xf32>
    %652 = arith.addf %649, %651 : vector<1x512xf32>
    %cst_316 = arith.constant 0.000000e+00 : f32
    %653 = vector.broadcast %cst_316 : f32 to vector<1x512xf32>
    %654 = arith.maximumf %652, %653 : vector<1x512xf32>
    %c34_i32_317 = arith.constant 34 : i32
    %655 = tpu.dynamic_rotate %426 by %c34_i32_317 dim 1 : vector<1x512xf32>, i32 -> vector<1x512xf32>
    %656 = arith.mulf %655, %311 : vector<1x512xf32>
    %c32_i32_318 = arith.constant 32 : i32
    %657 = tpu.dynamic_rotate %426 by %c32_i32_318 dim 1 : vector<1x512xf32>, i32 -> vector<1x512xf32>
    %658 = arith.mulf %657, %312 : vector<1x512xf32>
    %c30_i32_319 = arith.constant 30 : i32
    %659 = tpu.dynamic_rotate %426 by %c30_i32_319 dim 1 : vector<1x512xf32>, i32 -> vector<1x512xf32>
    %660 = arith.mulf %659, %313 : vector<1x512xf32>
    %c2_i32_320 = arith.constant 2 : i32
    %661 = tpu.dynamic_rotate %426 by %c2_i32_320 dim 1 : vector<1x512xf32>, i32 -> vector<1x512xf32>
    %662 = arith.mulf %661, %314 : vector<1x512xf32>
    %c510_i32_321 = arith.constant 510 : i32
    %663 = tpu.dynamic_rotate %426 by %c510_i32_321 dim 1 : vector<1x512xf32>, i32 -> vector<1x512xf32>
    %664 = arith.mulf %663, %315 : vector<1x512xf32>
    %c482_i32_322 = arith.constant 482 : i32
    %665 = tpu.dynamic_rotate %426 by %c482_i32_322 dim 1 : vector<1x512xf32>, i32 -> vector<1x512xf32>
    %666 = arith.mulf %665, %316 : vector<1x512xf32>
    %c480_i32_323 = arith.constant 480 : i32
    %667 = tpu.dynamic_rotate %426 by %c480_i32_323 dim 1 : vector<1x512xf32>, i32 -> vector<1x512xf32>
    %668 = arith.mulf %667, %317 : vector<1x512xf32>
    %c478_i32_324 = arith.constant 478 : i32
    %669 = tpu.dynamic_rotate %426 by %c478_i32_324 dim 1 : vector<1x512xf32>, i32 -> vector<1x512xf32>
    %670 = arith.mulf %669, %318 : vector<1x512xf32>
    %c34_i32_325 = arith.constant 34 : i32
    %671 = tpu.dynamic_rotate %502 by %c34_i32_325 dim 1 : vector<1x512xf32>, i32 -> vector<1x512xf32>
    %672 = arith.mulf %671, %311 : vector<1x512xf32>
    %c32_i32_326 = arith.constant 32 : i32
    %673 = tpu.dynamic_rotate %502 by %c32_i32_326 dim 1 : vector<1x512xf32>, i32 -> vector<1x512xf32>
    %674 = arith.mulf %673, %312 : vector<1x512xf32>
    %c30_i32_327 = arith.constant 30 : i32
    %675 = tpu.dynamic_rotate %502 by %c30_i32_327 dim 1 : vector<1x512xf32>, i32 -> vector<1x512xf32>
    %676 = arith.mulf %675, %313 : vector<1x512xf32>
    %c2_i32_328 = arith.constant 2 : i32
    %677 = tpu.dynamic_rotate %502 by %c2_i32_328 dim 1 : vector<1x512xf32>, i32 -> vector<1x512xf32>
    %678 = arith.mulf %677, %314 : vector<1x512xf32>
    %c510_i32_329 = arith.constant 510 : i32
    %679 = tpu.dynamic_rotate %502 by %c510_i32_329 dim 1 : vector<1x512xf32>, i32 -> vector<1x512xf32>
    %680 = arith.mulf %679, %315 : vector<1x512xf32>
    %c482_i32_330 = arith.constant 482 : i32
    %681 = tpu.dynamic_rotate %502 by %c482_i32_330 dim 1 : vector<1x512xf32>, i32 -> vector<1x512xf32>
    %682 = arith.mulf %681, %316 : vector<1x512xf32>
    %c480_i32_331 = arith.constant 480 : i32
    %683 = tpu.dynamic_rotate %502 by %c480_i32_331 dim 1 : vector<1x512xf32>, i32 -> vector<1x512xf32>
    %684 = arith.mulf %683, %317 : vector<1x512xf32>
    %c478_i32_332 = arith.constant 478 : i32
    %685 = tpu.dynamic_rotate %502 by %c478_i32_332 dim 1 : vector<1x512xf32>, i32 -> vector<1x512xf32>
    %686 = arith.mulf %685, %318 : vector<1x512xf32>
    %c34_i32_333 = arith.constant 34 : i32
    %687 = tpu.dynamic_rotate %578 by %c34_i32_333 dim 1 : vector<1x512xf32>, i32 -> vector<1x512xf32>
    %688 = arith.mulf %687, %311 : vector<1x512xf32>
    %c32_i32_334 = arith.constant 32 : i32
    %689 = tpu.dynamic_rotate %578 by %c32_i32_334 dim 1 : vector<1x512xf32>, i32 -> vector<1x512xf32>
    %690 = arith.mulf %689, %312 : vector<1x512xf32>
    %c30_i32_335 = arith.constant 30 : i32
    %691 = tpu.dynamic_rotate %578 by %c30_i32_335 dim 1 : vector<1x512xf32>, i32 -> vector<1x512xf32>
    %692 = arith.mulf %691, %313 : vector<1x512xf32>
    %c2_i32_336 = arith.constant 2 : i32
    %693 = tpu.dynamic_rotate %578 by %c2_i32_336 dim 1 : vector<1x512xf32>, i32 -> vector<1x512xf32>
    %694 = arith.mulf %693, %314 : vector<1x512xf32>
    %c510_i32_337 = arith.constant 510 : i32
    %695 = tpu.dynamic_rotate %578 by %c510_i32_337 dim 1 : vector<1x512xf32>, i32 -> vector<1x512xf32>
    %696 = arith.mulf %695, %315 : vector<1x512xf32>
    %c482_i32_338 = arith.constant 482 : i32
    %697 = tpu.dynamic_rotate %578 by %c482_i32_338 dim 1 : vector<1x512xf32>, i32 -> vector<1x512xf32>
    %698 = arith.mulf %697, %316 : vector<1x512xf32>
    %c480_i32_339 = arith.constant 480 : i32
    %699 = tpu.dynamic_rotate %578 by %c480_i32_339 dim 1 : vector<1x512xf32>, i32 -> vector<1x512xf32>
    %700 = arith.mulf %699, %317 : vector<1x512xf32>
    %c478_i32_340 = arith.constant 478 : i32
    %701 = tpu.dynamic_rotate %578 by %c478_i32_340 dim 1 : vector<1x512xf32>, i32 -> vector<1x512xf32>
    %702 = arith.mulf %701, %318 : vector<1x512xf32>
    %c34_i32_341 = arith.constant 34 : i32
    %703 = tpu.dynamic_rotate %654 by %c34_i32_341 dim 1 : vector<1x512xf32>, i32 -> vector<1x512xf32>
    %704 = arith.mulf %703, %311 : vector<1x512xf32>
    %c32_i32_342 = arith.constant 32 : i32
    %705 = tpu.dynamic_rotate %654 by %c32_i32_342 dim 1 : vector<1x512xf32>, i32 -> vector<1x512xf32>
    %706 = arith.mulf %705, %312 : vector<1x512xf32>
    %c30_i32_343 = arith.constant 30 : i32
    %707 = tpu.dynamic_rotate %654 by %c30_i32_343 dim 1 : vector<1x512xf32>, i32 -> vector<1x512xf32>
    %708 = arith.mulf %707, %313 : vector<1x512xf32>
    %c2_i32_344 = arith.constant 2 : i32
    %709 = tpu.dynamic_rotate %654 by %c2_i32_344 dim 1 : vector<1x512xf32>, i32 -> vector<1x512xf32>
    %710 = arith.mulf %709, %314 : vector<1x512xf32>
    %c510_i32_345 = arith.constant 510 : i32
    %711 = tpu.dynamic_rotate %654 by %c510_i32_345 dim 1 : vector<1x512xf32>, i32 -> vector<1x512xf32>
    %712 = arith.mulf %711, %315 : vector<1x512xf32>
    %c482_i32_346 = arith.constant 482 : i32
    %713 = tpu.dynamic_rotate %654 by %c482_i32_346 dim 1 : vector<1x512xf32>, i32 -> vector<1x512xf32>
    %714 = arith.mulf %713, %316 : vector<1x512xf32>
    %c480_i32_347 = arith.constant 480 : i32
    %715 = tpu.dynamic_rotate %654 by %c480_i32_347 dim 1 : vector<1x512xf32>, i32 -> vector<1x512xf32>
    %716 = arith.mulf %715, %317 : vector<1x512xf32>
    %c478_i32_348 = arith.constant 478 : i32
    %717 = tpu.dynamic_rotate %654 by %c478_i32_348 dim 1 : vector<1x512xf32>, i32 -> vector<1x512xf32>
    %718 = arith.mulf %717, %318 : vector<1x512xf32>
    %c0_349 = arith.constant 0 : index
    %c0_350 = arith.constant 0 : index
    %719 = memref.load %arg10[%c0_349, %c0_350] : memref<4x36xf32, #tpu.memory_space<smem>>
    %720 = vector.broadcast %719 : f32 to vector<1x512xf32>
    %721 = arith.mulf %720, %656 : vector<1x512xf32>
    %c0_351 = arith.constant 0 : index
    %c1_352 = arith.constant 1 : index
    %722 = memref.load %arg10[%c0_351, %c1_352] : memref<4x36xf32, #tpu.memory_space<smem>>
    %723 = vector.broadcast %722 : f32 to vector<1x512xf32>
    %724 = arith.mulf %723, %658 : vector<1x512xf32>
    %725 = arith.addf %721, %724 : vector<1x512xf32>
    %c0_353 = arith.constant 0 : index
    %c2_354 = arith.constant 2 : index
    %726 = memref.load %arg10[%c0_353, %c2_354] : memref<4x36xf32, #tpu.memory_space<smem>>
    %727 = vector.broadcast %726 : f32 to vector<1x512xf32>
    %728 = arith.mulf %727, %660 : vector<1x512xf32>
    %729 = arith.addf %725, %728 : vector<1x512xf32>
    %c0_355 = arith.constant 0 : index
    %c3_356 = arith.constant 3 : index
    %730 = memref.load %arg10[%c0_355, %c3_356] : memref<4x36xf32, #tpu.memory_space<smem>>
    %731 = vector.broadcast %730 : f32 to vector<1x512xf32>
    %732 = arith.mulf %731, %662 : vector<1x512xf32>
    %733 = arith.addf %729, %732 : vector<1x512xf32>
    %c0_357 = arith.constant 0 : index
    %c4_358 = arith.constant 4 : index
    %734 = memref.load %arg10[%c0_357, %c4_358] : memref<4x36xf32, #tpu.memory_space<smem>>
    %735 = vector.broadcast %734 : f32 to vector<1x512xf32>
    %736 = arith.mulf %735, %426 : vector<1x512xf32>
    %737 = arith.addf %733, %736 : vector<1x512xf32>
    %c0_359 = arith.constant 0 : index
    %c5_360 = arith.constant 5 : index
    %738 = memref.load %arg10[%c0_359, %c5_360] : memref<4x36xf32, #tpu.memory_space<smem>>
    %739 = vector.broadcast %738 : f32 to vector<1x512xf32>
    %740 = arith.mulf %739, %664 : vector<1x512xf32>
    %741 = arith.addf %737, %740 : vector<1x512xf32>
    %c0_361 = arith.constant 0 : index
    %c6_362 = arith.constant 6 : index
    %742 = memref.load %arg10[%c0_361, %c6_362] : memref<4x36xf32, #tpu.memory_space<smem>>
    %743 = vector.broadcast %742 : f32 to vector<1x512xf32>
    %744 = arith.mulf %743, %666 : vector<1x512xf32>
    %745 = arith.addf %741, %744 : vector<1x512xf32>
    %c0_363 = arith.constant 0 : index
    %c7_364 = arith.constant 7 : index
    %746 = memref.load %arg10[%c0_363, %c7_364] : memref<4x36xf32, #tpu.memory_space<smem>>
    %747 = vector.broadcast %746 : f32 to vector<1x512xf32>
    %748 = arith.mulf %747, %668 : vector<1x512xf32>
    %749 = arith.addf %745, %748 : vector<1x512xf32>
    %c0_365 = arith.constant 0 : index
    %c8_366 = arith.constant 8 : index
    %750 = memref.load %arg10[%c0_365, %c8_366] : memref<4x36xf32, #tpu.memory_space<smem>>
    %751 = vector.broadcast %750 : f32 to vector<1x512xf32>
    %752 = arith.mulf %751, %670 : vector<1x512xf32>
    %753 = arith.addf %749, %752 : vector<1x512xf32>
    %c0_367 = arith.constant 0 : index
    %c9_368 = arith.constant 9 : index
    %754 = memref.load %arg10[%c0_367, %c9_368] : memref<4x36xf32, #tpu.memory_space<smem>>
    %755 = vector.broadcast %754 : f32 to vector<1x512xf32>
    %756 = arith.mulf %755, %672 : vector<1x512xf32>
    %757 = arith.addf %753, %756 : vector<1x512xf32>
    %c0_369 = arith.constant 0 : index
    %c10_370 = arith.constant 10 : index
    %758 = memref.load %arg10[%c0_369, %c10_370] : memref<4x36xf32, #tpu.memory_space<smem>>
    %759 = vector.broadcast %758 : f32 to vector<1x512xf32>
    %760 = arith.mulf %759, %674 : vector<1x512xf32>
    %761 = arith.addf %757, %760 : vector<1x512xf32>
    %c0_371 = arith.constant 0 : index
    %c11_372 = arith.constant 11 : index
    %762 = memref.load %arg10[%c0_371, %c11_372] : memref<4x36xf32, #tpu.memory_space<smem>>
    %763 = vector.broadcast %762 : f32 to vector<1x512xf32>
    %764 = arith.mulf %763, %676 : vector<1x512xf32>
    %765 = arith.addf %761, %764 : vector<1x512xf32>
    %c0_373 = arith.constant 0 : index
    %c12_374 = arith.constant 12 : index
    %766 = memref.load %arg10[%c0_373, %c12_374] : memref<4x36xf32, #tpu.memory_space<smem>>
    %767 = vector.broadcast %766 : f32 to vector<1x512xf32>
    %768 = arith.mulf %767, %678 : vector<1x512xf32>
    %769 = arith.addf %765, %768 : vector<1x512xf32>
    %c0_375 = arith.constant 0 : index
    %c13_376 = arith.constant 13 : index
    %770 = memref.load %arg10[%c0_375, %c13_376] : memref<4x36xf32, #tpu.memory_space<smem>>
    %771 = vector.broadcast %770 : f32 to vector<1x512xf32>
    %772 = arith.mulf %771, %502 : vector<1x512xf32>
    %773 = arith.addf %769, %772 : vector<1x512xf32>
    %c0_377 = arith.constant 0 : index
    %c14_378 = arith.constant 14 : index
    %774 = memref.load %arg10[%c0_377, %c14_378] : memref<4x36xf32, #tpu.memory_space<smem>>
    %775 = vector.broadcast %774 : f32 to vector<1x512xf32>
    %776 = arith.mulf %775, %680 : vector<1x512xf32>
    %777 = arith.addf %773, %776 : vector<1x512xf32>
    %c0_379 = arith.constant 0 : index
    %c15_380 = arith.constant 15 : index
    %778 = memref.load %arg10[%c0_379, %c15_380] : memref<4x36xf32, #tpu.memory_space<smem>>
    %779 = vector.broadcast %778 : f32 to vector<1x512xf32>
    %780 = arith.mulf %779, %682 : vector<1x512xf32>
    %781 = arith.addf %777, %780 : vector<1x512xf32>
    %c0_381 = arith.constant 0 : index
    %c16_382 = arith.constant 16 : index
    %782 = memref.load %arg10[%c0_381, %c16_382] : memref<4x36xf32, #tpu.memory_space<smem>>
    %783 = vector.broadcast %782 : f32 to vector<1x512xf32>
    %784 = arith.mulf %783, %684 : vector<1x512xf32>
    %785 = arith.addf %781, %784 : vector<1x512xf32>
    %c0_383 = arith.constant 0 : index
    %c17_384 = arith.constant 17 : index
    %786 = memref.load %arg10[%c0_383, %c17_384] : memref<4x36xf32, #tpu.memory_space<smem>>
    %787 = vector.broadcast %786 : f32 to vector<1x512xf32>
    %788 = arith.mulf %787, %686 : vector<1x512xf32>
    %789 = arith.addf %785, %788 : vector<1x512xf32>
    %c0_385 = arith.constant 0 : index
    %c18 = arith.constant 18 : index
    %790 = memref.load %arg10[%c0_385, %c18] : memref<4x36xf32, #tpu.memory_space<smem>>
    %791 = vector.broadcast %790 : f32 to vector<1x512xf32>
    %792 = arith.mulf %791, %688 : vector<1x512xf32>
    %793 = arith.addf %789, %792 : vector<1x512xf32>
    %c0_386 = arith.constant 0 : index
    %c19 = arith.constant 19 : index
    %794 = memref.load %arg10[%c0_386, %c19] : memref<4x36xf32, #tpu.memory_space<smem>>
    %795 = vector.broadcast %794 : f32 to vector<1x512xf32>
    %796 = arith.mulf %795, %690 : vector<1x512xf32>
    %797 = arith.addf %793, %796 : vector<1x512xf32>
    %c0_387 = arith.constant 0 : index
    %c20 = arith.constant 20 : index
    %798 = memref.load %arg10[%c0_387, %c20] : memref<4x36xf32, #tpu.memory_space<smem>>
    %799 = vector.broadcast %798 : f32 to vector<1x512xf32>
    %800 = arith.mulf %799, %692 : vector<1x512xf32>
    %801 = arith.addf %797, %800 : vector<1x512xf32>
    %c0_388 = arith.constant 0 : index
    %c21 = arith.constant 21 : index
    %802 = memref.load %arg10[%c0_388, %c21] : memref<4x36xf32, #tpu.memory_space<smem>>
    %803 = vector.broadcast %802 : f32 to vector<1x512xf32>
    %804 = arith.mulf %803, %694 : vector<1x512xf32>
    %805 = arith.addf %801, %804 : vector<1x512xf32>
    %c0_389 = arith.constant 0 : index
    %c22 = arith.constant 22 : index
    %806 = memref.load %arg10[%c0_389, %c22] : memref<4x36xf32, #tpu.memory_space<smem>>
    %807 = vector.broadcast %806 : f32 to vector<1x512xf32>
    %808 = arith.mulf %807, %578 : vector<1x512xf32>
    %809 = arith.addf %805, %808 : vector<1x512xf32>
    %c0_390 = arith.constant 0 : index
    %c23 = arith.constant 23 : index
    %810 = memref.load %arg10[%c0_390, %c23] : memref<4x36xf32, #tpu.memory_space<smem>>
    %811 = vector.broadcast %810 : f32 to vector<1x512xf32>
    %812 = arith.mulf %811, %696 : vector<1x512xf32>
    %813 = arith.addf %809, %812 : vector<1x512xf32>
    %c0_391 = arith.constant 0 : index
    %c24 = arith.constant 24 : index
    %814 = memref.load %arg10[%c0_391, %c24] : memref<4x36xf32, #tpu.memory_space<smem>>
    %815 = vector.broadcast %814 : f32 to vector<1x512xf32>
    %816 = arith.mulf %815, %698 : vector<1x512xf32>
    %817 = arith.addf %813, %816 : vector<1x512xf32>
    %c0_392 = arith.constant 0 : index
    %c25 = arith.constant 25 : index
    %818 = memref.load %arg10[%c0_392, %c25] : memref<4x36xf32, #tpu.memory_space<smem>>
    %819 = vector.broadcast %818 : f32 to vector<1x512xf32>
    %820 = arith.mulf %819, %700 : vector<1x512xf32>
    %821 = arith.addf %817, %820 : vector<1x512xf32>
    %c0_393 = arith.constant 0 : index
    %c26 = arith.constant 26 : index
    %822 = memref.load %arg10[%c0_393, %c26] : memref<4x36xf32, #tpu.memory_space<smem>>
    %823 = vector.broadcast %822 : f32 to vector<1x512xf32>
    %824 = arith.mulf %823, %702 : vector<1x512xf32>
    %825 = arith.addf %821, %824 : vector<1x512xf32>
    %c0_394 = arith.constant 0 : index
    %c27 = arith.constant 27 : index
    %826 = memref.load %arg10[%c0_394, %c27] : memref<4x36xf32, #tpu.memory_space<smem>>
    %827 = vector.broadcast %826 : f32 to vector<1x512xf32>
    %828 = arith.mulf %827, %704 : vector<1x512xf32>
    %829 = arith.addf %825, %828 : vector<1x512xf32>
    %c0_395 = arith.constant 0 : index
    %c28 = arith.constant 28 : index
    %830 = memref.load %arg10[%c0_395, %c28] : memref<4x36xf32, #tpu.memory_space<smem>>
    %831 = vector.broadcast %830 : f32 to vector<1x512xf32>
    %832 = arith.mulf %831, %706 : vector<1x512xf32>
    %833 = arith.addf %829, %832 : vector<1x512xf32>
    %c0_396 = arith.constant 0 : index
    %c29 = arith.constant 29 : index
    %834 = memref.load %arg10[%c0_396, %c29] : memref<4x36xf32, #tpu.memory_space<smem>>
    %835 = vector.broadcast %834 : f32 to vector<1x512xf32>
    %836 = arith.mulf %835, %708 : vector<1x512xf32>
    %837 = arith.addf %833, %836 : vector<1x512xf32>
    %c0_397 = arith.constant 0 : index
    %c30 = arith.constant 30 : index
    %838 = memref.load %arg10[%c0_397, %c30] : memref<4x36xf32, #tpu.memory_space<smem>>
    %839 = vector.broadcast %838 : f32 to vector<1x512xf32>
    %840 = arith.mulf %839, %710 : vector<1x512xf32>
    %841 = arith.addf %837, %840 : vector<1x512xf32>
    %c0_398 = arith.constant 0 : index
    %c31 = arith.constant 31 : index
    %842 = memref.load %arg10[%c0_398, %c31] : memref<4x36xf32, #tpu.memory_space<smem>>
    %843 = vector.broadcast %842 : f32 to vector<1x512xf32>
    %844 = arith.mulf %843, %654 : vector<1x512xf32>
    %845 = arith.addf %841, %844 : vector<1x512xf32>
    %c0_399 = arith.constant 0 : index
    %c32 = arith.constant 32 : index
    %846 = memref.load %arg10[%c0_399, %c32] : memref<4x36xf32, #tpu.memory_space<smem>>
    %847 = vector.broadcast %846 : f32 to vector<1x512xf32>
    %848 = arith.mulf %847, %712 : vector<1x512xf32>
    %849 = arith.addf %845, %848 : vector<1x512xf32>
    %c0_400 = arith.constant 0 : index
    %c33 = arith.constant 33 : index
    %850 = memref.load %arg10[%c0_400, %c33] : memref<4x36xf32, #tpu.memory_space<smem>>
    %851 = vector.broadcast %850 : f32 to vector<1x512xf32>
    %852 = arith.mulf %851, %714 : vector<1x512xf32>
    %853 = arith.addf %849, %852 : vector<1x512xf32>
    %c0_401 = arith.constant 0 : index
    %c34 = arith.constant 34 : index
    %854 = memref.load %arg10[%c0_401, %c34] : memref<4x36xf32, #tpu.memory_space<smem>>
    %855 = vector.broadcast %854 : f32 to vector<1x512xf32>
    %856 = arith.mulf %855, %716 : vector<1x512xf32>
    %857 = arith.addf %853, %856 : vector<1x512xf32>
    %c0_402 = arith.constant 0 : index
    %c35 = arith.constant 35 : index
    %858 = memref.load %arg10[%c0_402, %c35] : memref<4x36xf32, #tpu.memory_space<smem>>
    %859 = vector.broadcast %858 : f32 to vector<1x512xf32>
    %860 = arith.mulf %859, %718 : vector<1x512xf32>
    %861 = arith.addf %857, %860 : vector<1x512xf32>
    %c0_403 = arith.constant 0 : index
    %862 = memref.load %arg11[%c0_403] : memref<4xf32, #tpu.memory_space<smem>>
    %863 = vector.broadcast %862 : f32 to vector<1x512xf32>
    %864 = arith.addf %861, %863 : vector<1x512xf32>
    %cst_404 = arith.constant 0.000000e+00 : f32
    %865 = vector.broadcast %cst_404 : f32 to vector<1x512xf32>
    %866 = arith.maximumf %864, %865 : vector<1x512xf32>
    %c1_405 = arith.constant 1 : index
    %c0_406 = arith.constant 0 : index
    %867 = memref.load %arg10[%c1_405, %c0_406] : memref<4x36xf32, #tpu.memory_space<smem>>
    %868 = vector.broadcast %867 : f32 to vector<1x512xf32>
    %869 = arith.mulf %868, %656 : vector<1x512xf32>
    %c1_407 = arith.constant 1 : index
    %c1_408 = arith.constant 1 : index
    %870 = memref.load %arg10[%c1_407, %c1_408] : memref<4x36xf32, #tpu.memory_space<smem>>
    %871 = vector.broadcast %870 : f32 to vector<1x512xf32>
    %872 = arith.mulf %871, %658 : vector<1x512xf32>
    %873 = arith.addf %869, %872 : vector<1x512xf32>
    %c1_409 = arith.constant 1 : index
    %c2_410 = arith.constant 2 : index
    %874 = memref.load %arg10[%c1_409, %c2_410] : memref<4x36xf32, #tpu.memory_space<smem>>
    %875 = vector.broadcast %874 : f32 to vector<1x512xf32>
    %876 = arith.mulf %875, %660 : vector<1x512xf32>
    %877 = arith.addf %873, %876 : vector<1x512xf32>
    %c1_411 = arith.constant 1 : index
    %c3_412 = arith.constant 3 : index
    %878 = memref.load %arg10[%c1_411, %c3_412] : memref<4x36xf32, #tpu.memory_space<smem>>
    %879 = vector.broadcast %878 : f32 to vector<1x512xf32>
    %880 = arith.mulf %879, %662 : vector<1x512xf32>
    %881 = arith.addf %877, %880 : vector<1x512xf32>
    %c1_413 = arith.constant 1 : index
    %c4_414 = arith.constant 4 : index
    %882 = memref.load %arg10[%c1_413, %c4_414] : memref<4x36xf32, #tpu.memory_space<smem>>
    %883 = vector.broadcast %882 : f32 to vector<1x512xf32>
    %884 = arith.mulf %883, %426 : vector<1x512xf32>
    %885 = arith.addf %881, %884 : vector<1x512xf32>
    %c1_415 = arith.constant 1 : index
    %c5_416 = arith.constant 5 : index
    %886 = memref.load %arg10[%c1_415, %c5_416] : memref<4x36xf32, #tpu.memory_space<smem>>
    %887 = vector.broadcast %886 : f32 to vector<1x512xf32>
    %888 = arith.mulf %887, %664 : vector<1x512xf32>
    %889 = arith.addf %885, %888 : vector<1x512xf32>
    %c1_417 = arith.constant 1 : index
    %c6_418 = arith.constant 6 : index
    %890 = memref.load %arg10[%c1_417, %c6_418] : memref<4x36xf32, #tpu.memory_space<smem>>
    %891 = vector.broadcast %890 : f32 to vector<1x512xf32>
    %892 = arith.mulf %891, %666 : vector<1x512xf32>
    %893 = arith.addf %889, %892 : vector<1x512xf32>
    %c1_419 = arith.constant 1 : index
    %c7_420 = arith.constant 7 : index
    %894 = memref.load %arg10[%c1_419, %c7_420] : memref<4x36xf32, #tpu.memory_space<smem>>
    %895 = vector.broadcast %894 : f32 to vector<1x512xf32>
    %896 = arith.mulf %895, %668 : vector<1x512xf32>
    %897 = arith.addf %893, %896 : vector<1x512xf32>
    %c1_421 = arith.constant 1 : index
    %c8_422 = arith.constant 8 : index
    %898 = memref.load %arg10[%c1_421, %c8_422] : memref<4x36xf32, #tpu.memory_space<smem>>
    %899 = vector.broadcast %898 : f32 to vector<1x512xf32>
    %900 = arith.mulf %899, %670 : vector<1x512xf32>
    %901 = arith.addf %897, %900 : vector<1x512xf32>
    %c1_423 = arith.constant 1 : index
    %c9_424 = arith.constant 9 : index
    %902 = memref.load %arg10[%c1_423, %c9_424] : memref<4x36xf32, #tpu.memory_space<smem>>
    %903 = vector.broadcast %902 : f32 to vector<1x512xf32>
    %904 = arith.mulf %903, %672 : vector<1x512xf32>
    %905 = arith.addf %901, %904 : vector<1x512xf32>
    %c1_425 = arith.constant 1 : index
    %c10_426 = arith.constant 10 : index
    %906 = memref.load %arg10[%c1_425, %c10_426] : memref<4x36xf32, #tpu.memory_space<smem>>
    %907 = vector.broadcast %906 : f32 to vector<1x512xf32>
    %908 = arith.mulf %907, %674 : vector<1x512xf32>
    %909 = arith.addf %905, %908 : vector<1x512xf32>
    %c1_427 = arith.constant 1 : index
    %c11_428 = arith.constant 11 : index
    %910 = memref.load %arg10[%c1_427, %c11_428] : memref<4x36xf32, #tpu.memory_space<smem>>
    %911 = vector.broadcast %910 : f32 to vector<1x512xf32>
    %912 = arith.mulf %911, %676 : vector<1x512xf32>
    %913 = arith.addf %909, %912 : vector<1x512xf32>
    %c1_429 = arith.constant 1 : index
    %c12_430 = arith.constant 12 : index
    %914 = memref.load %arg10[%c1_429, %c12_430] : memref<4x36xf32, #tpu.memory_space<smem>>
    %915 = vector.broadcast %914 : f32 to vector<1x512xf32>
    %916 = arith.mulf %915, %678 : vector<1x512xf32>
    %917 = arith.addf %913, %916 : vector<1x512xf32>
    %c1_431 = arith.constant 1 : index
    %c13_432 = arith.constant 13 : index
    %918 = memref.load %arg10[%c1_431, %c13_432] : memref<4x36xf32, #tpu.memory_space<smem>>
    %919 = vector.broadcast %918 : f32 to vector<1x512xf32>
    %920 = arith.mulf %919, %502 : vector<1x512xf32>
    %921 = arith.addf %917, %920 : vector<1x512xf32>
    %c1_433 = arith.constant 1 : index
    %c14_434 = arith.constant 14 : index
    %922 = memref.load %arg10[%c1_433, %c14_434] : memref<4x36xf32, #tpu.memory_space<smem>>
    %923 = vector.broadcast %922 : f32 to vector<1x512xf32>
    %924 = arith.mulf %923, %680 : vector<1x512xf32>
    %925 = arith.addf %921, %924 : vector<1x512xf32>
    %c1_435 = arith.constant 1 : index
    %c15_436 = arith.constant 15 : index
    %926 = memref.load %arg10[%c1_435, %c15_436] : memref<4x36xf32, #tpu.memory_space<smem>>
    %927 = vector.broadcast %926 : f32 to vector<1x512xf32>
    %928 = arith.mulf %927, %682 : vector<1x512xf32>
    %929 = arith.addf %925, %928 : vector<1x512xf32>
    %c1_437 = arith.constant 1 : index
    %c16_438 = arith.constant 16 : index
    %930 = memref.load %arg10[%c1_437, %c16_438] : memref<4x36xf32, #tpu.memory_space<smem>>
    %931 = vector.broadcast %930 : f32 to vector<1x512xf32>
    %932 = arith.mulf %931, %684 : vector<1x512xf32>
    %933 = arith.addf %929, %932 : vector<1x512xf32>
    %c1_439 = arith.constant 1 : index
    %c17_440 = arith.constant 17 : index
    %934 = memref.load %arg10[%c1_439, %c17_440] : memref<4x36xf32, #tpu.memory_space<smem>>
    %935 = vector.broadcast %934 : f32 to vector<1x512xf32>
    %936 = arith.mulf %935, %686 : vector<1x512xf32>
    %937 = arith.addf %933, %936 : vector<1x512xf32>
    %c1_441 = arith.constant 1 : index
    %c18_442 = arith.constant 18 : index
    %938 = memref.load %arg10[%c1_441, %c18_442] : memref<4x36xf32, #tpu.memory_space<smem>>
    %939 = vector.broadcast %938 : f32 to vector<1x512xf32>
    %940 = arith.mulf %939, %688 : vector<1x512xf32>
    %941 = arith.addf %937, %940 : vector<1x512xf32>
    %c1_443 = arith.constant 1 : index
    %c19_444 = arith.constant 19 : index
    %942 = memref.load %arg10[%c1_443, %c19_444] : memref<4x36xf32, #tpu.memory_space<smem>>
    %943 = vector.broadcast %942 : f32 to vector<1x512xf32>
    %944 = arith.mulf %943, %690 : vector<1x512xf32>
    %945 = arith.addf %941, %944 : vector<1x512xf32>
    %c1_445 = arith.constant 1 : index
    %c20_446 = arith.constant 20 : index
    %946 = memref.load %arg10[%c1_445, %c20_446] : memref<4x36xf32, #tpu.memory_space<smem>>
    %947 = vector.broadcast %946 : f32 to vector<1x512xf32>
    %948 = arith.mulf %947, %692 : vector<1x512xf32>
    %949 = arith.addf %945, %948 : vector<1x512xf32>
    %c1_447 = arith.constant 1 : index
    %c21_448 = arith.constant 21 : index
    %950 = memref.load %arg10[%c1_447, %c21_448] : memref<4x36xf32, #tpu.memory_space<smem>>
    %951 = vector.broadcast %950 : f32 to vector<1x512xf32>
    %952 = arith.mulf %951, %694 : vector<1x512xf32>
    %953 = arith.addf %949, %952 : vector<1x512xf32>
    %c1_449 = arith.constant 1 : index
    %c22_450 = arith.constant 22 : index
    %954 = memref.load %arg10[%c1_449, %c22_450] : memref<4x36xf32, #tpu.memory_space<smem>>
    %955 = vector.broadcast %954 : f32 to vector<1x512xf32>
    %956 = arith.mulf %955, %578 : vector<1x512xf32>
    %957 = arith.addf %953, %956 : vector<1x512xf32>
    %c1_451 = arith.constant 1 : index
    %c23_452 = arith.constant 23 : index
    %958 = memref.load %arg10[%c1_451, %c23_452] : memref<4x36xf32, #tpu.memory_space<smem>>
    %959 = vector.broadcast %958 : f32 to vector<1x512xf32>
    %960 = arith.mulf %959, %696 : vector<1x512xf32>
    %961 = arith.addf %957, %960 : vector<1x512xf32>
    %c1_453 = arith.constant 1 : index
    %c24_454 = arith.constant 24 : index
    %962 = memref.load %arg10[%c1_453, %c24_454] : memref<4x36xf32, #tpu.memory_space<smem>>
    %963 = vector.broadcast %962 : f32 to vector<1x512xf32>
    %964 = arith.mulf %963, %698 : vector<1x512xf32>
    %965 = arith.addf %961, %964 : vector<1x512xf32>
    %c1_455 = arith.constant 1 : index
    %c25_456 = arith.constant 25 : index
    %966 = memref.load %arg10[%c1_455, %c25_456] : memref<4x36xf32, #tpu.memory_space<smem>>
    %967 = vector.broadcast %966 : f32 to vector<1x512xf32>
    %968 = arith.mulf %967, %700 : vector<1x512xf32>
    %969 = arith.addf %965, %968 : vector<1x512xf32>
    %c1_457 = arith.constant 1 : index
    %c26_458 = arith.constant 26 : index
    %970 = memref.load %arg10[%c1_457, %c26_458] : memref<4x36xf32, #tpu.memory_space<smem>>
    %971 = vector.broadcast %970 : f32 to vector<1x512xf32>
    %972 = arith.mulf %971, %702 : vector<1x512xf32>
    %973 = arith.addf %969, %972 : vector<1x512xf32>
    %c1_459 = arith.constant 1 : index
    %c27_460 = arith.constant 27 : index
    %974 = memref.load %arg10[%c1_459, %c27_460] : memref<4x36xf32, #tpu.memory_space<smem>>
    %975 = vector.broadcast %974 : f32 to vector<1x512xf32>
    %976 = arith.mulf %975, %704 : vector<1x512xf32>
    %977 = arith.addf %973, %976 : vector<1x512xf32>
    %c1_461 = arith.constant 1 : index
    %c28_462 = arith.constant 28 : index
    %978 = memref.load %arg10[%c1_461, %c28_462] : memref<4x36xf32, #tpu.memory_space<smem>>
    %979 = vector.broadcast %978 : f32 to vector<1x512xf32>
    %980 = arith.mulf %979, %706 : vector<1x512xf32>
    %981 = arith.addf %977, %980 : vector<1x512xf32>
    %c1_463 = arith.constant 1 : index
    %c29_464 = arith.constant 29 : index
    %982 = memref.load %arg10[%c1_463, %c29_464] : memref<4x36xf32, #tpu.memory_space<smem>>
    %983 = vector.broadcast %982 : f32 to vector<1x512xf32>
    %984 = arith.mulf %983, %708 : vector<1x512xf32>
    %985 = arith.addf %981, %984 : vector<1x512xf32>
    %c1_465 = arith.constant 1 : index
    %c30_466 = arith.constant 30 : index
    %986 = memref.load %arg10[%c1_465, %c30_466] : memref<4x36xf32, #tpu.memory_space<smem>>
    %987 = vector.broadcast %986 : f32 to vector<1x512xf32>
    %988 = arith.mulf %987, %710 : vector<1x512xf32>
    %989 = arith.addf %985, %988 : vector<1x512xf32>
    %c1_467 = arith.constant 1 : index
    %c31_468 = arith.constant 31 : index
    %990 = memref.load %arg10[%c1_467, %c31_468] : memref<4x36xf32, #tpu.memory_space<smem>>
    %991 = vector.broadcast %990 : f32 to vector<1x512xf32>
    %992 = arith.mulf %991, %654 : vector<1x512xf32>
    %993 = arith.addf %989, %992 : vector<1x512xf32>
    %c1_469 = arith.constant 1 : index
    %c32_470 = arith.constant 32 : index
    %994 = memref.load %arg10[%c1_469, %c32_470] : memref<4x36xf32, #tpu.memory_space<smem>>
    %995 = vector.broadcast %994 : f32 to vector<1x512xf32>
    %996 = arith.mulf %995, %712 : vector<1x512xf32>
    %997 = arith.addf %993, %996 : vector<1x512xf32>
    %c1_471 = arith.constant 1 : index
    %c33_472 = arith.constant 33 : index
    %998 = memref.load %arg10[%c1_471, %c33_472] : memref<4x36xf32, #tpu.memory_space<smem>>
    %999 = vector.broadcast %998 : f32 to vector<1x512xf32>
    %1000 = arith.mulf %999, %714 : vector<1x512xf32>
    %1001 = arith.addf %997, %1000 : vector<1x512xf32>
    %c1_473 = arith.constant 1 : index
    %c34_474 = arith.constant 34 : index
    %1002 = memref.load %arg10[%c1_473, %c34_474] : memref<4x36xf32, #tpu.memory_space<smem>>
    %1003 = vector.broadcast %1002 : f32 to vector<1x512xf32>
    %1004 = arith.mulf %1003, %716 : vector<1x512xf32>
    %1005 = arith.addf %1001, %1004 : vector<1x512xf32>
    %c1_475 = arith.constant 1 : index
    %c35_476 = arith.constant 35 : index
    %1006 = memref.load %arg10[%c1_475, %c35_476] : memref<4x36xf32, #tpu.memory_space<smem>>
    %1007 = vector.broadcast %1006 : f32 to vector<1x512xf32>
    %1008 = arith.mulf %1007, %718 : vector<1x512xf32>
    %1009 = arith.addf %1005, %1008 : vector<1x512xf32>
    %c1_477 = arith.constant 1 : index
    %1010 = memref.load %arg11[%c1_477] : memref<4xf32, #tpu.memory_space<smem>>
    %1011 = vector.broadcast %1010 : f32 to vector<1x512xf32>
    %1012 = arith.addf %1009, %1011 : vector<1x512xf32>
    %cst_478 = arith.constant 0.000000e+00 : f32
    %1013 = vector.broadcast %cst_478 : f32 to vector<1x512xf32>
    %1014 = arith.maximumf %1012, %1013 : vector<1x512xf32>
    %c2_479 = arith.constant 2 : index
    %c0_480 = arith.constant 0 : index
    %1015 = memref.load %arg10[%c2_479, %c0_480] : memref<4x36xf32, #tpu.memory_space<smem>>
    %1016 = vector.broadcast %1015 : f32 to vector<1x512xf32>
    %1017 = arith.mulf %1016, %656 : vector<1x512xf32>
    %c2_481 = arith.constant 2 : index
    %c1_482 = arith.constant 1 : index
    %1018 = memref.load %arg10[%c2_481, %c1_482] : memref<4x36xf32, #tpu.memory_space<smem>>
    %1019 = vector.broadcast %1018 : f32 to vector<1x512xf32>
    %1020 = arith.mulf %1019, %658 : vector<1x512xf32>
    %1021 = arith.addf %1017, %1020 : vector<1x512xf32>
    %c2_483 = arith.constant 2 : index
    %c2_484 = arith.constant 2 : index
    %1022 = memref.load %arg10[%c2_483, %c2_484] : memref<4x36xf32, #tpu.memory_space<smem>>
    %1023 = vector.broadcast %1022 : f32 to vector<1x512xf32>
    %1024 = arith.mulf %1023, %660 : vector<1x512xf32>
    %1025 = arith.addf %1021, %1024 : vector<1x512xf32>
    %c2_485 = arith.constant 2 : index
    %c3_486 = arith.constant 3 : index
    %1026 = memref.load %arg10[%c2_485, %c3_486] : memref<4x36xf32, #tpu.memory_space<smem>>
    %1027 = vector.broadcast %1026 : f32 to vector<1x512xf32>
    %1028 = arith.mulf %1027, %662 : vector<1x512xf32>
    %1029 = arith.addf %1025, %1028 : vector<1x512xf32>
    %c2_487 = arith.constant 2 : index
    %c4_488 = arith.constant 4 : index
    %1030 = memref.load %arg10[%c2_487, %c4_488] : memref<4x36xf32, #tpu.memory_space<smem>>
    %1031 = vector.broadcast %1030 : f32 to vector<1x512xf32>
    %1032 = arith.mulf %1031, %426 : vector<1x512xf32>
    %1033 = arith.addf %1029, %1032 : vector<1x512xf32>
    %c2_489 = arith.constant 2 : index
    %c5_490 = arith.constant 5 : index
    %1034 = memref.load %arg10[%c2_489, %c5_490] : memref<4x36xf32, #tpu.memory_space<smem>>
    %1035 = vector.broadcast %1034 : f32 to vector<1x512xf32>
    %1036 = arith.mulf %1035, %664 : vector<1x512xf32>
    %1037 = arith.addf %1033, %1036 : vector<1x512xf32>
    %c2_491 = arith.constant 2 : index
    %c6_492 = arith.constant 6 : index
    %1038 = memref.load %arg10[%c2_491, %c6_492] : memref<4x36xf32, #tpu.memory_space<smem>>
    %1039 = vector.broadcast %1038 : f32 to vector<1x512xf32>
    %1040 = arith.mulf %1039, %666 : vector<1x512xf32>
    %1041 = arith.addf %1037, %1040 : vector<1x512xf32>
    %c2_493 = arith.constant 2 : index
    %c7_494 = arith.constant 7 : index
    %1042 = memref.load %arg10[%c2_493, %c7_494] : memref<4x36xf32, #tpu.memory_space<smem>>
    %1043 = vector.broadcast %1042 : f32 to vector<1x512xf32>
    %1044 = arith.mulf %1043, %668 : vector<1x512xf32>
    %1045 = arith.addf %1041, %1044 : vector<1x512xf32>
    %c2_495 = arith.constant 2 : index
    %c8_496 = arith.constant 8 : index
    %1046 = memref.load %arg10[%c2_495, %c8_496] : memref<4x36xf32, #tpu.memory_space<smem>>
    %1047 = vector.broadcast %1046 : f32 to vector<1x512xf32>
    %1048 = arith.mulf %1047, %670 : vector<1x512xf32>
    %1049 = arith.addf %1045, %1048 : vector<1x512xf32>
    %c2_497 = arith.constant 2 : index
    %c9_498 = arith.constant 9 : index
    %1050 = memref.load %arg10[%c2_497, %c9_498] : memref<4x36xf32, #tpu.memory_space<smem>>
    %1051 = vector.broadcast %1050 : f32 to vector<1x512xf32>
    %1052 = arith.mulf %1051, %672 : vector<1x512xf32>
    %1053 = arith.addf %1049, %1052 : vector<1x512xf32>
    %c2_499 = arith.constant 2 : index
    %c10_500 = arith.constant 10 : index
    %1054 = memref.load %arg10[%c2_499, %c10_500] : memref<4x36xf32, #tpu.memory_space<smem>>
    %1055 = vector.broadcast %1054 : f32 to vector<1x512xf32>
    %1056 = arith.mulf %1055, %674 : vector<1x512xf32>
    %1057 = arith.addf %1053, %1056 : vector<1x512xf32>
    %c2_501 = arith.constant 2 : index
    %c11_502 = arith.constant 11 : index
    %1058 = memref.load %arg10[%c2_501, %c11_502] : memref<4x36xf32, #tpu.memory_space<smem>>
    %1059 = vector.broadcast %1058 : f32 to vector<1x512xf32>
    %1060 = arith.mulf %1059, %676 : vector<1x512xf32>
    %1061 = arith.addf %1057, %1060 : vector<1x512xf32>
    %c2_503 = arith.constant 2 : index
    %c12_504 = arith.constant 12 : index
    %1062 = memref.load %arg10[%c2_503, %c12_504] : memref<4x36xf32, #tpu.memory_space<smem>>
    %1063 = vector.broadcast %1062 : f32 to vector<1x512xf32>
    %1064 = arith.mulf %1063, %678 : vector<1x512xf32>
    %1065 = arith.addf %1061, %1064 : vector<1x512xf32>
    %c2_505 = arith.constant 2 : index
    %c13_506 = arith.constant 13 : index
    %1066 = memref.load %arg10[%c2_505, %c13_506] : memref<4x36xf32, #tpu.memory_space<smem>>
    %1067 = vector.broadcast %1066 : f32 to vector<1x512xf32>
    %1068 = arith.mulf %1067, %502 : vector<1x512xf32>
    %1069 = arith.addf %1065, %1068 : vector<1x512xf32>
    %c2_507 = arith.constant 2 : index
    %c14_508 = arith.constant 14 : index
    %1070 = memref.load %arg10[%c2_507, %c14_508] : memref<4x36xf32, #tpu.memory_space<smem>>
    %1071 = vector.broadcast %1070 : f32 to vector<1x512xf32>
    %1072 = arith.mulf %1071, %680 : vector<1x512xf32>
    %1073 = arith.addf %1069, %1072 : vector<1x512xf32>
    %c2_509 = arith.constant 2 : index
    %c15_510 = arith.constant 15 : index
    %1074 = memref.load %arg10[%c2_509, %c15_510] : memref<4x36xf32, #tpu.memory_space<smem>>
    %1075 = vector.broadcast %1074 : f32 to vector<1x512xf32>
    %1076 = arith.mulf %1075, %682 : vector<1x512xf32>
    %1077 = arith.addf %1073, %1076 : vector<1x512xf32>
    %c2_511 = arith.constant 2 : index
    %c16_512 = arith.constant 16 : index
    %1078 = memref.load %arg10[%c2_511, %c16_512] : memref<4x36xf32, #tpu.memory_space<smem>>
    %1079 = vector.broadcast %1078 : f32 to vector<1x512xf32>
    %1080 = arith.mulf %1079, %684 : vector<1x512xf32>
    %1081 = arith.addf %1077, %1080 : vector<1x512xf32>
    %c2_513 = arith.constant 2 : index
    %c17_514 = arith.constant 17 : index
    %1082 = memref.load %arg10[%c2_513, %c17_514] : memref<4x36xf32, #tpu.memory_space<smem>>
    %1083 = vector.broadcast %1082 : f32 to vector<1x512xf32>
    %1084 = arith.mulf %1083, %686 : vector<1x512xf32>
    %1085 = arith.addf %1081, %1084 : vector<1x512xf32>
    %c2_515 = arith.constant 2 : index
    %c18_516 = arith.constant 18 : index
    %1086 = memref.load %arg10[%c2_515, %c18_516] : memref<4x36xf32, #tpu.memory_space<smem>>
    %1087 = vector.broadcast %1086 : f32 to vector<1x512xf32>
    %1088 = arith.mulf %1087, %688 : vector<1x512xf32>
    %1089 = arith.addf %1085, %1088 : vector<1x512xf32>
    %c2_517 = arith.constant 2 : index
    %c19_518 = arith.constant 19 : index
    %1090 = memref.load %arg10[%c2_517, %c19_518] : memref<4x36xf32, #tpu.memory_space<smem>>
    %1091 = vector.broadcast %1090 : f32 to vector<1x512xf32>
    %1092 = arith.mulf %1091, %690 : vector<1x512xf32>
    %1093 = arith.addf %1089, %1092 : vector<1x512xf32>
    %c2_519 = arith.constant 2 : index
    %c20_520 = arith.constant 20 : index
    %1094 = memref.load %arg10[%c2_519, %c20_520] : memref<4x36xf32, #tpu.memory_space<smem>>
    %1095 = vector.broadcast %1094 : f32 to vector<1x512xf32>
    %1096 = arith.mulf %1095, %692 : vector<1x512xf32>
    %1097 = arith.addf %1093, %1096 : vector<1x512xf32>
    %c2_521 = arith.constant 2 : index
    %c21_522 = arith.constant 21 : index
    %1098 = memref.load %arg10[%c2_521, %c21_522] : memref<4x36xf32, #tpu.memory_space<smem>>
    %1099 = vector.broadcast %1098 : f32 to vector<1x512xf32>
    %1100 = arith.mulf %1099, %694 : vector<1x512xf32>
    %1101 = arith.addf %1097, %1100 : vector<1x512xf32>
    %c2_523 = arith.constant 2 : index
    %c22_524 = arith.constant 22 : index
    %1102 = memref.load %arg10[%c2_523, %c22_524] : memref<4x36xf32, #tpu.memory_space<smem>>
    %1103 = vector.broadcast %1102 : f32 to vector<1x512xf32>
    %1104 = arith.mulf %1103, %578 : vector<1x512xf32>
    %1105 = arith.addf %1101, %1104 : vector<1x512xf32>
    %c2_525 = arith.constant 2 : index
    %c23_526 = arith.constant 23 : index
    %1106 = memref.load %arg10[%c2_525, %c23_526] : memref<4x36xf32, #tpu.memory_space<smem>>
    %1107 = vector.broadcast %1106 : f32 to vector<1x512xf32>
    %1108 = arith.mulf %1107, %696 : vector<1x512xf32>
    %1109 = arith.addf %1105, %1108 : vector<1x512xf32>
    %c2_527 = arith.constant 2 : index
    %c24_528 = arith.constant 24 : index
    %1110 = memref.load %arg10[%c2_527, %c24_528] : memref<4x36xf32, #tpu.memory_space<smem>>
    %1111 = vector.broadcast %1110 : f32 to vector<1x512xf32>
    %1112 = arith.mulf %1111, %698 : vector<1x512xf32>
    %1113 = arith.addf %1109, %1112 : vector<1x512xf32>
    %c2_529 = arith.constant 2 : index
    %c25_530 = arith.constant 25 : index
    %1114 = memref.load %arg10[%c2_529, %c25_530] : memref<4x36xf32, #tpu.memory_space<smem>>
    %1115 = vector.broadcast %1114 : f32 to vector<1x512xf32>
    %1116 = arith.mulf %1115, %700 : vector<1x512xf32>
    %1117 = arith.addf %1113, %1116 : vector<1x512xf32>
    %c2_531 = arith.constant 2 : index
    %c26_532 = arith.constant 26 : index
    %1118 = memref.load %arg10[%c2_531, %c26_532] : memref<4x36xf32, #tpu.memory_space<smem>>
    %1119 = vector.broadcast %1118 : f32 to vector<1x512xf32>
    %1120 = arith.mulf %1119, %702 : vector<1x512xf32>
    %1121 = arith.addf %1117, %1120 : vector<1x512xf32>
    %c2_533 = arith.constant 2 : index
    %c27_534 = arith.constant 27 : index
    %1122 = memref.load %arg10[%c2_533, %c27_534] : memref<4x36xf32, #tpu.memory_space<smem>>
    %1123 = vector.broadcast %1122 : f32 to vector<1x512xf32>
    %1124 = arith.mulf %1123, %704 : vector<1x512xf32>
    %1125 = arith.addf %1121, %1124 : vector<1x512xf32>
    %c2_535 = arith.constant 2 : index
    %c28_536 = arith.constant 28 : index
    %1126 = memref.load %arg10[%c2_535, %c28_536] : memref<4x36xf32, #tpu.memory_space<smem>>
    %1127 = vector.broadcast %1126 : f32 to vector<1x512xf32>
    %1128 = arith.mulf %1127, %706 : vector<1x512xf32>
    %1129 = arith.addf %1125, %1128 : vector<1x512xf32>
    %c2_537 = arith.constant 2 : index
    %c29_538 = arith.constant 29 : index
    %1130 = memref.load %arg10[%c2_537, %c29_538] : memref<4x36xf32, #tpu.memory_space<smem>>
    %1131 = vector.broadcast %1130 : f32 to vector<1x512xf32>
    %1132 = arith.mulf %1131, %708 : vector<1x512xf32>
    %1133 = arith.addf %1129, %1132 : vector<1x512xf32>
    %c2_539 = arith.constant 2 : index
    %c30_540 = arith.constant 30 : index
    %1134 = memref.load %arg10[%c2_539, %c30_540] : memref<4x36xf32, #tpu.memory_space<smem>>
    %1135 = vector.broadcast %1134 : f32 to vector<1x512xf32>
    %1136 = arith.mulf %1135, %710 : vector<1x512xf32>
    %1137 = arith.addf %1133, %1136 : vector<1x512xf32>
    %c2_541 = arith.constant 2 : index
    %c31_542 = arith.constant 31 : index
    %1138 = memref.load %arg10[%c2_541, %c31_542] : memref<4x36xf32, #tpu.memory_space<smem>>
    %1139 = vector.broadcast %1138 : f32 to vector<1x512xf32>
    %1140 = arith.mulf %1139, %654 : vector<1x512xf32>
    %1141 = arith.addf %1137, %1140 : vector<1x512xf32>
    %c2_543 = arith.constant 2 : index
    %c32_544 = arith.constant 32 : index
    %1142 = memref.load %arg10[%c2_543, %c32_544] : memref<4x36xf32, #tpu.memory_space<smem>>
    %1143 = vector.broadcast %1142 : f32 to vector<1x512xf32>
    %1144 = arith.mulf %1143, %712 : vector<1x512xf32>
    %1145 = arith.addf %1141, %1144 : vector<1x512xf32>
    %c2_545 = arith.constant 2 : index
    %c33_546 = arith.constant 33 : index
    %1146 = memref.load %arg10[%c2_545, %c33_546] : memref<4x36xf32, #tpu.memory_space<smem>>
    %1147 = vector.broadcast %1146 : f32 to vector<1x512xf32>
    %1148 = arith.mulf %1147, %714 : vector<1x512xf32>
    %1149 = arith.addf %1145, %1148 : vector<1x512xf32>
    %c2_547 = arith.constant 2 : index
    %c34_548 = arith.constant 34 : index
    %1150 = memref.load %arg10[%c2_547, %c34_548] : memref<4x36xf32, #tpu.memory_space<smem>>
    %1151 = vector.broadcast %1150 : f32 to vector<1x512xf32>
    %1152 = arith.mulf %1151, %716 : vector<1x512xf32>
    %1153 = arith.addf %1149, %1152 : vector<1x512xf32>
    %c2_549 = arith.constant 2 : index
    %c35_550 = arith.constant 35 : index
    %1154 = memref.load %arg10[%c2_549, %c35_550] : memref<4x36xf32, #tpu.memory_space<smem>>
    %1155 = vector.broadcast %1154 : f32 to vector<1x512xf32>
    %1156 = arith.mulf %1155, %718 : vector<1x512xf32>
    %1157 = arith.addf %1153, %1156 : vector<1x512xf32>
    %c2_551 = arith.constant 2 : index
    %1158 = memref.load %arg11[%c2_551] : memref<4xf32, #tpu.memory_space<smem>>
    %1159 = vector.broadcast %1158 : f32 to vector<1x512xf32>
    %1160 = arith.addf %1157, %1159 : vector<1x512xf32>
    %cst_552 = arith.constant 0.000000e+00 : f32
    %1161 = vector.broadcast %cst_552 : f32 to vector<1x512xf32>
    %1162 = arith.maximumf %1160, %1161 : vector<1x512xf32>
    %c3_553 = arith.constant 3 : index
    %c0_554 = arith.constant 0 : index
    %1163 = memref.load %arg10[%c3_553, %c0_554] : memref<4x36xf32, #tpu.memory_space<smem>>
    %1164 = vector.broadcast %1163 : f32 to vector<1x512xf32>
    %1165 = arith.mulf %1164, %656 : vector<1x512xf32>
    %c3_555 = arith.constant 3 : index
    %c1_556 = arith.constant 1 : index
    %1166 = memref.load %arg10[%c3_555, %c1_556] : memref<4x36xf32, #tpu.memory_space<smem>>
    %1167 = vector.broadcast %1166 : f32 to vector<1x512xf32>
    %1168 = arith.mulf %1167, %658 : vector<1x512xf32>
    %1169 = arith.addf %1165, %1168 : vector<1x512xf32>
    %c3_557 = arith.constant 3 : index
    %c2_558 = arith.constant 2 : index
    %1170 = memref.load %arg10[%c3_557, %c2_558] : memref<4x36xf32, #tpu.memory_space<smem>>
    %1171 = vector.broadcast %1170 : f32 to vector<1x512xf32>
    %1172 = arith.mulf %1171, %660 : vector<1x512xf32>
    %1173 = arith.addf %1169, %1172 : vector<1x512xf32>
    %c3_559 = arith.constant 3 : index
    %c3_560 = arith.constant 3 : index
    %1174 = memref.load %arg10[%c3_559, %c3_560] : memref<4x36xf32, #tpu.memory_space<smem>>
    %1175 = vector.broadcast %1174 : f32 to vector<1x512xf32>
    %1176 = arith.mulf %1175, %662 : vector<1x512xf32>
    %1177 = arith.addf %1173, %1176 : vector<1x512xf32>
    %c3_561 = arith.constant 3 : index
    %c4_562 = arith.constant 4 : index
    %1178 = memref.load %arg10[%c3_561, %c4_562] : memref<4x36xf32, #tpu.memory_space<smem>>
    %1179 = vector.broadcast %1178 : f32 to vector<1x512xf32>
    %1180 = arith.mulf %1179, %426 : vector<1x512xf32>
    %1181 = arith.addf %1177, %1180 : vector<1x512xf32>
    %c3_563 = arith.constant 3 : index
    %c5_564 = arith.constant 5 : index
    %1182 = memref.load %arg10[%c3_563, %c5_564] : memref<4x36xf32, #tpu.memory_space<smem>>
    %1183 = vector.broadcast %1182 : f32 to vector<1x512xf32>
    %1184 = arith.mulf %1183, %664 : vector<1x512xf32>
    %1185 = arith.addf %1181, %1184 : vector<1x512xf32>
    %c3_565 = arith.constant 3 : index
    %c6_566 = arith.constant 6 : index
    %1186 = memref.load %arg10[%c3_565, %c6_566] : memref<4x36xf32, #tpu.memory_space<smem>>
    %1187 = vector.broadcast %1186 : f32 to vector<1x512xf32>
    %1188 = arith.mulf %1187, %666 : vector<1x512xf32>
    %1189 = arith.addf %1185, %1188 : vector<1x512xf32>
    %c3_567 = arith.constant 3 : index
    %c7_568 = arith.constant 7 : index
    %1190 = memref.load %arg10[%c3_567, %c7_568] : memref<4x36xf32, #tpu.memory_space<smem>>
    %1191 = vector.broadcast %1190 : f32 to vector<1x512xf32>
    %1192 = arith.mulf %1191, %668 : vector<1x512xf32>
    %1193 = arith.addf %1189, %1192 : vector<1x512xf32>
    %c3_569 = arith.constant 3 : index
    %c8_570 = arith.constant 8 : index
    %1194 = memref.load %arg10[%c3_569, %c8_570] : memref<4x36xf32, #tpu.memory_space<smem>>
    %1195 = vector.broadcast %1194 : f32 to vector<1x512xf32>
    %1196 = arith.mulf %1195, %670 : vector<1x512xf32>
    %1197 = arith.addf %1193, %1196 : vector<1x512xf32>
    %c3_571 = arith.constant 3 : index
    %c9_572 = arith.constant 9 : index
    %1198 = memref.load %arg10[%c3_571, %c9_572] : memref<4x36xf32, #tpu.memory_space<smem>>
    %1199 = vector.broadcast %1198 : f32 to vector<1x512xf32>
    %1200 = arith.mulf %1199, %672 : vector<1x512xf32>
    %1201 = arith.addf %1197, %1200 : vector<1x512xf32>
    %c3_573 = arith.constant 3 : index
    %c10_574 = arith.constant 10 : index
    %1202 = memref.load %arg10[%c3_573, %c10_574] : memref<4x36xf32, #tpu.memory_space<smem>>
    %1203 = vector.broadcast %1202 : f32 to vector<1x512xf32>
    %1204 = arith.mulf %1203, %674 : vector<1x512xf32>
    %1205 = arith.addf %1201, %1204 : vector<1x512xf32>
    %c3_575 = arith.constant 3 : index
    %c11_576 = arith.constant 11 : index
    %1206 = memref.load %arg10[%c3_575, %c11_576] : memref<4x36xf32, #tpu.memory_space<smem>>
    %1207 = vector.broadcast %1206 : f32 to vector<1x512xf32>
    %1208 = arith.mulf %1207, %676 : vector<1x512xf32>
    %1209 = arith.addf %1205, %1208 : vector<1x512xf32>
    %c3_577 = arith.constant 3 : index
    %c12_578 = arith.constant 12 : index
    %1210 = memref.load %arg10[%c3_577, %c12_578] : memref<4x36xf32, #tpu.memory_space<smem>>
    %1211 = vector.broadcast %1210 : f32 to vector<1x512xf32>
    %1212 = arith.mulf %1211, %678 : vector<1x512xf32>
    %1213 = arith.addf %1209, %1212 : vector<1x512xf32>
    %c3_579 = arith.constant 3 : index
    %c13_580 = arith.constant 13 : index
    %1214 = memref.load %arg10[%c3_579, %c13_580] : memref<4x36xf32, #tpu.memory_space<smem>>
    %1215 = vector.broadcast %1214 : f32 to vector<1x512xf32>
    %1216 = arith.mulf %1215, %502 : vector<1x512xf32>
    %1217 = arith.addf %1213, %1216 : vector<1x512xf32>
    %c3_581 = arith.constant 3 : index
    %c14_582 = arith.constant 14 : index
    %1218 = memref.load %arg10[%c3_581, %c14_582] : memref<4x36xf32, #tpu.memory_space<smem>>
    %1219 = vector.broadcast %1218 : f32 to vector<1x512xf32>
    %1220 = arith.mulf %1219, %680 : vector<1x512xf32>
    %1221 = arith.addf %1217, %1220 : vector<1x512xf32>
    %c3_583 = arith.constant 3 : index
    %c15_584 = arith.constant 15 : index
    %1222 = memref.load %arg10[%c3_583, %c15_584] : memref<4x36xf32, #tpu.memory_space<smem>>
    %1223 = vector.broadcast %1222 : f32 to vector<1x512xf32>
    %1224 = arith.mulf %1223, %682 : vector<1x512xf32>
    %1225 = arith.addf %1221, %1224 : vector<1x512xf32>
    %c3_585 = arith.constant 3 : index
    %c16_586 = arith.constant 16 : index
    %1226 = memref.load %arg10[%c3_585, %c16_586] : memref<4x36xf32, #tpu.memory_space<smem>>
    %1227 = vector.broadcast %1226 : f32 to vector<1x512xf32>
    %1228 = arith.mulf %1227, %684 : vector<1x512xf32>
    %1229 = arith.addf %1225, %1228 : vector<1x512xf32>
    %c3_587 = arith.constant 3 : index
    %c17_588 = arith.constant 17 : index
    %1230 = memref.load %arg10[%c3_587, %c17_588] : memref<4x36xf32, #tpu.memory_space<smem>>
    %1231 = vector.broadcast %1230 : f32 to vector<1x512xf32>
    %1232 = arith.mulf %1231, %686 : vector<1x512xf32>
    %1233 = arith.addf %1229, %1232 : vector<1x512xf32>
    %c3_589 = arith.constant 3 : index
    %c18_590 = arith.constant 18 : index
    %1234 = memref.load %arg10[%c3_589, %c18_590] : memref<4x36xf32, #tpu.memory_space<smem>>
    %1235 = vector.broadcast %1234 : f32 to vector<1x512xf32>
    %1236 = arith.mulf %1235, %688 : vector<1x512xf32>
    %1237 = arith.addf %1233, %1236 : vector<1x512xf32>
    %c3_591 = arith.constant 3 : index
    %c19_592 = arith.constant 19 : index
    %1238 = memref.load %arg10[%c3_591, %c19_592] : memref<4x36xf32, #tpu.memory_space<smem>>
    %1239 = vector.broadcast %1238 : f32 to vector<1x512xf32>
    %1240 = arith.mulf %1239, %690 : vector<1x512xf32>
    %1241 = arith.addf %1237, %1240 : vector<1x512xf32>
    %c3_593 = arith.constant 3 : index
    %c20_594 = arith.constant 20 : index
    %1242 = memref.load %arg10[%c3_593, %c20_594] : memref<4x36xf32, #tpu.memory_space<smem>>
    %1243 = vector.broadcast %1242 : f32 to vector<1x512xf32>
    %1244 = arith.mulf %1243, %692 : vector<1x512xf32>
    %1245 = arith.addf %1241, %1244 : vector<1x512xf32>
    %c3_595 = arith.constant 3 : index
    %c21_596 = arith.constant 21 : index
    %1246 = memref.load %arg10[%c3_595, %c21_596] : memref<4x36xf32, #tpu.memory_space<smem>>
    %1247 = vector.broadcast %1246 : f32 to vector<1x512xf32>
    %1248 = arith.mulf %1247, %694 : vector<1x512xf32>
    %1249 = arith.addf %1245, %1248 : vector<1x512xf32>
    %c3_597 = arith.constant 3 : index
    %c22_598 = arith.constant 22 : index
    %1250 = memref.load %arg10[%c3_597, %c22_598] : memref<4x36xf32, #tpu.memory_space<smem>>
    %1251 = vector.broadcast %1250 : f32 to vector<1x512xf32>
    %1252 = arith.mulf %1251, %578 : vector<1x512xf32>
    %1253 = arith.addf %1249, %1252 : vector<1x512xf32>
    %c3_599 = arith.constant 3 : index
    %c23_600 = arith.constant 23 : index
    %1254 = memref.load %arg10[%c3_599, %c23_600] : memref<4x36xf32, #tpu.memory_space<smem>>
    %1255 = vector.broadcast %1254 : f32 to vector<1x512xf32>
    %1256 = arith.mulf %1255, %696 : vector<1x512xf32>
    %1257 = arith.addf %1253, %1256 : vector<1x512xf32>
    %c3_601 = arith.constant 3 : index
    %c24_602 = arith.constant 24 : index
    %1258 = memref.load %arg10[%c3_601, %c24_602] : memref<4x36xf32, #tpu.memory_space<smem>>
    %1259 = vector.broadcast %1258 : f32 to vector<1x512xf32>
    %1260 = arith.mulf %1259, %698 : vector<1x512xf32>
    %1261 = arith.addf %1257, %1260 : vector<1x512xf32>
    %c3_603 = arith.constant 3 : index
    %c25_604 = arith.constant 25 : index
    %1262 = memref.load %arg10[%c3_603, %c25_604] : memref<4x36xf32, #tpu.memory_space<smem>>
    %1263 = vector.broadcast %1262 : f32 to vector<1x512xf32>
    %1264 = arith.mulf %1263, %700 : vector<1x512xf32>
    %1265 = arith.addf %1261, %1264 : vector<1x512xf32>
    %c3_605 = arith.constant 3 : index
    %c26_606 = arith.constant 26 : index
    %1266 = memref.load %arg10[%c3_605, %c26_606] : memref<4x36xf32, #tpu.memory_space<smem>>
    %1267 = vector.broadcast %1266 : f32 to vector<1x512xf32>
    %1268 = arith.mulf %1267, %702 : vector<1x512xf32>
    %1269 = arith.addf %1265, %1268 : vector<1x512xf32>
    %c3_607 = arith.constant 3 : index
    %c27_608 = arith.constant 27 : index
    %1270 = memref.load %arg10[%c3_607, %c27_608] : memref<4x36xf32, #tpu.memory_space<smem>>
    %1271 = vector.broadcast %1270 : f32 to vector<1x512xf32>
    %1272 = arith.mulf %1271, %704 : vector<1x512xf32>
    %1273 = arith.addf %1269, %1272 : vector<1x512xf32>
    %c3_609 = arith.constant 3 : index
    %c28_610 = arith.constant 28 : index
    %1274 = memref.load %arg10[%c3_609, %c28_610] : memref<4x36xf32, #tpu.memory_space<smem>>
    %1275 = vector.broadcast %1274 : f32 to vector<1x512xf32>
    %1276 = arith.mulf %1275, %706 : vector<1x512xf32>
    %1277 = arith.addf %1273, %1276 : vector<1x512xf32>
    %c3_611 = arith.constant 3 : index
    %c29_612 = arith.constant 29 : index
    %1278 = memref.load %arg10[%c3_611, %c29_612] : memref<4x36xf32, #tpu.memory_space<smem>>
    %1279 = vector.broadcast %1278 : f32 to vector<1x512xf32>
    %1280 = arith.mulf %1279, %708 : vector<1x512xf32>
    %1281 = arith.addf %1277, %1280 : vector<1x512xf32>
    %c3_613 = arith.constant 3 : index
    %c30_614 = arith.constant 30 : index
    %1282 = memref.load %arg10[%c3_613, %c30_614] : memref<4x36xf32, #tpu.memory_space<smem>>
    %1283 = vector.broadcast %1282 : f32 to vector<1x512xf32>
    %1284 = arith.mulf %1283, %710 : vector<1x512xf32>
    %1285 = arith.addf %1281, %1284 : vector<1x512xf32>
    %c3_615 = arith.constant 3 : index
    %c31_616 = arith.constant 31 : index
    %1286 = memref.load %arg10[%c3_615, %c31_616] : memref<4x36xf32, #tpu.memory_space<smem>>
    %1287 = vector.broadcast %1286 : f32 to vector<1x512xf32>
    %1288 = arith.mulf %1287, %654 : vector<1x512xf32>
    %1289 = arith.addf %1285, %1288 : vector<1x512xf32>
    %c3_617 = arith.constant 3 : index
    %c32_618 = arith.constant 32 : index
    %1290 = memref.load %arg10[%c3_617, %c32_618] : memref<4x36xf32, #tpu.memory_space<smem>>
    %1291 = vector.broadcast %1290 : f32 to vector<1x512xf32>
    %1292 = arith.mulf %1291, %712 : vector<1x512xf32>
    %1293 = arith.addf %1289, %1292 : vector<1x512xf32>
    %c3_619 = arith.constant 3 : index
    %c33_620 = arith.constant 33 : index
    %1294 = memref.load %arg10[%c3_619, %c33_620] : memref<4x36xf32, #tpu.memory_space<smem>>
    %1295 = vector.broadcast %1294 : f32 to vector<1x512xf32>
    %1296 = arith.mulf %1295, %714 : vector<1x512xf32>
    %1297 = arith.addf %1293, %1296 : vector<1x512xf32>
    %c3_621 = arith.constant 3 : index
    %c34_622 = arith.constant 34 : index
    %1298 = memref.load %arg10[%c3_621, %c34_622] : memref<4x36xf32, #tpu.memory_space<smem>>
    %1299 = vector.broadcast %1298 : f32 to vector<1x512xf32>
    %1300 = arith.mulf %1299, %716 : vector<1x512xf32>
    %1301 = arith.addf %1297, %1300 : vector<1x512xf32>
    %c3_623 = arith.constant 3 : index
    %c35_624 = arith.constant 35 : index
    %1302 = memref.load %arg10[%c3_623, %c35_624] : memref<4x36xf32, #tpu.memory_space<smem>>
    %1303 = vector.broadcast %1302 : f32 to vector<1x512xf32>
    %1304 = arith.mulf %1303, %718 : vector<1x512xf32>
    %1305 = arith.addf %1301, %1304 : vector<1x512xf32>
    %c3_625 = arith.constant 3 : index
    %1306 = memref.load %arg11[%c3_625] : memref<4xf32, #tpu.memory_space<smem>>
    %1307 = vector.broadcast %1306 : f32 to vector<1x512xf32>
    %1308 = arith.addf %1305, %1307 : vector<1x512xf32>
    %cst_626 = arith.constant 0.000000e+00 : f32
    %1309 = vector.broadcast %cst_626 : f32 to vector<1x512xf32>
    %1310 = arith.maximumf %1308, %1309 : vector<1x512xf32>
    %c510_i32_627 = arith.constant 510 : i32
    %1311 = tpu.dynamic_rotate %866 by %c510_i32_627 dim 1 : vector<1x512xf32>, i32 -> vector<1x512xf32>
    %1312 = arith.addf %866, %1311 : vector<1x512xf32>
    %c480_i32_628 = arith.constant 480 : i32
    %1313 = tpu.dynamic_rotate %866 by %c480_i32_628 dim 1 : vector<1x512xf32>, i32 -> vector<1x512xf32>
    %1314 = arith.addf %1312, %1313 : vector<1x512xf32>
    %c478_i32_629 = arith.constant 478 : i32
    %1315 = tpu.dynamic_rotate %866 by %c478_i32_629 dim 1 : vector<1x512xf32>, i32 -> vector<1x512xf32>
    %1316 = arith.addf %1314, %1315 : vector<1x512xf32>
    %cst_630 = arith.constant 2.500000e-01 : f32
    %1317 = vector.broadcast %cst_630 : f32 to vector<1x512xf32>
    %1318 = arith.mulf %1317, %1316 : vector<1x512xf32>
    %c510_i32_631 = arith.constant 510 : i32
    %1319 = tpu.dynamic_rotate %1014 by %c510_i32_631 dim 1 : vector<1x512xf32>, i32 -> vector<1x512xf32>
    %1320 = arith.addf %1014, %1319 : vector<1x512xf32>
    %c480_i32_632 = arith.constant 480 : i32
    %1321 = tpu.dynamic_rotate %1014 by %c480_i32_632 dim 1 : vector<1x512xf32>, i32 -> vector<1x512xf32>
    %1322 = arith.addf %1320, %1321 : vector<1x512xf32>
    %c478_i32_633 = arith.constant 478 : i32
    %1323 = tpu.dynamic_rotate %1014 by %c478_i32_633 dim 1 : vector<1x512xf32>, i32 -> vector<1x512xf32>
    %1324 = arith.addf %1322, %1323 : vector<1x512xf32>
    %cst_634 = arith.constant 2.500000e-01 : f32
    %1325 = vector.broadcast %cst_634 : f32 to vector<1x512xf32>
    %1326 = arith.mulf %1325, %1324 : vector<1x512xf32>
    %c510_i32_635 = arith.constant 510 : i32
    %1327 = tpu.dynamic_rotate %1162 by %c510_i32_635 dim 1 : vector<1x512xf32>, i32 -> vector<1x512xf32>
    %1328 = arith.addf %1162, %1327 : vector<1x512xf32>
    %c480_i32_636 = arith.constant 480 : i32
    %1329 = tpu.dynamic_rotate %1162 by %c480_i32_636 dim 1 : vector<1x512xf32>, i32 -> vector<1x512xf32>
    %1330 = arith.addf %1328, %1329 : vector<1x512xf32>
    %c478_i32_637 = arith.constant 478 : i32
    %1331 = tpu.dynamic_rotate %1162 by %c478_i32_637 dim 1 : vector<1x512xf32>, i32 -> vector<1x512xf32>
    %1332 = arith.addf %1330, %1331 : vector<1x512xf32>
    %cst_638 = arith.constant 2.500000e-01 : f32
    %1333 = vector.broadcast %cst_638 : f32 to vector<1x512xf32>
    %1334 = arith.mulf %1333, %1332 : vector<1x512xf32>
    %c510_i32_639 = arith.constant 510 : i32
    %1335 = tpu.dynamic_rotate %1310 by %c510_i32_639 dim 1 : vector<1x512xf32>, i32 -> vector<1x512xf32>
    %1336 = arith.addf %1310, %1335 : vector<1x512xf32>
    %c480_i32_640 = arith.constant 480 : i32
    %1337 = tpu.dynamic_rotate %1310 by %c480_i32_640 dim 1 : vector<1x512xf32>, i32 -> vector<1x512xf32>
    %1338 = arith.addf %1336, %1337 : vector<1x512xf32>
    %c478_i32_641 = arith.constant 478 : i32
    %1339 = tpu.dynamic_rotate %1310 by %c478_i32_641 dim 1 : vector<1x512xf32>, i32 -> vector<1x512xf32>
    %1340 = arith.addf %1338, %1339 : vector<1x512xf32>
    %cst_642 = arith.constant 2.500000e-01 : f32
    %1341 = vector.broadcast %cst_642 : f32 to vector<1x512xf32>
    %1342 = arith.mulf %1341, %1340 : vector<1x512xf32>
    %1343 = vector.extract_strided_slice %1318 {offsets = [0, 0], sizes = [1, 256], strides = [1, 1]} : vector<1x512xf32> to vector<1x256xf32>
    %1344 = vector.extract_strided_slice %1326 {offsets = [0, 0], sizes = [1, 256], strides = [1, 1]} : vector<1x512xf32> to vector<1x256xf32>
    %1345 = vector.extract_strided_slice %1334 {offsets = [0, 0], sizes = [1, 256], strides = [1, 1]} : vector<1x512xf32> to vector<1x256xf32>
    %1346 = vector.extract_strided_slice %1342 {offsets = [0, 0], sizes = [1, 256], strides = [1, 1]} : vector<1x512xf32> to vector<1x256xf32>
    %1347 = tpu.concatenate %1343, %1344, %1345, %1346 in 1 : vector<1x256xf32>, vector<1x256xf32>, vector<1x256xf32>, vector<1x256xf32> -> vector<1x1024xf32>
    %1348 = vector.extract_strided_slice %1318 {offsets = [0, 256], sizes = [1, 256], strides = [1, 1]} : vector<1x512xf32> to vector<1x256xf32>
    %1349 = vector.extract_strided_slice %1326 {offsets = [0, 256], sizes = [1, 256], strides = [1, 1]} : vector<1x512xf32> to vector<1x256xf32>
    %1350 = vector.extract_strided_slice %1334 {offsets = [0, 256], sizes = [1, 256], strides = [1, 1]} : vector<1x512xf32> to vector<1x256xf32>
    %1351 = vector.extract_strided_slice %1342 {offsets = [0, 256], sizes = [1, 256], strides = [1, 1]} : vector<1x512xf32> to vector<1x256xf32>
    %1352 = tpu.concatenate %1348, %1349, %1350, %1351 in 1 : vector<1x256xf32>, vector<1x256xf32>, vector<1x256xf32>, vector<1x256xf32> -> vector<1x1024xf32>
    %1353 = tpu.concatenate %1347, %1352 in 0 : vector<1x1024xf32>, vector<1x1024xf32> -> vector<2x1024xf32>
    %c0_643 = arith.constant 0 : index
    %c0_644 = arith.constant 0 : index
    %1354 = vector.load %arg12[%c0_643, %c0_644] : memref<1024x32xf32, #tpu.memory_space<vmem>>, vector<1024x32xf32>
    %cst_645 = arith.constant dense<0.000000e+00> : vector<2x32xf32>
    %1355 = tpu.matmul %1353, %1354, %cst_645 {dimension_numbers = #tpu.dot_dimension_numbers<[1], [0], [0], [1], [0, 0, 1, 1], [], []>} : vector<2x1024xf32>, vector<1024x32xf32>, vector<2x32xf32> -> vector<2x32xf32>
    %c0_646 = arith.constant 0 : index
    %c0_647 = arith.constant 0 : index
    %1356 = vector.load %arg13[%c0_646, %c0_647] : memref<1x32xf32, #tpu.memory_space<vmem>>, vector<1x32xf32>
    %1357 = vector.broadcast %1356 : vector<1x32xf32> to vector<2x32xf32>
    %1358 = arith.addf %1355, %1357 : vector<2x32xf32>
    %1359 = math.tanh %1358 : vector<2x32xf32>
    %c0_648 = arith.constant 0 : index
    %c0_649 = arith.constant 0 : index
    %1360 = vector.load %arg14[%c0_648, %c0_649] : memref<32x8xf32, #tpu.memory_space<vmem>>, vector<32x8xf32>
    %cst_650 = arith.constant dense<0.000000e+00> : vector<2x8xf32>
    %1361 = tpu.matmul %1359, %1360, %cst_650 {dimension_numbers = #tpu.dot_dimension_numbers<[1], [0], [0], [1], [0, 0, 1, 1], [], []>} : vector<2x32xf32>, vector<32x8xf32>, vector<2x8xf32> -> vector<2x8xf32>
    %c0_651 = arith.constant 0 : index
    %c0_652 = arith.constant 0 : index
    %1362 = vector.load %arg15[%c0_651, %c0_652] : memref<2x8xf32, #tpu.memory_space<vmem>>, vector<2x8xf32>
    tpu.vector_store %arg15[%c0_651, %c0_652], %1361 {strides = array<i32>} : memref<2x8xf32, #tpu.memory_space<vmem>>, vector<2x8xf32>,
    return
  }
}

</mosaic_0001>

<bundles_post_ra>
// kernel: squeeze.1
= control target key start
LH: loop header
LB: loop body
LE: loop exit
PB: predicated region body
PF: predicated region fallthrough
CT: control target
= control target key end

     0   :  { %s89_s8 = smov 112   ;;  %s90_s11 = smov 80   ;;  %vm3_vm0 = vcmask 130048   ;;  %vm9_vm1 = vcmask 1048448   ;;  %vm15_vm2 = vcmask 917248   ;;  %vm21_vm3 = vcmask 786048   ;;  %s142_s0 = inlined_call_operand.vmem [shape: f32[2,1,16,16], index: 0, kind: input, shape index: {}]   ;;  %s143_s1 = inlined_call_operand.vmem [shape: f32[1,512], index: 1, kind: output, shape index: {}]  }
   0x1   :  { %v72_v0 = vld [vmem:[%s142_s0 + $0x7] ss:$8 sm:$0xf]   ;;  %v74_v1 = vld [vmem:[%s142_s0 + $0x5] ss:$8 sm:$0xf]  }
   0x2   :  { %7 = vrot.lane.b32.xlu0 %v72_v0, %s89_s8  ;;  %19 = vrot.lane.b32.xlu1 %v74_v1, %s90_s11  ;;  %v73_v2 = vld [vmem:[%s142_s0 + $0x6] ss:$8 sm:$0xf]   ;;  %v75_v3 = vld [vmem:[%s142_s0 + $0x4] ss:$8 sm:$0xf]  }
   0x3   :  { %s91_s16 = smov 96   ;;  %v2_v4 = vld [vmem:[%s142_s0] ss:$8 sm:$0xf]   ;;  %s92_s19 = smov 64   ;;  %vm27_vm4 = vcmask 654848  }
   0x4   :  { %v76_v5 = vld [vmem:[%s142_s0 + $0x3] ss:$8 sm:$0xf]   ;;  %4 = vst.msk [vmem:[#allocation0] ss:$8 sm:$0xf] %vm3_vm0, %v2_v4  }
   0x5   :  { %v77_v6 = vld [vmem:[%s142_s0 + $0x2] ss:$8 sm:$0xf]   ;;  %s93_s24 = smov 48   ;;  %s94_s25 = smov 32   ;;  %vm33_vm5 = vcmask 523648  }
   0x6   :  { %13 = vrot.lane.b32.xlu0 %v73_v2, %s91_s16  ;;  %25 = vrot.lane.b32.xlu1 %v75_v3, %s92_s19  ;;  %v78_v7 = vld [vmem:[%s142_s0 + $0x1] ss:$8 sm:$0xf]   ;;  %s95_s0 = smov 16   ;;  %vm39_vm6 = vcmask 392448   ;;  %vm45_vm7 = vcmask 261248  }
   0xa   :  { %31 = vrot.lane.b32.xlu0 %v76_v5, %s93_s24  ;;  %37 = vrot.lane.b32.xlu1 %v77_v6, %s94_s25 }
   0xe   :  { %43 = vrot.lane.b32.xlu0 %v78_v7, %s95_s0 }
  0x74   :  { %v8_v8 = vpop.permute.xlu0 %7   ;;  %v20_v9 = vpop.permute.xlu1 %19  }
  0x75   :  { %10 = vst.msk [vmem:[#allocation0] ss:$8 sm:$0xf] %vm9_vm1, %v8_v8  }
  0x78   :  { %v14_v10 = vpop.permute.xlu0 %13   ;;  %v26_v11 = vpop.permute.xlu1 %25  }
  0x79   :  { %16 = vst.msk [vmem:[#allocation0] ss:$8 sm:$0xf] %vm15_vm2, %v14_v10  }
  0x7a   :  { %22 = vst.msk [vmem:[#allocation0] ss:$8 sm:$0xf] %vm21_vm3, %v20_v9  }
  0x7b   :  { %28 = vst.msk [vmem:[#allocation0] ss:$8 sm:$0xf] %vm27_vm4, %v26_v11  }
  0x7c   :  { %v32_v12 = vpop.permute.xlu0 %31   ;;  %v38_v13 = vpop.permute.xlu1 %37  }
  0x7d   :  { %34 = vst.msk [vmem:[#allocation0] ss:$8 sm:$0xf] %vm33_vm5, %v32_v12  }
  0x7e   :  { %40 = vst.msk [vmem:[#allocation0] ss:$8 sm:$0xf] %vm39_vm6, %v38_v13  }
  0x80   :  { %v44_v14 = vpop.permute.xlu0 %43  }
  0x81   :  { %46 = vst.msk [vmem:[#allocation0] ss:$8 sm:$0xf] %vm45_vm7, %v44_v14  }
  0x88   :  { %v50_v15 = vld [vmem:[#allocation0] sm:$0x1]  ;;  %v54_v16 = vld [vmem:[#allocation0 + $0x8] sm:$0x1]  ;;  %v59_v17 = vld [vmem:[#allocation0 + $0x10] sm:$0x1] }
  0x89   :  { %52 = vst [vmem:[%s143_s1] sm:$0x1] %v50_v15  ;;  %79 = vst [vmem:[%s143_s1 + $0x1] sm:$0x1] %v54_v16  ;;  %v65_v18 = vld [vmem:[#allocation0 + $0x18] sm:$0x1] }
  0x8a   :  { %80 = vst [vmem:[%s143_s1 + $0x2] sm:$0x1] %v59_v17  ;;  %81 = vst [vmem:[%s143_s1 + $0x3] sm:$0x1] %v65_v18 }

// kernel: forward.1
= control target key start
LH: loop header
LB: loop body
LE: loop exit
PB: predicated region body
PF: predicated region fallthrough
CT: control target
= control target key end

     0   :  { %s12766_s0 = inlined_call_operand.vmem [shape: f32[1,512], index: 0, kind: input, shape index: {}]   ;;  %s12767_s1 = inlined_call_operand.hbm [shape: f32[2], index: 1, kind: input, shape index: {}]   ;;  %s12768_s2 = inlined_call_operand.vmem [shape: f32[8,512], index: 2, kind: input, shape index: {}]   ;;  %s12769_s3 = inlined_call_operand.vmem [shape: f32[2,9], index: 3, kind: input, shape index: {}]   ;;  %s12770_s4 = inlined_call_operand.vmem [shape: f32[2], index: 4, kind: input, shape index: {}]   ;;  %s12771_s5 = inlined_call_operand.vmem [shape: f32[2,18], index: 5, kind: input, shape index: {}]   ;;  %s12772_s6 = inlined_call_operand.vmem [shape: f32[2], index: 6, kind: input, shape index: {}]   ;;  %s12773_s7 = inlined_call_operand.vmem [shape: f32[8,512], index: 7, kind: input, shape index: {}]   ;;  %s12774_s8 = inlined_call_operand.vmem [shape: f32[4,18], index: 8, kind: input, shape index: {}]   ;;  %s12775_s9 = inlined_call_operand.vmem [shape: f32[4], index: 9, kind: input, shape index: {}]   ;;  %s12776_s10 = inlined_call_operand.vmem [shape: f32[4,36], index: 10, kind: input, shape index: {}]   ;;  %s12777_s11 = inlined_call_operand.vmem [shape: f32[4], index: 11, kind: input, shape index: {}]   ;;  %s12778_s12 = inlined_call_operand.hbm [shape: f32[1024,32], index: 12, kind: input, shape index: {}]   ;;  %s12779_s13 = inlined_call_operand.vmem [shape: f32[1,32], index: 13, kind: input, shape index: {}]   ;;  %s12780_s14 = inlined_call_operand.vmem [shape: f32[32,8], index: 14, kind: input, shape index: {}]   ;;  %s12781_s15 = inlined_call_operand.hbm [shape: f32[2,8], index: 15, kind: output, shape index: {}]  }
   0x1   :  { %13110 = sst [smem:[#allocation149_spill]] %s12779_s13 }
   0x2   :  { %13111 = sst [smem:[#allocation150_spill]] %s12780_s14 }
   0x3   :  { %13112 = sst [smem:[#allocation151_spill]] %s12781_s15 }
   0x4   :  { %20 = vsyncpa [#allocation5], 0 }
   0x5   :  { %21 = vsyncpa [#allocation6], 0 }
   0x6   :  { %22 = vsyncpa [#allocation9], 0 }
   0x7   :  { %23 = vsyncpa [#allocation12], 0 }
   0x8   :  { %24 = vsyncpa [#allocation15], 0 }
   0x9   :  { %25 = vsyncpa [#allocation18], 0 }
   0xa   :  { %26 = vsyncpa [#allocation3], 0  ;;  %s56_s20 = sshll.u32 %s12770_s4, 4  ;;  %s57_s20 = int_to_ptr.vmem [resolvable:$true] %s56_s20 }
   0xb   :  { %27 = vsyncpa [#allocation4], 0  ;;  %s76_s23 = sshll.u32 %s12772_s6, 4  ;;  %s6018_s24 = scalar_lea.vmem %s57_s20, 16  ;;  %s77_s23 = int_to_ptr.vmem [resolvable:$true] %s76_s23 }
   0xc   :  { %p6019_p0 = scmp.ne.s32.totalorder %s57_s20, %s6018_s24  ;;  %p6023_p1 = scmp.lt.s32.totalorder %s57_s20, %s57_s20 }
   0xd   :  { %p6024_p2 = scmp.lt.s32.totalorder %s6018_s24, %s6018_s24 }
   0xf   :  { %p6025_p3 = por %p6024_p2, %p6023_p1 }
  0x11   :  { %p6026_p4 = pnand %p6025_p3, %p6019_p0 }
  0x13   :  { %6029 = shalt.err (!%p6026_p4)
}
  0x14   :  { %s6184_s25 = smov [#allocation8]   ;;  %s6030_s26 = scalar_lea.vmem %s77_s23, 16 }
  0x15   :  { %59 = dma.vmem_to_smem %s57_s20, 16, %s6184_s25, [#allocation9]  }
  0x16   :  { %p6031_p5 = scmp.ne.s32.totalorder %s77_s23, %s6030_s26  ;;  %p6035_p6 = scmp.lt.s32.totalorder %s77_s23, %s77_s23 }
  0x17   :  { %p6036_p7 = scmp.lt.s32.totalorder %s6030_s26, %s6030_s26 }
  0x19   :  { %p6037_p8 = por %p6036_p7, %p6035_p6 }
  0x1b   :  { %p6038_p9 = pnand %p6037_p8, %p6031_p5 }
  0x1d   :  { %6041 = shalt.err (!%p6038_p9)
}
  0x1e   :  { %s6185_s4 = smov [#allocation11]   ;;  %s98_s28 = sshll.u32 %s12775_s9, 4  ;;  %s99_s28 = int_to_ptr.vmem [resolvable:$true] %s98_s28 }
  0x1f   :  { %79 = dma.vmem_to_smem %s77_s23, 16, %s6185_s4, [#allocation12]  }
  0x20   :  { %s6042_s29 = scalar_lea.vmem %s99_s28, 16  ;;  %p6047_p11 = scmp.lt.s32.totalorder %s99_s28, %s99_s28 }
  0x21   :  { %p6043_p10 = scmp.ne.s32.totalorder %s99_s28, %s6042_s29  ;;  %p6048_p12 = scmp.lt.s32.totalorder %s6042_s29, %s6042_s29 }
  0x23   :  { %p6049_p13 = por %p6048_p12, %p6047_p11 }
  0x25   :  { %p6050_p0 = pnand %p6049_p13, %p6043_p10 }
  0x27   :  { %6053 = shalt.err (!%p6050_p0)
}
  0x28   :  { %s6186_s30 = smov [#allocation14]   ;;  %s6054_s18 = scalar_lea.hbm %s12767_s1, 16 }
  0x29   :  { %101 = dma.vmem_to_smem %s99_s28, 16, %s6186_s30, [#allocation15]  }
  0x2a   :  { %p6055_p1 = scmp.ne.s32.totalorder %s12767_s1, %s6054_s18  ;;  %p6058_p2 = scmp.lt.u32.totalorder %s6054_s18, %s12767_s1 }
  0x2c   :  { %p6060_p3 = pnand %p6058_p2, %p6055_p1 }
  0x2e   :  { %6063 = shalt.err (!%p6060_p3)
}
  0x2f   :  { %s6187_s22 = smov [#allocation2]   ;;  %s46_s4 = sshll.u32 %s12769_s3, 4  ;;  %s47_s4 = int_to_ptr.vmem [resolvable:$true] %s46_s4 }
  0x30   :  { %37 = dma.hbm_to_smem %s12767_s1, 16, %s6187_s22, [#allocation5]  }
  0x31   :  { %s66_s28 = sshll.u32 %s12771_s5, 4  ;;  %s6064_s29 = scalar_lea.vmem %s47_s4, 32  ;;  %s67_s28 = int_to_ptr.vmem [resolvable:$true] %s66_s28 }
  0x32   :  { %p6065_p4 = scmp.ne.s32.totalorder %s47_s4, %s6064_s29  ;;  %p6069_p5 = scmp.lt.s32.totalorder %s47_s4, %s47_s4 }
  0x33   :  { %p6070_p6 = scmp.lt.s32.totalorder %s6064_s29, %s6064_s29 }
  0x35   :  { %p6071_p7 = por %p6070_p6, %p6069_p5 }
  0x37   :  { %p6072_p8 = pnand %p6071_p7, %p6065_p4 }
  0x39   :  { %6075 = shalt.err (!%p6072_p8)
}
  0x3a   :  { %s6188_s30 = smov [#allocation7]   ;;  %s6076_s1 = scalar_lea.vmem %s67_s28, 32 }
  0x3b   :  { %49 = dma.vmem_to_smem %s47_s4, 32, %s6188_s30, [#allocation6]  }
  0x3c   :  { %p6077_p9 = scmp.ne.s32.totalorder %s67_s28, %s6076_s1  ;;  %p6081_p10 = scmp.lt.s32.totalorder %s67_s28, %s67_s28 }
  0x3d   :  { %p6082_p11 = scmp.lt.s32.totalorder %s6076_s1, %s6076_s1 }
  0x3f   :  { %p6083_p12 = por %p6082_p11, %p6081_p10 }
  0x41   :  { %p6084_p13 = pnand %p6083_p12, %p6077_p9 }
  0x43   :  { %6087 = shalt.err (!%p6084_p13)
}
  0x44   :  { %s6189_s3 = smov [#allocation10]   ;;  %s88_s17 = sshll.u32 %s12774_s8, 4  ;;  %s89_s17 = int_to_ptr.vmem [resolvable:$true] %s88_s17 }
  0x45   :  { %69 = dma.vmem_to_smem %s67_s28, 32, %s6189_s3, [#allocation9]  }
  0x46   :  { %s108_s20 = sshll.u32 %s12776_s10, 4  ;;  %s6088_s21 = scalar_lea.vmem %s89_s17, 64  ;;  %s109_s20 = int_to_ptr.vmem [resolvable:$true] %s108_s20 }
  0x47   :  { %p6089_p0 = scmp.ne.s32.totalorder %s89_s17, %s6088_s21  ;;  %p6093_p1 = scmp.lt.s32.totalorder %s89_s17, %s89_s17 }
  0x48   :  { %p6094_p2 = scmp.lt.s32.totalorder %s6088_s21, %s6088_s21 }
  0x4a   :  { %p6095_p3 = por %p6094_p2, %p6093_p1 }
  0x4c   :  { %p6096_p4 = pnand %p6095_p3, %p6089_p0 }
  0x4e   :  { %6099 = shalt.err (!%p6096_p4)
}
  0x4f   :  { %s6190_s9 = smov [#allocation13]   ;;  %s6100_s22 = scalar_lea.vmem %s109_s20, 64 }
  0x50   :  { %91 = dma.vmem_to_smem %s89_s17, 64, %s6190_s9, [#allocation12]  }
  0x51   :  { %p6101_p5 = scmp.ne.s32.totalorder %s109_s20, %s6100_s22  ;;  %p6105_p6 = scmp.lt.s32.totalorder %s109_s20, %s109_s20 }
  0x52   :  { %p6106_p7 = scmp.lt.s32.totalorder %s6100_s22, %s6100_s22 }
  0x54   :  { %p6107_p8 = por %p6106_p7, %p6105_p6 }
  0x56   :  { %p6108_p9 = pnand %p6107_p8, %p6101_p5 }
  0x58   :  { %6111 = shalt.err (!%p6108_p9)
}
  0x59   :  { %s6191_s8 = smov [#allocation16]   ;;  %s118_s24 = sshll.u32 %s12777_s11, 4  ;;  %s119_s24 = int_to_ptr.vmem [resolvable:$true] %s118_s24 }
  0x5a   :  { %111 = dma.vmem_to_smem %s109_s20, 64, %s6191_s8, [#allocation15]  }
  0x5b   :  { %s6112_s25 = scalar_lea.vmem %s119_s24, 16  ;;  %p6117_p11 = scmp.lt.s32.totalorder %s119_s24, %s119_s24 }
  0x5c   :  { %p6113_p10 = scmp.ne.s32.totalorder %s119_s24, %s6112_s25  ;;  %p6118_p12 = scmp.lt.s32.totalorder %s6112_s25, %s6112_s25 }
  0x5e   :  { %p6119_p13 = por %p6118_p12, %p6117_p11 }
  0x60   :  { %p6120_p0 = pnand %p6119_p13, %p6113_p10 }
  0x62   :  { %6123 = shalt.err (!%p6120_p0)
}
  0x63   :  { %s6192_s26 = smov [#allocation17]   ;;  %s6193_s4 = smov [#allocation19]  }
  0x64   :  { %121 = dma.vmem_to_smem %s119_s24, 16, %s6192_s26, [#allocation18]  }
  0x65   :  { %s127_s6 = sshll.u32 %s6193_s4, 4  ;;  %s6124_s29 = scalar_lea.hbm %s12778_s12, 16384  ;;  %s128_s6 = int_to_ptr.vmem [resolvable:$true] %s127_s6 }
  0x66   :  { %p6125_p1 = scmp.ne.s32.totalorder %s12778_s12, %s6124_s29  ;;  %p6128_p2 = scmp.lt.u32.totalorder %s6124_s29, %s12778_s12 }
  0x68   :  { %p6130_p3 = pnand %p6128_p2, %p6125_p1 }
  0x6a   :  { %6133 = shalt.err (!%p6130_p3)
}
  0x6b   :  { %s6134_s5 = scalar_lea.vmem %s128_s6, 16384  ;;  %p6139_p5 = scmp.lt.s32.totalorder %s128_s6, %s128_s6 }
  0x6c   :  { %p6135_p4 = scmp.ne.s32.totalorder %s128_s6, %s6134_s5  ;;  %p6140_p6 = scmp.lt.s32.totalorder %s6134_s5, %s6134_s5 }
  0x6e   :  { %p6141_p7 = por %p6140_p6, %p6139_p5 }
  0x70   :  { %p6142_p8 = pnand %p6141_p7, %p6135_p4 }
  0x72   :  { %6145 = shalt.err (!%p6142_p8)
}
  0x73   :  { %s6194_s16 = smov 128   ;;  %s6195_s17 = smov 8  }
  0x74   :  { %133 = dma.hbm_to_vmem [thread:$0]  %s12778_s12, 16384, %s128_s6, [#allocation3], %s6194_s16, %s6194_s16, %s6195_s17  }
  0x75   :  { %6168 = dma.done.wait [#allocation5], 16  }
  0x76   :  { %6169 = vsyncadd [#allocation5], 4294967280 }
  0x77   :  { %6170 = dma.done.wait [#allocation6], 32  }
  0x78   :  { %6171 = vsyncadd [#allocation6], 4294967264 }
  0x79   :  { %6172 = dma.done.wait [#allocation9], 48  }
  0x7a   :  { %6173 = vsyncadd [#allocation9], 4294967248 }
  0x7b   :  { %6174 = dma.done.wait [#allocation12], 80  }
  0x7c   :  { %6175 = vsyncadd [#allocation12], 4294967216 }
  0x7d   :  { %6176 = dma.done.wait [#allocation15], 80  }
  0x7e   :  { %6177 = vsyncadd [#allocation15], 4294967216 }
  0x7f   :  { %6178 = dma.done.wait [#allocation18], 16  }
  0x80   :  { %6179 = vsyncadd [#allocation18], 4294967280 }
  0x81   :  { %6180 = dma.done.wait [#allocation3], 16384  }
  0x82   :  { %6181 = vsyncadd [#allocation3], 4294950912 }
  0x83   :  { %168 = sfence }
  0x84   :  { %s170_s20 = sld [smem:[#allocation2]]  ;;  %s5403_s21 = sld [smem:[#allocation2 + $0x1]]  ;;  %v192_v0 = vlaneseq  ;;  %v169_v2 = vld [vmem:[%s12766_s0] sm:$0xf] }
  0x85   :  { %s6196_s0 = smov 17   ;;  %s6197_s22 = smov 16   ;;  %v176_v15 = vld [vmem:[%s12768_s2] ss:$8 sm:$0xf] }
  0x86   :  { %v193_v1 = vshrl.u32 %v192_v0, 7  ;;  %s6198_s8 = smov 15   ;;  %s6199_s10 = smov 1   ;;  %v6400_v16 = vand.u32 127, %v192_v0 }
  0x87   :  { %s6200_s23 = smov 127   ;;  %s6201_s24 = smov 113   ;;  %v5404_v19 = vld [vmem:[%s12768_s2 + $0x1] ss:$8 sm:$0xf] }
  0x88   :  { %v6347_v6 = vsub.s32 2, %v193_v1  ;;  %v6349_v7 = vsub.s32 0, %v193_v1  ;;  %v6353_v9 = vsub.s32 3, %v193_v1  ;;  %v6355_v10 = vsub.s32 1, %v193_v1  ;;  %s6202_s25 = smov 112   ;;  %s6203_s26 = smov 111  }
  0x89   :  { %s518_s4 = sld [smem:[#allocation7]]  ;;  %s5411_s27 = sld [smem:[#allocation7 + $0x1]]  ;;  %13117 = vst [vmem:[#allocation33_spill] sm:$0xff] %v6400_v16  ;;  %vm222_vm0 = vcmp.lt.s32.totalorder %v6400_v16, 17  ;;  %vm260_vm1 = vcmp.lt.s32.totalorder %v6400_v16, 16  ;;  %vm298_vm2 = vcmp.lt.s32.totalorder %v6400_v16, 15 }
  0x8a   :  { %v171_v3 = vstv %s170_s20  ;;  %v174_v4 = vstv %s5403_s21  ;;  %13113 = vst [vmem:[#allocation29_spill] sm:$0xff] %v6347_v6  ;;  %13114 = vst [vmem:[#allocation30_spill] sm:$0xff] %v6349_v7  ;;  %s5419_s6 = sld [smem:[#allocation7 + $0x80]]  ;;  %s5420_s28 = sld [smem:[#allocation7 + $0x81]]  ;;  %v6411_v20 = vrot.slane %v176_v15, %v6349_v7  ;;  %v6418_v21 = vrot.slane %v176_v15, %v6353_v9 }
  0x8b   :  { %v172_v5 = vmul.f32 %v171_v3, %v169_v2  ;;  %13115 = vst [vmem:[#allocation31_spill] sm:$0xff] %v6353_v9  ;;  %13116 = vst [vmem:[#allocation32_spill] sm:$0xff] %v6355_v10  ;;  %s5412_s1 = sld [smem:[#allocation7 + $0x2]]  ;;  %s6402_s3 = sld [smem:[#allocation7 + $0x4]]  ;;  %v6421_v23 = vrot.slane %v176_v15, %v6355_v10  ;;  %v6424_v24 = vrot.slane %v176_v15, %v6347_v6  ;;  %vm336_vm3 = vcmp.lt.s32.totalorder %v6400_v16, 1 }
  0x8c   :  { %s5421_s11 = sld [smem:[#allocation7 + $0x82]]  ;;  %s6407_s17 = sld [smem:[#allocation7 + $0x3]]  ;;  %13118 = vst [vmem:[#allocation34_spill] sm:$0xff] %v6411_v20  ;;  %13119 = vst [vmem:[#allocation35_spill] sm:$0xff] %v6418_v21  ;;  %v6433_v29 = vrot.slane %v5404_v19, %v6355_v10  ;;  %v6440_v33 = vrot.slane %v5404_v19, %v6349_v7  ;;  %v6443_v34 = vrot.slane %v5404_v19, %v6347_v6  ;;  %vm374_vm4 = vcmp.lt.s32.totalorder %v6400_v16, 127 }
  0x8d   :  { %v6351_v8 = vadd.f32 %v174_v4, %v172_v5  ;;  %s6413_s18 = sld [smem:[#allocation7 + $0x83]]  ;;  %s6415_s19 = sld [smem:[#allocation7 + $0x84]]  ;;  %13120 = vst [vmem:[#allocation36_spill] sm:$0xff] %v6421_v23  ;;  %13121 = vst [vmem:[#allocation37_spill] sm:$0xff] %v6424_v24  ;;  %v6446_v35 = vrot.slane %v5404_v19, %v6353_v9  ;;  %vm412_vm5 = vcmp.lt.s32.totalorder %v6400_v16, 113  ;;  %vm450_vm6 = vcmp.lt.s32.totalorder %v6400_v16, 112 }
  0x8e   :  { %v5405_v26 = vld [vmem:[%s12768_s2 + $0x2] ss:$8 sm:$0xf]  ;;  %13122 = vst [vmem:[#allocation38_spill] sm:$0xff] %v6433_v29  ;;  %13123 = vst [vmem:[#allocation39_spill] sm:$0xff] %v6440_v33  ;;  %s6552_s29 = sld [smem:[#allocation7 + $0x6]] }
  0x8f   :  { %v203_v11 = vrot.slane %v6351_v8, %v6347_v6  ;;  %v195_v12 = vrot.slane %v6351_v8, %v6349_v7  ;;  %v207_v13 = vrot.slane %v6351_v8, %v6353_v9  ;;  %v199_v14 = vrot.slane %v6351_v8, %v6355_v10  ;;  %13124 = vst [vmem:[#allocation40_spill] sm:$0xff] %v6443_v34  ;;  %v5406_v38 = vld [vmem:[%s12768_s2 + $0x3] ss:$8 sm:$0xf]  ;;  %s6554_s30 = sld [smem:[#allocation7 + $0x86]]  ;;  %s6613_s16 = sld [smem:[#allocation7 + $0x8]] }
  0x90   :  { %v6430_v27 = vstv %s518_s4  ;;  %v633_v28 = vstv %s5419_s6  ;;  %v6435_v30 = vstv %s5411_s27  ;;  %v639_v32 = vstv %s5420_s28  ;;  %13125 = vst [vmem:[#allocation41_spill] sm:$0xff] %v6446_v35  ;;  %s6508_s4 = sld [smem:[#allocation7 + $0x5]]  ;;  %s5428_s12 = sld [smem:[#allocation8 + $0x1]] }
  0x91   :  { %216 = vrot.lane.b32.xlu1 %v203_v11, %s6196_s0  ;;  %212 = vrot.lane.b32.xlu0 %v195_v12, %s6196_s0  ;;  %v6450_v36 = vrot.slane %v5405_v26, %v6355_v10  ;;  %v6452_v37 = vstv %s5412_s1  ;;  %v6460_v42 = vrot.slane %v5405_v26, %v6349_v7  ;;  %v6463_v43 = vrot.slane %v5405_v26, %v6347_v6  ;;  %s6510_s6 = sld [smem:[#allocation7 + $0x85]]  ;;  %s6578_s1 = sld [smem:[#allocation7 + $0x7]] }
  0x92   :  { %v6457_v41 = vstv %s5421_s11  ;;  %v555_v44 = vstv %s6402_s3  ;;  %v6478_v50 = vrot.slane %v5405_v26, %v6353_v9  ;;  %v6481_v51 = vrot.slane %v5406_v38, %v6355_v10  ;;  %s6580_s11 = sld [smem:[#allocation7 + $0x87]]  ;;  %s5446_s9 = sld [smem:[#allocation10 + $0x80]] }
  0x93   :  { %13126 = vst [vmem:[#allocation42_spill] sm:$0xff] %v6450_v36  ;;  %13127 = vst [vmem:[#allocation43_spill] sm:$0xff] %v6460_v42  ;;  %v6484_v52 = vstv %s6407_s17  ;;  %v6490_v54 = vstv %s6413_s18  ;;  %v6493_v55 = vrot.slane %v5406_v38, %v6349_v7  ;;  %v669_v56 = vstv %s6415_s19  ;;  %s6615_s17 = sld [smem:[#allocation7 + $0x88]]  ;;  %s7034_s27 = sld [smem:[#allocation10 + $0x2]] }
  0x94   :  { %13128 = vst [vmem:[#allocation44_spill] sm:$0xff] %v6463_v43  ;;  %13129 = vst [vmem:[#allocation45_spill] sm:$0xff] %v6478_v50  ;;  %v6506_v62 = vmul.f32 %v555_v44, %v6351_v8  ;;  %v6537_v15 = vrot.slane %v5406_v38, %v6353_v9  ;;  %vm488_vm7 = vcmp.lt.s32.totalorder %v6400_v16, 111  ;;  %s7036_s28 = sld [smem:[#allocation10 + $0x82]]  ;;  %s7050_s3 = sld [smem:[#allocation10 + $0x6]]  ;;  %vm1501_vm8 = vcmp.lt.s32.totalorder %v6400_v16, 34 }
  0x95   :  { %218 = vrot.lane.b32.xlu1 %v207_v13, %s6196_s0  ;;  %214 = vrot.lane.b32.xlu0 %v199_v14, %s6196_s0  ;;  %13130 = vst [vmem:[#allocation46_spill] sm:$0xff] %v6481_v51  ;;  %13131 = vst [vmem:[#allocation47_spill] sm:$0xff] %v6493_v55  ;;  %s7052_s5 = sld [smem:[#allocation10 + $0x86]]  ;;  %s7060_s18 = sld [smem:[#allocation10 + $0x8]]  ;;  %vm1539_vm9 = vcmp.lt.s32.totalorder %v6400_v16, 32  ;;  %vm1577_vm10 = vcmp.lt.s32.totalorder %v6400_v16, 30 }
  0x96   :  { %13133 = vst [vmem:[#allocation49_spill] sm:$0xff] %v6537_v15  ;;  %s7064_s19 = sld [smem:[#allocation10 + $0x88]]  ;;  %s7066_s20 = sld [smem:[#allocation10 + $0x9]]  ;;  %vm1615_vm11 = vcmp.lt.s32.totalorder %v6400_v16, 2  ;;  %vm1653_vm12 = vcmp.lt.s32.totalorder %v6400_v16, 126  ;;  %vm1691_vm13 = vcmp.lt.s32.totalorder %v6400_v16, 98 }
  0x97   :  { %s7072_s21 = sld [smem:[#allocation10 + $0x89]]  ;;  %vm1729_vm14 = vcmp.lt.s32.totalorder %v6400_v16, 96  ;;  %vm1767_vm15 = vcmp.lt.s32.totalorder %v6400_v16, 94  ;;  %s9973_s15 = sld [smem:[#allocation16 + $0x188]] }
  0x98   :  { %s9975_s13 = sld [smem:[#allocation16 + $0x9]] }
  0x99   :  { %254 = vrot.lane.b32.xlu1 %v199_v14, %s6197_s22  ;;  %252 = vrot.lane.b32.xlu0 %v195_v12, %s6197_s22  ;;  %s9986_s14 = sld [smem:[#allocation16 + $0x89]] }
  0x9d   :  { %258 = vrot.lane.b32.xlu1 %v207_v13, %s6197_s22  ;;  %256 = vrot.lane.b32.xlu0 %v203_v11, %s6197_s22 }
  0x9e   :  { %13565 = sst [smem:[#allocation140_spill]] %s9975_s13  ;;  %s10008_s13 = sld [smem:[#allocation16 + $0xa]] }
  0xa1   :  { %292 = vrot.lane.b32.xlu1 %v199_v14, %s6198_s8  ;;  %290 = vrot.lane.b32.xlu0 %v195_v12, %s6198_s8 }
  0xa5   :  { %296 = vrot.lane.b32.xlu1 %v207_v13, %s6198_s8  ;;  %294 = vrot.lane.b32.xlu0 %v203_v11, %s6198_s8 }
  0xa9   :  { %330 = vrot.lane.b32.xlu1 %v199_v14, %s6199_s10  ;;  %328 = vrot.lane.b32.xlu0 %v195_v12, %s6199_s10 }
  0xad   :  { %334 = vrot.lane.b32.xlu1 %v207_v13, %s6199_s10  ;;  %332 = vrot.lane.b32.xlu0 %v203_v11, %s6199_s10 }
  0xb1   :  { %368 = vrot.lane.b32.xlu1 %v199_v14, %s6200_s23  ;;  %366 = vrot.lane.b32.xlu0 %v195_v12, %s6200_s23 }
  0xb5   :  { %372 = vrot.lane.b32.xlu1 %v207_v13, %s6200_s23  ;;  %370 = vrot.lane.b32.xlu0 %v203_v11, %s6200_s23 }
  0xb9   :  { %406 = vrot.lane.b32.xlu1 %v199_v14, %s6201_s24  ;;  %404 = vrot.lane.b32.xlu0 %v195_v12, %s6201_s24 }
  0xbd   :  { %410 = vrot.lane.b32.xlu1 %v207_v13, %s6201_s24  ;;  %408 = vrot.lane.b32.xlu0 %v203_v11, %s6201_s24 }
  0xc1   :  { %444 = vrot.lane.b32.xlu1 %v199_v14, %s6202_s25  ;;  %442 = vrot.lane.b32.xlu0 %v195_v12, %s6202_s25 }
  0xc5   :  { %448 = vrot.lane.b32.xlu1 %v207_v13, %s6202_s25  ;;  %446 = vrot.lane.b32.xlu0 %v203_v11, %s6202_s25 }
  0xc9   :  { %482 = vrot.lane.b32.xlu1 %v199_v14, %s6203_s26  ;;  %480 = vrot.lane.b32.xlu0 %v195_v12, %s6203_s26  ;;  %v6534_v14 = vrot.slane %v5406_v38, %v6347_v6 }
  0xcb   :  { %13132 = vst [vmem:[#allocation48_spill] sm:$0xff] %v6534_v14 }
  0xcd   :  { %486 = vrot.lane.b32.xlu1 %v207_v13, %s6203_s26  ;;  %484 = vrot.lane.b32.xlu0 %v203_v11, %s6203_s26  ;;  %v6528_v11 = vmul.f32 %v669_v56, %v6351_v8  ;;  %v6638_v56 = vstv %s6554_s30  ;;  %s7042_s30 = sld [smem:[#allocation10 + $0x83]] }
 0x103   :  { %v217_v17 = vpop.permute.xlu1 %216  ;;  %v213_v18 = vpop.permute.xlu0 %212 }
 0x107   :  { %v219_v22 = vpop.permute.xlu1 %218  ;;  %v215_v25 = vpop.permute.xlu0 %214 }
 0x108   :  { %v225_v31 = vsel %vm222_vm0, %v213_v18, %v215_v25  ;;  %v223_v45 = vsel %vm222_vm0, %v217_v17, %v219_v22  ;;  %v226_v46 = vsel %vm222_vm0, %v219_v22, %v213_v18  ;;  %v224_v47 = vsel %vm222_vm0, %v215_v25, %v217_v17  ;;  %v5407_v17 = vld [vmem:[%s12768_s2 + $0x4] ss:$8 sm:$0xf] }
 0x109   :  { %v6473_v48 = vmul.f32 %v6421_v23, %v225_v31  ;;  %v6497_v57 = vmul.f32 %v6411_v20, %v226_v46  ;;  %v6500_v58 = vmul.f32 %v6418_v21, %v223_v45  ;;  %v6503_v59 = vmul.f32 %v6424_v24, %v224_v47 }
 0x10a   :  { %v6557_v46 = vrot.slane %v5407_v17, %v6349_v7 }
 0x10b   :  { %v255_v39 = vpop.permute.xlu1 %254  ;;  %v253_v40 = vpop.permute.xlu0 %252  ;;  %v635_v63 = vmul.f32 %v633_v28, %v6473_v48  ;;  %v634_v18 = vmul.f32 %v633_v28, %v6497_v57  ;;  %v637_v19 = vmul.f32 %v633_v28, %v6500_v58  ;;  %v636_v31 = vmul.f32 %v633_v28, %v6503_v59 }
 0x10c   :  { %v263_v49 = vsel %vm260_vm1, %v253_v40, %v255_v39 }
 0x10d   :  { %v6487_v53 = vmul.f32 %v6433_v29, %v263_v49 }
 0x10f   :  { %v259_v60 = vpop.permute.xlu1 %258  ;;  %v257_v61 = vpop.permute.xlu0 %256  ;;  %v641_v0 = vmul.f32 %v639_v32, %v6487_v53 }
 0x110   :  { %v264_v1 = vsel %vm260_vm1, %v259_v60, %v253_v40  ;;  %v261_v2 = vsel %vm260_vm1, %v257_v61, %v259_v60  ;;  %v262_v4 = vsel %vm260_vm1, %v255_v39, %v257_v61  ;;  %v5409_v40 = vld [vmem:[%s12768_s2 + $0x6] ss:$8 sm:$0xf] }
 0x111   :  { %v6519_v3 = vmul.f32 %v6440_v33, %v264_v1  ;;  %v6524_v5 = vmul.f32 %v6446_v35, %v261_v2  ;;  %v645_v12 = vadd.f32 %v641_v0, %v635_v63  ;;  %v6531_v13 = vmul.f32 %v6443_v34, %v262_v4 }
 0x112   :  { %v6569_v63 = vstv %s6508_s4  ;;  %v6572_v0 = vstv %s6510_s6  ;;  %v6611_v1 = vrot.slane %v5407_v17, %v6355_v10  ;;  %v6635_v2 = vstv %s6552_s29  ;;  %s5429_s4 = sld [smem:[#allocation10 + $0x1]]  ;;  %s7038_s29 = sld [smem:[#allocation10 + $0x3]] }
 0x113   :  { %v640_v8 = vmul.f32 %v639_v32, %v6519_v3  ;;  %v643_v22 = vmul.f32 %v639_v32, %v6524_v5  ;;  %v293_v25 = vpop.permute.xlu1 %292  ;;  %v291_v26 = vpop.permute.xlu0 %290  ;;  %v642_v38 = vmul.f32 %v639_v32, %v6531_v13  ;;  %v6653_v35 = vrot.slane %v5409_v40, %v6349_v7  ;;  %s5447_s6 = sld [smem:[#allocation10 + $0x81]] }
 0x114   :  { %v301_v39 = vsel %vm298_vm2, %v291_v26, %v293_v25  ;;  %v6679_v34 = vrot.slane %v5409_v40, %v6347_v6 }
 0x115   :  { %v644_v44 = vadd.f32 %v640_v8, %v634_v18  ;;  %v647_v45 = vadd.f32 %v643_v22, %v637_v19  ;;  %v646_v32 = vadd.f32 %v642_v38, %v636_v31  ;;  %v6562_v47 = vmul.f32 %v6450_v36, %v301_v39  ;;  %v5408_v22 = vld [vmem:[%s12768_s2 + $0x5] ss:$8 sm:$0xf]  ;;  %13137 = vst [vmem:[#allocation53_spill] sm:$0xff] %v6653_v35 }
 0x116   :  { %13141 = vst [vmem:[#allocation57_spill] sm:$0xff] %v6679_v34 }
 0x117   :  { %v297_v60 = vpop.permute.xlu1 %296  ;;  %v295_v61 = vpop.permute.xlu0 %294  ;;  %v651_v4 = vmul.f32 %v6457_v41, %v6562_v47 }
 0x118   :  { %v302_v18 = vsel %vm298_vm2, %v297_v60, %v291_v26  ;;  %v299_v19 = vsel %vm298_vm2, %v295_v61, %v297_v60  ;;  %v300_v38 = vsel %vm298_vm2, %v293_v25, %v295_v61 }
 0x119   :  { %v6594_v31 = vmul.f32 %v6460_v42, %v302_v18  ;;  %v6599_v39 = vmul.f32 %v6478_v50, %v299_v19  ;;  %v655_v60 = vadd.f32 %v651_v4, %v645_v12  ;;  %v6605_v8 = vmul.f32 %v6463_v43, %v300_v38 }
 0x11a   :  { %v6608_v18 = vrot.slane %v5407_v17, %v6353_v9  ;;  %v6622_v19 = vrot.slane %v5407_v17, %v6347_v6  ;;  %v6625_v38 = vrot.slane %v5408_v22, %v6349_v7  ;;  %v6641_v50 = vrot.slane %v5408_v22, %v6353_v9 }
 0x11b   :  { %v650_v25 = vmul.f32 %v6457_v41, %v6594_v31  ;;  %v653_v12 = vmul.f32 %v6457_v41, %v6599_v39  ;;  %v331_v61 = vpop.permute.xlu1 %330  ;;  %v329_v4 = vpop.permute.xlu0 %328  ;;  %v652_v49 = vmul.f32 %v6457_v41, %v6605_v8  ;;  %v6644_v42 = vrot.slane %v5408_v22, %v6355_v10 }
 0x11c   :  { %v339_v26 = vsel %vm336_vm3, %v329_v4, %v331_v61  ;;  %13134 = vst [vmem:[#allocation50_spill] sm:$0xff] %v6641_v50  ;;  %v6650_v41 = vrot.slane %v5408_v22, %v6347_v6  ;;  %v6670_v22 = vrot.slane %v5409_v40, %v6355_v10 }
 0x11d   :  { %v654_v17 = vadd.f32 %v650_v25, %v644_v44  ;;  %v657_v28 = vadd.f32 %v653_v12, %v647_v45  ;;  %13135 = vst [vmem:[#allocation51_spill] sm:$0xff] %v6644_v42  ;;  %v656_v43 = vadd.f32 %v652_v49, %v646_v32  ;;  %v6647_v36 = vmul.f32 %v6481_v51, %v339_v26  ;;  %v6658_v44 = vld [vmem:[%s12768_s2 + $0x7] ss:$8 sm:$0xf]  ;;  %s6761_s2 = sld [smem:[#allocation8]] }
 0x11e   :  { %13136 = vst [vmem:[#allocation52_spill] sm:$0xff] %v6650_v41  ;;  %v6661_v12 = vstv %s6578_s1  ;;  %v6664_v32 = vstv %s6580_s11  ;;  %v6667_v49 = vrot.slane %v5409_v40, %v6353_v9  ;;  %13140 = vst [vmem:[#allocation56_spill] sm:$0xff] %v6670_v22  ;;  %v6687_v24 = vrot.slane %v6658_v44, %v6349_v7  ;;  %s7046_s1 = sld [smem:[#allocation10 + $0x5]] }
 0x11f   :  { %v335_v45 = vpop.permute.xlu1 %334  ;;  %v333_v25 = vpop.permute.xlu0 %332  ;;  %13138 = vst [vmem:[#allocation54_spill] sm:$0xff] %v6661_v12  ;;  %v661_v26 = vmul.f32 %v6490_v54, %v6647_v36  ;;  %v6695_v40 = vstv %s6615_s17  ;;  %v528_v22 = vmul.f32 %v6435_v30, %v6531_v13  ;;  %v13148_v13 = vrot.slane %v6528_v11, %v6347_v6  ;;  %s7048_s11 = sld [smem:[#allocation10 + $0x85]]  ;;  %s7058_s17 = sld [smem:[#allocation10 + $0x87]] }
 0x120   :  { %13139 = vst [vmem:[#allocation55_spill] sm:$0xff] %v6667_v49  ;;  %v340_v51 = vsel %vm336_vm3, %v335_v45, %v329_v4  ;;  %v337_v33 = vsel %vm336_vm3, %v333_v25, %v335_v45  ;;  %v338_v20 = vsel %vm336_vm3, %v331_v61, %v333_v25  ;;  %13142 = vst [vmem:[#allocation58_spill] sm:$0xff] %v6687_v24  ;;  %v6692_v45 = vstv %s6613_s16  ;;  %s7054_s16 = sld [smem:[#allocation10 + $0x7]] }
 0x121   :  { %v362_v21 = vmul.f32 %v6493_v55, %v340_v51  ;;  %v365_v29 = vmul.f32 %v6537_v15, %v337_v33  ;;  %v665_v23 = vadd.f32 %v661_v26, %v655_v60  ;;  %v364_v4 = vmul.f32 %v6534_v14, %v338_v20  ;;  %13143 = vst [vmem:[#allocation59_spill] sm:$0xff] %v6692_v45 }
 0x122   :  { %13144 = vst [vmem:[#allocation60_spill] sm:$0xff] %v6695_v40  ;;  %v520_v51 = vmul.f32 %v6430_v27, %v6497_v57  ;;  %v527_v61 = vmul.f32 %v6435_v30, %v6487_v53  ;;  %v523_v20 = vmul.f32 %v6430_v27, %v6500_v58  ;;  %v526_v26 = vmul.f32 %v6435_v30, %v6519_v3 }
 0x123   :  { %v660_v33 = vmul.f32 %v6490_v54, %v362_v21  ;;  %v663_v25 = vmul.f32 %v6490_v54, %v365_v29  ;;  %v369_v15 = vpop.permute.xlu1 %368  ;;  %v367_v60 = vpop.permute.xlu0 %366  ;;  %v662_v14 = vmul.f32 %v6490_v54, %v364_v4  ;;  %v521_v53 = vmul.f32 %v6430_v27, %v6473_v48 }
 0x124   :  { %v377_v57 = vsel %vm374_vm4, %v367_v60, %v369_v15  ;;  %v522_v55 = vmul.f32 %v6430_v27, %v6503_v59  ;;  %v529_v24 = vmul.f32 %v6435_v30, %v6524_v5  ;;  %v13145_v54 = vrot.slane %v6528_v11, %v6355_v10 }
 0x125   :  { %v664_v40 = vadd.f32 %v660_v33, %v654_v17  ;;  %v667_v45 = vadd.f32 %v663_v25, %v657_v28  ;;  %v666_v58 = vadd.f32 %v662_v14, %v656_v43  ;;  %v400_v12 = vmul.f32 %v6557_v46, %v377_v57 }
 0x126   :  { %v693_v3 = vadd.f32 %v13145_v54, %v665_v23  ;;  %v531_v34 = vadd.f32 %v527_v61, %v521_v53  ;;  %v13146_v48 = vrot.slane %v6528_v11, %v6349_v7  ;;  %v13147_v28 = vrot.slane %v6528_v11, %v6353_v9 }
 0x127   :  { %v373_v59 = vpop.permute.xlu1 %372  ;;  %v371_v43 = vpop.permute.xlu0 %370  ;;  %v530_v14 = vadd.f32 %v526_v26, %v520_v51  ;;  %v536_v17 = vmul.f32 %v6452_v37, %v6594_v31  ;;  %v698_v23 = vmul.f32 %v6572_v0, %v400_v12  ;;  %v533_v51 = vadd.f32 %v529_v24, %v523_v20 }
 0x128   :  { %v692_v27 = vadd.f32 %v13146_v48, %v664_v40  ;;  %v695_v5 = vadd.f32 %v13147_v28, %v667_v45  ;;  %v378_v61 = vsel %vm374_vm4, %v373_v59, %v367_v60  ;;  %v694_v40 = vadd.f32 %v13148_v13, %v666_v58 }
 0x129   :  { %v403_v30 = vmul.f32 %v6608_v18, %v378_v61  ;;  %v375_v33 = vsel %vm374_vm4, %v371_v43, %v373_v59  ;;  %v376_v45 = vsel %vm374_vm4, %v369_v15, %v371_v43  ;;  %v537_v60 = vmul.f32 %v6452_v37, %v6562_v47 }
 0x12a   :  { %v702_v25 = vadd.f32 %v698_v23, %v692_v27  ;;  %v401_v31 = vmul.f32 %v6611_v1, %v376_v45  ;;  %v6743_v26 = vmul.f32 %v6622_v19, %v375_v33  ;;  %v539_v11 = vmul.f32 %v6452_v37, %v6599_v39 }
 0x12b   :  { %v546_v57 = vmul.f32 %v6484_v52, %v362_v21  ;;  %v701_v53 = vmul.f32 %v6572_v0, %v403_v30  ;;  %v407_v15 = vpop.permute.xlu1 %406  ;;  %v405_v24 = vpop.permute.xlu0 %404  ;;  %v532_v20 = vadd.f32 %v528_v22, %v522_v55  ;;  %v538_v58 = vmul.f32 %v6452_v37, %v6605_v8 }
 0x12c   :  { %v699_v54 = vmul.f32 %v6572_v0, %v401_v31  ;;  %v700_v48 = vmul.f32 %v6572_v0, %v6743_v26  ;;  %v540_v27 = vadd.f32 %v536_v17, %v530_v14  ;;  %v547_v47 = vmul.f32 %v6484_v52, %v6647_v36 }
 0x12d   :  { %v705_v39 = vadd.f32 %v701_v53, %v695_v5  ;;  %v415_v21 = vsel %vm412_vm5, %v405_v24, %v407_v15  ;;  %v548_v55 = vmul.f32 %v6484_v52, %v364_v4  ;;  %v549_v22 = vmul.f32 %v6484_v52, %v365_v29 }
 0x12e   :  { %v703_v37 = vadd.f32 %v699_v54, %v693_v3  ;;  %v704_v8 = vadd.f32 %v700_v48, %v694_v40  ;;  %v541_v59 = vadd.f32 %v537_v60, %v531_v34  ;;  %v543_v28 = vadd.f32 %v539_v11, %v533_v51 }
 0x12f   :  { %v550_v43 = vadd.f32 %v546_v57, %v540_v27  ;;  %v438_v0 = vmul.f32 %v6625_v38, %v415_v21  ;;  %v411_v14 = vpop.permute.xlu1 %410  ;;  %v409_v17 = vpop.permute.xlu0 %408  ;;  %v542_v36 = vadd.f32 %v538_v58, %v532_v20  ;;  %v6779_v33 = vrot.slane %v6658_v44, %v6353_v9 }
 0x130   :  { %v416_v5 = vsel %vm412_vm5, %v411_v14, %v405_v24  ;;  %v413_v23 = vsel %vm412_vm5, %v409_v17, %v411_v14  ;;  %v414_v4 = vsel %vm412_vm5, %v407_v15, %v409_v17  ;;  %v551_v29 = vadd.f32 %v547_v47, %v541_v59 }
 0x131   :  { %v708_v52 = vmul.f32 %v6638_v56, %v438_v0  ;;  %v441_v34 = vmul.f32 %v6641_v50, %v416_v5  ;;  %v439_v3 = vmul.f32 %v6644_v42, %v414_v4  ;;  %v552_v61 = vadd.f32 %v548_v55, %v542_v36  ;;  %13149 = vst [vmem:[#allocation61_spill] sm:$0xff] %v6779_v33  ;;  %v13156_v4 = vld [vmem:[#allocation56_spill] sm:$0xff] }
 0x132   :  { %v553_v13 = vadd.f32 %v549_v22, %v543_v28  ;;  %v440_v40 = vmul.f32 %v6650_v41, %v413_v23  ;;  %v13150_v45 = vrot.slane %v6506_v62, %v6349_v7  ;;  %v584_v60 = vmul.f32 %v6569_v63, %v400_v12 }
 0x133   :  { %v712_v11 = vadd.f32 %v708_v52, %v702_v25  ;;  %v711_v57 = vmul.f32 %v6638_v56, %v441_v34  ;;  %v445_v53 = vpop.permute.xlu1 %444  ;;  %v443_v15 = vpop.permute.xlu0 %442  ;;  %v709_v24 = vmul.f32 %v6638_v56, %v439_v3  ;;  %v6790_v58 = vrot.slane %v6658_v44, %v6355_v10 }
 0x134   :  { %v578_v51 = vadd.f32 %v13150_v45, %v550_v43  ;;  %v710_v20 = vmul.f32 %v6638_v56, %v440_v40  ;;  %v6794_v54 = vrot.slane %v6658_v44, %v6347_v6  ;;  %v13153_v12 = vrot.slane %v6506_v62, %v6355_v10 }
 0x135   :  { %13151 = vst [vmem:[#allocation62_spill] sm:$0xff] %v6790_v58  ;;  %v715_v48 = vadd.f32 %v711_v57, %v705_v39  ;;  %v453_v27 = vsel %vm450_vm6, %v443_v15, %v445_v53  ;;  %v6802_v47 = vstv %s6761_s2  ;;  %v587_v56 = vmul.f32 %v6569_v63, %v403_v30  ;;  %s7074_s2 = sld [smem:[#allocation10 + $0xa]] }
 0x136   :  { %13152 = vst [vmem:[#allocation63_spill] sm:$0xff] %v6794_v54  ;;  %v579_v25 = vadd.f32 %v13153_v12, %v551_v29  ;;  %v585_v21 = vmul.f32 %v6569_v63, %v401_v31  ;;  %v713_v55 = vadd.f32 %v709_v24, %v703_v37  ;;  %v714_v22 = vadd.f32 %v710_v20, %v704_v8  ;;  %v13158_v24 = vld [vmem:[#allocation54_spill] sm:$0xff] }
 0x137   :  { %v588_v59 = vadd.f32 %v584_v60, %v578_v51  ;;  %v13154_v44 = vrot.slane %v6506_v62, %v6353_v9  ;;  %v13155_v43 = vrot.slane %v6506_v62, %v6347_v6  ;;  %v476_v14 = vmul.f32 %v6653_v35, %v453_v27  ;;  %v449_v17 = vpop.permute.xlu1 %448  ;;  %v447_v36 = vpop.permute.xlu0 %446  ;;  %v13187_v35 = vld [vmem:[#allocation38_spill] sm:$0xff] }
 0x138   :  { %v586_v30 = vmul.f32 %v6569_v63, %v6743_v26  ;;  %v454_v31 = vsel %vm450_vm6, %v449_v17, %v443_v15  ;;  %v451_v37 = vsel %vm450_vm6, %v447_v36, %v449_v17  ;;  %v452_v8 = vsel %vm450_vm6, %v445_v53, %v447_v36  ;;  %v13157_v26 = vld [vmem:[#allocation57_spill] sm:$0xff] }
 0x139   :  { %v581_v28 = vadd.f32 %v13154_v44, %v553_v13  ;;  %v580_v39 = vadd.f32 %v13155_v43, %v552_v61  ;;  %v594_v5 = vmul.f32 %v6635_v2, %v438_v0  ;;  %v718_v62 = vmul.f32 %v6664_v32, %v476_v14 }
 0x13a   :  { %v479_v23 = vmul.f32 %v6667_v49, %v454_v31  ;;  %v477_v29 = vmul.f32 %v13156_v4, %v452_v8  ;;  %v589_v61 = vadd.f32 %v585_v21, %v579_v25  ;;  %v597_v63 = vmul.f32 %v6635_v2, %v441_v34  ;;  %v13160_v31 = vld [vmem:[#allocation59_spill] sm:$0xff]  ;;  %v13186_v4 = vld [vmem:[#allocation37_spill] sm:$0xff] }
 0x13b   :  { %v591_v52 = vadd.f32 %v587_v56, %v581_v28  ;;  %v478_v13 = vmul.f32 %v13157_v26, %v451_v37  ;;  %v595_v45 = vmul.f32 %v6635_v2, %v439_v3  ;;  %v596_v51 = vmul.f32 %v6635_v2, %v440_v40  ;;  %v483_v0 = vpop.permute.xlu1 %482  ;;  %v481_v53 = vpop.permute.xlu0 %480 }
 0x13c   :  { %v722_v60 = vadd.f32 %v718_v62, %v712_v11  ;;  %v721_v57 = vmul.f32 %v6664_v32, %v479_v23  ;;  %v590_v15 = vadd.f32 %v586_v30, %v580_v39  ;;  %v604_v20 = vmul.f32 %v13158_v24, %v476_v14  ;;  %v13159_v39 = vld [vmem:[#allocation58_spill] sm:$0xff] }
 0x13d   :  { %v719_v12 = vmul.f32 %v6664_v32, %v477_v29  ;;  %v720_v25 = vmul.f32 %v6664_v32, %v478_v13  ;;  %v598_v27 = vadd.f32 %v594_v5, %v588_v59  ;;  %v607_v34 = vmul.f32 %v13158_v24, %v479_v23 }
 0x13e   :  { %v725_v56 = vadd.f32 %v721_v57, %v715_v48  ;;  %v491_v3 = vsel %vm488_vm7, %v481_v53, %v483_v0  ;;  %v605_v2 = vmul.f32 %v13158_v24, %v477_v29  ;;  %v606_v40 = vmul.f32 %v13158_v24, %v478_v13 }
 0x13f   :  { %v723_v11 = vadd.f32 %v719_v12, %v713_v55  ;;  %v724_v21 = vadd.f32 %v720_v25, %v714_v22  ;;  %v601_v44 = vadd.f32 %v597_v63, %v591_v52  ;;  %v599_v28 = vadd.f32 %v595_v45, %v589_v61  ;;  %v487_v17 = vpop.permute.xlu1 %486  ;;  %v485_v32 = vpop.permute.xlu0 %484  ;;  %v13161_v22 = vld [vmem:[#allocation60_spill] sm:$0xff] }
 0x140   :  { %v600_v43 = vadd.f32 %v596_v51, %v590_v15  ;;  %v514_v14 = vmul.f32 %v13159_v39, %v491_v3  ;;  %v608_v59 = vadd.f32 %v604_v20, %v598_v27  ;;  %v492_v48 = vsel %vm488_vm7, %v487_v17, %v481_v53 }
 0x141   :  { %v489_v36 = vsel %vm488_vm7, %v485_v32, %v487_v17  ;;  %v490_v30 = vsel %vm488_vm7, %v483_v0, %v485_v32  ;;  %v517_v8 = vmul.f32 %v6779_v33, %v492_v48  ;;  %v611_v62 = vadd.f32 %v607_v34, %v601_v44 }
 0x142   :  { %v614_v55 = vmul.f32 %v13160_v31, %v514_v14  ;;  %v728_v37 = vmul.f32 %v13161_v22, %v514_v14  ;;  %v515_v5 = vmul.f32 %v6790_v58, %v490_v30  ;;  %v609_v23 = vadd.f32 %v605_v2, %v599_v28 }
 0x143   :  { %v610_v29 = vadd.f32 %v606_v40, %v600_v43  ;;  %v516_v52 = vmul.f32 %v6794_v54, %v489_v36  ;;  %v617_v13 = vmul.f32 %v13160_v31, %v517_v8  ;;  %v731_v45 = vmul.f32 %v13161_v22, %v517_v8 }
 0x144   :  { %v618_v61 = vadd.f32 %v614_v55, %v608_v59  ;;  %v732_v63 = vadd.f32 %v728_v37, %v722_v60  ;;  %v615_v51 = vmul.f32 %v13160_v31, %v515_v5  ;;  %v729_v0 = vmul.f32 %v13161_v22, %v515_v5 }
 0x145   :  { %v616_v57 = vmul.f32 %v13160_v31, %v516_v52  ;;  %v730_v53 = vmul.f32 %v13161_v22, %v516_v52  ;;  %v621_v24 = vadd.f32 %v617_v13, %v611_v62  ;;  %v735_v20 = vadd.f32 %v731_v45, %v725_v56 }
 0x146   :  { %v624_v15 = vadd.f32 %v6802_v47, %v618_v61  ;;  %v619_v12 = vadd.f32 %v615_v51, %v609_v23  ;;  %v733_v27 = vadd.f32 %v729_v0, %v723_v11  ;;  %v7130_v9 = vstv %s7034_s27  ;;  %s7173_s27 = sld [smem:[#allocation11]] }
 0x147   :  { %v620_v25 = vadd.f32 %v616_v57, %v610_v29  ;;  %v734_v60 = vadd.f32 %v730_v53, %v724_v21  ;;  %v627_v40 = vadd.f32 %v6802_v47, %v621_v24  ;;  %v7149_v6 = vstv %s7038_s29  ;;  %s7767_s29 = sld [smem:[#allocation10 + $0x8f]] }
 0x148   :  { %v6857_v34 = vmax.f32 %v624_v15, 0.0  ;;  %v625_v3 = vadd.f32 %v6802_v47, %v619_v12  ;;  %v7152_v10 = vstv %s7042_s30  ;;  %v7188_v33 = vstv %s7064_s19  ;;  %s7777_s30 = sld [smem:[#allocation10 + $0x90]]  ;;  %s5475_s19 = sld [smem:[#allocation13 + $0x4]] }
 0x149   :  { %v626_v2 = vadd.f32 %v6802_v47, %v620_v25  ;;  %v6872_v56 = vmax.f32 %v627_v40, 0.0  ;;  %v737_v47 = vstv %s5428_s12  ;;  %s7088_s12 = sld [smem:[#allocation10 + $0x8a]]  ;;  %13178 = vst [vmem:[#allocation77_spill] sm:$0xff] %v7188_v33  ;;  %v7199_v39 = vstv %s7066_s20  ;;  %s5493_s20 = sld [smem:[#allocation13 + $0x84]] }
 0x14a   :  { %746 = vrot.lane.b32.xlu0 %v6857_v34, %s6196_s0  ;;  %v6864_v44 = vmax.f32 %v625_v3, 0.0  ;;  %v738_v11 = vadd.f32 %v737_v47, %v732_v63  ;;  %v739_v21 = vadd.f32 %v737_v47, %v733_v27  ;;  %v740_v14 = vadd.f32 %v737_v47, %v734_v60  ;;  %13179 = vst [vmem:[#allocation78_spill] sm:$0xff] %v7199_v39 }
 0x14b   :  { %v6866_v28 = vmax.f32 %v626_v2, 0.0  ;;  %v741_v17 = vadd.f32 %v737_v47, %v735_v20  ;;  %v7070_v20 = vstv %s5446_s9  ;;  %v7078_v27 = vstv %s5429_s4  ;;  %s7141_s9 = sld [smem:[#allocation10 + $0xf]]  ;;  %s7143_s4 = sld [smem:[#allocation10 + $0x10]] }
 0x14c   :  { %748 = vrot.lane.b32.xlu1 %v6864_v44, %s6196_s0  ;;  %v6930_v43 = vmax.f32 %v738_v11, 0.0  ;;  %v6936_v32 = vmax.f32 %v739_v21, 0.0  ;;  %v6938_v59 = vmax.f32 %v740_v14, 0.0  ;;  %v7080_v60 = vstv %s5447_s6  ;;  %s7171_s6 = sld [smem:[#allocation10 + $0x11]] }
 0x14d   :  { %v6944_v48 = vmax.f32 %v741_v17, 0.0  ;;  %v7202_v49 = vstv %s7072_s21  ;;  %s5512_s21 = sld [smem:[#allocation13 + $0x104]] }
 0x14e   :  { %750 = vrot.lane.b32.xlu0 %v6866_v28, %s6196_s0  ;;  %13162 = vst [vmem:[#allocation54_spill] sm:$0xff] %v6936_v32  ;;  %13163 = vst [vmem:[#allocation59_spill] sm:$0xff] %v6938_v59 }
 0x14f   :  { %13164 = vst [vmem:[#allocation60_spill] sm:$0xff] %v6944_v48  ;;  %13180 = vst [vmem:[#allocation79_spill] sm:$0xff] %v7202_v49 }
 0x150   :  { %752 = vrot.lane.b32.xlu1 %v6872_v56, %s6196_s0 }
 0x152   :  { %762 = vrot.lane.b32.xlu0 %v6857_v34, %s6197_s22 }
 0x154   :  { %764 = vrot.lane.b32.xlu1 %v6864_v44, %s6197_s22 }
 0x156   :  { %766 = vrot.lane.b32.xlu0 %v6866_v28, %s6197_s22 }
 0x158   :  { %768 = vrot.lane.b32.xlu1 %v6872_v56, %s6197_s22 }
 0x15a   :  { %778 = vrot.lane.b32.xlu0 %v6857_v34, %s6198_s8 }
 0x15c   :  { %780 = vrot.lane.b32.xlu1 %v6864_v44, %s6198_s8 }
 0x15e   :  { %782 = vrot.lane.b32.xlu0 %v6866_v28, %s6198_s8 }
 0x160   :  { %784 = vrot.lane.b32.xlu1 %v6872_v56, %s6198_s8 }
 0x162   :  { %794 = vrot.lane.b32.xlu0 %v6857_v34, %s6199_s10 }
 0x164   :  { %796 = vrot.lane.b32.xlu1 %v6864_v44, %s6199_s10 }
 0x166   :  { %798 = vrot.lane.b32.xlu0 %v6866_v28, %s6199_s10 }
 0x168   :  { %800 = vrot.lane.b32.xlu1 %v6872_v56, %s6199_s10 }
 0x16a   :  { %810 = vrot.lane.b32.xlu0 %v6857_v34, %s6200_s23 }
 0x16c   :  { %812 = vrot.lane.b32.xlu1 %v6864_v44, %s6200_s23 }
 0x16e   :  { %814 = vrot.lane.b32.xlu0 %v6866_v28, %s6200_s23 }
 0x170   :  { %816 = vrot.lane.b32.xlu1 %v6872_v56, %s6200_s23 }
 0x172   :  { %826 = vrot.lane.b32.xlu0 %v6857_v34, %s6201_s24 }
 0x174   :  { %828 = vrot.lane.b32.xlu1 %v6864_v44, %s6201_s24 }
 0x176   :  { %830 = vrot.lane.b32.xlu0 %v6866_v28, %s6201_s24 }
 0x178   :  { %832 = vrot.lane.b32.xlu1 %v6872_v56, %s6201_s24 }
 0x17a   :  { %842 = vrot.lane.b32.xlu0 %v6857_v34, %s6202_s25 }
 0x17c   :  { %844 = vrot.lane.b32.xlu1 %v6864_v44, %s6202_s25 }
 0x17e   :  { %846 = vrot.lane.b32.xlu0 %v6866_v28, %s6202_s25 }
 0x180   :  { %848 = vrot.lane.b32.xlu1 %v6872_v56, %s6202_s25 }
 0x182   :  { %858 = vrot.lane.b32.xlu0 %v6857_v34, %s6203_s26 }
 0x184   :  { %860 = vrot.lane.b32.xlu1 %v6864_v44, %s6203_s26 }
 0x186   :  { %862 = vrot.lane.b32.xlu0 %v6866_v28, %s6203_s26 }
 0x188   :  { %864 = vrot.lane.b32.xlu1 %v6872_v56, %s6203_s26 }
 0x18a   :  { %874 = vrot.lane.b32.xlu0 %v6930_v43, %s6196_s0 }
 0x18c   :  { %876 = vrot.lane.b32.xlu1 %v6936_v32, %s6196_s0 }
 0x18e   :  { %878 = vrot.lane.b32.xlu0 %v6938_v59, %s6196_s0 }
 0x190   :  { %880 = vrot.lane.b32.xlu1 %v6944_v48, %s6196_s0  ;;  %s5432_s0 = sld [smem:[#allocation10 + $0x4]] }
 0x192   :  { %890 = vrot.lane.b32.xlu0 %v6930_v43, %s6197_s22 }
 0x194   :  { %892 = vrot.lane.b32.xlu1 %v6936_v32, %s6197_s22 }
 0x196   :  { %894 = vrot.lane.b32.xlu0 %v6938_v59, %s6197_s22  ;;  %v1039_v57 = vstv %s5432_s0  ;;  %s7090_s0 = sld [smem:[#allocation10 + $0xb]] }
 0x197   :  { %v7083_v3 = vmul.f32 %v1039_v57, %v6857_v34  ;;  %v7093_v40 = vmul.f32 %v1039_v57, %v6864_v44  ;;  %v7099_v11 = vmul.f32 %v1039_v57, %v6872_v56 }
 0x198   :  { %896 = vrot.lane.b32.xlu1 %v6944_v48, %s6197_s22  ;;  %s5450_s22 = sld [smem:[#allocation10 + $0x84]] }
 0x199   :  { %13166 = vst [vmem:[#allocation65_spill] sm:$0xff] %v7099_v11 }
 0x19a   :  { %906 = vrot.lane.b32.xlu0 %v6930_v43, %s6198_s8 }
 0x19c   :  { %908 = vrot.lane.b32.xlu1 %v6936_v32, %s6198_s8 }
 0x19e   :  { %910 = vrot.lane.b32.xlu0 %v6938_v59, %s6198_s8  ;;  %v1225_v0 = vstv %s5450_s22  ;;  %s7106_s22 = sld [smem:[#allocation10 + $0x8b]] }
 0x19f   :  { %v7086_v2 = vmul.f32 %v1225_v0, %v6857_v34  ;;  %v7096_v47 = vmul.f32 %v1225_v0, %v6864_v44  ;;  %v7102_v21 = vmul.f32 %v1225_v0, %v6872_v56  ;;  %v7111_v34 = vmul.f32 %v1039_v57, %v6866_v28 }
 0x1a0   :  { %912 = vrot.lane.b32.xlu1 %v6944_v48, %s6198_s8  ;;  %s5441_s8 = sld [smem:[#allocation10 + $0xd]]  ;;  %v7114_v44 = vmul.f32 %v1225_v0, %v6866_v28 }
 0x1a1   :  { %13167 = vst [vmem:[#allocation66_spill] sm:$0xff] %v7102_v21 }
 0x1a2   :  { %922 = vrot.lane.b32.xlu0 %v6930_v43, %s6199_s10 }
 0x1a4   :  { %924 = vrot.lane.b32.xlu1 %v6936_v32, %s6199_s10 }
 0x1a6   :  { %926 = vrot.lane.b32.xlu0 %v6938_v59, %s6199_s10  ;;  %v1129_v12 = vstv %s5441_s8  ;;  %s7108_s8 = sld [smem:[#allocation10 + $0xc]] }
 0x1a7   :  { %v7121_v56 = vmul.f32 %v1129_v12, %v6930_v43  ;;  %v7133_v28 = vmul.f32 %v1129_v12, %v6936_v32  ;;  %v7136_v0 = vmul.f32 %v1129_v12, %v6944_v48  ;;  %v7139_v7 = vmul.f32 %v1129_v12, %v6938_v59 }
 0x1a8   :  { %928 = vrot.lane.b32.xlu1 %v6944_v48, %s6199_s10  ;;  %s1002_s10 = sld [smem:[#allocation10]]  ;;  %v7161_v12 = vstv %s7050_s3  ;;  %s13001_s3 = smov 2  }
 0x1a9   :  { %13168 = vst [vmem:[#allocation67_spill] sm:$0xff] %v7121_v56  ;;  %13170 = vst [vmem:[#allocation69_spill] sm:$0xff] %v7133_v28  ;;  %v7182_v28 = vstv %s7058_s17  ;;  %v7185_v56 = vstv %s7060_s18  ;;  %s13009_s17 = smov 96   ;;  %s13005_s18 = smov 94  }
 0x1aa   :  { %938 = vrot.lane.b32.xlu0 %v6930_v43, %s6200_s23  ;;  %13171 = vst [vmem:[#allocation70_spill] sm:$0xff] %v7136_v0  ;;  %13172 = vst [vmem:[#allocation71_spill] sm:$0xff] %v7139_v7 }
 0x1ab   :  { %13173 = vst [vmem:[#allocation72_spill] sm:$0xff] %v7161_v12  ;;  %13176 = vst [vmem:[#allocation75_spill] sm:$0xff] %v7182_v28  ;;  %v7215_v28 = vstv %s7090_s0  ;;  %v7249_v12 = vstv %s7143_s4  ;;  %s5502_s0 = sld [smem:[#allocation13 + $0x8d]]  ;;  %s8069_s4 = sld [smem:[#allocation13 + $0x180]] }
 0x1ac   :  { %940 = vrot.lane.b32.xlu1 %v6936_v32, %s6200_s23  ;;  %13177 = vst [vmem:[#allocation76_spill] sm:$0xff] %v7185_v56  ;;  %v7209_v56 = vstv %s7074_s2  ;;  %13183 = vst [vmem:[#allocation82_spill] sm:$0xff] %v7215_v28  ;;  %s5531_s2 = sld [smem:[#allocation13 + $0x184]] }
 0x1ad   :  { %13181 = vst [vmem:[#allocation80_spill] sm:$0xff] %v7209_v56  ;;  %v7229_v56 = vstv %s7106_s22  ;;  %13194 = vst [vmem:[#allocation89_spill] sm:$0xff] %v7249_v12  ;;  %v7266_v12 = vstv %s7171_s6  ;;  %s5521_s22 = sld [smem:[#allocation13 + $0x10d]]  ;;  %s8071_s6 = sld [smem:[#allocation13 + $0x1]] }
 0x1ae   :  { %942 = vrot.lane.b32.xlu0 %v6938_v59, %s6200_s23  ;;  %v7068_v24 = vstv %s1002_s10  ;;  %s7118_s10 = sld [smem:[#allocation10 + $0x8c]]  ;;  %13185 = vst [vmem:[#allocation83_spill] sm:$0xff] %v7229_v56  ;;  %v13195_v56 = vld [vmem:[#allocation35_spill] sm:$0xff]  ;;  %13198 = vst [vmem:[#allocation91_spill] sm:$0xff] %v7266_v12  ;;  %v13202_v12 = vld [vmem:[#allocation41_spill] sm:$0xff] }
 0x1b0   :  { %944 = vrot.lane.b32.xlu1 %v6944_v48, %s6200_s23 }
 0x1b2   :  { %954 = vrot.lane.b32.xlu0 %v6930_v43, %s6201_s24 }
 0x1b4   :  { %956 = vrot.lane.b32.xlu1 %v6936_v32, %s6201_s24 }
 0x1b6   :  { %958 = vrot.lane.b32.xlu0 %v6938_v59, %s6201_s24 }
 0x1b8   :  { %960 = vrot.lane.b32.xlu1 %v6944_v48, %s6201_s24  ;;  %s5459_s24 = sld [smem:[#allocation10 + $0x8d]] }
 0x1ba   :  { %970 = vrot.lane.b32.xlu0 %v6930_v43, %s6202_s25 }
 0x1bc   :  { %v6990_v36 = vpop.permute.xlu0 %746  ;;  %972 = vrot.lane.b32.xlu1 %v6936_v32, %s6202_s25 }
 0x1be   :  { %974 = vrot.lane.b32.xlu0 %v6938_v59, %s6202_s25  ;;  %v6996_v30 = vpop.permute.xlu1 %748  ;;  %v7076_v25 = vstv %s5459_s24  ;;  %s7123_s24 = sld [smem:[#allocation10 + $0xe]] }
 0x1bf   :  { %13165 = vst [vmem:[#allocation64_spill] sm:$0xff] %v7076_v25  ;;  %v7127_v57 = vmul.f32 %v7076_v25, %v6930_v43  ;;  %v7155_v25 = vstv %s7046_s1  ;;  %v756_v0 = vsel %vm222_vm0, %v6990_v36, %v6996_v30  ;;  %s7788_s1 = sld [smem:[#allocation10 + $0x91]] }
 0x1c0   :  { %v6998_v31 = vpop.permute.xlu0 %750  ;;  %976 = vrot.lane.b32.xlu1 %v6944_v48, %s6202_s25 }
 0x1c1   :  { %13169 = vst [vmem:[#allocation68_spill] sm:$0xff] %v7127_v57  ;;  %v7169_v57 = vstv %s7054_s16  ;;  %v755_v54 = vsel %vm222_vm0, %v6996_v30, %v6998_v31  ;;  %v7212_v30 = vstv %s7088_s12  ;;  %s13011_s16 = smov 98   ;;  %s5484_s12 = sld [smem:[#allocation13 + $0xd]] }
 0x1c2   :  { %986 = vrot.lane.b32.xlu0 %v6930_v43, %s6203_s26  ;;  %v7004_v55 = vpop.permute.xlu1 %752  ;;  %v7146_v43 = vstv %s7036_s28  ;;  %13175 = vst [vmem:[#allocation74_spill] sm:$0xff] %v7169_v57  ;;  %13182 = vst [vmem:[#allocation81_spill] sm:$0xff] %v7212_v30  ;;  %v13184_v57 = vld [vmem:[#allocation36_spill] sm:$0xff]  ;;  %v760_v30 = vmul.f32 %v755_v54, %v13186_v4  ;;  %s7747_s28 = sld [smem:[#allocation10 + $0x8e]] }
 0x1c3   :  { %v757_v33 = vsel %vm222_vm0, %v7004_v55, %v6990_v36  ;;  %v759_v26 = vmul.f32 %v756_v0, %v13184_v57  ;;  %v754_v49 = vsel %vm222_vm0, %v6998_v31, %v7004_v55  ;;  %v7236_v57 = vstv %s7108_s8  ;;  %v13191_v55 = vld [vmem:[#allocation34_spill] sm:$0xff]  ;;  %v13196_v4 = vld [vmem:[#allocation40_spill] sm:$0xff]  ;;  %s1925_s8 = sld [smem:[#allocation13]] }
 0x1c4   :  { %v7006_v22 = vpop.permute.xlu0 %762  ;;  %988 = vrot.lane.b32.xlu1 %v6936_v32, %s6203_s26  ;;  %13189 = vst [vmem:[#allocation85_spill] sm:$0xff] %v7236_v57  ;;  %v7239_v31 = vstv %s7118_s10  ;;  %v7243_v50 = vstv %s7123_s24  ;;  %v761_v54 = vmul.f32 %v754_v49, %v13195_v56  ;;  %v7269_v49 = vstv %s7173_s27  ;;  %s5540_s10 = sld [smem:[#allocation13 + $0x18d]]  ;;  %s5489_s24 = sld [smem:[#allocation13 + $0x80]] }
 0x1c5   :  { %13190 = vst [vmem:[#allocation86_spill] sm:$0xff] %v7239_v31  ;;  %13192 = vst [vmem:[#allocation87_spill] sm:$0xff] %v7243_v50  ;;  %v1005_v31 = vmul.f32 %v7068_v24, %v759_v26  ;;  %s8073_s27 = sld [smem:[#allocation13 + $0x81]] }
 0x1c6   :  { %990 = vrot.lane.b32.xlu0 %v6938_v59, %s6203_s26  ;;  %v7012_v37 = vpop.permute.xlu1 %764  ;;  %v7164_v59 = vstv %s7052_s5  ;;  %13199 = vst [vmem:[#allocation92_spill] sm:$0xff] %v7269_v49  ;;  %s13007_s5 = smov 126  }
 0x1c7   :  { %13174 = vst [vmem:[#allocation73_spill] sm:$0xff] %v7164_v59  ;;  %v772_v58 = vsel %vm260_vm1, %v7006_v22, %v7012_v37  ;;  %v758_v59 = vmul.f32 %v757_v33, %v13191_v55  ;;  %v1007_v55 = vmul.f32 %v7068_v24, %v761_v54 }
 0x1c8   :  { %v7014_v8 = vpop.permute.xlu0 %766  ;;  %992 = vrot.lane.b32.xlu1 %v6944_v48, %s6203_s26  ;;  %v7158_v48 = vstv %s7048_s11  ;;  %v775_v28 = vmul.f32 %v772_v58, %v13187_v35  ;;  %s5464_s11 = sld [smem:[#allocation11 + $0x1]] }
 0x1c9   :  { %v771_v36 = vsel %vm260_vm1, %v7012_v37, %v7014_v8  ;;  %v7246_v37 = vstv %s7141_s9  ;;  %s5508_s9 = sld [smem:[#allocation13 + $0x100]] }
 0x1ca   :  { %v7018_v5 = vpop.permute.xlu1 %768  ;;  %13193 = vst [vmem:[#allocation88_spill] sm:$0xff] %v7246_v37  ;;  %v776_v41 = vmul.f32 %v771_v36, %v13196_v4  ;;  %v1191_v37 = vmul.f32 %v7070_v20, %v759_v26  ;;  %v1006_v36 = vmul.f32 %v7068_v24, %v760_v30  ;;  %v1011_v57 = vmul.f32 %v7078_v27, %v775_v28  ;;  %v13201_v4 = vld [vmem:[#allocation39_spill] sm:$0xff] }
 0x1cb   :  { %v770_v58 = vsel %vm260_vm1, %v7014_v8, %v7018_v5  ;;  %v773_v33 = vsel %vm260_vm1, %v7018_v5, %v7006_v22  ;;  %v1197_v8 = vmul.f32 %v7080_v60, %v775_v28  ;;  %v1192_v26 = vmul.f32 %v7070_v20, %v760_v30  ;;  %v13203_v30 = vld [vmem:[#allocation42_spill] sm:$0xff] }
 0x1cc   :  { %v7020_v62 = vpop.permute.xlu0 %778  ;;  %v774_v35 = vmul.f32 %v773_v33, %v13201_v4  ;;  %v777_v56 = vmul.f32 %v770_v58, %v13202_v12  ;;  %v1004_v28 = vmul.f32 %v7068_v24, %v758_v59  ;;  %v1015_v24 = vadd.f32 %v1011_v57, %v1005_v31  ;;  %v13205_v4 = vld [vmem:[#allocation44_spill] sm:$0xff]  ;;  %v13207_v57 = vld [vmem:[#allocation43_spill] sm:$0xff] }
 0x1cd   :  { %v1201_v12 = vadd.f32 %v1197_v8, %v1191_v37  ;;  %v13208_v37 = vld [vmem:[#allocation46_spill] sm:$0xff] }
 0x1ce   :  { %v7022_v23 = vpop.permute.xlu1 %780 }
 0x1cf   :  { %v788_v22 = vsel %vm298_vm2, %v7020_v62, %v7022_v23 }
 0x1d0   :  { %v7024_v29 = vpop.permute.xlu0 %782  ;;  %v791_v21 = vmul.f32 %v788_v22, %v13203_v30  ;;  %v1010_v22 = vmul.f32 %v7078_v27, %v774_v35  ;;  %v1013_v30 = vmul.f32 %v7078_v27, %v777_v56 }
 0x1d1   :  { %v787_v49 = vsel %vm298_vm2, %v7022_v23, %v7024_v29 }
 0x1d2   :  { %v7026_v52 = vpop.permute.xlu1 %784 }
 0x1d3   :  { %v789_v58 = vsel %vm298_vm2, %v7026_v52, %v7020_v62  ;;  %v1196_v62 = vmul.f32 %v7080_v60, %v774_v35  ;;  %v1021_v35 = vmul.f32 %v7130_v9, %v791_v21 }
 0x1d4   :  { %v7028_v61 = vpop.permute.xlu0 %794  ;;  %v790_v31 = vmul.f32 %v789_v58, %v13207_v57  ;;  %v13212_v57 = vld [vmem:[#allocation48_spill] sm:$0xff] }
 0x1d6   :  { %v7030_v63 = vpop.permute.xlu1 %796 }
 0x1d7   :  { %v804_v23 = vsel %vm336_vm3, %v7028_v61, %v7030_v63 }
 0x1d8   :  { %v7032_v13 = vpop.permute.xlu0 %798 }
 0x1da   :  { %v7040_v45 = vpop.permute.xlu1 %800 }
 0x1db   :  { %v805_v11 = vsel %vm336_vm3, %v7040_v45, %v7028_v61  ;;  %v803_v61 = vsel %vm336_vm3, %v7030_v63, %v7032_v13 }
 0x1dc   :  { %v7044_v51 = vpop.permute.xlu0 %810 }
 0x1de   :  { %v7056_v53 = vpop.permute.xlu1 %812 }
 0x1e0   :  { %v7062_v15 = vpop.permute.xlu0 %814 }
 0x1e2   :  { %v7104_v14 = vpop.permute.xlu1 %816 }
 0x1e4   :  { %v7116_v17 = vpop.permute.xlu0 %826 }
 0x1e6   :  { %v7166_v32 = vpop.permute.xlu1 %828 }
 0x1e8   :  { %v7179_v7 = vpop.permute.xlu0 %830 }
 0x1ea   :  { %v7226_v39 = vpop.permute.xlu1 %832 }
 0x1ec   :  { %v7233_v0 = vpop.permute.xlu0 %842 }
 0x1ed   :  { %13188 = vst [vmem:[#allocation84_spill] sm:$0xff] %v7233_v0  ;;  %v1190_v0 = vmul.f32 %v7070_v20, %v758_v59  ;;  %v1193_v59 = vmul.f32 %v7070_v20, %v761_v54  ;;  %v786_v20 = vsel %vm298_vm2, %v7024_v29, %v7026_v52  ;;  %v807_v54 = vmul.f32 %v804_v23, %v13208_v37  ;;  %v13211_v23 = vld [vmem:[#allocation45_spill] sm:$0xff] }
 0x1ee   :  { %v7263_v50 = vpop.permute.xlu1 %844  ;;  %v802_v29 = vsel %vm336_vm3, %v7032_v13, %v7040_v45  ;;  %v793_v63 = vmul.f32 %v786_v20, %v13211_v23  ;;  %v1206_v13 = vmul.f32 %v7146_v43, %v790_v31  ;;  %v820_v20 = vsel %vm374_vm4, %v7044_v51, %v7056_v53 }
 0x1ef   :  { %13197 = vst [vmem:[#allocation90_spill] sm:$0xff] %v7263_v50  ;;  %v1012_v50 = vmul.f32 %v7078_v27, %v776_v41  ;;  %v1200_v58 = vadd.f32 %v1196_v62, %v1190_v0  ;;  %v1217_v45 = vmul.f32 %v7152_v10, %v807_v54  ;;  %v1025_v0 = vadd.f32 %v1021_v35, %v1015_v24 }
 0x1f0   :  { %v7278_v5 = vpop.permute.xlu0 %846  ;;  %v1209_v62 = vmul.f32 %v7146_v43, %v793_v63 }
 0x1f1   :  { %13200 = vst [vmem:[#allocation93_spill] sm:$0xff] %v7278_v5  ;;  %v1198_v5 = vmul.f32 %v7080_v60, %v776_v41  ;;  %v792_v41 = vmul.f32 %v787_v49, %v13205_v4  ;;  %v1016_v49 = vadd.f32 %v1012_v50, %v1006_v36  ;;  %v13210_v50 = vld [vmem:[#allocation47_spill] sm:$0xff]  ;;  %v1020_v4 = vmul.f32 %v7130_v9, %v790_v31 }
 0x1f2   :  { %v7301_v33 = vpop.permute.xlu1 %848  ;;  %v806_v52 = vmul.f32 %v805_v11, %v13210_v50  ;;  %v13213_v11 = vld [vmem:[#allocation49_spill] sm:$0xff]  ;;  %v1210_v35 = vadd.f32 %v1206_v13, %v1200_v58 }
 0x1f3   :  { %13204 = vst [vmem:[#allocation94_spill] sm:$0xff] %v7301_v33  ;;  %v1199_v33 = vmul.f32 %v7080_v60, %v777_v56  ;;  %v1202_v27 = vadd.f32 %v1198_v5, %v1192_v26  ;;  %v1207_v60 = vmul.f32 %v7146_v43, %v791_v21  ;;  %v1022_v56 = vmul.f32 %v7130_v9, %v792_v41 }
 0x1f4   :  { %v7305_v42 = vpop.permute.xlu0 %858  ;;  %v1014_v5 = vadd.f32 %v1010_v22, %v1004_v28  ;;  %v1017_v26 = vadd.f32 %v1013_v30, %v1007_v55  ;;  %v1031_v21 = vmul.f32 %v7149_v6, %v807_v54  ;;  %v809_v50 = vmul.f32 %v802_v29, %v13213_v11 }
 0x1f5   :  { %13206 = vst [vmem:[#allocation95_spill] sm:$0xff] %v7305_v42  ;;  %v1203_v37 = vadd.f32 %v1199_v33, %v1193_v59  ;;  %v808_v42 = vmul.f32 %v803_v61, %v13212_v57  ;;  %v1211_v55 = vadd.f32 %v1207_v60, %v1201_v12  ;;  %v1026_v30 = vadd.f32 %v1022_v56, %v1016_v49 }
 0x1f6   :  { %v7326_v8 = vpop.permute.xlu1 %860  ;;  %v1030_v33 = vmul.f32 %v7149_v6, %v806_v52  ;;  %v1023_v22 = vmul.f32 %v7130_v9, %v793_v63  ;;  %v1024_v31 = vadd.f32 %v1020_v4, %v1014_v5  ;;  %v1035_v54 = vadd.f32 %v1031_v21, %v1025_v0 }
 0x1f7   :  { %13209 = vst [vmem:[#allocation96_spill] sm:$0xff] %v7326_v8  ;;  %v1208_v8 = vmul.f32 %v7146_v43, %v792_v41  ;;  %v1216_v41 = vmul.f32 %v7152_v10, %v806_v52  ;;  %v1032_v12 = vmul.f32 %v7149_v6, %v808_v42  ;;  %v1218_v24 = vmul.f32 %v7152_v10, %v808_v42 }
 0x1f8   :  { %v7335_v36 = vpop.permute.xlu0 %862  ;;  %v1221_v61 = vadd.f32 %v1217_v45, %v1211_v55  ;;  %v1033_v9 = vmul.f32 %v7149_v6, %v809_v50  ;;  %v1034_v43 = vadd.f32 %v1030_v33, %v1024_v31  ;;  %v822_v56 = vmul.f32 %v820_v20, %v6557_v46  ;;  %v13214_v20 = vld [vmem:[#allocation65_spill] sm:$0xff] }
 0x1f9   :  { %v1212_v49 = vadd.f32 %v1208_v8, %v1202_v27  ;;  %v819_v4 = vsel %vm374_vm4, %v7056_v53, %v7062_v15  ;;  %v818_v42 = vsel %vm374_vm4, %v7062_v15, %v7104_v14  ;;  %v1027_v8 = vadd.f32 %v1023_v22, %v1017_v26 }
 0x1fa   :  { %v7345_v28 = vpop.permute.xlu1 %864  ;;  %v1219_v6 = vmul.f32 %v7152_v10, %v809_v50  ;;  %v1220_v29 = vadd.f32 %v1216_v41, %v1210_v35  ;;  %v821_v52 = vsel %vm374_vm4, %v7104_v14, %v7044_v51  ;;  %v1213_v5 = vadd.f32 %v1209_v62, %v1203_v37  ;;  %v13216_v35 = vld [vmem:[#allocation66_spill] sm:$0xff] }
 0x1fb   :  { %v1036_v58 = vadd.f32 %v1032_v12, %v1026_v30  ;;  %v1222_v63 = vadd.f32 %v1218_v24, %v1212_v49  ;;  %v1045_v53 = vadd.f32 %v7093_v40, %v1035_v54  ;;  %v1231_v21 = vadd.f32 %v7096_v47, %v1221_v61  ;;  %v13215_v12 = vld [vmem:[#allocation51_spill] sm:$0xff] }
 0x1fc   :  { %v7348_v59 = vpop.permute.xlu0 %874  ;;  %v823_v15 = vmul.f32 %v819_v4, %v6611_v1  ;;  %v824_v13 = vmul.f32 %v818_v42, %v6622_v19  ;;  %v836_v10 = vsel %vm412_vm5, %v7116_v17, %v7166_v32  ;;  %v1037_v26 = vadd.f32 %v1033_v9, %v1027_v8  ;;  %v13219_v42 = vld [vmem:[#allocation50_spill] sm:$0xff] }
 0x1fd   :  { %v1044_v51 = vadd.f32 %v7083_v3, %v1034_v43  ;;  %v1050_v14 = vmul.f32 %v7155_v25, %v822_v56  ;;  %v825_v40 = vmul.f32 %v821_v52, %v6608_v18  ;;  %v1223_v47 = vadd.f32 %v1219_v6, %v1213_v5  ;;  %v13217_v43 = vld [vmem:[#allocation52_spill] sm:$0xff]  ;;  %v13220_v6 = vld [vmem:[#allocation90_spill] sm:$0xff] }
 0x1fe   :  { %v7360_v60 = vpop.permute.xlu1 %876  ;;  %v1230_v45 = vadd.f32 %v7086_v2, %v1220_v29  ;;  %v1236_v0 = vmul.f32 %v7158_v48, %v822_v56  ;;  %v835_v55 = vsel %vm412_vm5, %v7166_v32, %v7179_v7  ;;  %v1046_v30 = vadd.f32 %v7111_v34, %v1036_v58  ;;  %v13221_v29 = vld [vmem:[#allocation84_spill] sm:$0xff] }
 0x1ff   :  { %v1232_v3 = vadd.f32 %v7114_v44, %v1222_v63  ;;  %v838_v33 = vmul.f32 %v836_v10, %v6625_v38  ;;  %v834_v22 = vsel %vm412_vm5, %v7179_v7, %v7226_v39  ;;  %v1051_v2 = vmul.f32 %v7155_v25, %v823_v15  ;;  %v13222_v63 = vld [vmem:[#allocation73_spill] sm:$0xff] }
 0x200   :  { %v7371_v27 = vpop.permute.xlu0 %878  ;;  %v1237_v62 = vmul.f32 %v7158_v48, %v823_v15  ;;  %v1052_v41 = vmul.f32 %v7155_v25, %v824_v13  ;;  %v837_v32 = vsel %vm412_vm5, %v7226_v39, %v7116_v17  ;;  %v1054_v44 = vadd.f32 %v1050_v14, %v1044_v51  ;;  %v13218_v17 = vld [vmem:[#allocation72_spill] sm:$0xff]  ;;  %v13223_v51 = vld [vmem:[#allocation93_spill] sm:$0xff] }
 0x201   :  { %v1047_v31 = vadd.f32 %v13214_v20, %v1037_v26  ;;  %v1053_v54 = vmul.f32 %v7155_v25, %v825_v40  ;;  %v839_v7 = vmul.f32 %v835_v55, %v13215_v12  ;;  %v1240_v49 = vadd.f32 %v1236_v0, %v1230_v45  ;;  %v13225_v0 = vld [vmem:[#allocation94_spill] sm:$0xff]  ;;  %v13227_v20 = vld [vmem:[#allocation96_spill] sm:$0xff] }
 0x202   :  { %v7386_v50 = vpop.permute.xlu1 %880  ;;  %v1233_v61 = vadd.f32 %v13216_v35, %v1223_v47  ;;  %v1238_v9 = vmul.f32 %v7158_v48, %v824_v13  ;;  %v840_v56 = vmul.f32 %v834_v22, %v13217_v43  ;;  %v1239_v39 = vmul.f32 %v7158_v48, %v825_v40 }
 0x203   :  { %v1060_v4 = vmul.f32 %v13218_v17, %v838_v33  ;;  %v841_v8 = vmul.f32 %v837_v32, %v13219_v42  ;;  %v852_v25 = vsel %vm450_vm6, %v13221_v29, %v13220_v6  ;;  %v1055_v52 = vadd.f32 %v1051_v2, %v1045_v53 }
 0x204   :  { %v7391_v37 = vpop.permute.xlu0 %890  ;;  %v1241_v5 = vadd.f32 %v1237_v62, %v1231_v21  ;;  %v1056_v58 = vadd.f32 %v1052_v41, %v1046_v30  ;;  %v1246_v15 = vmul.f32 %v13222_v63, %v838_v33  ;;  %v1057_v13 = vadd.f32 %v1053_v54, %v1047_v31  ;;  %v13224_v21 = vld [vmem:[#allocation53_spill] sm:$0xff]  ;;  %v13226_v41 = vld [vmem:[#allocation56_spill] sm:$0xff]  ;;  %v13228_v31 = vld [vmem:[#allocation95_spill] sm:$0xff] }
 0x205   :  { %v1061_v26 = vmul.f32 %v13218_v17, %v839_v7  ;;  %v1247_v48 = vmul.f32 %v13222_v63, %v839_v7  ;;  %v851_v14 = vsel %vm450_vm6, %v13220_v6, %v13223_v51  ;;  %v1242_v47 = vadd.f32 %v1238_v9, %v1232_v3  ;;  %v13229_v9 = vld [vmem:[#allocation57_spill] sm:$0xff]  ;;  %v13231_v6 = vld [vmem:[#allocation55_spill] sm:$0xff] }
 0x206   :  { %v7413_v34 = vpop.permute.xlu1 %892  ;;  %v1062_v53 = vmul.f32 %v13218_v17, %v840_v56  ;;  %v854_v45 = vmul.f32 %v852_v25, %v13224_v21  ;;  %v850_v55 = vsel %vm450_vm6, %v13223_v51, %v13225_v0  ;;  %v1243_v30 = vadd.f32 %v1239_v39, %v1233_v61  ;;  %v13232_v51 = vld [vmem:[#allocation58_spill] sm:$0xff] }
 0x207   :  { %v1064_v33 = vadd.f32 %v1060_v4, %v1054_v44  ;;  %v1063_v22 = vmul.f32 %v13218_v17, %v841_v8  ;;  %v853_v2 = vsel %vm450_vm6, %v13225_v0, %v13221_v29  ;;  %v1250_v62 = vadd.f32 %v1246_v15, %v1240_v49  ;;  %v13230_v4 = vld [vmem:[#allocation74_spill] sm:$0xff] }
 0x208   :  { %v7418_v24 = vpop.permute.xlu0 %894  ;;  %v1248_v3 = vmul.f32 %v13222_v63, %v840_v56  ;;  %v855_v32 = vmul.f32 %v851_v14, %v13226_v41  ;;  %v868_v54 = vsel %vm488_vm7, %v13228_v31, %v13227_v20  ;;  %v1065_v44 = vadd.f32 %v1061_v26, %v1055_v52 }
 0x209   :  { %v1251_v35 = vadd.f32 %v1247_v48, %v1241_v5  ;;  %v1249_v61 = vmul.f32 %v13222_v63, %v841_v8  ;;  %v856_v39 = vmul.f32 %v850_v55, %v13229_v9  ;;  %v1066_v49 = vadd.f32 %v1062_v53, %v1056_v58  ;;  %v13233_v63 = vld [vmem:[#allocation75_spill] sm:$0xff]  ;;  %v13234_v55 = vld [vmem:[#allocation62_spill] sm:$0xff] }
 0x20a   :  { %v7431_v10 = vpop.permute.xlu1 %896  ;;  %v1070_v56 = vmul.f32 %v13230_v4, %v854_v45  ;;  %v857_v29 = vmul.f32 %v853_v2, %v13231_v6  ;;  %v867_v25 = vsel %vm488_vm7, %v13227_v20, %v7335_v36  ;;  %v1067_v15 = vadd.f32 %v1063_v22, %v1057_v13  ;;  %v13235_v2 = vld [vmem:[#allocation63_spill] sm:$0xff] }
 0x20b   :  { %v870_v52 = vmul.f32 %v868_v54, %v13232_v51  ;;  %v866_v8 = vsel %vm488_vm7, %v7335_v36, %v7345_v28  ;;  %v869_v5 = vsel %vm488_vm7, %v7345_v28, %v13228_v31  ;;  %v1252_v58 = vadd.f32 %v1248_v3, %v1242_v47  ;;  %v13237_v54 = vld [vmem:[#allocation76_spill] sm:$0xff] }
 0x20c   :  { %v7439_v40 = vpop.permute.xlu0 %906  ;;  %v1256_v26 = vmul.f32 %v13233_v63, %v854_v45  ;;  %v1071_v48 = vmul.f32 %v13230_v4, %v855_v32  ;;  %v1257_v14 = vmul.f32 %v13233_v63, %v855_v32  ;;  %v1253_v53 = vadd.f32 %v1249_v61, %v1243_v30  ;;  %v13236_v32 = vld [vmem:[#allocation61_spill] sm:$0xff] }
 0x20d   :  { %v1072_v0 = vmul.f32 %v13230_v4, %v856_v39  ;;  %v871_v22 = vmul.f32 %v867_v25, %v13234_v55  ;;  %v884_v36 = vsel %vm222_vm0, %v7348_v59, %v7360_v60  ;;  %v1074_v47 = vadd.f32 %v1070_v56, %v1064_v33  ;;  %v13238_v56 = vld [vmem:[#allocation36_spill] sm:$0xff] }
 0x20e   :  { %v7458_v7 = vpop.permute.xlu1 %908  ;;  %v1073_v45 = vmul.f32 %v13230_v4, %v857_v29  ;;  %v872_v3 = vmul.f32 %v866_v8, %v13235_v2  ;;  %v873_v20 = vmul.f32 %v869_v5, %v13236_v32  ;;  %v1258_v30 = vmul.f32 %v13233_v63, %v856_v39  ;;  %v13239_v5 = vld [vmem:[#allocation77_spill] sm:$0xff] }
 0x20f   :  { %v1259_v31 = vmul.f32 %v13233_v63, %v857_v29  ;;  %v1080_v61 = vmul.f32 %v13237_v54, %v870_v52  ;;  %v883_v25 = vsel %vm222_vm0, %v7360_v60, %v7371_v27  ;;  %v1260_v55 = vadd.f32 %v1256_v26, %v1250_v62  ;;  %v13240_v60 = vld [vmem:[#allocation37_spill] sm:$0xff] }
 0x210   :  { %v7462_v17 = vpop.permute.xlu0 %910  ;;  %v1075_v51 = vadd.f32 %v1071_v48, %v1065_v44  ;;  %v1261_v33 = vadd.f32 %v1257_v14, %v1251_v35  ;;  %v887_v4 = vmul.f32 %v884_v36, %v13238_v56  ;;  %v1076_v8 = vadd.f32 %v1072_v0, %v1066_v49  ;;  %v13241_v0 = vld [vmem:[#allocation78_spill] sm:$0xff] }
 0x211   :  { %v1266_v32 = vmul.f32 %v13239_v5, %v870_v52  ;;  %v1081_v39 = vmul.f32 %v13237_v54, %v871_v22  ;;  %v1267_v29 = vmul.f32 %v13239_v5, %v871_v22  ;;  %v1082_v2 = vmul.f32 %v13237_v54, %v872_v3 }
 0x212   :  { %v7482_v13 = vpop.permute.xlu1 %912  ;;  %v1083_v9 = vmul.f32 %v13237_v54, %v873_v20  ;;  %v888_v62 = vmul.f32 %v883_v25, %v13240_v60  ;;  %v885_v44 = vsel %vm222_vm0, %v7386_v50, %v7348_v59  ;;  %v1077_v35 = vadd.f32 %v1073_v45, %v1067_v15  ;;  %v13242_v60 = vld [vmem:[#allocation79_spill] sm:$0xff]  ;;  %v13243_v15 = vld [vmem:[#allocation34_spill] sm:$0xff] }
 0x213   :  { %v1262_v49 = vadd.f32 %v1258_v30, %v1252_v58  ;;  %v1263_v26 = vadd.f32 %v1259_v31, %v1253_v53  ;;  %v1084_v52 = vadd.f32 %v1080_v61, %v1074_v47  ;;  %v1268_v48 = vmul.f32 %v13239_v5, %v872_v3  ;;  %v13244_v31 = vld [vmem:[#allocation35_spill] sm:$0xff] }
 0x214   :  { %v7490_v28 = vpop.permute.xlu0 %922  ;;  %v1269_v14 = vmul.f32 %v13239_v5, %v873_v20  ;;  %v1091_v22 = vmul.f32 %v13241_v0, %v887_v4  ;;  %v882_v36 = vsel %vm222_vm0, %v7371_v27, %v7386_v50  ;;  %v1270_v25 = vadd.f32 %v1266_v32, %v1260_v55 }
 0x215   :  { %v1085_v56 = vadd.f32 %v1081_v39, %v1075_v51  ;;  %v1277_v59 = vmul.f32 %v13242_v60, %v887_v4  ;;  %v886_v58 = vmul.f32 %v885_v44, %v13243_v15  ;;  %v1271_v47 = vadd.f32 %v1267_v29, %v1261_v33  ;;  %v13245_v29 = vld [vmem:[#allocation38_spill] sm:$0xff] }
 0x216   :  { %v7503_v6 = vpop.permute.xlu1 %924  ;;  %v1086_v45 = vadd.f32 %v1082_v2, %v1076_v8  ;;  %v1087_v3 = vadd.f32 %v1083_v9, %v1077_v35  ;;  %v1092_v20 = vmul.f32 %v13241_v0, %v888_v62  ;;  %v1278_v30 = vmul.f32 %v13242_v60, %v888_v62 }
 0x217   :  { %v889_v61 = vmul.f32 %v882_v36, %v13244_v31  ;;  %v900_v27 = vsel %vm260_vm1, %v7391_v37, %v7413_v34  ;;  %v901_v50 = vsel %vm260_vm1, %v7431_v10, %v7391_v37  ;;  %v1272_v51 = vadd.f32 %v1268_v48, %v1262_v49  ;;  %v13249_v36 = vld [vmem:[#allocation42_spill] sm:$0xff]  ;;  %v13251_v31 = vld [vmem:[#allocation80_spill] sm:$0xff] }
 0x218   :  { %v927_v63 = vpop.permute.xlu0 %926  ;;  %v1273_v55 = vadd.f32 %v1269_v14, %v1263_v26  ;;  %v1095_v2 = vadd.f32 %v1091_v22, %v1085_v56  ;;  %v899_v9 = vsel %vm260_vm1, %v7413_v34, %v7418_v24  ;;  %v7541_v33 = vadd.f32 %v1277_v59, %v1271_v47  ;;  %v13246_v34 = vld [vmem:[#allocation39_spill] sm:$0xff]  ;;  %v13248_v14 = vld [vmem:[#allocation41_spill] sm:$0xff] }
 0x219   :  { %v1090_v4 = vmul.f32 %v13241_v0, %v886_v58  ;;  %v898_v8 = vsel %vm260_vm1, %v7418_v24, %v7431_v10  ;;  %v916_v37 = vsel %vm298_vm2, %v7439_v40, %v7458_v7  ;;  %v1096_v39 = vadd.f32 %v1092_v20, %v1086_v45  ;;  %v13247_v10 = vld [vmem:[#allocation40_spill] sm:$0xff]  ;;  %v13250_v45 = vld [vmem:[#allocation43_spill] sm:$0xff] }
 0x21a   :  { %v929_v54 = vpop.permute.xlu1 %928  ;;  %v903_v62 = vmul.f32 %v900_v27, %v13245_v29  ;;  %v902_v44 = vmul.f32 %v901_v50, %v13246_v34  ;;  %v917_v35 = vsel %vm298_vm2, %v7482_v13, %v7439_v40  ;;  %v7558_v49 = vadd.f32 %v1278_v30, %v1272_v51  ;;  %v13252_v51 = vld [vmem:[#allocation44_spill] sm:$0xff] }
 0x21b   :  { %v1093_v24 = vmul.f32 %v13241_v0, %v889_v61  ;;  %v7562_v26 = vmul.f32 %v899_v9, %v13247_v10  ;;  %v915_v48 = vsel %vm298_vm2, %v7458_v7, %v7462_v17  ;;  %v7569_v22 = vmul.f32 %v898_v8, %v13248_v14 }
 0x21c   :  { %v7524_v53 = vpop.permute.xlu0 %938  ;;  %v7572_v56 = vmul.f32 %v916_v37, %v13249_v36  ;;  %v914_v40 = vsel %vm298_vm2, %v7462_v17, %v7482_v13  ;;  %v933_v0 = vsel %vm336_vm3, %v929_v54, %v7490_v28  ;;  %v1094_v15 = vadd.f32 %v1090_v4, %v1084_v52 }
 0x21d   :  { %v1276_v47 = vmul.f32 %v13242_v60, %v886_v58  ;;  %v1279_v7 = vmul.f32 %v13242_v60, %v889_v61  ;;  %v918_v20 = vmul.f32 %v917_v35, %v13250_v45  ;;  %v1101_v27 = vmul.f32 %v13251_v31, %v903_v62  ;;  %v13253_v58 = vld [vmem:[#allocation47_spill] sm:$0xff] }
 0x21e   :  { %v941_v32 = vpop.permute.xlu1 %940  ;;  %v1100_v50 = vmul.f32 %v13251_v31, %v902_v44  ;;  %v7587_v9 = vmul.f32 %v915_v48, %v13252_v51  ;;  %v932_v17 = vsel %vm336_vm3, %v7490_v28, %v7503_v6  ;;  %v7594_v13 = vmul.f32 %v914_v40, %v13211_v23  ;;  %v13254_v23 = vld [vmem:[#allocation82_spill] sm:$0xff] }
 0x21f   :  { %v931_v52 = vsel %vm336_vm3, %v7503_v6, %v927_v63  ;;  %v930_v60 = vsel %vm336_vm3, %v927_v63, %v929_v54  ;;  %v7602_v61 = vmul.f32 %v933_v0, %v13253_v58  ;;  %v1097_v4 = vadd.f32 %v1093_v24, %v1087_v3  ;;  %v13255_v54 = vld [vmem:[#allocation46_spill] sm:$0xff]  ;;  %v13257_v0 = vld [vmem:[#allocation85_spill] sm:$0xff] }
 0x220   :  { %v943_v5 = vpop.permute.xlu0 %942  ;;  %v1102_v8 = vmul.f32 %v13251_v31, %v7562_v26  ;;  %v1103_v28 = vmul.f32 %v13251_v31, %v7569_v22  ;;  %v1111_v37 = vmul.f32 %v13254_v23, %v7572_v56  ;;  %v7610_v34 = vadd.f32 %v1276_v47, %v1270_v25  ;;  %v13256_v25 = vld [vmem:[#allocation81_spill] sm:$0xff] }
 0x221   :  { %v7612_v6 = vadd.f32 %v1279_v7, %v1273_v55  ;;  %v1110_v63 = vmul.f32 %v13254_v23, %v918_v20  ;;  %v7616_v35 = vmul.f32 %v932_v17, %v13255_v54  ;;  %v1105_v24 = vadd.f32 %v1101_v27, %v1095_v2 }
 0x222   :  { %v945_v59 = vpop.permute.xlu1 %944  ;;  %v1112_v10 = vmul.f32 %v13254_v23, %v7587_v9  ;;  %v7621_v48 = vmul.f32 %v931_v52, %v13212_v57  ;;  %v7624_v14 = vmul.f32 %v930_v60, %v13213_v11  ;;  %v7627_v36 = vmul.f32 %v13256_v25, %v903_v62 }
 0x223   :  { %v1104_v55 = vadd.f32 %v1100_v50, %v1094_v15  ;;  %v1113_v40 = vmul.f32 %v13254_v23, %v7594_v13  ;;  %v1120_v47 = vmul.f32 %v13257_v0, %v7602_v61  ;;  %v1106_v2 = vadd.f32 %v1102_v8, %v1096_v39 }
 0x224   :  { %v955_v30 = vpop.permute.xlu0 %954  ;;  %v1107_v7 = vadd.f32 %v1103_v28, %v1097_v4  ;;  %v7634_v45 = vmul.f32 %v13256_v25, %v902_v44  ;;  %v1115_v57 = vadd.f32 %v1111_v37, %v1105_v24  ;;  %v1121_v11 = vmul.f32 %v13257_v0, %v7616_v35  ;;  %v13258_v37 = vld [vmem:[#allocation83_spill] sm:$0xff] }
 0x225   :  { %v1114_v27 = vadd.f32 %v1110_v63, %v1104_v55  ;;  %v948_v62 = vsel %vm374_vm4, %v7524_v53, %v941_v32  ;;  %v947_v15 = vsel %vm374_vm4, %v941_v32, %v943_v5  ;;  %v1116_v51 = vadd.f32 %v1112_v10, %v1106_v2 }
 0x226   :  { %v957_v29 = vpop.permute.xlu1 %956  ;;  %v1122_v39 = vmul.f32 %v13257_v0, %v7621_v48  ;;  %v1123_v44 = vmul.f32 %v13257_v0, %v7624_v14  ;;  %v946_v17 = vsel %vm374_vm4, %v943_v5, %v945_v59  ;;  %v1117_v52 = vadd.f32 %v1113_v40, %v1107_v7  ;;  %v13259_v40 = vld [vmem:[#allocation67_spill] sm:$0xff] }
 0x227   :  { %v1124_v60 = vadd.f32 %v1120_v47, %v1114_v27  ;;  %v949_v58 = vsel %vm374_vm4, %v945_v59, %v7524_v53  ;;  %v964_v32 = vsel %vm412_vm5, %v955_v30, %v957_v29  ;;  %v7655_v4 = vmul.f32 %v948_v62, %v6557_v46  ;;  %v13261_v27 = vld [vmem:[#allocation69_spill] sm:$0xff]  ;;  %v13262_v62 = vld [vmem:[#allocation71_spill] sm:$0xff] }
 0x228   :  { %v959_v3 = vpop.permute.xlu0 %958  ;;  %v7658_v8 = vmul.f32 %v947_v15, %v6611_v1  ;;  %v7665_v63 = vmul.f32 %v13258_v37, %v918_v20  ;;  %v1125_v53 = vadd.f32 %v1121_v11, %v1115_v57  ;;  %v7668_v59 = vmul.f32 %v946_v17, %v6622_v19 }
 0x229   :  { %v963_v28 = vsel %vm412_vm5, %v957_v29, %v959_v3  ;;  %v1126_v1 = vadd.f32 %v1122_v39, %v1116_v51  ;;  %v1127_v24 = vadd.f32 %v1123_v44, %v1117_v52  ;;  %v7673_v10 = vmul.f32 %v949_v58, %v6608_v18  ;;  %v13260_v18 = vld [vmem:[#allocation87_spill] sm:$0xff]  ;;  %v13264_v44 = vld [vmem:[#allocation70_spill] sm:$0xff]  ;;  %v13265_v58 = vld [vmem:[#allocation89_spill] sm:$0xff] }
 0x22a   :  { %v961_v31 = vpop.permute.xlu1 %960  ;;  %v7676_v29 = vmul.f32 %v964_v32, %v6625_v38  ;;  %v1134_v0 = vadd.f32 %v13259_v40, %v1124_v60  ;;  %v1140_v47 = vmul.f32 %v13260_v18, %v7655_v4  ;;  %v1141_v38 = vmul.f32 %v13260_v18, %v7658_v8 }
 0x22b   :  { %v962_v5 = vsel %vm412_vm5, %v959_v3, %v961_v31  ;;  %v7679_v3 = vmul.f32 %v963_v28, %v13215_v12  ;;  %v965_v20 = vsel %vm412_vm5, %v961_v31, %v955_v30  ;;  %v1142_v30 = vmul.f32 %v13260_v18, %v7668_v59  ;;  %v13266_v28 = vld [vmem:[#allocation57_spill] sm:$0xff] }
 0x22c   :  { %v971_v50 = vpop.permute.xlu0 %970  ;;  %v7684_v19 = vmul.f32 %v962_v5, %v13217_v43  ;;  %v1135_v11 = vadd.f32 %v13261_v27, %v1125_v53  ;;  %v1136_v15 = vadd.f32 %v13262_v62, %v1126_v1  ;;  %v7710_v39 = vmul.f32 %v965_v20, %v13219_v42  ;;  %v13267_v42 = vld [vmem:[#allocation55_spill] sm:$0xff] }
 0x22d   :  { %v1143_v17 = vmul.f32 %v13260_v18, %v7673_v10  ;;  %v1144_v60 = vadd.f32 %v1140_v47, %v1134_v0  ;;  %v13268_v0 = vld [vmem:[#allocation58_spill] sm:$0xff]  ;;  %vm4877_vm0 = vcmask 1040384   ;;  %vm6213_vm1 = vmmov 0  }
 0x22e   :  { %v973_v23 = vpop.permute.xlu1 %972  ;;  %vm5306_vm2 = vcmask 261120   ;;  %vm5380_vm3 = vcmask 58368  }
 0x22f   :  { %v980_v46 = vsel %vm450_vm6, %v971_v50, %v973_v23 }
 0x230   :  { %v975_v54 = vpop.permute.xlu0 %974  ;;  %v7694_v12 = vmul.f32 %v980_v46, %v13224_v21  ;;  %v13263_v21 = vld [vmem:[#allocation88_spill] sm:$0xff]  ;;  %v1145_v46 = vadd.f32 %v1141_v38, %v1135_v11 }
 0x231   :  { %v979_v55 = vsel %vm450_vm6, %v973_v23, %v975_v54  ;;  %v1150_v51 = vmul.f32 %v13263_v21, %v7676_v29  ;;  %v1151_v52 = vmul.f32 %v13263_v21, %v7679_v3  ;;  %v1153_v40 = vmul.f32 %v13263_v21, %v7710_v39 }
 0x232   :  { %v977_v2 = vpop.permute.xlu1 %976  ;;  %v7699_v43 = vmul.f32 %v979_v55, %v13226_v41  ;;  %v1137_v41 = vadd.f32 %v13264_v44, %v1127_v24  ;;  %v1160_v32 = vmul.f32 %v13265_v58, %v7694_v12 }
 0x233   :  { %v978_v7 = vsel %vm450_vm6, %v975_v54, %v977_v2  ;;  %v981_v57 = vsel %vm450_vm6, %v977_v2, %v971_v50  ;;  %v1152_v50 = vmul.f32 %v13263_v21, %v7684_v19  ;;  %v1146_v54 = vadd.f32 %v1142_v30, %v1136_v15  ;;  %v13270_v15 = vld [vmem:[#allocation91_spill] sm:$0xff] }
 0x234   :  { %v987_v31 = vpop.permute.xlu0 %986  ;;  %v7722_v5 = vmul.f32 %v978_v7, %v13266_v28  ;;  %v7725_v23 = vmul.f32 %v981_v57, %v13267_v42  ;;  %v1161_v1 = vmul.f32 %v13265_v58, %v7699_v43  ;;  %v1154_v55 = vadd.f32 %v1150_v51, %v1144_v60  ;;  %v13269_v7 = vld [vmem:[#allocation62_spill] sm:$0xff]  ;;  %v13272_v28 = vld [vmem:[#allocation61_spill] sm:$0xff] }
 0x235   :  { %v1147_v2 = vadd.f32 %v1143_v17, %v1137_v41  ;;  %v1155_v38 = vadd.f32 %v1151_v52, %v1145_v46  ;;  %v1156_v30 = vadd.f32 %v1152_v50, %v1146_v54  ;;  %v1290_v46 = vadd.f32 %v7634_v45, %v7610_v34  ;;  %v13273_v54 = vld [vmem:[#allocation86_spill] sm:$0xff] }
 0x236   :  { %v989_v53 = vpop.permute.xlu1 %988  ;;  %v1164_v27 = vadd.f32 %v1160_v32, %v1154_v55  ;;  %v1162_v11 = vmul.f32 %v13265_v58, %v7722_v5  ;;  %v1163_v62 = vmul.f32 %v13265_v58, %v7725_v23  ;;  %v13271_v32 = vld [vmem:[#allocation63_spill] sm:$0xff]  ;;  %v1297_v34 = vmul.f32 %v13258_v37, %v7572_v56 }
 0x237   :  { %v996_v24 = vsel %vm488_vm7, %v987_v31, %v989_v53  ;;  %v1165_v44 = vadd.f32 %v1161_v1, %v1155_v38  ;;  %v1157_v50 = vadd.f32 %v1153_v40, %v1147_v2  ;;  %v1306_v1 = vmul.f32 %v13273_v54, %v7602_v61  ;;  %v13274_v61 = vld [vmem:[#allocation92_spill] sm:$0xff] }
 0x238   :  { %v991_v20 = vpop.permute.xlu0 %990  ;;  %v7734_v18 = vmul.f32 %v996_v24, %v13268_v0  ;;  %v1166_v24 = vadd.f32 %v1162_v11, %v1156_v30  ;;  %v1300_v2 = vadd.f32 %v7665_v63, %v1290_v46  ;;  %v1307_v56 = vmul.f32 %v13273_v54, %v7616_v35  ;;  %v13278_v46 = vld [vmem:[#allocation60_spill] sm:$0xff] }
 0x239   :  { %v995_v47 = vsel %vm488_vm7, %v989_v53, %v991_v20  ;;  %v1288_v53 = vmul.f32 %v13256_v25, %v7562_v26  ;;  %v1291_v26 = vadd.f32 %v7627_v36, %v7541_v33  ;;  %v1298_v33 = vmul.f32 %v13258_v37, %v7587_v9 }
 0x23a   :  { %v7739_v57 = vmul.f32 %v995_v47, %v13269_v7  ;;  %v1170_v21 = vmul.f32 %v13270_v15, %v7734_v18  ;;  %v993_v51 = vpop.permute.xlu1 %992  ;;  %v1289_v47 = vmul.f32 %v13256_v25, %v7569_v22  ;;  %v1299_v22 = vmul.f32 %v13258_v37, %v7594_v13 }
 0x23b   :  { %v994_v17 = vsel %vm488_vm7, %v991_v20, %v993_v51  ;;  %v997_v52 = vsel %vm488_vm7, %v993_v51, %v987_v31  ;;  %v1167_v20 = vadd.f32 %v1163_v62, %v1157_v50  ;;  %v1310_v25 = vadd.f32 %v1306_v1, %v1300_v2 }
 0x23c   :  { %v1171_v41 = vmul.f32 %v13270_v15, %v7739_v57  ;;  %v1174_v60 = vadd.f32 %v1170_v21, %v1164_v27  ;;  %v7756_v58 = vmul.f32 %v994_v17, %v13271_v32  ;;  %v7759_v42 = vmul.f32 %v997_v52, %v13272_v28  ;;  %v13277_v32 = vld [vmem:[#allocation64_spill] sm:$0xff] }
 0x23d   :  { %v1292_v9 = vadd.f32 %v1288_v53, %v7558_v49  ;;  %v1301_v11 = vadd.f32 %v1297_v34, %v1291_v26  ;;  %v1308_v35 = vmul.f32 %v13273_v54, %v7621_v48  ;;  %v1325_v62 = vstv %s7747_s28  ;;  %s8091_s28 = sld [smem:[#allocation13 + $0x181]] }
 0x23e   :  { %v1175_v31 = vadd.f32 %v1171_v41, %v1165_v44  ;;  %v1172_v55 = vmul.f32 %v13270_v15, %v7756_v58  ;;  %v1173_v40 = vmul.f32 %v13270_v15, %v7759_v42  ;;  %v1180_v45 = vadd.f32 %v13274_v61, %v1174_v60  ;;  %v13275_v41 = vld [vmem:[#allocation68_spill] sm:$0xff]  ;;  %v13276_v60 = vld [vmem:[#allocation54_spill] sm:$0xff] }
 0x23f   :  { %v1293_v13 = vadd.f32 %v1289_v47, %v7612_v6  ;;  %v1309_v37 = vmul.f32 %v13273_v54, %v7624_v14  ;;  %v1302_v21 = vadd.f32 %v1298_v33, %v1292_v9  ;;  %v1311_v51 = vadd.f32 %v1307_v56, %v1301_v11 }
 0x240   :  { %v1181_v0 = vadd.f32 %v13274_v61, %v1175_v31  ;;  %v1176_v38 = vadd.f32 %v1172_v55, %v1166_v24  ;;  %v1177_v30 = vadd.f32 %v1173_v40, %v1167_v20  ;;  %v7790_v36 = vmax.f32 %v1180_v45, 0.0  ;;  %v13279_v31 = vld [vmem:[#allocation59_spill] sm:$0xff] }
 0x241   :  { %v1335_v48 = vstv %s7767_s29  ;;  %v1303_v44 = vadd.f32 %v1299_v22, %v1293_v13  ;;  %v1320_v17 = vadd.f32 %v13275_v41, %v1310_v25  ;;  %v1326_v52 = vmul.f32 %v1325_v62, %v7655_v4  ;;  %s8251_s29 = sld [smem:[#allocation13 + $0x105]] }
 0x242   :  { %v7792_v7 = vmax.f32 %v1181_v0, 0.0  ;;  %v1183_v63 = vadd.f32 %v13274_v61, %v1177_v30  ;;  %v1182_v27 = vadd.f32 %v13274_v61, %v1176_v38  ;;  %1374 = vrot.lane.b32.xlu0 %v7790_v36, %s6200_s23  ;;  %v1312_v50 = vadd.f32 %v1308_v35, %v1302_v21 }
 0x243   :  { %v1317_v6 = vmul.f32 %v13277_v32, %v13276_v60  ;;  %v1327_v28 = vmul.f32 %v1325_v62, %v7658_v8  ;;  %v1345_v14 = vstv %s7777_s30  ;;  %v1313_v53 = vadd.f32 %v1309_v37, %v1303_v44  ;;  %s8078_s30 = sld [smem:[#allocation13 + $0x101]] }
 0x244   :  { %1376 = vrot.lane.b32.xlu1 %v7792_v7, %s6200_s23  ;;  %v7809_v15 = vmax.f32 %v1183_v63, 0.0  ;;  %v7811_v49 = vmax.f32 %v1182_v27, 0.0  ;;  %v1319_v54 = vmul.f32 %v13277_v32, %v13278_v46  ;;  %v1336_v1 = vmul.f32 %v1335_v48, %v7676_v29 }
 0x245   :  { %v1321_v4 = vadd.f32 %v1317_v6, %v1311_v51  ;;  %v1318_v24 = vmul.f32 %v13277_v32, %v13279_v31  ;;  %v1337_v20 = vmul.f32 %v1335_v48, %v7679_v3  ;;  %v1355_v8 = vstv %s7788_s1  ;;  %s8291_s1 = sld [smem:[#allocation13 + $0x6]] }
 0x246   :  { %1378 = vrot.lane.b32.xlu0 %v7811_v49, %s6200_s23  ;;  %v1330_v55 = vadd.f32 %v1326_v52, %v1320_v17  ;;  %v1328_v40 = vmul.f32 %v1325_v62, %v7668_v59  ;;  %v1329_v26 = vmul.f32 %v1325_v62, %v7673_v10  ;;  %v1346_v34 = vmul.f32 %v1345_v14, %v7694_v12 }
 0x247   :  { %v1331_v61 = vadd.f32 %v1327_v28, %v1321_v4  ;;  %v1322_v45 = vadd.f32 %v1318_v24, %v1312_v50  ;;  %v1347_v0 = vmul.f32 %v1345_v14, %v7699_v43  ;;  %v1323_v29 = vadd.f32 %v1319_v54, %v1313_v53 }
 0x248   :  { %1380 = vrot.lane.b32.xlu1 %v7809_v15, %s6200_s23  ;;  %v1340_v3 = vadd.f32 %v1336_v1, %v1330_v55  ;;  %v1338_v47 = vmul.f32 %v1335_v48, %v7684_v19  ;;  %v1339_v59 = vmul.f32 %v1335_v48, %v7710_v39  ;;  %v1356_v12 = vmul.f32 %v1355_v8, %v7734_v18 }
 0x249   :  { %v1341_v10 = vadd.f32 %v1337_v20, %v1331_v61  ;;  %v1357_v2 = vmul.f32 %v1355_v8, %v7739_v57  ;;  %v1332_v38 = vadd.f32 %v1328_v40, %v1322_v45  ;;  %v1333_v30 = vadd.f32 %v1329_v26, %v1323_v29 }
 0x24a   :  { %1390 = vrot.lane.b32.xlu0 %v7790_v36, %s6202_s25  ;;  %v1350_v43 = vadd.f32 %v1346_v34, %v1340_v3  ;;  %v1348_v56 = vmul.f32 %v1345_v14, %v7722_v5  ;;  %v1349_v22 = vmul.f32 %v1345_v14, %v7725_v23  ;;  %v1358_v57 = vmul.f32 %v1355_v8, %v7756_v58 }
 0x24b   :  { %v1351_v33 = vadd.f32 %v1347_v0, %v1341_v10  ;;  %v1342_v19 = vadd.f32 %v1338_v47, %v1332_v38  ;;  %v1343_v39 = vadd.f32 %v1339_v59, %v1333_v30  ;;  %v1359_v63 = vmul.f32 %v1355_v8, %v7759_v42 }
 0x24c   :  { %1392 = vrot.lane.b32.xlu1 %v7792_v7, %s6202_s25  ;;  %v1360_v25 = vadd.f32 %v1356_v12, %v1350_v43  ;;  %v1365_v27 = vstv %s5464_s11  ;;  %s8608_s11 = sld [smem:[#allocation13 + $0x89]] }
 0x24d   :  { %v1361_v18 = vadd.f32 %v1357_v2, %v1351_v33  ;;  %v1352_v9 = vadd.f32 %v1348_v56, %v1342_v19  ;;  %v1353_v11 = vadd.f32 %v1349_v22, %v1343_v39 }
 0x24e   :  { %1394 = vrot.lane.b32.xlu0 %v7811_v49, %s6202_s25  ;;  %v1366_v62 = vadd.f32 %v1365_v27, %v1360_v25 }
 0x24f   :  { %v1362_v5 = vadd.f32 %v1358_v57, %v1352_v9  ;;  %v1363_v23 = vadd.f32 %v1359_v63, %v1353_v11  ;;  %v1367_v35 = vadd.f32 %v1365_v27, %v1361_v18 }
 0x250   :  { %1396 = vrot.lane.b32.xlu1 %v7809_v15, %s6202_s25  ;;  %v7861_v42 = vmax.f32 %v1366_v62, 0.0 }
 0x251   :  { %v7859_v58 = vmax.f32 %v1367_v35, 0.0  ;;  %v1369_v13 = vadd.f32 %v1365_v27, %v1363_v23  ;;  %v1368_v37 = vadd.f32 %v1365_v27, %v1362_v5 }
 0x252   :  { %1406 = vrot.lane.b32.xlu0 %v7790_v36, %s6203_s26 }
 0x253   :  { %v7867_v21 = vmax.f32 %v1369_v13, 0.0  ;;  %v7869_v51 = vmax.f32 %v1368_v37, 0.0 }
 0x254   :  { %1408 = vrot.lane.b32.xlu1 %v7792_v7, %s6203_s26 }
 0x256   :  { %1410 = vrot.lane.b32.xlu0 %v7811_v49, %s6203_s26 }
 0x258   :  { %1412 = vrot.lane.b32.xlu1 %v7809_v15, %s6203_s26 }
 0x25a   :  { %1426 = vrot.lane.b32.xlu0 %v7861_v42, %s6200_s23 }
 0x25c   :  { %1428 = vrot.lane.b32.xlu1 %v7859_v58, %s6200_s23 }
 0x25e   :  { %1430 = vrot.lane.b32.xlu0 %v7869_v51, %s6200_s23 }
 0x260   :  { %1432 = vrot.lane.b32.xlu1 %v7867_v21, %s6200_s23  ;;  %s13003_s23 = smov 34  }
 0x262   :  { %1442 = vrot.lane.b32.xlu0 %v7861_v42, %s6202_s25 }
 0x264   :  { %1444 = vrot.lane.b32.xlu1 %v7859_v58, %s6202_s25 }
 0x266   :  { %1446 = vrot.lane.b32.xlu0 %v7869_v51, %s6202_s25 }
 0x268   :  { %1448 = vrot.lane.b32.xlu1 %v7867_v21, %s6202_s25  ;;  %s12999_s25 = smov 32  }
 0x26a   :  { %1458 = vrot.lane.b32.xlu0 %v7861_v42, %s6203_s26 }
 0x26c   :  { %1460 = vrot.lane.b32.xlu1 %v7859_v58, %s6203_s26 }
 0x26e   :  { %1462 = vrot.lane.b32.xlu0 %v7869_v51, %s6203_s26 }
 0x270   :  { %1464 = vrot.lane.b32.xlu1 %v7867_v21, %s6203_s26  ;;  %s12997_s26 = smov 30  }
 0x2b4   :  { %v1375_v44 = vpop.permute.xlu0 %1374 }
 0x2b6   :  { %v1377_v48 = vpop.permute.xlu1 %1376 }
 0x2b7   :  { %v1384_v60 = vsel %vm374_vm4, %v1375_v44, %v1377_v48 }
 0x2b8   :  { %v1379_v17 = vpop.permute.xlu0 %1378  ;;  %v1386_v14 = vadd.f32 %v1384_v60, %v7790_v36 }
 0x2b9   :  { %v1383_v46 = vsel %vm374_vm4, %v1377_v48, %v1379_v17 }
 0x2ba   :  { %v1381_v41 = vpop.permute.xlu1 %1380  ;;  %v1387_v8 = vadd.f32 %v1383_v46, %v7792_v7 }
 0x2bb   :  { %v1382_v53 = vsel %vm374_vm4, %v1379_v17, %v1381_v41  ;;  %v1385_v31 = vsel %vm374_vm4, %v1381_v41, %v1375_v44 }
 0x2bc   :  { %v1391_v50 = vpop.permute.xlu0 %1390  ;;  %v1388_v55 = vadd.f32 %v1382_v53, %v7811_v49  ;;  %v1389_v34 = vadd.f32 %v1385_v31, %v7809_v15 }
 0x2be   :  { %v1393_v52 = vpop.permute.xlu1 %1392 }
 0x2bf   :  { %v1400_v28 = vsel %vm450_vm6, %v1391_v50, %v1393_v52 }
 0x2c0   :  { %v1395_v6 = vpop.permute.xlu0 %1394  ;;  %v1402_v54 = vadd.f32 %v1400_v28, %v1386_v14 }
 0x2c1   :  { %v1399_v20 = vsel %vm450_vm6, %v1393_v52, %v1395_v6 }
 0x2c2   :  { %v1397_v32 = vpop.permute.xlu1 %1396  ;;  %v1403_v61 = vadd.f32 %v1399_v20, %v1387_v8  ;;  %v1962_v20 = vstv %s5475_s19  ;;  %v2334_v8 = vstv %s5512_s21  ;;  %s8100_s19 = sld [smem:[#allocation13 + $0x2]] }
 0x2c3   :  { %v1398_v24 = vsel %vm450_vm6, %v1395_v6, %v1397_v32  ;;  %v1401_v26 = vsel %vm450_vm6, %v1397_v32, %v1391_v50  ;;  %s8118_s21 = sld [smem:[#allocation13 + $0x102]] }
 0x2c4   :  { %v1407_v4 = vpop.permute.xlu0 %1406  ;;  %v1404_v45 = vadd.f32 %v1398_v24, %v1388_v55  ;;  %v1405_v59 = vadd.f32 %v1401_v26, %v1389_v34  ;;  %v1478_v24 = vld [vmem:[%s12773_s7] ss:$8 sm:$0xf]  ;;  %v2520_v55 = vstv %s5531_s2  ;;  %v5465_v26 = vld [vmem:[%s12773_s7 + $0x1] ss:$8 sm:$0xf]  ;;  %v8093_v34 = vstv %s5502_s0 }
 0x2c5   :  { %13285 = vst [vmem:[#allocation66_spill] sm:$0xff] %v8093_v34  ;;  %s8120_s2 = sld [smem:[#allocation13 + $0x182]]  ;;  %s8148_s0 = sld [smem:[#allocation13 + $0x83]] }
 0x2c6   :  { %v1409_v1 = vpop.permute.xlu1 %1408 }
 0x2c7   :  { %v1416_v36 = vsel %vm488_vm7, %v1407_v4, %v1409_v1 }
 0x2c8   :  { %v1418_v40 = vadd.f32 %v1416_v36, %v1402_v54  ;;  %v1411_v3 = vpop.permute.xlu0 %1410  ;;  %v8080_v36 = vstv %s5493_s20  ;;  %s8102_s20 = sld [smem:[#allocation13 + $0x82]] }
 0x2c9   :  { %v1415_v49 = vsel %vm488_vm7, %v1409_v1, %v1411_v3  ;;  %13283 = vst [vmem:[#allocation65_spill] sm:$0xff] %v8080_v36 }
 0x2ca   :  { %v7913_v0 = vmul.f32 0.25, %v1418_v40  ;;  %v1413_v29 = vpop.permute.xlu1 %1412  ;;  %v1419_v10 = vadd.f32 %v1415_v49, %v1403_v61  ;;  %v8082_v40 = vstv %s5484_s12  ;;  %v13286_v61 = vld [vmem:[#allocation32_spill] sm:$0xff]  ;;  %v8110_v49 = vstv %s5508_s9  ;;  %s8128_s12 = sld [smem:[#allocation13 + $0x3]]  ;;  %s8516_s9 = sld [smem:[#allocation13 + $0x187]] }
 0x2cb   :  { %v1417_v47 = vsel %vm488_vm7, %v1413_v29, %v1407_v4  ;;  %v1414_v7 = vsel %vm488_vm7, %v1411_v3, %v1413_v29  ;;  %13284 = vst [vmem:[#allocation51_spill] sm:$0xff] %v8082_v40  ;;  %v8098_v29 = vstv %s1925_s8  ;;  %v8104_v3 = vstv %s5521_s22  ;;  %s8150_s22 = sld [smem:[#allocation13 + $0x103]] }
 0x2cc   :  { %v1420_v12 = vadd.f32 %v1414_v7, %v1404_v45  ;;  %1493 = vrot.lane.b32.xlu0 %v7913_v0, %s13003_s23  ;;  %v1421_v15 = vadd.f32 %v1417_v47, %v1405_v59  ;;  %v7923_v2 = vmul.f32 0.25, %v1419_v10  ;;  %v1427_v33 = vpop.permute.xlu0 %1426  ;;  %v8096_v45 = vrot.slane %v1478_v24, %v13286_v61  ;;  %13288 = vst [vmem:[#allocation72_spill] sm:$0xff] %v8098_v29  ;;  %v13290_v59 = vld [vmem:[#allocation29_spill] sm:$0xff]  ;;  %s8707_s8 = sld [smem:[#allocation13 + $0x10b]] }
 0x2cd   :  { %v8106_v47 = vstv %s5540_s10  ;;  %v8108_v7 = vstv %s5489_s24  ;;  %v8113_v10 = vrot.slane %v1478_v24, %v13290_v59  ;;  %s8514_s24 = sld [smem:[#allocation13 + $0x107]]  ;;  %s8735_s10 = sld [smem:[#allocation13 + $0x18b]] }
 0x2ce   :  { %13280 = vst [vmem:[#allocation45_spill] sm:$0xff] %v7923_v2  ;;  %v7925_v38 = vmul.f32 0.25, %v1420_v12  ;;  %1495 = vrot.lane.b32.xlu1 %v7923_v2, %s13003_s23  ;;  %v7931_v30 = vmul.f32 0.25, %v1421_v15  ;;  %v1429_v43 = vpop.permute.xlu1 %1428  ;;  %13287 = vst [vmem:[#allocation52_spill] sm:$0xff] %v8096_v45  ;;  %v13292_v12 = vld [vmem:[#allocation30_spill] sm:$0xff] }
 0x2cf   :  { %v1436_v27 = vsel %vm374_vm4, %v1427_v33, %v1429_v43  ;;  %13289 = vst [vmem:[#allocation50_spill] sm:$0xff] %v8108_v7  ;;  %13291 = vst [vmem:[#allocation90_spill] sm:$0xff] %v8113_v10  ;;  %v8116_v15 = vrot.slane %v1478_v24, %v13292_v12 }
 0x2d0   :  { %1497 = vrot.lane.b32.xlu0 %v7925_v38, %s13003_s23  ;;  %v1431_v22 = vpop.permute.xlu0 %1430  ;;  %v1438_v11 = vadd.f32 %v1436_v27, %v7861_v42  ;;  %v8162_v27 = vstv %s8073_s27  ;;  %s8233_s27 = sld [smem:[#allocation13 + $0x85]] }
 0x2d1   :  { %v1435_v23 = vsel %vm374_vm4, %v1429_v43, %v1431_v22  ;;  %13293 = vst [vmem:[#allocation84_spill] sm:$0xff] %v8116_v15  ;;  %v13294_v43 = vld [vmem:[#allocation31_spill] sm:$0xff]  ;;  %13300 = vst [vmem:[#allocation96_spill] sm:$0xff] %v8162_v27 }
 0x2d2   :  { %1499 = vrot.lane.b32.xlu1 %v7931_v30, %s13003_s23  ;;  %v1433_v56 = vpop.permute.xlu1 %1432  ;;  %v1439_v44 = vadd.f32 %v1435_v23, %v7859_v58  ;;  %v8173_v23 = vstv %s8078_s30  ;;  %s8253_s30 = sld [smem:[#allocation13 + $0x185]] }
 0x2d3   :  { %v1434_v5 = vsel %vm374_vm4, %v1431_v22, %v1433_v56  ;;  %v1437_v52 = vsel %vm374_vm4, %v1433_v56, %v1427_v33  ;;  %v8123_v33 = vrot.slane %v1478_v24, %v13294_v43  ;;  %v8126_v56 = vrot.slane %v5465_v26, %v13286_v61 }
 0x2d4   :  { %1531 = vrot.lane.b32.xlu0 %v7913_v0, %s12999_s25  ;;  %v1443_v39 = vpop.permute.xlu0 %1442  ;;  %v1440_v41 = vadd.f32 %v1434_v5, %v7869_v51  ;;  %v1441_v51 = vadd.f32 %v1437_v52, %v7867_v21  ;;  %v8131_v22 = vmul.f32 %v1962_v20, %v7913_v0  ;;  %v8217_v52 = vmul.f32 %v8080_v36, %v7925_v38 }
 0x2d5   :  { %13295 = vst [vmem:[#allocation73_spill] sm:$0xff] %v8123_v33  ;;  %13296 = vst [vmem:[#allocation93_spill] sm:$0xff] %v8126_v56 }
 0x2d6   :  { %1533 = vrot.lane.b32.xlu1 %v7923_v2, %s12999_s25  ;;  %v1445_v19 = vpop.permute.xlu1 %1444  ;;  %13297 = vst [vmem:[#allocation53_spill] sm:$0xff] %v8131_v22  ;;  %13309 = vst [vmem:[#allocation79_spill] sm:$0xff] %v8217_v52  ;;  %v8373_v29 = vstv %s8233_s27  ;;  %s8547_s27 = sld [smem:[#allocation13 + $0x108]] }
 0x2d7   :  { %v1452_v9 = vsel %vm450_vm6, %v1443_v39, %v1445_v19  ;;  %13342 = vst [vmem:[#allocation68_spill] sm:$0xff] %v8373_v29 }
 0x2d8   :  { %1535 = vrot.lane.b32.xlu0 %v7925_v38, %s12999_s25  ;;  %v1447_v18 = vpop.permute.xlu0 %1446  ;;  %v1454_v62 = vadd.f32 %v1452_v9, %v1438_v11  ;;  %v8165_v9 = vmul.f32 %v1962_v20, %v7923_v2  ;;  %v8168_v11 = vmul.f32 %v2334_v8, %v7923_v2 }
 0x2d9   :  { %v1451_v48 = vsel %vm450_vm6, %v1445_v19, %v1447_v18  ;;  %v8135_v19 = vmul.f32 %v8080_v36, %v7913_v0 }
 0x2da   :  { %1537 = vrot.lane.b32.xlu1 %v7931_v30, %s12999_s25  ;;  %v1449_v25 = vpop.permute.xlu1 %1448  ;;  %v1455_v32 = vadd.f32 %v1451_v48, %v1439_v44  ;;  %13301 = vst [vmem:[#allocation95_spill] sm:$0xff] %v8165_v9  ;;  %v8195_v48 = vmul.f32 %v2334_v8, %v7931_v30  ;;  %v8198_v44 = vmul.f32 %v2520_v55, %v7931_v30 }
 0x2db   :  { %v1450_v42 = vsel %vm450_vm6, %v1447_v18, %v1449_v25  ;;  %v1453_v58 = vsel %vm450_vm6, %v1449_v25, %v1443_v39  ;;  %v8143_v39 = vstv %s8069_s4  ;;  %v8146_v25 = vrot.slane %v5465_v26, %v13290_v59  ;;  %s8210_s4 = sld [smem:[#allocation13 + $0x183]] }
 0x2dc   :  { %1569 = vrot.lane.b32.xlu0 %v7913_v0, %s12997_s26  ;;  %v1459_v63 = vpop.permute.xlu0 %1458  ;;  %v1456_v6 = vadd.f32 %v1450_v42, %v1440_v41  ;;  %v1457_v54 = vadd.f32 %v1453_v58, %v1441_v51  ;;  %v8153_v18 = vmul.f32 %v2334_v8, %v7913_v0  ;;  %v8192_v42 = vmul.f32 %v8080_v36, %v7931_v30 }
 0x2dd   :  { %13298 = vst [vmem:[#allocation94_spill] sm:$0xff] %v8146_v25  ;;  %13306 = vst [vmem:[#allocation77_spill] sm:$0xff] %v8195_v48  ;;  %v8205_v41 = vstv %s8091_s28  ;;  %v8236_v58 = vmul.f32 %v2520_v55, %v7925_v38  ;;  %v8413_v48 = vstv %s8291_s1  ;;  %s8594_s1 = sld [smem:[#allocation13 + $0x9]] }
 0x2de   :  { %1571 = vrot.lane.b32.xlu1 %v7923_v2, %s12997_s26  ;;  %v1461_v57 = vpop.permute.xlu1 %1460  ;;  %13305 = vst [vmem:[#allocation36_spill] sm:$0xff] %v8192_v42  ;;  %13307 = vst [vmem:[#allocation37_spill] sm:$0xff] %v8198_v44  ;;  %v8379_v44 = vstv %s8253_s30  ;;  %s8620_s28 = sld [smem:[#allocation13 + $0x109]]  ;;  %s8763_s30 = sld [smem:[#allocation13 + $0x10e]] }
 0x2df   :  { %v1468_v35 = vsel %vm488_vm7, %v1459_v63, %v1461_v57  ;;  %13314 = vst [vmem:[#allocation40_spill] sm:$0xff] %v8236_v58  ;;  %13349 = vst [vmem:[#allocation30_spill] sm:$0xff] %v8413_v48 }
 0x2e0   :  { %1573 = vrot.lane.b32.xlu0 %v7925_v38, %s12997_s26  ;;  %v1463_v37 = vpop.permute.xlu0 %1462  ;;  %v1470_v17 = vadd.f32 %v1468_v35, %v1454_v62  ;;  %v8176_v35 = vrot.slane %v5465_v26, %v13292_v12  ;;  %v5466_v62 = vld [vmem:[%s12773_s7 + $0x2] ss:$8 sm:$0xf] }
 0x2e1   :  { %v1467_v60 = vsel %vm488_vm7, %v1461_v57, %v1463_v37  ;;  %v8156_v57 = vmul.f32 %v2520_v55, %v7913_v0 }
 0x2e2   :  { %1575 = vrot.lane.b32.xlu1 %v7931_v30, %s12997_s26  ;;  %v1465_v13 = vpop.permute.xlu1 %1464  ;;  %v8015_v28 = vmul.f32 0.25, %v1470_v17  ;;  %v1471_v14 = vadd.f32 %v1467_v60, %v1455_v32  ;;  %13302 = vst [vmem:[#allocation74_spill] sm:$0xff] %v8176_v35  ;;  %v5467_v17 = vld [vmem:[%s12773_s7 + $0x3] ss:$8 sm:$0xf]  ;;  %v8223_v60 = vrot.slane %v5466_v62, %v13286_v61  ;;  %v8226_v32 = vstv %s8100_s19  ;;  %s8634_s19 = sld [smem:[#allocation13 + $0x189]] }
 0x2e3   :  { %v1466_v50 = vsel %vm488_vm7, %v1463_v37, %v1465_v13  ;;  %v1469_v46 = vsel %vm488_vm7, %v1465_v13, %v1459_v63  ;;  %v8159_v63 = vstv %s8071_s6  ;;  %v8185_v13 = vmul.f32 %v2520_v55, %v7923_v2  ;;  %13312 = vst [vmem:[#allocation38_spill] sm:$0xff] %v8226_v32  ;;  %s8231_s6 = sld [smem:[#allocation13 + $0x5]] }
 0x2e4   :  { %1607 = vrot.lane.b32.xlu0 %v7913_v0, %s13001_s3  ;;  %v1472_v53 = vadd.f32 %v1466_v50, %v1456_v6  ;;  %v1473_v1 = vadd.f32 %v1469_v46, %v1457_v54  ;;  %v8023_v4 = vmul.f32 0.25, %v1471_v14  ;;  %13299 = vst [vmem:[#allocation56_spill] sm:$0xff] %v8159_v63  ;;  %v8188_v37 = vmul.f32 %v1962_v20, %v7931_v30 }
 0x2e5   :  { %v8220_v50 = vmul.f32 %v2334_v8, %v7925_v38  ;;  %13311 = vst [vmem:[#allocation35_spill] sm:$0xff] %v8223_v60  ;;  %v8229_v6 = vrot.slane %v5466_v62, %v13290_v59  ;;  %v8243_v46 = vstv %s8118_s21  ;;  %v8246_v54 = vstv %s8120_s2  ;;  %s8381_s21 = sld [smem:[#allocation13 + $0x86]] }
 0x2e6   :  { %1609 = vrot.lane.b32.xlu1 %v7923_v2, %s13001_s3  ;;  %13281 = vst [vmem:[#allocation48_spill] sm:$0xff] %v8023_v4  ;;  %v8025_v31 = vmul.f32 0.25, %v1472_v53  ;;  %v8031_v21 = vmul.f32 0.25, %v1473_v1  ;;  %13304 = vst [vmem:[#allocation76_spill] sm:$0xff] %v8188_v37  ;;  %v8240_v53 = vstv %s8102_s20  ;;  %v8249_v1 = vrot.slane %v5466_v62, %v13292_v12  ;;  %s8448_s2 = sld [smem:[#allocation13 + $0x106]]  ;;  %s8636_s20 = sld [smem:[#allocation13 + $0xa]] }
 0x2e7   :  { %13310 = vst [vmem:[#allocation34_spill] sm:$0xff] %v8220_v50  ;;  %13313 = vst [vmem:[#allocation39_spill] sm:$0xff] %v8229_v6  ;;  %v8259_v24 = vrot.slane %v5467_v17, %v13286_v61  ;;  %v8265_v8 = vrot.slane %v5467_v17, %v13290_v59  ;;  %v8272_v55 = vstv %s8148_s0  ;;  %v8283_v36 = vmul.f32 %v8093_v34, %v8015_v28  ;;  %s8468_s0 = sld [smem:[#allocation13 + $0x7]] }
 0x2e8   :  { %1611 = vrot.lane.b32.xlu0 %v7925_v38, %s13001_s3  ;;  %13282 = vst [vmem:[#allocation49_spill] sm:$0xff] %v8025_v31  ;;  %13315 = vst [vmem:[#allocation41_spill] sm:$0xff] %v8240_v53  ;;  %v8289_v37 = vrot.slane %v5467_v17, %v13294_v43  ;;  %v8329_v32 = vmul.f32 %v8104_v3, %v8031_v21 }
 0x2e9   :  { %13316 = vst [vmem:[#allocation42_spill] sm:$0xff] %v8249_v1  ;;  %13318 = vst [vmem:[#allocation80_spill] sm:$0xff] %v8259_v24 }
 0x2ea   :  { %1613 = vrot.lane.b32.xlu1 %v7931_v30, %s13001_s3  ;;  %13320 = vst [vmem:[#allocation47_spill] sm:$0xff] %v8265_v8  ;;  %13321 = vst [vmem:[#allocation82_spill] sm:$0xff] %v8272_v55 }
 0x2eb   :  { %13323 = vst [vmem:[#allocation81_spill] sm:$0xff] %v8283_v36  ;;  %13325 = vst [vmem:[#allocation83_spill] sm:$0xff] %v8289_v37  ;;  %v5468_v36 = vld [vmem:[%s12773_s7 + $0x4] ss:$8 sm:$0xf]  ;;  %v8463_v42 = vstv %s8381_s21  ;;  %s8644_s21 = sld [smem:[#allocation13 + $0x8a]] }
 0x2ec   :  { %1645 = vrot.lane.b32.xlu0 %v7913_v0, %s13007_s5  ;;  %13333 = vst [vmem:[#allocation57_spill] sm:$0xff] %v8329_v32  ;;  %v8346_v32 = vmul.f32 %v8093_v34, %v8025_v31  ;;  %13352 = vst [vmem:[#allocation98_spill] sm:$0xff] %v8463_v42 }
 0x2ee   :  { %1647 = vrot.lane.b32.xlu1 %v7923_v2, %s13007_s5  ;;  %13335 = vst [vmem:[#allocation58_spill] sm:$0xff] %v8346_v32 }
 0x2f0   :  { %1649 = vrot.lane.b32.xlu0 %v7925_v38, %s13007_s5 }
 0x2f2   :  { %1651 = vrot.lane.b32.xlu1 %v7931_v30, %s13007_s5 }
 0x2f4   :  { %1683 = vrot.lane.b32.xlu0 %v7913_v0, %s13011_s16 }
 0x2f6   :  { %1685 = vrot.lane.b32.xlu1 %v7923_v2, %s13011_s16 }
 0x2f8   :  { %1687 = vrot.lane.b32.xlu0 %v7925_v38, %s13011_s16 }
 0x2fa   :  { %1689 = vrot.lane.b32.xlu1 %v7931_v30, %s13011_s16 }
 0x2fc   :  { %1721 = vrot.lane.b32.xlu0 %v7913_v0, %s13009_s17 }
 0x2fe   :  { %1723 = vrot.lane.b32.xlu1 %v7923_v2, %s13009_s17 }
 0x300   :  { %1725 = vrot.lane.b32.xlu0 %v7925_v38, %s13009_s17 }
 0x302   :  { %1727 = vrot.lane.b32.xlu1 %v7931_v30, %s13009_s17 }
 0x304   :  { %1759 = vrot.lane.b32.xlu0 %v7913_v0, %s13005_s18  ;;  %v8179_v0 = vrot.slane %v5465_v26, %v13294_v43  ;;  %v8275_v26 = vstv %s8150_s22  ;;  %s8489_s22 = sld [smem:[#allocation13 + $0x87]] }
 0x306   :  { %1761 = vrot.lane.b32.xlu1 %v7923_v2, %s13005_s18  ;;  %13303 = vst [vmem:[#allocation75_spill] sm:$0xff] %v8179_v0  ;;  %v8286_v2 = vrot.slane %v5467_v17, %v13292_v12  ;;  %v8306_v17 = vmul.f32 %v8082_v40, %v8023_v4 }
 0x308   :  { %1763 = vrot.lane.b32.xlu0 %v7925_v38, %s13005_s18  ;;  %13324 = vst [vmem:[#allocation85_spill] sm:$0xff] %v8286_v2  ;;  %13328 = vst [vmem:[#allocation69_spill] sm:$0xff] %v8306_v17  ;;  %v8325_v17 = vmul.f32 %v8093_v34, %v8031_v21  ;;  %v8367_v34 = vmul.f32 %v8106_v47, %v8025_v31 }
 0x30a   :  { %1765 = vrot.lane.b32.xlu1 %v7931_v30, %s13005_s18  ;;  %v8213_v30 = vmul.f32 %v1962_v20, %v7925_v38  ;;  %v8256_v38 = vrot.slane %v5466_v62, %v13294_v43  ;;  %v8262_v20 = vstv %s8128_s12  ;;  %v8279_v62 = vmul.f32 %v8082_v40, %v8015_v28  ;;  %13332 = vst [vmem:[#allocation89_spill] sm:$0xff] %v8325_v17  ;;  %s8450_s12 = sld [smem:[#allocation13 + $0x186]] }
 0x30b   :  { %13319 = vst [vmem:[#allocation44_spill] sm:$0xff] %v8262_v20  ;;  %v8310_v20 = vmul.f32 %v8104_v3, %v8023_v4  ;;  %v8360_v17 = vrot.slane %v5468_v36, %v13286_v61  ;;  %13340 = vst [vmem:[#allocation86_spill] sm:$0xff] %v8367_v34 }
 0x30c   :  { %1797 = vrot.lane.b32.xlu0 %v8015_v28, %s13003_s23  ;;  %13308 = vst [vmem:[#allocation78_spill] sm:$0xff] %v8213_v30  ;;  %13317 = vst [vmem:[#allocation43_spill] sm:$0xff] %v8256_v38  ;;  %v8295_v30 = vmul.f32 %v8104_v3, %v8015_v28 }
 0x30d   :  { %13322 = vst [vmem:[#allocation46_spill] sm:$0xff] %v8279_v62  ;;  %v8299_v62 = vmul.f32 %v8106_v47, %v8015_v28  ;;  %13329 = vst [vmem:[#allocation71_spill] sm:$0xff] %v8310_v20  ;;  %v8333_v20 = vmul.f32 %v8106_v47, %v8031_v21 }
 0x30e   :  { %1799 = vrot.lane.b32.xlu1 %v8023_v4, %s13003_s23  ;;  %13326 = vst [vmem:[#allocation67_spill] sm:$0xff] %v8295_v30  ;;  %v8314_v30 = vmul.f32 %v8106_v47, %v8023_v4  ;;  %13339 = vst [vmem:[#allocation61_spill] sm:$0xff] %v8360_v17 }
 0x30f   :  { %13327 = vst [vmem:[#allocation87_spill] sm:$0xff] %v8299_v62  ;;  %13334 = vst [vmem:[#allocation55_spill] sm:$0xff] %v8333_v20  ;;  %v8350_v20 = vmul.f32 %v8104_v3, %v8025_v31 }
 0x310   :  { %1801 = vrot.lane.b32.xlu0 %v8025_v31, %s13003_s23  ;;  %13330 = vst [vmem:[#allocation88_spill] sm:$0xff] %v8314_v30  ;;  %v5469_v30 = vld [vmem:[%s12773_s7 + $0x5] ss:$8 sm:$0xf] }
 0x311   :  { %13336 = vst [vmem:[#allocation62_spill] sm:$0xff] %v8350_v20 }
 0x312   :  { %1803 = vrot.lane.b32.xlu1 %v8031_v21, %s13003_s23 }
 0x314   :  { %1813 = vrot.lane.b32.xlu0 %v8015_v28, %s12999_s25 }
 0x316   :  { %1815 = vrot.lane.b32.xlu1 %v8023_v4, %s12999_s25 }
 0x318   :  { %1817 = vrot.lane.b32.xlu0 %v8025_v31, %s12999_s25 }
 0x31a   :  { %1819 = vrot.lane.b32.xlu1 %v8031_v21, %s12999_s25 }
 0x31c   :  { %1829 = vrot.lane.b32.xlu0 %v8015_v28, %s12997_s26 }
 0x31e   :  { %1831 = vrot.lane.b32.xlu1 %v8023_v4, %s12997_s26 }
 0x320   :  { %1833 = vrot.lane.b32.xlu0 %v8025_v31, %s12997_s26 }
 0x322   :  { %1835 = vrot.lane.b32.xlu1 %v8031_v21, %s12997_s26 }
 0x324   :  { %1845 = vrot.lane.b32.xlu0 %v8015_v28, %s13001_s3 }
 0x326   :  { %1847 = vrot.lane.b32.xlu1 %v8023_v4, %s13001_s3 }
 0x328   :  { %1849 = vrot.lane.b32.xlu0 %v8025_v31, %s13001_s3 }
 0x32a   :  { %1851 = vrot.lane.b32.xlu1 %v8031_v21, %s13001_s3 }
 0x32c   :  { %1861 = vrot.lane.b32.xlu0 %v8015_v28, %s13007_s5 }
 0x32e   :  { %1863 = vrot.lane.b32.xlu1 %v8023_v4, %s13007_s5 }
 0x330   :  { %1865 = vrot.lane.b32.xlu0 %v8025_v31, %s13007_s5 }
 0x332   :  { %1867 = vrot.lane.b32.xlu1 %v8031_v21, %s13007_s5 }
 0x334   :  { %1877 = vrot.lane.b32.xlu0 %v8015_v28, %s13011_s16 }
 0x336   :  { %1879 = vrot.lane.b32.xlu1 %v8023_v4, %s13011_s16 }
 0x338   :  { %1881 = vrot.lane.b32.xlu0 %v8025_v31, %s13011_s16 }
 0x33a   :  { %1883 = vrot.lane.b32.xlu1 %v8031_v21, %s13011_s16 }
 0x33c   :  { %1893 = vrot.lane.b32.xlu0 %v8015_v28, %s13009_s17 }
 0x33e   :  { %v8170_v5 = vpop.permute.xlu0 %1493  ;;  %1895 = vrot.lane.b32.xlu1 %v8023_v4, %s13009_s17 }
 0x340   :  { %1897 = vrot.lane.b32.xlu0 %v8025_v31, %s13009_s17  ;;  %v1496_v51 = vpop.permute.xlu1 %1495 }
 0x341   :  { %v1504_v62 = vsel %vm1501_vm8, %v8170_v5, %v1496_v51 }
 0x342   :  { %v1498_v14 = vpop.permute.xlu0 %1497  ;;  %1899 = vrot.lane.b32.xlu1 %v8031_v21, %s13009_s17  ;;  %v8370_v3 = vmul.f32 %v8096_v45, %v1504_v62  ;;  %v8390_v62 = vrot.slane %v5468_v36, %v13290_v59  ;;  %v8400_v45 = vrot.slane %v5469_v30, %v13292_v12 }
 0x344   :  { %1909 = vrot.lane.b32.xlu0 %v8015_v28, %s13005_s18  ;;  %v1500_v9 = vpop.permute.xlu1 %1499  ;;  %v8318_v28 = vmul.f32 %v8082_v40, %v8031_v21  ;;  %v8342_v40 = vstv %s8210_s4  ;;  %13341 = vst [vmem:[#allocation92_spill] sm:$0xff] %v8370_v3  ;;  %13344 = vst [vmem:[#allocation64_spill] sm:$0xff] %v8390_v62  ;;  %s8524_s4 = sld [smem:[#allocation13 + $0x8]] }
 0x345   :  { %v1505_v47 = vsel %vm1501_vm8, %v1500_v9, %v8170_v5  ;;  %v1502_v34 = vsel %vm1501_vm8, %v1498_v14, %v1500_v9  ;;  %13346 = vst [vmem:[#allocation59_spill] sm:$0xff] %v8400_v45  ;;  %v8406_v5 = vrot.slane %v5469_v30, %v13290_v59  ;;  %v8416_v9 = vrot.slane %v5469_v30, %v13294_v43 }
 0x346   :  { %v1532_v22 = vpop.permute.xlu0 %1531  ;;  %13331 = vst [vmem:[#allocation70_spill] sm:$0xff] %v8318_v28  ;;  %v1503_v28 = vsel %vm1501_vm8, %v1496_v51, %v1498_v14  ;;  %1911 = vrot.lane.b32.xlu1 %v8023_v4, %s13005_s18  ;;  %v8354_v51 = vrot.slane %v5468_v36, %v13292_v12  ;;  %v8357_v4 = vstv %s8231_s6  ;;  %v8421_v14 = vmul.f32 %v8116_v15, %v1505_v47  ;;  %s8526_s6 = sld [smem:[#allocation13 + $0x88]] }
 0x347   :  { %13338 = vst [vmem:[#allocation63_spill] sm:$0xff] %v8357_v4  ;;  %v8376_v4 = vstv %s8251_s29  ;;  %v8384_v58 = vmul.f32 %v8113_v10, %v1503_v28  ;;  %v8403_v28 = vrot.slane %v5469_v30, %v13286_v61  ;;  %13348 = vst [vmem:[#allocation29_spill] sm:$0xff] %v8406_v5  ;;  %v8438_v47 = vmul.f32 %v8123_v33, %v1502_v34  ;;  %s8761_s29 = sld [smem:[#allocation13 + $0x8e]] }
 0x348   :  { %1913 = vrot.lane.b32.xlu0 %v8025_v31, %s13005_s18  ;;  %13337 = vst [vmem:[#allocation91_spill] sm:$0xff] %v8354_v51  ;;  %v1534_v20 = vpop.permute.xlu1 %1533  ;;  %v8393_v31 = vrot.slane %v5468_v36, %v13294_v43  ;;  %13350 = vst [vmem:[#allocation31_spill] sm:$0xff] %v8416_v9 }
 0x349   :  { %13343 = vst [vmem:[#allocation54_spill] sm:$0xff] %v8384_v58  ;;  %13347 = vst [vmem:[#allocation32_spill] sm:$0xff] %v8403_v28  ;;  %v1542_v10 = vsel %vm1539_vm9, %v1532_v22, %v1534_v20  ;;  %v2115_v30 = vmul.f32 %v8108_v7, %v8384_v58  ;;  %v2301_v48 = vmul.f32 %v8110_v49, %v8384_v58 }
 0x34a   :  { %v1536_v32 = vpop.permute.xlu0 %1535  ;;  %13345 = vst [vmem:[#allocation60_spill] sm:$0xff] %v8393_v31  ;;  %1915 = vrot.lane.b32.xlu1 %v8031_v21, %s13005_s18  ;;  %v2300_v21 = vmul.f32 %v8110_v49, %v8370_v3  ;;  %v8424_v28 = vmul.f32 %v8126_v56, %v1542_v10  ;;  %v2487_v10 = vmul.f32 %v8143_v39, %v8384_v58 }
 0x34b   :  { %v1541_v36 = vsel %vm1539_vm9, %v1534_v20, %v1536_v32  ;;  %v2486_v20 = vmul.f32 %v8143_v39, %v8370_v3  ;;  %v2113_v58 = vmul.f32 %v8108_v7, %v8421_v14  ;;  %v2116_v52 = vmul.f32 %v8108_v7, %v8438_v47 }
 0x34c   :  { %13351 = vst [vmem:[#allocation97_spill] sm:$0xff] %v8424_v28  ;;  %v8427_v5 = vmul.f32 %v8146_v25, %v1541_v36  ;;  %v1538_v45 = vpop.permute.xlu1 %1537  ;;  %v2306_v36 = vmul.f32 %v8173_v23, %v8424_v28  ;;  %v2492_v25 = vmul.f32 %v8205_v41, %v8424_v28 }
 0x34d   :  { %v1540_v56 = vsel %vm1539_vm9, %v1536_v32, %v1538_v45  ;;  %v1543_v9 = vsel %vm1539_vm9, %v1538_v45, %v1532_v22 }
 0x34e   :  { %v8429_v50 = vpop.permute.xlu0 %1569  ;;  %v2121_v34 = vmul.f32 %v8162_v27, %v8427_v5  ;;  %v2307_v33 = vmul.f32 %v8173_v23, %v8427_v5  ;;  %v2493_v15 = vmul.f32 %v8205_v41, %v8427_v5  ;;  %v2310_v32 = vadd.f32 %v2306_v36, %v2300_v21 }
 0x34f   :  { %v2496_v3 = vadd.f32 %v2492_v25, %v2486_v20  ;;  %v8471_v45 = vmul.f32 %v8176_v35, %v1543_v9  ;;  %v8474_v22 = vmul.f32 %v8179_v0, %v1540_v56  ;;  %v2488_v56 = vmul.f32 %v8143_v39, %v8438_v47 }
 0x350   :  { %v1572_v63 = vpop.permute.xlu1 %1571  ;;  %v2125_v31 = vadd.f32 %v2121_v34, %v2115_v30  ;;  %v2311_v62 = vadd.f32 %v2307_v33, %v2301_v48  ;;  %v2497_v17 = vadd.f32 %v2493_v15, %v2487_v10  ;;  %v2299_v15 = vmul.f32 %v8110_v49, %v8421_v14 }
 0x351   :  { %13353 = vst [vmem:[#allocation99_spill] sm:$0xff] %v8471_v45  ;;  %13354 = vst [vmem:[#allocation100_spill] sm:$0xff] %v8474_v22  ;;  %v1580_v25 = vsel %vm1577_vm10, %v8429_v50, %v1572_v63  ;;  %v2302_v33 = vmul.f32 %v8110_v49, %v8438_v47  ;;  %v2485_v48 = vmul.f32 %v8143_v39, %v8421_v14  ;;  %v5470_v39 = vld [vmem:[%s12773_s7 + $0x6] ss:$8 sm:$0xf] }
 0x352   :  { %v1574_v28 = vpop.permute.xlu0 %1573  ;;  %v2119_v9 = vmul.f32 %v8162_v27, %v8471_v45  ;;  %v8496_v20 = vmul.f32 %v8223_v60, %v1580_v25  ;;  %v2305_v36 = vmul.f32 %v8173_v23, %v8471_v45  ;;  %v2308_v34 = vmul.f32 %v8173_v23, %v8474_v22 }
 0x353   :  { %v1579_v21 = vsel %vm1577_vm10, %v1572_v63, %v1574_v28  ;;  %v2122_v63 = vmul.f32 %v8162_v27, %v8474_v22  ;;  %v2491_v25 = vmul.f32 %v8205_v41, %v8471_v45  ;;  %v8522_v60 = vstv %s8450_s12  ;;  %s8657_s12 = sld [smem:[#allocation13 + $0x18a]] }
 0x354   :  { %13355 = vst [vmem:[#allocation101_spill] sm:$0xff] %v8496_v20  ;;  %v8499_v49 = vmul.f32 %v8229_v6, %v1579_v21  ;;  %v1576_v30 = vpop.permute.xlu1 %1575  ;;  %v2494_v21 = vmul.f32 %v8205_v41, %v8474_v22  ;;  %v2123_v7 = vadd.f32 %v2119_v9, %v2113_v58  ;;  %v8519_v6 = vstv %s8448_s2  ;;  %s8655_s2 = sld [smem:[#allocation13 + $0x10a]] }
 0x355   :  { %v2126_v27 = vadd.f32 %v2122_v63, %v2116_v52  ;;  %v2309_v23 = vadd.f32 %v2305_v36, %v2299_v15  ;;  %v2312_v0 = vadd.f32 %v2308_v34, %v2302_v33  ;;  %v2495_v35 = vadd.f32 %v2491_v25, %v2485_v48 }
 0x356   :  { %13356 = vst [vmem:[#allocation102_spill] sm:$0xff] %v8499_v49  ;;  %v8501_v10 = vpop.permute.xlu0 %1607  ;;  %v2498_v45 = vadd.f32 %v2494_v21, %v2488_v56  ;;  %v2316_v41 = vmul.f32 %v8243_v46, %v8496_v20  ;;  %v2502_v58 = vmul.f32 %v8246_v54, %v8496_v20  ;;  %v8533_v63 = vrot.slane %v5470_v39, %v13292_v12 }
 0x357   :  { %v8536_v22 = vrot.slane %v5470_v39, %v13286_v61  ;;  %v2131_v15 = vmul.f32 %v8240_v53, %v8499_v49  ;;  %v2317_v33 = vmul.f32 %v8243_v46, %v8499_v49  ;;  %v2503_v48 = vmul.f32 %v8246_v54, %v8499_v49 }
 0x358   :  { %v1610_v52 = vpop.permute.xlu1 %1609  ;;  %13357 = vst [vmem:[#allocation103_spill] sm:$0xff] %v8533_v63  ;;  %v8545_v56 = vstv %s8468_s0  ;;  %v2320_v36 = vadd.f32 %v2316_v41, %v2310_v32  ;;  %v2506_v34 = vadd.f32 %v2502_v58, %v2496_v3  ;;  %v8550_v25 = vrot.slane %v5470_v39, %v13290_v59  ;;  %v5471_v3 = vld [vmem:[%s12773_s7 + $0x7] ss:$8 sm:$0xf]  ;;  %s8592_s7 = sld [smem:[#allocation13 + $0x188]]  ;;  %s8678_s0 = sld [smem:[#allocation13 + $0xb]] }
 0x359   :  { %13358 = vst [vmem:[#allocation104_spill] sm:$0xff] %v8536_v22  ;;  %13359 = vst [vmem:[#allocation105_spill] sm:$0xff] %v8545_v56  ;;  %v8553_v21 = vrot.slane %v5470_v39, %v13294_v43  ;;  %v8555_v22 = vadd.f32 %v2131_v15, %v2125_v31  ;;  %v8557_v63 = vadd.f32 %v2317_v33, %v2311_v62  ;;  %v8562_v49 = vstv %s8489_s22  ;;  %s8680_s22 = sld [smem:[#allocation13 + $0x8b]] }
 0x35a   :  { %v1612_v9 = vpop.permute.xlu0 %1611  ;;  %13360 = vst [vmem:[#allocation106_spill] sm:$0xff] %v8550_v25  ;;  %v8559_v20 = vadd.f32 %v2503_v48, %v2497_v17  ;;  %13362 = vst [vmem:[#allocation108_spill] sm:$0xff] %v8562_v49  ;;  %v1578_v32 = vsel %vm1577_vm10, %v1574_v28, %v1576_v30  ;;  %v1581_v31 = vsel %vm1577_vm10, %v1576_v30, %v8429_v50  ;;  %v8587_v28 = vstv %s8514_s24  ;;  %s8737_s24 = sld [smem:[#allocation13 + $0xc]] }
 0x35b   :  { %13361 = vst [vmem:[#allocation107_spill] sm:$0xff] %v8553_v21  ;;  %v1618_v17 = vsel %vm1615_vm11, %v8501_v10, %v1610_v52  ;;  %v1617_v62 = vsel %vm1615_vm11, %v1610_v52, %v1612_v9  ;;  %v8581_v58 = vmul.f32 %v8249_v1, %v1581_v31  ;;  %v8584_v15 = vmul.f32 %v8256_v38, %v1578_v32 }
 0x35c   :  { %v1614_v39 = vpop.permute.xlu1 %1613  ;;  %v8590_v33 = vstv %s8516_s9  ;;  %v8597_v50 = vrot.slane %v5471_v3, %v13292_v12  ;;  %v8600_v30 = vstv %s8524_s4  ;;  %v8603_v52 = vstv %s8526_s6  ;;  %s8747_s9 = sld [smem:[#allocation13 + $0x8c]] }
 0x35d   :  { %13363 = vst [vmem:[#allocation109_spill] sm:$0xff] %v8584_v15  ;;  %13365 = vst [vmem:[#allocation111_spill] sm:$0xff] %v8600_v30  ;;  %v8606_v48 = vrot.slane %v5471_v3, %v13286_v61  ;;  %v2129_v32 = vmul.f32 %v8240_v53, %v8581_v58  ;;  %v2132_v31 = vmul.f32 %v8240_v53, %v8584_v15  ;;  %s8749_s4 = sld [smem:[#allocation13 + $0x10c]] }
 0x35e   :  { %v8578_v41 = vpop.permute.xlu0 %1645  ;;  %13364 = vst [vmem:[#allocation110_spill] sm:$0xff] %v8597_v50  ;;  %13366 = vst [vmem:[#allocation112_spill] sm:$0xff] %v8603_v52  ;;  %v8615_v38 = vmul.f32 %v8259_v24, %v1618_v17  ;;  %v8618_v12 = vmul.f32 %v8265_v8, %v1617_v62  ;;  %v2315_v61 = vmul.f32 %v8243_v46, %v8581_v58  ;;  %v8639_v24 = vstv %s8547_s27  ;;  %s8757_s6 = sld [smem:[#allocation13 + $0x18c]]  ;;  %s8759_s27 = sld [smem:[#allocation13 + $0xe]] }
 0x35f   :  { %13367 = vst [vmem:[#allocation113_spill] sm:$0xff] %v8606_v48  ;;  %v2318_v30 = vmul.f32 %v8243_v46, %v8584_v15  ;;  %v2501_v1 = vmul.f32 %v8246_v54, %v8581_v58  ;;  %v2504_v53 = vmul.f32 %v8246_v54, %v8584_v15  ;;  %v2133_v62 = vadd.f32 %v2129_v32, %v2123_v7 }
 0x360   :  { %13368 = vst [vmem:[#allocation114_spill] sm:$0xff] %v8615_v38  ;;  %v8630_v56 = vpop.permute.xlu1 %1647  ;;  %v2136_v8 = vadd.f32 %v2132_v31, %v2126_v27  ;;  %v8642_v46 = vrot.slane %v5471_v3, %v13290_v59  ;;  %v2319_v52 = vadd.f32 %v2315_v61, %v2309_v23  ;;  %v2326_v50 = vmul.f32 %v8275_v26, %v8615_v38 }
 0x361   :  { %v2322_v48 = vadd.f32 %v2318_v30, %v2312_v0  ;;  %v2505_v54 = vadd.f32 %v2501_v1, %v2495_v35  ;;  %v2508_v15 = vadd.f32 %v2504_v53, %v2498_v45  ;;  %v2512_v7 = vmul.f32 %v8342_v40, %v8615_v38 }
 0x362   :  { %v8632_v17 = vpop.permute.xlu0 %1649  ;;  %13369 = vst [vmem:[#allocation115_spill] sm:$0xff] %v8642_v46  ;;  %v1616_v27 = vsel %vm1615_vm11, %v1612_v9, %v1614_v39  ;;  %v8653_v59 = vrot.slane %v5471_v3, %v13294_v43  ;;  %v2141_v35 = vmul.f32 %v8272_v55, %v8618_v12  ;;  %v2327_v0 = vmul.f32 %v8275_v26, %v8618_v12 }
 0x363   :  { %v2513_v53 = vmul.f32 %v8342_v40, %v8618_v12  ;;  %v1619_v1 = vsel %vm1615_vm11, %v1614_v39, %v8501_v10  ;;  %v2330_v23 = vadd.f32 %v2326_v50, %v2320_v36  ;;  %v2516_v9 = vadd.f32 %v2512_v7, %v2506_v34 }
 0x364   :  { %13370 = vst [vmem:[#allocation116_spill] sm:$0xff] %v8653_v59  ;;  %v8668_v43 = vpop.permute.xlu1 %1651  ;;  %v8673_v3 = vstv %s8592_s7  ;;  %v8676_v30 = vstv %s8594_s1  ;;  %v8683_v32 = vadd.f32 %v2141_v35, %v8555_v22  ;;  %v8686_v10 = vadd.f32 %v2327_v0, %v8557_v63  ;;  %s8776_s7 = sld [smem:[#allocation13 + $0x18e]]  ;;  %s8998_s1 = sld [smem:[#allocation13 + $0x8f]] }
 0x365   :  { %13371 = vst [vmem:[#allocation117_spill] sm:$0xff] %v8676_v30  ;;  %v8689_v39 = vadd.f32 %v2513_v53, %v8559_v20  ;;  %v8692_v36 = vstv %s8608_s11  ;;  %v8695_v34 = vmul.f32 %v8286_v2, %v1619_v1  ;;  %v8698_v50 = vmul.f32 %v8289_v37, %v1616_v27  ;;  %s9353_s11 = sld [smem:[#allocation13 + $0x10f]] }
 0x366   :  { %v8670_v45 = vpop.permute.xlu0 %1683  ;;  %13372 = vst [vmem:[#allocation118_spill] sm:$0xff] %v8692_v36  ;;  %v1656_v22 = vsel %vm1653_vm12, %v8578_v41, %v8630_v56  ;;  %v8705_v31 = vstv %s8620_s28  ;;  %v8710_v20 = vadd.f32 %v8168_v11, %v2330_v23  ;;  %v8713_v63 = vadd.f32 %v8185_v13, %v2516_v9  ;;  %v13406_v36 = vld [vmem:[#allocation37_spill] sm:$0xff]  ;;  %s9355_s28 = sld [smem:[#allocation13 + $0x18f]] }
 0x367   :  { %13373 = vst [vmem:[#allocation119_spill] sm:$0xff] %v8698_v50  ;;  %13374 = vst [vmem:[#allocation120_spill] sm:$0xff] %v8705_v31  ;;  %v8720_v27 = vstv %s8634_s19  ;;  %v8723_v35 = vstv %s8636_s20  ;;  %v2139_v0 = vmul.f32 %v8272_v55, %v8695_v34  ;;  %v2142_v11 = vmul.f32 %v8272_v55, %v8698_v50  ;;  %s9393_s19 = sld [smem:[#allocation13 + $0x90]]  ;;  %v13880_v16 = vld [vmem:[#allocation113_spill] sm:$0xff] }
 0x368   :  { %v8715_v61 = vpop.permute.xlu1 %1685  ;;  %13375 = vst [vmem:[#allocation121_spill] sm:$0xff] %v8720_v27  ;;  %13376 = vst [vmem:[#allocation122_spill] sm:$0xff] %v8723_v35  ;;  %v8730_v53 = vmul.f32 %v8354_v51, %v1656_v22  ;;  %v8733_v13 = vstv %s8644_s21  ;;  %v2325_v1 = vmul.f32 %v8275_v26, %v8695_v34  ;;  %v2328_v23 = vmul.f32 %v8275_v26, %v8698_v50  ;;  %s9402_s20 = sld [smem:[#allocation13 + $0x110]] }
 0x369   :  { %13378 = vst [vmem:[#allocation124_spill] sm:$0xff] %v8733_v13  ;;  %v2511_v9 = vmul.f32 %v8342_v40, %v8695_v34  ;;  %v2514_v55 = vmul.f32 %v8342_v40, %v8698_v50  ;;  %v2143_v22 = vadd.f32 %v2139_v0, %v2133_v62  ;;  %v2146_v51 = vadd.f32 %v2142_v11, %v2136_v8  ;;  %s9404_s21 = sld [smem:[#allocation13 + $0x190]] }
 0x36a   :  { %v8717_v7 = vpop.permute.xlu0 %1687  ;;  %13377 = vst [vmem:[#allocation123_spill] sm:$0xff] %v8730_v53  ;;  %v8752_v35 = vstv %s8655_s2  ;;  %v8755_v37 = vstv %s8657_s12  ;;  %v2329_v26 = vadd.f32 %v2325_v1, %v2319_v52  ;;  %v2332_v2 = vadd.f32 %v2328_v23, %v2322_v48  ;;  %v13384_v23 = vld [vmem:[#allocation61_spill] sm:$0xff]  ;;  %s9431_s2 = sld [smem:[#allocation13 + $0xf]]  ;;  %s9461_s12 = sld [smem:[#allocation13 + $0x10]] }
 0x36b   :  { %13379 = vst [vmem:[#allocation125_spill] sm:$0xff] %v8752_v35  ;;  %13380 = vst [vmem:[#allocation126_spill] sm:$0xff] %v8755_v37  ;;  %v2515_v30 = vadd.f32 %v2511_v9, %v2505_v54  ;;  %v2518_v40 = vadd.f32 %v2514_v55, %v2508_v15  ;;  %v2153_v8 = vadd.f32 %v8135_v19, %v2143_v22  ;;  %v8771_v11 = vstv %s8678_s0  ;;  %v13405_v35 = vld [vmem:[#allocation40_spill] sm:$0xff]  ;;  %s9484_s0 = sld [smem:[#allocation13 + $0x11]] }
 0x36c   :  { %v1690_v13 = vpop.permute.xlu1 %1689  ;;  %v2159_v62 = vmul.f32 %v8373_v29, %v8730_v53  ;;  %13381 = vst [vmem:[#allocation127_spill] sm:$0xff] %v8771_v11  ;;  %v8774_v37 = vstv %s8680_s22  ;;  %v2339_v55 = vadd.f32 %v8153_v18, %v2329_v26  ;;  %v2345_v15 = vmul.f32 %v8376_v4, %v8730_v53  ;;  %v13386_v26 = vld [vmem:[#allocation64_spill] sm:$0xff]  ;;  %s9486_s22 = sld [smem:[#allocation13 + $0x91]] }
 0x36d   :  { %13382 = vst [vmem:[#allocation128_spill] sm:$0xff] %v8774_v37  ;;  %v2525_v19 = vadd.f32 %v8156_v57, %v2515_v30  ;;  %v2531_v52 = vmul.f32 %v8379_v44, %v8730_v53  ;;  %v1655_v18 = vsel %vm1653_vm12, %v8630_v56, %v8632_v17  ;;  %v1654_v54 = vsel %vm1653_vm12, %v8632_v17, %v8668_v43 }
 0x36e   :  { %v8768_v0 = vpop.permute.xlu0 %1721  ;;  %v8785_v48 = vadd.f32 %v2159_v62, %v2153_v8  ;;  %v8796_v57 = vstv %s8707_s8  ;;  %v8798_v30 = vadd.f32 %v2345_v15, %v2339_v55  ;;  %v8803_v9 = vmul.f32 %v13384_v23, %v1655_v18  ;;  %v13388_v8 = vld [vmem:[#allocation60_spill] sm:$0xff]  ;;  %v13394_v18 = vld [vmem:[#allocation79_spill] sm:$0xff]  ;;  %s9494_s8 = sld [smem:[#allocation13 + $0x111]] }
 0x36f   :  { %13383 = vst [vmem:[#allocation129_spill] sm:$0xff] %v8796_v57  ;;  %v8800_v1 = vadd.f32 %v2531_v52, %v2525_v19  ;;  %v1657_v56 = vsel %vm1653_vm12, %v8668_v43, %v8578_v41  ;;  %v8812_v17 = vmul.f32 %v13386_v26, %v1654_v54  ;;  %v8818_v55 = vstv %s8735_s10  ;;  %s9496_s10 = sld [smem:[#allocation13 + $0x191]] }
 0x370   :  { %13385 = vst [vmem:[#allocation130_spill] sm:$0xff] %v8803_v9  ;;  %v8809_v22 = vpop.permute.xlu1 %1723  ;;  %v8815_v62 = vmul.f32 %v13388_v8, %v1657_v56  ;;  %13390 = vst [vmem:[#allocation133_spill] sm:$0xff] %v8818_v55  ;;  %v8821_v15 = vstv %s8737_s24  ;;  %v2346_v19 = vmul.f32 %v8376_v4, %v8803_v9  ;;  %v2532_v41 = vmul.f32 %v8379_v44, %v8803_v9  ;;  %v13395_v56 = vld [vmem:[#allocation36_spill] sm:$0xff]  ;;  %s9502_s24 = sld [smem:[#allocation14]] }
 0x371   :  { %13387 = vst [vmem:[#allocation131_spill] sm:$0xff] %v8812_v17  ;;  %13391 = vst [vmem:[#allocation134_spill] sm:$0xff] %v8821_v15  ;;  %v8828_v43 = vstv %s8747_s9  ;;  %v8831_v52 = vstv %s8749_s4  ;;  %v2155_v54 = vadd.f32 %v13394_v18, %v8683_v32  ;;  %v2156_v8 = vadd.f32 %v13395_v56, %v2146_v51  ;;  %v13401_v32 = vld [vmem:[#allocation56_spill] sm:$0xff]  ;;  %s5507_s9 = sld [smem:[#allocation14 + $0x1]]  ;;  %s5526_s4 = sld [smem:[#allocation14 + $0x2]] }
 0x372   :  { %13389 = vst [vmem:[#allocation132_spill] sm:$0xff] %v8815_v62  ;;  %13392 = vst [vmem:[#allocation135_spill] sm:$0xff] %v8828_v43  ;;  %v8836_v26 = vpop.permute.xlu0 %1725  ;;  %v8839_v11 = vstv %s8757_s6  ;;  %v8842_v15 = vstv %s8759_s27  ;;  %v2350_v23 = vadd.f32 %v2346_v19, %v8710_v20  ;;  %v2536_v37 = vadd.f32 %v2532_v41, %v8713_v63  ;;  %v13403_v63 = vld [vmem:[#allocation34_spill] sm:$0xff]  ;;  %v13404_v41 = vld [vmem:[#allocation77_spill] sm:$0xff]  ;;  %s5545_s6 = sld [smem:[#allocation14 + $0x3]]  ;;  %s9725_s27 = sld [smem:[#allocation16 + $0x4]] }
 0x373   :  { %13393 = vst [vmem:[#allocation136_spill] sm:$0xff] %v8831_v52  ;;  %13396 = vst [vmem:[#allocation79_spill] sm:$0xff] %v8839_v11  ;;  %v8847_v55 = vstv %s8761_s29  ;;  %v8850_v43 = vstv %s8763_s30  ;;  %v13400_v52 = vld [vmem:[#allocation97_spill] sm:$0xff]  ;;  %v2161_v51 = vmul.f32 %v8373_v29, %v8812_v17  ;;  %v2162_v56 = vmul.f32 %v8373_v29, %v8815_v62  ;;  %s9727_s29 = sld [smem:[#allocation16 + $0x84]] }
 0x374   :  { %13397 = vst [vmem:[#allocation36_spill] sm:$0xff] %v8842_v15  ;;  %13398 = vst [vmem:[#allocation137_spill] sm:$0xff] %v8847_v55  ;;  %v1934_v18 = vmul.f32 %v13401_v32, %v13400_v52  ;;  %v8859_v15 = vpop.permute.xlu1 %1727  ;;  %v8862_v20 = vstv %s8776_s7  ;;  %v2341_v19 = vadd.f32 %v13403_v63, %v8686_v10  ;;  %v2347_v55 = vmul.f32 %v8376_v4, %v8812_v17  ;;  %v13413_v63 = vld [vmem:[#allocation54_spill] sm:$0xff]  ;;  %s9729_s30 = sld [smem:[#allocation16 + $0x104]] }
 0x375   :  { %13399 = vst [vmem:[#allocation138_spill] sm:$0xff] %v8850_v43  ;;  %13402 = vst [vmem:[#allocation56_spill] sm:$0xff] %v8862_v20  ;;  %v2342_v43 = vadd.f32 %v13404_v41, %v2332_v2  ;;  %v2348_v52 = vmul.f32 %v8376_v4, %v8815_v62  ;;  %v2165_v11 = vadd.f32 %v2161_v51, %v2155_v54  ;;  %v13411_v51 = vld [vmem:[#allocation92_spill] sm:$0xff]  ;;  %s9731_s7 = sld [smem:[#allocation16 + $0x184]] }
 0x376   :  { %v2166_v57 = vadd.f32 %v2162_v56, %v2156_v8  ;;  %v2527_v29 = vadd.f32 %v13405_v35, %v8689_v39  ;;  %v2528_v27 = vadd.f32 %v13406_v36, %v2518_v40  ;;  %v2351_v31 = vadd.f32 %v2347_v55, %v2341_v19  ;;  %v8892_v40 = vpop.permute.xlu0 %1759  ;;  %v13407_v55 = vld [vmem:[#allocation59_spill] sm:$0xff] }
 0x377   :  { %v2352_v20 = vadd.f32 %v2348_v52, %v2342_v43  ;;  %v2533_v10 = vmul.f32 %v8379_v44, %v8812_v17  ;;  %v2534_v2 = vmul.f32 %v8379_v44, %v8815_v62  ;;  %v1694_v4 = vsel %vm1691_vm13, %v8670_v45, %v8715_v61  ;;  %v13409_v52 = vld [vmem:[#allocation32_spill] sm:$0xff] }
 0x378   :  { %v1693_v39 = vsel %vm1691_vm13, %v8715_v61, %v8717_v7  ;;  %v1692_v36 = vsel %vm1691_vm13, %v8717_v7, %v1690_v13  ;;  %v1695_v35 = vsel %vm1691_vm13, %v1690_v13, %v8670_v45  ;;  %v8895_v43 = vmul.f32 %v13407_v55, %v1694_v4  ;;  %v13412_v61 = vld [vmem:[#allocation72_spill] sm:$0xff]  ;;  %v13414_v45 = vld [vmem:[#allocation29_spill] sm:$0xff] }
 0x379   :  { %v2537_v44 = vadd.f32 %v2533_v10, %v2527_v29  ;;  %v2538_v8 = vadd.f32 %v2534_v2, %v2528_v27  ;;  %v8898_v54 = vmul.f32 %v13409_v52, %v1693_v39  ;;  %v1928_v56 = vmul.f32 %v13412_v61, %v13411_v51  ;;  %v8909_v29 = vpop.permute.xlu1 %1761  ;;  %v13416_v2 = vld [vmem:[#allocation31_spill] sm:$0xff] }
 0x37a   :  { %13408 = vst [vmem:[#allocation34_spill] sm:$0xff] %v8895_v43  ;;  %v1929_v7 = vmul.f32 %v13412_v61, %v13413_v63  ;;  %v1927_v19 = vmul.f32 %v13412_v61, %v8421_v14  ;;  %v8907_v13 = vmul.f32 %v13414_v45, %v1692_v36  ;;  %v2169_v27 = vmul.f32 %v8463_v42, %v8895_v43  ;;  %v8936_v62 = vpop.permute.xlu0 %1763 }
 0x37b   :  { %13410 = vst [vmem:[#allocation77_spill] sm:$0xff] %v8898_v54  ;;  %v2355_v41 = vmul.f32 %v8519_v6, %v8895_v43  ;;  %v2541_v10 = vmul.f32 %v8522_v60, %v8895_v43  ;;  %v8918_v4 = vmul.f32 %v13416_v2, %v1695_v35  ;;  %v1930_v14 = vmul.f32 %v13412_v61, %v8438_v47  ;;  %v13417_v2 = vld [vmem:[#allocation99_spill] sm:$0xff]  ;;  %v13418_v61 = vld [vmem:[#allocation100_spill] sm:$0xff] }
 0x37c   :  { %13415 = vst [vmem:[#allocation40_spill] sm:$0xff] %v8907_v13  ;;  %v1935_v39 = vmul.f32 %v13401_v32, %v8427_v5  ;;  %v2356_v36 = vmul.f32 %v8519_v6, %v8898_v54  ;;  %v2542_v63 = vmul.f32 %v8522_v60, %v8898_v54  ;;  %v1938_v51 = vadd.f32 %v1934_v18, %v1928_v56 }
 0x37d   :  { %v2173_v45 = vadd.f32 %v2169_v27, %v8785_v48  ;;  %v2359_v52 = vadd.f32 %v2355_v41, %v8798_v30  ;;  %v2545_v35 = vadd.f32 %v2541_v10, %v8800_v1  ;;  %v1933_v47 = vmul.f32 %v13401_v32, %v13417_v2  ;;  %v1766_v27 = vpop.permute.xlu1 %1765  ;;  %v13419_v41 = vld [vmem:[#allocation101_spill] sm:$0xff]  ;;  %v13420_v10 = vld [vmem:[#allocation38_spill] sm:$0xff] }
 0x37e   :  { %v1936_v5 = vmul.f32 %v13401_v32, %v13418_v61  ;;  %v2360_v55 = vadd.f32 %v2356_v36, %v2350_v23  ;;  %v2546_v43 = vadd.f32 %v2542_v63, %v2536_v37  ;;  %v2171_v18 = vmul.f32 %v8463_v42, %v8907_v13  ;;  %v13421_v36 = vld [vmem:[#allocation102_spill] sm:$0xff] }
 0x37f   :  { %v2172_v48 = vmul.f32 %v8463_v42, %v8918_v4  ;;  %v1732_v30 = vsel %vm1729_vm14, %v8768_v0, %v8809_v22  ;;  %v1731_v1 = vsel %vm1729_vm14, %v8809_v22, %v8836_v26  ;;  %v2357_v37 = vmul.f32 %v8519_v6, %v8907_v13 }
 0x380   :  { %v2358_v23 = vmul.f32 %v8519_v6, %v8918_v4  ;;  %v2543_v32 = vmul.f32 %v8522_v60, %v8907_v13  ;;  %v2544_v56 = vmul.f32 %v8522_v60, %v8918_v4  ;;  %v1944_v2 = vmul.f32 %v13420_v10, %v13419_v41  ;;  %v13422_v6 = vld [vmem:[#allocation103_spill] sm:$0xff]  ;;  %v13423_v13 = vld [vmem:[#allocation104_spill] sm:$0xff] }
 0x381   :  { %v1945_v63 = vmul.f32 %v13420_v10, %v13421_v36  ;;  %v2175_v22 = vadd.f32 %v2171_v18, %v2165_v11  ;;  %v2176_v61 = vadd.f32 %v2172_v48, %v2166_v57  ;;  %v2361_v42 = vadd.f32 %v2357_v37, %v2351_v31 }
 0x382   :  { %v2362_v54 = vadd.f32 %v2358_v23, %v2352_v20  ;;  %v2547_v17 = vadd.f32 %v2543_v32, %v2537_v44  ;;  %v2548_v9 = vadd.f32 %v2544_v56, %v2538_v8  ;;  %v8963_v53 = vmul.f32 %v13422_v6, %v1732_v30  ;;  %v8981_v8 = vpop.permute.xlu0 %1797  ;;  %v13424_v32 = vld [vmem:[#allocation44_spill] sm:$0xff] }
 0x383   :  { %v8966_v50 = vmul.f32 %v13423_v13, %v1731_v1  ;;  %v1730_v60 = vsel %vm1729_vm14, %v8836_v26, %v8859_v15  ;;  %v1733_v11 = vsel %vm1729_vm14, %v8859_v15, %v8768_v0  ;;  %v1939_v31 = vadd.f32 %v1935_v39, %v1929_v7  ;;  %v1800_v39 = vpop.permute.xlu1 %1799 }
 0x384   :  { %v1937_v57 = vadd.f32 %v1933_v47, %v1927_v19  ;;  %v1943_v20 = vmul.f32 %v13420_v10, %v8581_v58  ;;  %v8979_v44 = vmul.f32 %v8550_v25, %v1730_v60  ;;  %v2179_v18 = vmul.f32 %v8562_v49, %v8963_v53  ;;  %v13451_v25 = vld [vmem:[#allocation94_spill] sm:$0xff] }
 0x385   :  { %v2365_v26 = vmul.f32 %v8587_v28, %v8963_v53  ;;  %v2551_v48 = vmul.f32 %v8590_v33, %v8963_v53  ;;  %v8990_v0 = vmul.f32 %v8553_v21, %v1733_v11  ;;  %v8992_v15 = vadd.f32 %v1936_v5, %v1930_v14  ;;  %v13450_v21 = vld [vmem:[#allocation93_spill] sm:$0xff] }
 0x386   :  { %v1948_v58 = vadd.f32 %v1944_v2, %v1938_v51  ;;  %v2366_v7 = vmul.f32 %v8587_v28, %v8966_v50  ;;  %v2552_v19 = vmul.f32 %v8590_v33, %v8966_v50  ;;  %v1949_v47 = vadd.f32 %v1945_v63, %v1939_v31 }
 0x387   :  { %v2183_v30 = vadd.f32 %v2179_v18, %v2173_v45  ;;  %v2369_v1 = vadd.f32 %v2365_v26, %v2359_v52  ;;  %v2555_v37 = vadd.f32 %v2551_v48, %v2545_v35  ;;  %v1947_v23 = vadd.f32 %v1943_v20, %v1937_v57  ;;  %v1802_v35 = vpop.permute.xlu0 %1801  ;;  %v1804_v18 = vpop.permute.xlu1 %1803  ;;  %v13425_v26 = vld [vmem:[#allocation110_spill] sm:$0xff] }
 0x388   :  { %v1953_v56 = vmul.f32 %v13424_v32, %v8695_v34  ;;  %v2370_v14 = vadd.f32 %v2366_v7, %v2360_v55  ;;  %v2556_v5 = vadd.f32 %v2552_v19, %v2546_v43  ;;  %v2181_v51 = vmul.f32 %v8562_v49, %v8979_v44  ;;  %v13426_v7 = vld [vmem:[#allocation113_spill] sm:$0xff] }
 0x389   :  { %v2182_v2 = vmul.f32 %v8562_v49, %v8990_v0  ;;  %v1770_v36 = vsel %vm1767_vm15, %v8892_v40, %v8909_v29  ;;  %v1769_v52 = vsel %vm1767_vm15, %v8909_v29, %v8936_v62  ;;  %v2367_v34 = vmul.f32 %v8587_v28, %v8979_v44 }
 0x38a   :  { %v2368_v55 = vmul.f32 %v8587_v28, %v8990_v0  ;;  %v2553_v43 = vmul.f32 %v8590_v33, %v8979_v44  ;;  %v2554_v45 = vmul.f32 %v8590_v33, %v8990_v0  ;;  %v1954_v63 = vmul.f32 %v13424_v32, %v8615_v38 }
 0x38b   :  { %v1955_v29 = vmul.f32 %v13424_v32, %v8618_v12  ;;  %v2185_v60 = vadd.f32 %v2181_v51, %v2175_v22  ;;  %v2186_v11 = vadd.f32 %v2182_v2, %v2176_v61  ;;  %v2371_v31 = vadd.f32 %v2367_v34, %v2361_v42  ;;  %v13427_v22 = vld [vmem:[#allocation109_spill] sm:$0xff]  ;;  %v13429_v61 = vld [vmem:[#allocation112_spill] sm:$0xff]  ;;  %v1816_v49 = vpop.permute.xlu1 %1815 }
 0x38c   :  { %v2372_v57 = vadd.f32 %v2368_v55, %v2362_v54  ;;  %v2557_v20 = vadd.f32 %v2553_v43, %v2547_v17  ;;  %v2558_v28 = vadd.f32 %v2554_v45, %v2548_v9  ;;  %v9027_v48 = vmul.f32 %v13425_v26, %v1770_v36  ;;  %v9059_v36 = vpop.permute.xlu0 %1813 }
 0x38d   :  { %v9030_v33 = vmul.f32 %v13426_v7, %v1769_v52  ;;  %v1768_v19 = vsel %vm1767_vm15, %v8936_v62, %v1766_v27  ;;  %v1771_v12 = vsel %vm1767_vm15, %v1766_v27, %v8892_v40  ;;  %v1946_v42 = vmul.f32 %v13420_v10, %v13427_v22  ;;  %v13430_v52 = vld [vmem:[#allocation119_spill] sm:$0xff] }
 0x38e   :  { %v1957_v17 = vadd.f32 %v1953_v56, %v1947_v23  ;;  %v9041_v9 = vmul.f32 %v8642_v46, %v1768_v19  ;;  %v9044_v54 = vstv %s8998_s1  ;;  %v2189_v51 = vmul.f32 %v13429_v61, %v9027_v48  ;;  %v13431_v19 = vld [vmem:[#allocation53_spill] sm:$0xff]  ;;  %s9737_s1 = sld [smem:[#allocation16 + $0xd]] }
 0x38f   :  { %13428 = vst [vmem:[#allocation37_spill] sm:$0xff] %v9044_v54  ;;  %v2375_v2 = vmul.f32 %v8639_v24, %v9027_v48  ;;  %v2561_v62 = vmul.f32 %v8673_v3, %v9027_v48  ;;  %v9053_v40 = vmul.f32 %v8653_v59, %v1771_v12  ;;  %v1958_v27 = vadd.f32 %v1954_v63, %v1948_v58  ;;  %v13432_v58 = vld [vmem:[#allocation123_spill] sm:$0xff] }
 0x390   :  { %v1959_v10 = vadd.f32 %v1955_v29, %v1949_v47  ;;  %v2376_v23 = vmul.f32 %v8639_v24, %v9030_v33  ;;  %v2562_v56 = vmul.f32 %v8673_v3, %v9030_v33  ;;  %v1956_v34 = vmul.f32 %v13424_v32, %v13430_v52  ;;  %v13433_v47 = vld [vmem:[#allocation63_spill] sm:$0xff] }
 0x391   :  { %v2193_v55 = vadd.f32 %v2189_v51, %v2183_v30  ;;  %v9063_v43 = vadd.f32 %v2375_v2, %v2369_v1  ;;  %v9065_v45 = vadd.f32 %v2561_v62, %v2555_v37  ;;  %v1967_v12 = vadd.f32 %v13431_v19, %v1957_v17  ;;  %v13434_v51 = vld [vmem:[#allocation95_spill] sm:$0xff] }
 0x392   :  { %v1973_v63 = vmul.f32 %v13433_v47, %v13432_v58  ;;  %v2380_v29 = vadd.f32 %v2376_v23, %v2370_v14  ;;  %v2566_v22 = vadd.f32 %v2562_v56, %v2556_v5  ;;  %v2191_v38 = vmul.f32 %v13429_v61, %v9041_v9  ;;  %v1818_v58 = vpop.permute.xlu0 %1817 }
 0x393   :  { %v2192_v41 = vmul.f32 %v13429_v61, %v9053_v40  ;;  %v1807_v30 = vsel %vm1501_vm8, %v8981_v8, %v1800_v39  ;;  %v1806_v1 = vsel %vm1501_vm8, %v1800_v39, %v1802_v35  ;;  %v2377_v37 = vmul.f32 %v8639_v24, %v9041_v9  ;;  %v13435_v61 = vld [vmem:[#allocation52_spill] sm:$0xff] }
 0x394   :  { %v2378_v32 = vmul.f32 %v8639_v24, %v9053_v40  ;;  %v2563_v14 = vmul.f32 %v8673_v3, %v9041_v9  ;;  %v2564_v5 = vmul.f32 %v8673_v3, %v9053_v40  ;;  %v1950_v17 = vadd.f32 %v1946_v42, %v8992_v15  ;;  %v13436_v24 = vld [vmem:[#allocation90_spill] sm:$0xff] }
 0x395   :  { %v1968_v2 = vadd.f32 %v13434_v51, %v1958_v27  ;;  %v2195_v62 = vadd.f32 %v2191_v38, %v2185_v60  ;;  %v2196_v23 = vadd.f32 %v2192_v41, %v2186_v11  ;;  %v2381_v56 = vadd.f32 %v2377_v37, %v2371_v31  ;;  %v13437_v60 = vld [vmem:[#allocation130_spill] sm:$0xff]  ;;  %v13440_v27 = vld [vmem:[#allocation121_spill] sm:$0xff] }
 0x396   :  { %v2382_v39 = vadd.f32 %v2378_v32, %v2372_v57  ;;  %v2567_v52 = vadd.f32 %v2563_v14, %v2557_v20  ;;  %v2568_v19 = vadd.f32 %v2564_v5, %v2558_v28  ;;  %v9090_v59 = vmul.f32 %v1807_v30, %v13435_v61  ;;  %v13438_v31 = vld [vmem:[#allocation78_spill] sm:$0xff]  ;;  %v1820_v20 = vpop.permute.xlu1 %1819  ;;  %v13439_v28 = vld [vmem:[#allocation120_spill] sm:$0xff]  ;;  %v13442_v37 = vld [vmem:[#allocation73_spill] sm:$0xff] }
 0x397   :  { %v9093_v46 = vmul.f32 %v1806_v1, %v13436_v24  ;;  %v1805_v3 = vsel %vm1501_vm8, %v1802_v35, %v1804_v18  ;;  %v1808_v15 = vsel %vm1501_vm8, %v1804_v18, %v8981_v8  ;;  %v1960_v38 = vadd.f32 %v1956_v34, %v1950_v17  ;;  %v13441_v1 = vld [vmem:[#allocation84_spill] sm:$0xff]  ;;  %v13443_v8 = vld [vmem:[#allocation131_spill] sm:$0xff]  ;;  %v13444_v34 = vld [vmem:[#allocation118_spill] sm:$0xff] }
 0x398   :  { %v1977_v41 = vadd.f32 %v1973_v63, %v1967_v12  ;;  %v1974_v11 = vmul.f32 %v13433_v47, %v13437_v60  ;;  %v1969_v57 = vadd.f32 %v13438_v31, %v1959_v10  ;;  %v2386_v42 = vmul.f32 %v13439_v28, %v9090_v59  ;;  %v13445_v14 = vld [vmem:[#allocation132_spill] sm:$0xff]  ;;  %v13446_v17 = vld [vmem:[#allocation34_spill] sm:$0xff]  ;;  %v13448_v24 = vld [vmem:[#allocation77_spill] sm:$0xff]  ;;  %v9127_v60 = vpop.permute.xlu0 %1829 }
 0x399   :  { %v2572_v30 = vmul.f32 %v13440_v27, %v9090_v59  ;;  %v9108_v35 = vmul.f32 %v1808_v15, %v13441_v1  ;;  %v9111_v32 = vmul.f32 %v1805_v3, %v13442_v37  ;;  %v1975_v18 = vmul.f32 %v13433_v47, %v13443_v8  ;;  %v13447_v51 = vld [vmem:[#allocation30_spill] sm:$0xff] }
 0x39a   :  { %v2201_v12 = vmul.f32 %v13444_v34, %v9093_v46  ;;  %v2387_v10 = vmul.f32 %v13439_v28, %v9093_v46  ;;  %v2573_v63 = vmul.f32 %v13440_v27, %v9093_v46  ;;  %v1976_v5 = vmul.f32 %v13433_v47, %v13445_v14 }
 0x39b   :  { %v1983_v15 = vmul.f32 %v13447_v51, %v13446_v17  ;;  %v2390_v3 = vadd.f32 %v2386_v42, %v2380_v29  ;;  %v2576_v31 = vadd.f32 %v2572_v30, %v2566_v22  ;;  %v1984_v8 = vmul.f32 %v13447_v51, %v13448_v24  ;;  %v1832_v42 = vpop.permute.xlu1 %1831 }
 0x39c   :  { %v2205_v61 = vadd.f32 %v2201_v12, %v2195_v62  ;;  %v2391_v37 = vadd.f32 %v2387_v10, %v2381_v56  ;;  %v2577_v1 = vadd.f32 %v2573_v63, %v2567_v52  ;;  %v2199_v7 = vmul.f32 %v13444_v34, %v9108_v35  ;;  %v13449_v12 = vld [vmem:[#allocation76_spill] sm:$0xff] }
 0x39d   :  { %v2202_v26 = vmul.f32 %v13444_v34, %v9111_v32  ;;  %v1823_v47 = vsel %vm1539_vm9, %v9059_v36, %v1816_v49  ;;  %v1822_v29 = vsel %vm1539_vm9, %v1816_v49, %v1818_v58  ;;  %v2385_v22 = vmul.f32 %v13439_v28, %v9108_v35 }
 0x39e   :  { %v2388_v62 = vmul.f32 %v13439_v28, %v9111_v32  ;;  %v2571_v56 = vmul.f32 %v13440_v27, %v9108_v35  ;;  %v2574_v52 = vmul.f32 %v13440_v27, %v9111_v32  ;;  %v1978_v30 = vadd.f32 %v1974_v11, %v1968_v2  ;;  %v13454_v11 = vld [vmem:[#allocation74_spill] sm:$0xff] }
 0x39f   :  { %v1970_v10 = vadd.f32 %v13449_v12, %v1960_v38  ;;  %v2203_v63 = vadd.f32 %v2199_v7, %v2193_v55  ;;  %v2206_v14 = vadd.f32 %v2202_v26, %v2196_v23  ;;  %v2389_v49 = vadd.f32 %v2385_v22, %v9063_v43  ;;  %v1834_v23 = vpop.permute.xlu0 %1833  ;;  %v13456_v22 = vld [vmem:[#allocation40_spill] sm:$0xff] }
 0x3a0   :  { %v2392_v17 = vadd.f32 %v2388_v62, %v2382_v39  ;;  %v2575_v34 = vadd.f32 %v2571_v56, %v9065_v45  ;;  %v2578_v24 = vadd.f32 %v2574_v52, %v2568_v19  ;;  %v9150_v28 = vmul.f32 %v1823_v47, %v13450_v21  ;;  %v13452_v45 = vld [vmem:[#allocation125_spill] sm:$0xff]  ;;  %v13453_v19 = vld [vmem:[#allocation126_spill] sm:$0xff] }
 0x3a1   :  { %v9153_v13 = vmul.f32 %v1822_v29, %v13451_v25  ;;  %v1821_v27 = vsel %vm1539_vm9, %v1818_v58, %v1820_v20  ;;  %v1824_v7 = vsel %vm1539_vm9, %v1820_v20, %v9059_v36  ;;  %v1979_v26 = vadd.f32 %v1975_v18, %v1969_v57  ;;  %v13455_v29 = vld [vmem:[#allocation75_spill] sm:$0xff]  ;;  %v13457_v57 = vld [vmem:[#allocation124_spill] sm:$0xff] }
 0x3a2   :  { %v1980_v55 = vadd.f32 %v1976_v5, %v1970_v10  ;;  %v1987_v43 = vadd.f32 %v1983_v15, %v1977_v41  ;;  %v1988_v2 = vadd.f32 %v1984_v8, %v1978_v30  ;;  %v2396_v39 = vmul.f32 %v13452_v45, %v9150_v28  ;;  %v1836_v5 = vpop.permute.xlu1 %1835  ;;  %v13458_v8 = vld [vmem:[#allocation105_spill] sm:$0xff] }
 0x3a3   :  { %v2582_v38 = vmul.f32 %v13453_v19, %v9150_v28  ;;  %v9165_v47 = vmul.f32 %v1824_v7, %v13454_v11  ;;  %v9168_v58 = vmul.f32 %v1821_v27, %v13455_v29  ;;  %v1985_v36 = vmul.f32 %v13447_v51, %v13456_v22  ;;  %v13459_v29 = vld [vmem:[#allocation35_spill] sm:$0xff] }
 0x3a4   :  { %v2211_v41 = vmul.f32 %v13457_v57, %v9153_v13  ;;  %v2397_v20 = vmul.f32 %v13452_v45, %v9153_v13  ;;  %v2583_v18 = vmul.f32 %v13453_v19, %v9153_v13  ;;  %v1986_v15 = vmul.f32 %v13447_v51, %v8918_v4  ;;  %v13460_v11 = vld [vmem:[#allocation39_spill] sm:$0xff] }
 0x3a5   :  { %v1993_v62 = vmul.f32 %v13458_v8, %v8963_v53  ;;  %v2400_v56 = vadd.f32 %v2396_v39, %v2390_v3  ;;  %v2586_v52 = vadd.f32 %v2582_v38, %v2576_v31  ;;  %v1994_v30 = vmul.f32 %v13458_v8, %v8966_v50  ;;  %v1846_v3 = vpop.permute.xlu0 %1845 }
 0x3a6   :  { %v2215_v12 = vadd.f32 %v2211_v41, %v2205_v61  ;;  %v2401_v10 = vadd.f32 %v2397_v20, %v2391_v37  ;;  %v2587_v27 = vadd.f32 %v2583_v18, %v2577_v1  ;;  %v2209_v7 = vmul.f32 %v13457_v57, %v9165_v47  ;;  %v1848_v21 = vpop.permute.xlu1 %1847 }
 0x3a7   :  { %v2212_v22 = vmul.f32 %v13457_v57, %v9168_v58  ;;  %v1839_v4 = vsel %vm1577_vm10, %v9127_v60, %v1832_v42  ;;  %v1838_v53 = vsel %vm1577_vm10, %v1832_v42, %v1834_v23  ;;  %v2395_v51 = vmul.f32 %v13452_v45, %v9165_v47 }
 0x3a8   :  { %v2398_v61 = vmul.f32 %v13452_v45, %v9168_v58  ;;  %v2581_v1 = vmul.f32 %v13453_v19, %v9165_v47  ;;  %v2584_v37 = vmul.f32 %v13453_v19, %v9168_v58  ;;  %v1989_v31 = vadd.f32 %v1985_v36, %v1979_v26  ;;  %v13462_v26 = vld [vmem:[#allocation133_spill] sm:$0xff] }
 0x3a9   :  { %v1995_v39 = vmul.f32 %v13458_v8, %v8979_v44  ;;  %v2213_v38 = vadd.f32 %v2209_v7, %v2203_v63  ;;  %v2216_v41 = vadd.f32 %v2212_v22, %v2206_v14  ;;  %v2399_v42 = vadd.f32 %v2395_v51, %v2389_v49  ;;  %v13463_v7 = vld [vmem:[#allocation42_spill] sm:$0xff] }
 0x3aa   :  { %v2402_v20 = vadd.f32 %v2398_v61, %v2392_v17  ;;  %v2585_v18 = vadd.f32 %v2581_v1, %v2575_v34  ;;  %v2588_v25 = vadd.f32 %v2584_v37, %v2578_v24  ;;  %v9204_v45 = vmul.f32 %v1839_v4, %v13459_v29  ;;  %v13461_v34 = vld [vmem:[#allocation129_spill] sm:$0xff] }
 0x3ab   :  { %v9207_v57 = vmul.f32 %v1838_v53, %v13460_v11  ;;  %v1837_v19 = vsel %vm1577_vm10, %v1834_v23, %v1836_v5  ;;  %v1840_v44 = vsel %vm1577_vm10, %v1836_v5, %v9127_v60  ;;  %v1990_v63 = vadd.f32 %v1986_v15, %v1980_v55  ;;  %v13464_v23 = vld [vmem:[#allocation43_spill] sm:$0xff]  ;;  %v13465_v60 = vld [vmem:[#allocation128_spill] sm:$0xff] }
 0x3ac   :  { %v1997_v14 = vadd.f32 %v1993_v62, %v1987_v43  ;;  %v1998_v49 = vadd.f32 %v1994_v30, %v1988_v2  ;;  %v1996_v24 = vmul.f32 %v13458_v8, %v8990_v0  ;;  %v2406_v17 = vmul.f32 %v13461_v34, %v9204_v45  ;;  %v1850_v2 = vpop.permute.xlu0 %1849  ;;  %v13466_v5 = vld [vmem:[#allocation111_spill] sm:$0xff] }
 0x3ad   :  { %v2592_v36 = vmul.f32 %v13462_v26, %v9204_v45  ;;  %v9221_v22 = vmul.f32 %v1840_v44, %v13463_v7  ;;  %v9224_v4 = vmul.f32 %v1837_v19, %v13464_v23  ;;  %v1999_v53 = vadd.f32 %v1995_v39, %v1989_v31  ;;  %v1852_v31 = vpop.permute.xlu1 %1851  ;;  %v13467_v44 = vld [vmem:[#allocation117_spill] sm:$0xff]  ;;  %v13469_v7 = vld [vmem:[#allocation47_spill] sm:$0xff] }
 0x3ae   :  { %v2221_v55 = vmul.f32 %v13465_v60, %v9207_v57  ;;  %v2407_v43 = vmul.f32 %v13461_v34, %v9207_v57  ;;  %v2593_v0 = vmul.f32 %v13462_v26, %v9207_v57  ;;  %v2003_v15 = vmul.f32 %v13466_v5, %v9027_v48 }
 0x3af   :  { %v2004_v8 = vmul.f32 %v13466_v5, %v9030_v33  ;;  %v2410_v62 = vadd.f32 %v2406_v17, %v2400_v56  ;;  %v2596_v30 = vadd.f32 %v2592_v36, %v2586_v52  ;;  %v2005_v51 = vmul.f32 %v13466_v5, %v9041_v9 }
 0x3b0   :  { %v2225_v61 = vadd.f32 %v2221_v55, %v2215_v12  ;;  %v2411_v1 = vadd.f32 %v2407_v43, %v2401_v10  ;;  %v2597_v37 = vadd.f32 %v2593_v0, %v2587_v27  ;;  %v2219_v39 = vmul.f32 %v13465_v60, %v9221_v22  ;;  %v1862_v29 = vpop.permute.xlu0 %1861 }
 0x3b1   :  { %v2222_v19 = vmul.f32 %v13465_v60, %v9224_v4  ;;  %v1855_v48 = vsel %vm1615_vm11, %v1846_v3, %v1848_v21  ;;  %v1854_v56 = vsel %vm1615_vm11, %v1848_v21, %v1850_v2  ;;  %v2405_v52 = vmul.f32 %v13461_v34, %v9221_v22 }
 0x3b2   :  { %v2408_v9 = vmul.f32 %v13461_v34, %v9224_v4  ;;  %v2591_v12 = vmul.f32 %v13462_v26, %v9221_v22  ;;  %v2594_v10 = vmul.f32 %v13462_v26, %v9224_v4  ;;  %v2006_v27 = vmul.f32 %v13466_v5, %v9053_v40  ;;  %v13468_v34 = vld [vmem:[#allocation80_spill] sm:$0xff] }
 0x3b3   :  { %v2014_v17 = vmul.f32 %v13467_v44, %v9090_v59  ;;  %v2223_v36 = vadd.f32 %v2219_v39, %v2213_v38  ;;  %v2226_v21 = vadd.f32 %v2222_v19, %v2216_v41  ;;  %v2409_v55 = vadd.f32 %v2405_v52, %v2399_v42  ;;  %v13471_v39 = vld [vmem:[#allocation79_spill] sm:$0xff] }
 0x3b4   :  { %v2412_v43 = vadd.f32 %v2408_v9, %v2402_v20  ;;  %v2595_v0 = vadd.f32 %v2591_v12, %v2585_v18  ;;  %v2598_v11 = vadd.f32 %v2594_v10, %v2588_v25  ;;  %v9259_v23 = vmul.f32 %v1855_v48, %v13468_v34  ;;  %v1864_v20 = vpop.permute.xlu1 %1863  ;;  %v13470_v25 = vld [vmem:[#allocation136_spill] sm:$0xff]  ;;  %v13472_v48 = vld [vmem:[#allocation85_spill] sm:$0xff]  ;;  %v13473_v52 = vld [vmem:[#allocation83_spill] sm:$0xff] }
 0x3b5   :  { %v9262_v60 = vmul.f32 %v1854_v56, %v13469_v7  ;;  %v1853_v26 = vsel %vm1615_vm11, %v1850_v2, %v1852_v31  ;;  %v1856_v40 = vsel %vm1615_vm11, %v1852_v31, %v1846_v3  ;;  %v2000_v5 = vadd.f32 %v1996_v24, %v1990_v63  ;;  %v13474_v3 = vld [vmem:[#allocation135_spill] sm:$0xff]  ;;  %v13477_v34 = vld [vmem:[#allocation81_spill] sm:$0xff] }
 0x3b6   :  { %v2007_v38 = vadd.f32 %v2003_v15, %v1997_v14  ;;  %v2008_v41 = vadd.f32 %v2004_v8, %v1998_v49  ;;  %v2009_v42 = vadd.f32 %v2005_v51, %v1999_v53  ;;  %v2416_v18 = vmul.f32 %v13470_v25, %v9259_v23  ;;  %v13476_v7 = vld [vmem:[#allocation91_spill] sm:$0xff] }
 0x3b7   :  { %v2602_v19 = vmul.f32 %v13471_v39, %v9259_v23  ;;  %v9273_v56 = vmul.f32 %v1856_v40, %v13472_v48  ;;  %v9276_v9 = vmul.f32 %v1853_v26, %v13473_v52  ;;  %v2010_v2 = vadd.f32 %v2006_v27, %v2000_v5  ;;  %v1866_v27 = vpop.permute.xlu0 %1865 }
 0x3b8   :  { %v2231_v63 = vmul.f32 %v13474_v3, %v9262_v60  ;;  %v2417_v14 = vmul.f32 %v13470_v25, %v9262_v60  ;;  %v2603_v49 = vmul.f32 %v13471_v39, %v9262_v60  ;;  %v2018_v24 = vadd.f32 %v2014_v17, %v2008_v41 }
 0x3b9   :  { %v2015_v53 = vmul.f32 %v13467_v44, %v9093_v46  ;;  %v2420_v15 = vadd.f32 %v2416_v18, %v2410_v62  ;;  %v2606_v8 = vadd.f32 %v2602_v19, %v2596_v30  ;;  %v2013_v51 = vmul.f32 %v13467_v44, %v9108_v35 }
 0x3ba   :  { %v2235_v31 = vadd.f32 %v2231_v63, %v2225_v61  ;;  %v9288_v12 = vadd.f32 %v2417_v14, %v2411_v1  ;;  %v9290_v10 = vadd.f32 %v2603_v49, %v2597_v37  ;;  %v2016_v26 = vmul.f32 %v13467_v44, %v9111_v32  ;;  %v1868_v1 = vpop.permute.xlu1 %1867  ;;  %v13475_v44 = vld [vmem:[#allocation122_spill] sm:$0xff] }
 0x3bb   :  { %v2229_v17 = vmul.f32 %v13474_v3, %v9273_v56  ;;  %v2232_v46 = vmul.f32 %v13474_v3, %v9276_v9  ;;  %v1871_v62 = vsel %vm1653_vm12, %v1862_v29, %v1864_v20  ;;  %v2415_v35 = vmul.f32 %v13470_v25, %v9273_v56 }
 0x3bc   :  { %v2418_v30 = vmul.f32 %v13470_v25, %v9276_v9  ;;  %v2601_v61 = vmul.f32 %v13471_v39, %v9273_v56  ;;  %v2604_v32 = vmul.f32 %v13471_v39, %v9276_v9  ;;  %v2019_v37 = vadd.f32 %v2015_v53, %v2009_v42  ;;  %v13481_v53 = vld [vmem:[#allocation138_spill] sm:$0xff] }
 0x3bd   :  { %v2024_v40 = vmul.f32 %v13475_v44, %v9150_v28  ;;  %v2233_v5 = vadd.f32 %v2229_v17, %v2223_v36  ;;  %v2236_v41 = vadd.f32 %v2232_v46, %v2226_v21  ;;  %v2419_v18 = vadd.f32 %v2415_v35, %v2409_v55  ;;  %v13478_v36 = vld [vmem:[#allocation67_spill] sm:$0xff] }
 0x3be   :  { %v2422_v19 = vadd.f32 %v2418_v30, %v2412_v43  ;;  %v2605_v63 = vadd.f32 %v2601_v61, %v2595_v0  ;;  %v2608_v14 = vadd.f32 %v2604_v32, %v2598_v11  ;;  %v2017_v49 = vadd.f32 %v2013_v51, %v2007_v38  ;;  %v13479_v55 = vld [vmem:[#allocation87_spill] sm:$0xff]  ;;  %v9322_v0 = vpop.permute.xlu0 %1877  ;;  %v13480_v38 = vld [vmem:[#allocation137_spill] sm:$0xff] }
 0x3bf   :  { %v9311_v25 = vmul.f32 %v1871_v62, %v13476_v7  ;;  %v2243_v52 = vadd.f32 %v13477_v34, %v2233_v5  ;;  %v1870_v39 = vsel %vm1653_vm12, %v1864_v20, %v1866_v27  ;;  %v9316_v48 = vadd.f32 %v2016_v26, %v2010_v2  ;;  %v13482_v2 = vld [vmem:[#allocation56_spill] sm:$0xff]  ;;  %v13484_v35 = vld [vmem:[#allocation127_spill] sm:$0xff] }
 0x3c0   :  { %v2025_v42 = vmul.f32 %v13475_v44, %v9153_v13  ;;  %v2429_v21 = vadd.f32 %v13478_v36, %v2419_v18  ;;  %v2615_v43 = vadd.f32 %v13479_v55, %v2605_v63  ;;  %v2023_v11 = vmul.f32 %v13475_v44, %v9165_v47  ;;  %v13483_v13 = vld [vmem:[#allocation61_spill] sm:$0xff]  ;;  %v1880_v47 = vpop.permute.xlu1 %1879  ;;  %v13486_v18 = vld [vmem:[#allocation88_spill] sm:$0xff] }
 0x3c1   :  { %v2249_v34 = vmul.f32 %v13480_v38, %v9311_v25  ;;  %v2435_v20 = vmul.f32 %v13481_v53, %v9311_v25  ;;  %v2621_v51 = vmul.f32 %v13482_v2, %v9311_v25  ;;  %v2028_v26 = vadd.f32 %v2024_v40, %v2018_v24  ;;  %v13485_v24 = vld [vmem:[#allocation71_spill] sm:$0xff]  ;;  %v13488_v36 = vld [vmem:[#allocation60_spill] sm:$0xff] }
 0x3c2   :  { %v9333_v17 = vmul.f32 %v1870_v39, %v13483_v13  ;;  %v1869_v46 = vsel %vm1653_vm12, %v1866_v27, %v1868_v1  ;;  %v1872_v62 = vsel %vm1653_vm12, %v1868_v1, %v1862_v29  ;;  %v2033_v30 = vmul.f32 %v13484_v35, %v9221_v22  ;;  %v13487_v1 = vld [vmem:[#allocation64_spill] sm:$0xff]  ;;  %v13502_v13 = vld [vmem:[#allocation49_spill] sm:$0xff] }
 0x3c3   :  { %v9341_v61 = vadd.f32 %v2249_v34, %v2243_v52  ;;  %v9343_v32 = vadd.f32 %v2435_v20, %v2429_v21  ;;  %v9345_v5 = vadd.f32 %v2621_v51, %v2615_v43  ;;  %v2430_v40 = vadd.f32 %v13485_v24, %v2420_v15  ;;  %v1882_v34 = vpop.permute.xlu0 %1881  ;;  %v13490_v51 = vld [vmem:[#allocation58_spill] sm:$0xff] }
 0x3c4   :  { %v2616_v63 = vadd.f32 %v13486_v18, %v2606_v8  ;;  %v2436_v27 = vmul.f32 %v13481_v53, %v9333_v17  ;;  %v2622_v29 = vmul.f32 %v13482_v2, %v9333_v17  ;;  %v2029_v22 = vadd.f32 %v2025_v42, %v2019_v37  ;;  %v13489_v42 = vld [vmem:[#allocation134_spill] sm:$0xff] }
 0x3c5   :  { %v2027_v52 = vadd.f32 %v2023_v11, %v2017_v49  ;;  %v9358_v39 = vmul.f32 %v1869_v46, %v13487_v1  ;;  %v9361_v21 = vmul.f32 %v1872_v62, %v13488_v36  ;;  %v2026_v15 = vmul.f32 %v13475_v44, %v9168_v58  ;;  %v13491_v62 = vld [vmem:[#allocation89_spill] sm:$0xff]  ;;  %v13503_v36 = vld [vmem:[#allocation51_spill] sm:$0xff] }
 0x3c6   :  { %v2034_v8 = vmul.f32 %v13484_v35, %v9204_v45  ;;  %v2440_v55 = vadd.f32 %v2436_v27, %v2430_v40  ;;  %v2626_v43 = vadd.f32 %v2622_v29, %v2616_v63  ;;  %v2035_v20 = vmul.f32 %v13484_v35, %v9207_v57  ;;  %v1884_v57 = vpop.permute.xlu1 %1883  ;;  %v13492_v40 = vld [vmem:[#allocation62_spill] sm:$0xff]  ;;  %v13495_v29 = vld [vmem:[#allocation55_spill] sm:$0xff] }
 0x3c7   :  { %v2036_v37 = vmul.f32 %v13484_v35, %v9224_v4  ;;  %v2037_v49 = vadd.f32 %v2033_v30, %v2027_v52  ;;  %v2043_v11 = vmul.f32 %v13489_v42, %v9273_v56  ;;  %v2245_v46 = vadd.f32 %v13490_v51, %v2235_v31  ;;  %v13493_v35 = vld [vmem:[#allocation57_spill] sm:$0xff]  ;;  %v13494_v63 = vld [vmem:[#allocation86_spill] sm:$0xff] }
 0x3c8   :  { %v2246_v58 = vadd.f32 %v13491_v62, %v2236_v41  ;;  %v2251_v44 = vmul.f32 %v13480_v38, %v9358_v39  ;;  %v2252_v24 = vmul.f32 %v13480_v38, %v9361_v21  ;;  %v2431_v4 = vadd.f32 %v13492_v40, %v9288_v12 }
 0x3c9   :  { %v2432_v30 = vadd.f32 %v13493_v35, %v2422_v19  ;;  %v2437_v56 = vmul.f32 %v13481_v53, %v9358_v39  ;;  %v2438_v31 = vmul.f32 %v13481_v53, %v9361_v21  ;;  %v2617_v27 = vadd.f32 %v13494_v63, %v9290_v10 }
 0x3ca   :  { %v2255_v41 = vadd.f32 %v2251_v44, %v2245_v46  ;;  %v2256_v18 = vadd.f32 %v2252_v24, %v2246_v58  ;;  %v2618_v52 = vadd.f32 %v13495_v29, %v2608_v14  ;;  %v2623_v12 = vmul.f32 %v13482_v2, %v9358_v39  ;;  %v1894_v14 = vpop.permute.xlu0 %1893  ;;  %v13496_v44 = vld [vmem:[#allocation59_spill] sm:$0xff]  ;;  %v13497_v24 = vld [vmem:[#allocation32_spill] sm:$0xff]  ;;  %v1896_v63 = vpop.permute.xlu1 %1895 }
 0x3cb   :  { %v2441_v51 = vadd.f32 %v2437_v56, %v2431_v4  ;;  %v2442_v62 = vadd.f32 %v2438_v31, %v2432_v30  ;;  %v2624_v19 = vmul.f32 %v13482_v2, %v9361_v21  ;;  %v2444_v40 = vstv %s9353_s11  ;;  %s9739_s11 = sld [smem:[#allocation16 + $0x8d]] }
 0x3cc   :  { %v2630_v35 = vstv %s9355_s28  ;;  %v1887_v53 = vsel %vm1691_vm13, %v9322_v0, %v1880_v47  ;;  %v1886_v10 = vsel %vm1691_vm13, %v1880_v47, %v1882_v34  ;;  %v2627_v46 = vadd.f32 %v2623_v12, %v2617_v27  ;;  %s9741_s28 = sld [smem:[#allocation16]] }
 0x3cd   :  { %v2628_v58 = vadd.f32 %v2624_v19, %v2618_v52  ;;  %v9407_v2 = vmul.f32 %v1887_v53, %v13496_v44  ;;  %v9410_v4 = vmul.f32 %v1886_v10, %v13497_v24  ;;  %v2030_v30 = vadd.f32 %v2026_v15, %v9316_v48 }
 0x3ce   :  { %v2038_v56 = vadd.f32 %v2034_v8, %v2028_v26  ;;  %v2039_v31 = vadd.f32 %v2035_v20, %v2029_v22  ;;  %v2044_v47 = vmul.f32 %v13489_v42, %v9259_v23  ;;  %v2047_v29 = vadd.f32 %v2043_v11, %v2037_v49  ;;  %v1898_v10 = vpop.permute.xlu0 %1897 }
 0x3cf   :  { %v2259_v1 = vmul.f32 %v9044_v54, %v9407_v2  ;;  %v2445_v27 = vmul.f32 %v2444_v40, %v9407_v2  ;;  %v2631_v52 = vmul.f32 %v2630_v35, %v9407_v2  ;;  %v2446_v12 = vmul.f32 %v2444_v40, %v9410_v4 }
 0x3d0   :  { %v2632_v19 = vmul.f32 %v2630_v35, %v9410_v4  ;;  %v1885_v48 = vsel %vm1691_vm13, %v1882_v34, %v1884_v57  ;;  %v1888_v26 = vsel %vm1691_vm13, %v1884_v57, %v9322_v0  ;;  %v2040_v22 = vadd.f32 %v2036_v37, %v2030_v30  ;;  %v13498_v37 = vld [vmem:[#allocation46_spill] sm:$0xff] }
 0x3d1   :  { %v2263_v15 = vadd.f32 %v2259_v1, %v9341_v61  ;;  %v2449_v8 = vadd.f32 %v2445_v27, %v9343_v32  ;;  %v2635_v20 = vadd.f32 %v2631_v52, %v9345_v5  ;;  %v2048_v49 = vadd.f32 %v2044_v47, %v2038_v56  ;;  %v13499_v61 = vld [vmem:[#allocation29_spill] sm:$0xff]  ;;  %v13500_v32 = vld [vmem:[#allocation31_spill] sm:$0xff]  ;;  %v13501_v5 = vld [vmem:[#allocation36_spill] sm:$0xff] }
 0x3d2   :  { %v2045_v11 = vmul.f32 %v13489_v42, %v9262_v60  ;;  %v2450_v34 = vadd.f32 %v2446_v12, %v2440_v55  ;;  %v2636_v53 = vadd.f32 %v2632_v19, %v2626_v43  ;;  %v2046_v0 = vmul.f32 %v13489_v42, %v9276_v9  ;;  %v1900_v43 = vpop.permute.xlu1 %1899 }
 0x3d3   :  { %v2057_v57 = vadd.f32 %v13498_v37, %v2047_v29  ;;  %v9437_v1 = vmul.f32 %v1885_v48, %v13499_v61  ;;  %v9440_v30 = vmul.f32 %v1888_v26, %v13500_v32  ;;  %v2063_v56 = vmul.f32 %v13501_v5, %v9311_v25 }
 0x3d4   :  { %v9445_v60 = vstv %s9393_s19  ;;  %v2454_v47 = vstv %s9402_s20  ;;  %v2640_v55 = vstv %s9404_s21  ;;  %v1903_v42 = vsel %vm1729_vm14, %v1894_v14, %v1896_v63  ;;  %s9743_s19 = sld [smem:[#allocation16 + $0x10d]]  ;;  %s9745_s20 = sld [smem:[#allocation16 + $0x80]] }
 0x3d5   :  { %v2261_v27 = vmul.f32 %v9044_v54, %v9437_v1  ;;  %v2262_v9 = vmul.f32 %v9044_v54, %v9440_v30  ;;  %v1902_v29 = vsel %vm1729_vm14, %v1896_v63, %v1898_v10  ;;  %v2447_v52 = vmul.f32 %v2444_v40, %v9437_v1  ;;  %v13504_v54 = vld [vmem:[#allocation104_spill] sm:$0xff]  ;;  %s9747_s21 = sld [smem:[#allocation16 + $0x100]] }
 0x3d6   :  { %v2448_v25 = vmul.f32 %v2444_v40, %v9440_v30  ;;  %v2633_v12 = vmul.f32 %v2630_v35, %v9437_v1  ;;  %v2634_v19 = vmul.f32 %v2630_v35, %v9440_v30  ;;  %v1901_v37 = vsel %vm1729_vm14, %v1898_v10, %v1900_v43 }
 0x3d7   :  { %v2265_v48 = vadd.f32 %v2261_v27, %v2255_v41  ;;  %v2266_v26 = vadd.f32 %v2262_v9, %v2256_v18  ;;  %v1904_v61 = vsel %vm1729_vm14, %v1900_v43, %v1894_v14  ;;  %v2451_v63 = vadd.f32 %v2447_v52, %v2441_v51  ;;  %v13505_v18 = vld [vmem:[#allocation69_spill] sm:$0xff]  ;;  %v13506_v9 = vld [vmem:[#allocation106_spill] sm:$0xff] }
 0x3d8   :  { %v2452_v24 = vadd.f32 %v2448_v25, %v2442_v62  ;;  %v2637_v32 = vadd.f32 %v2633_v12, %v2627_v46  ;;  %v2638_v44 = vadd.f32 %v2634_v19, %v2628_v58  ;;  %v2049_v40 = vadd.f32 %v2045_v11, %v2039_v31  ;;  %v13507_v58 = vld [vmem:[#allocation107_spill] sm:$0xff] }
 0x3d9   :  { %v2055_v7 = vmul.f32 %v13503_v36, %v13502_v13  ;;  %v1905_v35 = vmul.f32 %v1903_v42, %v13422_v6  ;;  %v9471_v38 = vmul.f32 %v1902_v29, %v13504_v54  ;;  %v2050_v41 = vadd.f32 %v2046_v0, %v2040_v22  ;;  %v1910_v36 = vpop.permute.xlu0 %1909  ;;  %v13508_v29 = vld [vmem:[#allocation70_spill] sm:$0xff] }
 0x3da   :  { %v9474_v27 = vadd.f32 %v13505_v18, %v2048_v49  ;;  %v2072_v10 = vstv %s9431_s2  ;;  %v9478_v14 = vmul.f32 %v1901_v37, %v13506_v9  ;;  %v9482_v13 = vmul.f32 %v1904_v61, %v13507_v58  ;;  %s9752_s2 = sld [smem:[#allocation16 + $0x180]]  ;;  %v13609_v58 = vld [vmem:[#allocation73_spill] sm:$0xff] }
 0x3db   :  { %v2269_v51 = vmul.f32 %v9445_v60, %v1905_v35  ;;  %v2455_v62 = vmul.f32 %v2454_v47, %v1905_v35  ;;  %v2641_v46 = vmul.f32 %v2640_v55, %v1905_v35  ;;  %v2067_v31 = vadd.f32 %v2063_v56, %v2057_v57 }
 0x3dc   :  { %v9490_v22 = vmul.f32 %v13501_v5, %v9333_v17  ;;  %v2456_v49 = vmul.f32 %v2454_v47, %v9471_v38  ;;  %v2642_v11 = vmul.f32 %v2640_v55, %v9471_v38  ;;  %v2059_v0 = vadd.f32 %v2055_v7, %v2049_v40 }
 0x3dd   :  { %v2273_v61 = vadd.f32 %v2269_v51, %v2263_v15  ;;  %v2459_v43 = vadd.f32 %v2455_v62, %v2449_v8  ;;  %v2645_v42 = vadd.f32 %v2641_v46, %v2635_v20  ;;  %v2060_v52 = vadd.f32 %v13508_v29, %v2050_v41  ;;  %v1912_v15 = vpop.permute.xlu1 %1911  ;;  %v1914_v18 = vpop.permute.xlu0 %1913 }
 0x3de   :  { %v9500_v25 = vstv %s9461_s12  ;;  %v2460_v57 = vadd.f32 %v2456_v49, %v2450_v34  ;;  %v2646_v56 = vadd.f32 %v2642_v11, %v2636_v53  ;;  %v2065_v12 = vmul.f32 %v13501_v5, %v9358_v39  ;;  %s9754_s12 = sld [smem:[#allocation16 + $0x1]] }
 0x3df   :  { %v2073_v19 = vmul.f32 %v2072_v10, %v9407_v2  ;;  %v2271_v37 = vmul.f32 %v9445_v60, %v9478_v14  ;;  %v2272_v7 = vmul.f32 %v9445_v60, %v9482_v13  ;;  %v2457_v8 = vmul.f32 %v2454_v47, %v9478_v14 }
 0x3e0   :  { %v2458_v20 = vmul.f32 %v2454_v47, %v9482_v13  ;;  %v2643_v34 = vmul.f32 %v2640_v55, %v9478_v14  ;;  %v2644_v39 = vmul.f32 %v2640_v55, %v9482_v13  ;;  %v2066_v2 = vmul.f32 %v13501_v5, %v9361_v21 }
 0x3e1   :  { %v2083_v53 = vmul.f32 %v9500_v25, %v1905_v35  ;;  %v9518_v40 = vadd.f32 %v2271_v37, %v2265_v48  ;;  %v9520_v41 = vadd.f32 %v2272_v7, %v2266_v26  ;;  %v2461_v51 = vadd.f32 %v2457_v8, %v2451_v63  ;;  %v1916_v35 = vpop.permute.xlu1 %1915 }
 0x3e2   :  { %v2462_v62 = vadd.f32 %v2458_v20, %v2452_v24  ;;  %v2647_v46 = vadd.f32 %v2643_v34, %v2637_v32  ;;  %v2648_v47 = vadd.f32 %v2644_v39, %v2638_v44  ;;  %v2069_v49 = vadd.f32 %v2065_v12, %v2059_v0  ;;  %v13509_v24 = vld [vmem:[#allocation110_spill] sm:$0xff]  ;;  %v13510_v44 = vld [vmem:[#allocation113_spill] sm:$0xff] }
 0x3e3   :  { %v2077_v11 = vadd.f32 %v2073_v19, %v2067_v31  ;;  %v2092_v29 = vstv %s9484_s0  ;;  %v9524_v9 = vstv %s9486_s22  ;;  %v2464_v55 = vstv %s9494_s8  ;;  %s9762_s0 = sld [smem:[#allocation16 + $0x81]]  ;;  %s9764_s22 = sld [smem:[#allocation16 + $0x18d]] }
 0x3e4   :  { %v2650_v54 = vstv %s9496_s10  ;;  %v1919_v21 = vsel %vm1767_vm15, %v1910_v36, %v1912_v15  ;;  %v1918_v5 = vsel %vm1767_vm15, %v1912_v15, %v1914_v18  ;;  %v2070_v48 = vadd.f32 %v2066_v2, %v2060_v52  ;;  %s9768_s8 = sld [smem:[#allocation16 + $0x16]] }
 0x3e5   :  { %v2074_v26 = vmul.f32 %v2072_v10, %v9410_v4  ;;  %v1921_v32 = vmul.f32 %v1919_v21, %v13509_v24  ;;  %v9535_v63 = vmul.f32 %v1918_v5, %v13510_v44  ;;  %v2075_v31 = vmul.f32 %v2072_v10, %v9437_v1  ;;  %s9770_s10 = sld [smem:[#allocation16 + $0x96]] }
 0x3e6   :  { %v2076_v0 = vmul.f32 %v2072_v10, %v9440_v30  ;;  %v2087_v12 = vadd.f32 %v2083_v53, %v2077_v11  ;;  %v2102_v19 = vstv %s9502_s24  ;;  %v1917_v34 = vsel %vm1767_vm15, %v1914_v18, %v1916_v35  ;;  %s9773_s24 = sld [smem:[#allocation16 + $0x116]] }
 0x3e7   :  { %v2093_v37 = vmul.f32 %v2092_v29, %v1921_v32  ;;  %v2279_v7 = vmul.f32 %v9524_v9, %v1921_v32  ;;  %v2465_v8 = vmul.f32 %v2464_v55, %v1921_v32  ;;  %v2651_v15 = vmul.f32 %v2650_v54, %v1921_v32 }
 0x3e8   :  { %v2466_v52 = vmul.f32 %v2464_v55, %v9535_v63  ;;  %v2652_v20 = vmul.f32 %v2650_v54, %v9535_v63  ;;  %v1920_v39 = vsel %vm1767_vm15, %v1916_v35, %v1910_v36  ;;  %v2085_v53 = vmul.f32 %v9500_v25, %v9478_v14 }
 0x3e9   :  { %v2097_v1 = vadd.f32 %v2093_v37, %v2087_v12  ;;  %v9547_v2 = vadd.f32 %v2279_v7, %v2273_v61  ;;  %v9549_v30 = vadd.f32 %v2465_v8, %v2459_v43  ;;  %v9551_v10 = vadd.f32 %v2651_v15, %v2645_v42  ;;  %v13511_v61 = vld [vmem:[#allocation115_spill] sm:$0xff]  ;;  %v13512_v43 = vld [vmem:[#allocation116_spill] sm:$0xff] }
 0x3ea   :  { %v2086_v11 = vmul.f32 %v9500_v25, %v9482_v13  ;;  %v9557_v21 = vadd.f32 %v2466_v52, %v2460_v57  ;;  %v9559_v5 = vadd.f32 %v2652_v20, %v2646_v56  ;;  %v2068_v36 = vadd.f32 %v9490_v22, %v9474_v27 }
 0x3eb   :  { %v2103_v18 = vadd.f32 %v2102_v19, %v2097_v1  ;;  %v1923_v32 = vmul.f32 %v1917_v34, %v13511_v61  ;;  %v1924_v35 = vmul.f32 %v1920_v39, %v13512_v43  ;;  %v2079_v42 = vadd.f32 %v2075_v31, %v2069_v49 }
 0x3ec   :  { %v2080_v12 = vadd.f32 %v2076_v0, %v2070_v48  ;;  %v2078_v37 = vadd.f32 %v2074_v26, %v2068_v36  ;;  %v2084_v14 = vmul.f32 %v9500_v25, %v9471_v38  ;;  %v2094_v56 = vmul.f32 %v2092_v29, %v9535_v63 }
 0x3ed   :  { %v9565_v7 = vmax.f32 %v2103_v18, 0.0  ;;  %v2089_v13 = vadd.f32 %v2085_v53, %v2079_v42  ;;  %v2095_v8 = vmul.f32 %v2092_v29, %v1923_v32  ;;  %v2096_v15 = vmul.f32 %v2092_v29, %v1924_v35  ;;  %v13518_v42 = vld [vmem:[#allocation41_spill] sm:$0xff] }
 0x3ee   :  { %v2090_v57 = vadd.f32 %v2086_v11, %v2080_v12  ;;  %v2281_v27 = vmul.f32 %v9524_v9, %v1923_v32  ;;  %v2282_v22 = vmul.f32 %v9524_v9, %v1924_v35  ;;  %v2467_v49 = vmul.f32 %v2464_v55, %v1923_v32 }
 0x3ef   :  { %2669 = vrot.lane.b32.xlu0 %v9565_v7, %s13003_s23  ;;  %v2468_v48 = vmul.f32 %v2464_v55, %v1924_v35  ;;  %v2653_v26 = vmul.f32 %v2650_v54, %v1923_v32  ;;  %v2654_v31 = vmul.f32 %v2650_v54, %v1924_v35  ;;  %v2099_v0 = vadd.f32 %v2095_v8, %v2089_v13  ;;  %v13517_v35 = vld [vmem:[#allocation101_spill] sm:$0xff]  ;;  %v13520_v13 = vld [vmem:[#allocation82_spill] sm:$0xff] }
 0x3f0   :  { %v2100_v52 = vadd.f32 %v2096_v15, %v2090_v57  ;;  %v9575_v25 = vadd.f32 %v2281_v27, %v9518_v40  ;;  %v9578_v20 = vadd.f32 %v2282_v22, %v9520_v41  ;;  %v9580_v29 = vadd.f32 %v2467_v49, %v2461_v51  ;;  %v13513_v51 = vld [vmem:[#allocation97_spill] sm:$0xff]  ;;  %v13523_v49 = vld [vmem:[#allocation130_spill] sm:$0xff] }
 0x3f1   :  { %v9582_v34 = vadd.f32 %v2468_v48, %v2462_v62  ;;  %v9584_v39 = vadd.f32 %v2653_v26, %v2647_v46  ;;  %v9586_v1 = vadd.f32 %v2654_v31, %v2648_v47  ;;  %v2088_v53 = vadd.f32 %v2084_v14, %v2078_v37  ;;  %v13514_v62 = vld [vmem:[#allocation96_spill] sm:$0xff]  ;;  %v13519_v14 = vld [vmem:[#allocation114_spill] sm:$0xff]  ;;  %v13521_v15 = vld [vmem:[#allocation45_spill] sm:$0xff] }
 0x3f2   :  { %v2105_v55 = vadd.f32 %v2102_v19, %v2099_v0  ;;  %v2106_v11 = vadd.f32 %v2102_v19, %v2100_v52  ;;  %v2120_v46 = vmul.f32 %v13514_v62, %v13513_v51  ;;  %v13515_v47 = vld [vmem:[#allocation92_spill] sm:$0xff]  ;;  %v2130_v12 = vmul.f32 %v13518_v42, %v13517_v35  ;;  %v13522_v27 = vld [vmem:[#allocation65_spill] sm:$0xff]  ;;  %v13526_v52 = vld [vmem:[#allocation98_spill] sm:$0xff] }
 0x3f3   :  { %v2098_v54 = vadd.f32 %v2094_v56, %v2088_v53  ;;  %v2140_v57 = vmul.f32 %v13520_v13, %v13519_v14  ;;  %v2150_v22 = vmul.f32 %v13522_v27, %v13521_v15  ;;  %v13524_v48 = vld [vmem:[#allocation68_spill] sm:$0xff]  ;;  %v13525_v0 = vld [vmem:[#allocation77_spill] sm:$0xff]  ;;  %v13533_v13 = vld [vmem:[#allocation66_spill] sm:$0xff]  ;;  %v2288_v27 = vstv %s5507_s9  ;;  %s9775_s9 = sld [smem:[#allocation16 + $0x196]] }
 0x3f4   :  { %v9588_v36 = vmax.f32 %v2105_v55, 0.0  ;;  %v9590_v18 = vmax.f32 %v2106_v11, 0.0  ;;  %v2160_v26 = vmul.f32 %v13524_v48, %v13523_v49  ;;  %v2170_v53 = vmul.f32 %v13526_v52, %v13525_v0  ;;  %v13527_v11 = vld [vmem:[#allocation108_spill] sm:$0xff] }
 0x3f5   :  { %v2104_v40 = vadd.f32 %v2102_v19, %v2098_v54  ;;  %v13516_v19 = vld [vmem:[#allocation50_spill] sm:$0xff]  ;;  %v2180_v54 = vmul.f32 %v13527_v11, %v8966_v50  ;;  %v13528_v51 = vld [vmem:[#allocation112_spill] sm:$0xff]  ;;  %v2270_v49 = vmul.f32 %v9445_v60, %v9471_v38  ;;  %v2289_v48 = vadd.f32 %v2288_v27, %v9547_v2 }
 0x3f6   :  { %2675 = vrot.lane.b32.xlu0 %v9590_v18, %s13003_s23  ;;  %2673 = vrot.lane.b32.xlu1 %v9588_v36, %s13003_s23  ;;  %v2114_v32 = vmul.f32 %v13516_v19, %v13515_v47  ;;  %v2190_v62 = vmul.f32 %v13528_v51, %v9030_v33  ;;  %v13529_v47 = vld [vmem:[#allocation118_spill] sm:$0xff]  ;;  %v2230_v33 = vmul.f32 %v13474_v3, %v9259_v23  ;;  %v13535_v3 = vld [vmem:[#allocation37_spill] sm:$0xff]  ;;  %v2660_v52 = vstv %s5545_s6  ;;  %s9794_s6 = sld [smem:[#allocation16 + $0x181]] }
 0x3f7   :  { %v9600_v41 = vmax.f32 %v2104_v40, 0.0  ;;  %v2200_v19 = vmul.f32 %v13529_v47, %v9090_v59  ;;  %v2260_v15 = vmul.f32 %v13535_v3, %v9410_v4  ;;  %v9691_v38 = vmax.f32 %v2289_v48, 0.0 }
 0x3f8   :  { %v2124_v37 = vadd.f32 %v2120_v46, %v2114_v32  ;;  %v13530_v32 = vld [vmem:[#allocation124_spill] sm:$0xff]  ;;  %v2291_v60 = vadd.f32 %v2288_v27, %v9575_v25  ;;  %v2292_v0 = vadd.f32 %v2288_v27, %v9578_v20  ;;  %v2474_v20 = vstv %s5526_s4  ;;  %s9783_s4 = sld [smem:[#allocation16 + $0x101]] }
 0x3f9   :  { %v2210_v35 = vmul.f32 %v13530_v32, %v9150_v28  ;;  %v2476_v11 = vadd.f32 %v2474_v20, %v9557_v21  ;;  %v2664_v21 = vadd.f32 %v2660_v52, %v9586_v1  ;;  %v4406_v48 = vstv %s9764_s22  ;;  %s9922_s22 = sld [smem:[#allocation16 + $0x107]] }
 0x3fa   :  { %2689 = vrot.lane.b32.xlu0 %v9588_v36, %s12999_s25  ;;  %2685 = vrot.lane.b32.xlu1 %v9565_v7, %s12999_s25  ;;  %v2134_v56 = vadd.f32 %v2130_v12, %v2124_v37  ;;  %v13531_v12 = vld [vmem:[#allocation128_spill] sm:$0xff]  ;;  %v9701_v2 = vmax.f32 %v2292_v0, 0.0 }
 0x3fb   :  { %v2220_v37 = vmul.f32 %v13531_v12, %v9204_v45  ;;  %v13532_v45 = vld [vmem:[#allocation48_spill] sm:$0xff]  ;;  %v9809_v32 = vmax.f32 %v2664_v21, 0.0 }
 0x3fc   :  { %v2144_v8 = vadd.f32 %v2140_v57, %v2134_v56  ;;  %v2240_v57 = vmul.f32 %v13533_v13, %v13532_v45  ;;  %v13534_v56 = vld [vmem:[#allocation137_spill] sm:$0xff] }
 0x3fd   :  { %13539 = vst [vmem:[#allocation100_spill] sm:$0xff] %v9809_v32 }
 0x3fe   :  { %2671 = vrot.lane.b32.xlu0 %v9600_v41, %s13003_s23  ;;  %2691 = vrot.lane.b32.xlu1 %v9590_v18, %s12999_s25  ;;  %v2154_v31 = vadd.f32 %v2150_v22, %v2144_v8  ;;  %v2250_v8 = vmul.f32 %v13534_v56, %v9333_v17 }
 0x400   :  { %v2164_v55 = vadd.f32 %v2160_v26, %v2154_v31  ;;  %v2280_v26 = vmul.f32 %v9524_v9, %v9535_v63  ;;  %v9699_v63 = vmax.f32 %v2291_v60, 0.0 }
 0x402   :  { %2701 = vrot.lane.b32.xlu0 %v9565_v7, %s12997_s26  ;;  %2687 = vrot.lane.b32.xlu1 %v9600_v41, %s12999_s25  ;;  %v2174_v40 = vadd.f32 %v2170_v53, %v2164_v55  ;;  %v2475_v53 = vadd.f32 %v2474_v20, %v9549_v30  ;;  %v2661_v55 = vadd.f32 %v2660_v52, %v9551_v10 }
 0x403   :  { %v2478_v30 = vadd.f32 %v2474_v20, %v9582_v34  ;;  %v2663_v10 = vadd.f32 %v2660_v52, %v9584_v39  ;;  %v9781_v34 = vmax.f32 %v2476_v11, 0.0  ;;  %v3218_v39 = vstv %s9725_s27  ;;  %s9803_s27 = sld [smem:[#allocation16 + $0x82]] }
 0x404   :  { %v2184_v46 = vadd.f32 %v2180_v54, %v2174_v40  ;;  %v2662_v54 = vadd.f32 %v2660_v52, %v9559_v5  ;;  %v2477_v40 = vadd.f32 %v2474_v20, %v9580_v29  ;;  %v9777_v5 = vmax.f32 %v2475_v53, 0.0 }
 0x405   :  { %v9779_v29 = vmax.f32 %v2661_v55, 0.0  ;;  %v9801_v47 = vmax.f32 %v2663_v10, 0.0  ;;  %v9822_v12 = vmul.f32 %v3218_v39, %v9565_v7  ;;  %v9941_v20 = vmul.f32 %v4406_v48, %v9691_v38 }
 0x406   :  { %2707 = vrot.lane.b32.xlu0 %v9590_v18, %s12997_s26  ;;  %2705 = vrot.lane.b32.xlu1 %v9588_v36, %s12997_s26  ;;  %v2194_v50 = vadd.f32 %v2190_v62, %v2184_v46  ;;  %v9786_v51 = vmax.f32 %v2662_v54, 0.0  ;;  %v9788_v1 = vmax.f32 %v2477_v40, 0.0  ;;  %v3584_v62 = vstv %s9727_s29  ;;  %s9819_s29 = sld [smem:[#allocation16 + $0x3]] }
 0x407   :  { %13536 = vst [vmem:[#allocation72_spill] sm:$0xff] %v9779_v29  ;;  %v9799_v46 = vmax.f32 %v2478_v30, 0.0  ;;  %13538 = vst [vmem:[#allocation99_spill] sm:$0xff] %v9801_v47  ;;  %v9865_v56 = vmul.f32 %v3584_v62, %v9590_v18  ;;  %v9879_v3 = vmul.f32 %v3584_v62, %v9600_v41  ;;  %v3398_v55 = vstv %s9768_s8  ;;  %s13564_s8 = smov 98  }
 0x408   :  { %v2204_v42 = vadd.f32 %v2200_v19, %v2194_v50  ;;  %13537 = vst [vmem:[#allocation54_spill] sm:$0xff] %v9786_v51  ;;  %v3950_v19 = vstv %s9729_s30  ;;  %v4316_v50 = vstv %s9731_s7  ;;  %s9833_s30 = sld [smem:[#allocation16 + $0x83]]  ;;  %13556 = vst [vmem:[#allocation76_spill] sm:$0xff] %v9941_v20  ;;  %v9955_v11 = vmul.f32 %v4406_v48, %v9701_v2 }
 0x409   :  { %s9835_s7 = sld [smem:[#allocation16 + $0x103]]  ;;  %v9852_v45 = vmul.f32 %v3950_v19, %v9565_v7  ;;  %v9855_v13 = vmul.f32 %v4316_v50, %v9565_v7  ;;  %13541 = vst [vmem:[#allocation102_spill] sm:$0xff] %v9865_v56  ;;  %13545 = vst [vmem:[#allocation53_spill] sm:$0xff] %v9879_v3  ;;  %v9971_v10 = vstv %s9794_s6  ;;  %s10006_s6 = sld [smem:[#allocation16 + $0x189]]  ;;  %v10136_v47 = vstv %s9922_s22 }
 0x40a   :  { %2717 = vrot.lane.b32.xlu0 %v9565_v7, %s13001_s3  ;;  %2703 = vrot.lane.b32.xlu1 %v9600_v41, %s12997_s26  ;;  %v2214_v59 = vadd.f32 %v2210_v35, %v2204_v42  ;;  %v9812_v35 = vstv %s9741_s28  ;;  %v9815_v42 = vstv %s9745_s20  ;;  %s9847_s28 = sld [smem:[#allocation16 + $0x183]]  ;;  %s9849_s20 = sld [smem:[#allocation16 + $0x5]]  ;;  %13560 = vst [vmem:[#allocation40_spill] sm:$0xff] %v9955_v11  ;;  %13592 = vst [vmem:[#allocation49_spill] sm:$0xff] %v10136_v47 }
 0x40b   :  { %s13646_s22 = smov 2  }
 0x40c   :  { %v2224_v14 = vadd.f32 %v2220_v37, %v2214_v59  ;;  %v9825_v37 = vstv %s9747_s21  ;;  %v9828_v59 = vstv %s9752_s2  ;;  %s9860_s21 = sld [smem:[#allocation16 + $0x85]] }
 0x40d   :  { %s9862_s2 = sld [smem:[#allocation16 + $0x105]] }
 0x40e   :  { %2723 = vrot.lane.b32.xlu0 %v9590_v18, %s13001_s3  ;;  %2721 = vrot.lane.b32.xlu1 %v9588_v36, %s13001_s3  ;;  %v2234_v28 = vadd.f32 %v2230_v33, %v2224_v14  ;;  %v9831_v33 = vstv %s9754_s12  ;;  %v9838_v14 = vmul.f32 %v3584_v62, %v9565_v7  ;;  %s9876_s12 = sld [smem:[#allocation16 + $0x185]] }
 0x40f   :  { %v10078_v11 = vstv %s9835_s7  ;;  %s10104_s7 = sld [smem:[#allocation16 + $0x10c]] }
 0x410   :  { %v2244_v23 = vadd.f32 %v2240_v57, %v2234_v28  ;;  %v9845_v28 = vstv %s9762_s0  ;;  %v9858_v57 = vmul.f32 %v3218_v39, %v9590_v18  ;;  %s9881_s0 = sld [smem:[#allocation16 + $0x6]] }
 0x412   :  { %2733 = vrot.lane.b32.xlu0 %v9565_v7, %s13007_s5  ;;  %2719 = vrot.lane.b32.xlu1 %v9600_v41, %s13001_s3  ;;  %v2254_v22 = vadd.f32 %v2250_v8, %v2244_v23  ;;  %13540 = vst [vmem:[#allocation38_spill] sm:$0xff] %v9858_v57  ;;  %v9868_v8 = vmul.f32 %v3950_v19, %v9590_v18 }
 0x413   :  { %v9871_v23 = vmul.f32 %v4316_v50, %v9590_v18 }
 0x414   :  { %v2264_v17 = vadd.f32 %v2260_v15, %v2254_v22  ;;  %13542 = vst [vmem:[#allocation44_spill] sm:$0xff] %v9868_v8  ;;  %v3308_v15 = vstv %s9737_s1  ;;  %v4040_v22 = vstv %s9743_s19  ;;  %s9916_s1 = sld [smem:[#allocation16 + $0x186]]  ;;  %s9920_s19 = sld [smem:[#allocation16 + $0x87]] }
 0x415   :  { %13543 = vst [vmem:[#allocation109_spill] sm:$0xff] %v9871_v23  ;;  %v9925_v60 = vmul.f32 %v3308_v15, %v9691_v38  ;;  %v9947_v53 = vmul.f32 %v4040_v22, %v9701_v2  ;;  %v9961_v40 = vmul.f32 %v3308_v15, %v9699_v63 }
 0x416   :  { %2739 = vrot.lane.b32.xlu0 %v9590_v18, %s13007_s5  ;;  %2735 = vrot.lane.b32.xlu1 %v9600_v41, %s13007_s5  ;;  %v2274_v31 = vadd.f32 %v2270_v49, %v2264_v17  ;;  %v9887_v49 = vmul.f32 %v3950_v19, %v9600_v41  ;;  %v9893_v17 = vmul.f32 %v3218_v39, %v9588_v36 }
 0x417   :  { %13552 = vst [vmem:[#allocation131_spill] sm:$0xff] %v9925_v60  ;;  %13558 = vst [vmem:[#allocation126_spill] sm:$0xff] %v9947_v53  ;;  %v10081_v53 = vstv %s9847_s28 }
 0x418   :  { %v2284_v4 = vadd.f32 %v2280_v26, %v2274_v31  ;;  %13546 = vst [vmem:[#allocation123_spill] sm:$0xff] %v9887_v49  ;;  %13548 = vst [vmem:[#allocation95_spill] sm:$0xff] %v9893_v17  ;;  %v9905_v26 = vstv %s9783_s4  ;;  %v9908_v31 = vmul.f32 %v3584_v62, %v9588_v36  ;;  %s9936_s4 = sld [smem:[#allocation16 + $0x187]]  ;;  %v9984_v62 = vmul.f32 %v4040_v22, %v9699_v63 }
 0x419   :  { %13562 = vst [vmem:[#allocation129_spill] sm:$0xff] %v9961_v40  ;;  %v10027_v40 = vmul.f32 %v3398_v55, %v9781_v34 }
 0x41a   :  { %2749 = vrot.lane.b32.xlu0 %v9565_v7, %s13011_s16  ;;  %2737 = vrot.lane.b32.xlu1 %v9588_v36, %s13007_s5  ;;  %v2290_v9 = vadd.f32 %v2288_v27, %v2284_v4  ;;  %v3674_v27 = vstv %s9739_s11  ;;  %13549 = vst [vmem:[#allocation78_spill] sm:$0xff] %v9908_v31  ;;  %v9914_v4 = vmul.f32 %v4316_v50, %v9588_v36  ;;  %s9918_s11 = sld [smem:[#allocation16 + $0x7]]  ;;  %13568 = vst [vmem:[#allocation136_spill] sm:$0xff] %v9984_v62 }
 0x41b   :  { %v9928_v0 = vmul.f32 %v3674_v27, %v9691_v38  ;;  %v9944_v52 = vmul.f32 %v3674_v27, %v9701_v2  ;;  %v9978_v21 = vmul.f32 %v3674_v27, %v9699_v63  ;;  %v10014_v62 = vmul.f32 %v3398_v55, %v9777_v5  ;;  %13573 = vst [vmem:[#allocation67_spill] sm:$0xff] %v10027_v40 }
 0x41c   :  { %v9707_v25 = vmax.f32 %v2290_v9, 0.0  ;;  %13551 = vst [vmem:[#allocation121_spill] sm:$0xff] %v9914_v4  ;;  %v9931_v9 = vmul.f32 %v4040_v22, %v9691_v38  ;;  %v10127_v61 = vstv %s9916_s1  ;;  %v10133_v51 = vstv %s9920_s19  ;;  %s10373_s1 = sld [smem:[#allocation16 + $0x10]]  ;;  %s13639_s19 = smov 30  }
 0x41d   :  { %13553 = vst [vmem:[#allocation132_spill] sm:$0xff] %v9928_v0  ;;  %13557 = vst [vmem:[#allocation125_spill] sm:$0xff] %v9944_v52  ;;  %v10084_v52 = vstv %s9849_s20  ;;  %s10116_s20 = sld [smem:[#allocation16 + $0x18c]] }
 0x41e   :  { %2755 = vrot.lane.b32.xlu0 %v9590_v18, %s13011_s16  ;;  %2751 = vrot.lane.b32.xlu1 %v9600_v41, %s13011_s16  ;;  %13554 = vst [vmem:[#allocation34_spill] sm:$0xff] %v9931_v9  ;;  %v9958_v54 = vmul.f32 %v3308_v15, %v9707_v25  ;;  %v9964_v30 = vmul.f32 %v3674_v27, %v9707_v25  ;;  %13566 = vst [vmem:[#allocation111_spill] sm:$0xff] %v9978_v21  ;;  %v10004_v21 = vstv %s9803_s27  ;;  %s10061_s27 = sld [smem:[#allocation16 + $0x10b]] }
 0x41f   :  { %13571 = vst [vmem:[#allocation122_spill] sm:$0xff] %v10014_v62  ;;  %13588 = vst [vmem:[#allocation55_spill] sm:$0xff] %v10127_v61 }
 0x420   :  { %13561 = vst [vmem:[#allocation105_spill] sm:$0xff] %v9958_v54  ;;  %13563 = vst [vmem:[#allocation133_spill] sm:$0xff] %v9964_v30  ;;  %v9998_v30 = vstv %s9775_s9  ;;  %v10030_v54 = vmul.f32 %v3398_v55, %v9788_v1  ;;  %s10043_s9 = sld [smem:[#allocation16 + $0xb]]  ;;  %v10130_v44 = vstv %s9918_s11  ;;  %s10379_s11 = sld [smem:[#allocation16 + $0x90]] }
 0x421   :  { %v10054_v40 = vmul.f32 %v9998_v30, %v9777_v5  ;;  %13590 = vst [vmem:[#allocation46_spill] sm:$0xff] %v10130_v44  ;;  %13591 = vst [vmem:[#allocation36_spill] sm:$0xff] %v10133_v51  ;;  %v10162_v51 = vstv %s9973_s15  ;;  %s10292_s15 = sld [smem:[#allocation16 + $0x8f]] }
 0x422   :  { %2765 = vrot.lane.b32.xlu0 %v9565_v7, %s13009_s17  ;;  %2753 = vrot.lane.b32.xlu1 %v9588_v36, %s13011_s16  ;;  %13574 = vst [vmem:[#allocation87_spill] sm:$0xff] %v10030_v54  ;;  %13597 = vst [vmem:[#allocation96_spill] sm:$0xff] %v10162_v51  ;;  %v10189_v51 = vstv %s10008_s13  ;;  %s13627_s13 = smov 34  }
 0x423   :  { %13578 = vst [vmem:[#allocation127_spill] sm:$0xff] %v10054_v40  ;;  %v10075_v40 = vstv %s9833_s30  ;;  %s10102_s30 = sld [smem:[#allocation16 + $0x8c]]  ;;  %13605 = vst [vmem:[#allocation45_spill] sm:$0xff] %v10189_v51 }
 0x426   :  { %2771 = vrot.lane.b32.xlu0 %v9590_v18, %s13009_s17  ;;  %2767 = vrot.lane.b32.xlu1 %v9600_v41, %s13009_s17  ;;  %v10207_v51 = vstv %s10043_s9  ;;  %s11077_s9 = sld [smem:[#allocation16 + $0x111]] }
 0x427   :  { %13611 = vst [vmem:[#allocation77_spill] sm:$0xff] %v10207_v51  ;;  %v10353_v23 = vstv %s10292_s15  ;;  %s11331_s15 = sld [smem:[#allocation16 + $0x95]] }
 0x428   :  { %13636 = vst [vmem:[#allocation145_spill] sm:$0xff] %v10353_v23 }
 0x42a   :  { %2781 = vrot.lane.b32.xlu0 %v9565_v7, %s13005_s18  ;;  %2769 = vrot.lane.b32.xlu1 %v9588_v36, %s13009_s17  ;;  %v9874_v7 = vmul.f32 %v3218_v39, %v9600_v41  ;;  %s9950_s17 = sld [smem:[#allocation16 + $0x88]]  ;;  %v9981_v39 = vmul.f32 %v4040_v22, %v9707_v25  ;;  %v10011_v22 = vmul.f32 %v4406_v48, %v9699_v63 }
 0x42c   :  { %13544 = vst [vmem:[#allocation119_spill] sm:$0xff] %v9874_v7  ;;  %13567 = vst [vmem:[#allocation117_spill] sm:$0xff] %v9981_v39  ;;  %v10024_v39 = vmul.f32 %v3398_v55, %v9799_v46 }
 0x42d   :  { %13570 = vst [vmem:[#allocation135_spill] sm:$0xff] %v10011_v22 }
 0x42e   :  { %2787 = vrot.lane.b32.xlu0 %v9590_v18, %s13005_s18  ;;  %2783 = vrot.lane.b32.xlu1 %v9600_v41, %s13005_s18  ;;  %v9890_v18 = vmul.f32 %v4316_v50, %v9600_v41  ;;  %v9911_v41 = vmul.f32 %v3950_v19, %v9588_v36  ;;  %v9991_v19 = vmul.f32 %v4406_v48, %v9707_v25  ;;  %v3764_v50 = vstv %s9770_s10  ;;  %s10019_s10 = sld [smem:[#allocation16 + $0x8a]] }
 0x42f   :  { %13572 = vst [vmem:[#allocation81_spill] sm:$0xff] %v10024_v39  ;;  %v10046_v55 = vmul.f32 %v3764_v50, %v9777_v5  ;;  %v10057_v39 = vstv %s9819_s29  ;;  %v10064_v22 = vmul.f32 %v3764_v50, %v9799_v46  ;;  %s10086_s29 = sld [smem:[#allocation16 + $0x18b]]  ;;  %v10121_v0 = vmul.f32 %v3764_v50, %v9781_v34 }
 0x430   :  { %13547 = vst [vmem:[#allocation63_spill] sm:$0xff] %v9890_v18  ;;  %13550 = vst [vmem:[#allocation120_spill] sm:$0xff] %v9911_v41  ;;  %v10124_v60 = vmul.f32 %v3764_v50, %v9788_v1  ;;  %v10143_v50 = vstv %s9936_s4  ;;  %v10149_v43 = vstv %s9950_s17  ;;  %v13629_v18 = vld [vmem:[#allocation90_spill] sm:$0xff]  ;;  %s10305_s17 = sld [smem:[#allocation16 + $0x18f]]  ;;  %s13650_s4 = smov 126  }
 0x431   :  { %13569 = vst [vmem:[#allocation79_spill] sm:$0xff] %v9991_v19  ;;  %13576 = vst [vmem:[#allocation138_spill] sm:$0xff] %v10046_v55 }
 0x432   :  { %2797 = vrot.lane.b32.xlu0 %v9691_v38, %s13003_s23  ;;  %2785 = vrot.lane.b32.xlu1 %v9588_v36, %s13005_s18  ;;  %s9897_s18 = sld [smem:[#allocation16 + $0x106]]  ;;  %v9934_v36 = vmul.f32 %v3308_v15, %v9701_v2  ;;  %v9995_v15 = vstv %s9773_s24  ;;  %s10021_s24 = sld [smem:[#allocation16 + $0x10a]]  ;;  %13579 = vst [vmem:[#allocation71_spill] sm:$0xff] %v10064_v22  ;;  %v10094_v22 = vstv %s9862_s2  ;;  %13586 = vst [vmem:[#allocation57_spill] sm:$0xff] %v10121_v0 }
 0x433   :  { %v10050_v54 = vmul.f32 %v9995_v15, %v9777_v5  ;;  %v10068_v55 = vmul.f32 %v9995_v15, %v9799_v46  ;;  %13587 = vst [vmem:[#allocation86_spill] sm:$0xff] %v10124_v60  ;;  %s13589_s2 = sld [smem:[#allocation140_spill]]  ;;  %13593 = vst [vmem:[#allocation51_spill] sm:$0xff] %v10143_v50 }
 0x434   :  { %13555 = vst [vmem:[#allocation30_spill] sm:$0xff] %v9934_v36  ;;  %v10100_v36 = vstv %s9881_s0  ;;  %13595 = vst [vmem:[#allocation70_spill] sm:$0xff] %v10149_v43  ;;  %s13630_s0 = smov 32  }
 0x435   :  { %13577 = vst [vmem:[#allocation56_spill] sm:$0xff] %v10050_v54  ;;  %13580 = vst [vmem:[#allocation88_spill] sm:$0xff] %v10068_v55  ;;  %v10072_v54 = vmul.f32 %v9998_v30, %v9799_v46  ;;  %v10091_v55 = vstv %s9860_s21  ;;  %s10118_s21 = sld [smem:[#allocation16 + $0xe]] }
 0x436   :  { %2803 = vrot.lane.b32.xlu0 %v9701_v2, %s13003_s23  ;;  %2801 = vrot.lane.b32.xlu1 %v9699_v63, %s13003_s23  ;;  %13582 = vst [vmem:[#allocation58_spill] sm:$0xff] %v10100_v36  ;;  %v10368_v23 = vstv %s10305_s17  ;;  %s11339_s17 = sld [smem:[#allocation16 + $0x195]] }
 0x437   :  { %13581 = vst [vmem:[#allocation134_spill] sm:$0xff] %v10072_v54  ;;  %v10097_v54 = vstv %s9876_s12  ;;  %s10154_s12 = sld [smem:[#allocation16 + $0x18e]]  ;;  %13638 = vst [vmem:[#allocation147_spill] sm:$0xff] %v10368_v23 }
 0x438   :  { %v10114_v9 = vstv %s9897_s18  ;;  %s10140_s18 = sld [smem:[#allocation16 + $0x10e]] }
 0x439   :  { %13584 = vst [vmem:[#allocation62_spill] sm:$0xff] %v10114_v9  ;;  %v10165_v50 = vstv %s13589_s2  ;;  %v13626_v9 = vld [vmem:[#allocation75_spill] sm:$0xff]  ;;  %s11211_s2 = sld [smem:[#allocation16 + $0x193]] }
 0x43a   :  { %2813 = vrot.lane.b32.xlu0 %v9691_v38, %s12999_s25  ;;  %2799 = vrot.lane.b32.xlu1 %v9707_v25, %s13003_s23  ;;  %s9895_s23 = sld [smem:[#allocation16 + $0x86]]  ;;  %13598 = vst [vmem:[#allocation92_spill] sm:$0xff] %v10165_v50  ;;  %v10183_v50 = vmul.f32 %v9995_v15, %v9788_v1 }
 0x43c   :  { %13603 = vst [vmem:[#allocation114_spill] sm:$0xff] %v10183_v50 }
 0x43e   :  { %2819 = vrot.lane.b32.xlu0 %v9701_v2, %s12999_s25  ;;  %2817 = vrot.lane.b32.xlu1 %v9699_v63, %s12999_s25  ;;  %v10249_v51 = vstv %s10140_s18  ;;  %s11267_s18 = sld [smem:[#allocation16 + $0x94]] }
 0x43f   :  { %13623 = vst [vmem:[#allocation142_spill] sm:$0xff] %v10249_v51 }
 0x440   :  { %v10111_v20 = vstv %s9895_s23  ;;  %s10138_s23 = sld [smem:[#allocation16 + $0x8e]] }
 0x441   :  { %13583 = vst [vmem:[#allocation89_spill] sm:$0xff] %v10111_v20 }
 0x442   :  { %2829 = vrot.lane.b32.xlu0 %v9691_v38, %s12997_s26  ;;  %2815 = vrot.lane.b32.xlu1 %v9707_v25, %s12999_s25  ;;  %s9805_s25 = sld [smem:[#allocation16 + $0x102]] }
 0x446   :  { %2835 = vrot.lane.b32.xlu0 %v9701_v2, %s12997_s26  ;;  %2833 = vrot.lane.b32.xlu1 %v9699_v63, %s12997_s26 }
 0x448   :  { %v10017_v19 = vstv %s9805_s25  ;;  %s10041_s25 = sld [smem:[#allocation16 + $0x18a]] }
 0x44a   :  { %2845 = vrot.lane.b32.xlu0 %v9691_v38, %s13001_s3  ;;  %2831 = vrot.lane.b32.xlu1 %v9707_v25, %s12997_s26  ;;  %s9796_s26 = sld [smem:[#allocation16 + $0x2]] }
 0x44e   :  { %2851 = vrot.lane.b32.xlu0 %v9701_v2, %s13001_s3  ;;  %2849 = vrot.lane.b32.xlu1 %v9699_v63, %s13001_s3  ;;  %v10204_v50 = vstv %s10041_s25  ;;  %s11075_s25 = sld [smem:[#allocation16 + $0x91]] }
 0x44f   :  { %13610 = vst [vmem:[#allocation68_spill] sm:$0xff] %v10204_v50  ;;  %v10229_v50 = vstv %s10104_s7  ;;  %s11154_s7 = sld [smem:[#allocation16 + $0x192]] }
 0x450   :  { %v10001_v27 = vstv %s9796_s26  ;;  %s13575_s26 = smov 96   ;;  %13617 = vst [vmem:[#allocation128_spill] sm:$0xff] %v10229_v50 }
 0x452   :  { %2861 = vrot.lane.b32.xlu0 %v9691_v38, %s13007_s5  ;;  %2847 = vrot.lane.b32.xlu1 %v9707_v25, %s13001_s3  ;;  %s9817_s3 = sld [smem:[#allocation16 + $0x182]] }
 0x456   :  { %2867 = vrot.lane.b32.xlu0 %v9701_v2, %s13007_s5  ;;  %2863 = vrot.lane.b32.xlu1 %v9707_v25, %s13007_s5 }
 0x458   :  { %v10039_v62 = vstv %s9817_s3  ;;  %s10059_s3 = sld [smem:[#allocation16 + $0x8b]] }
 0x45a   :  { %2877 = vrot.lane.b32.xlu0 %v9691_v38, %s13011_s16  ;;  %2865 = vrot.lane.b32.xlu1 %v9699_v63, %s13007_s5  ;;  %s9938_s5 = sld [smem:[#allocation16 + $0x8]] }
 0x45b   :  { %s9952_s16 = sld [smem:[#allocation16 + $0x108]] }
 0x45e   :  { %2883 = vrot.lane.b32.xlu0 %v9701_v2, %s13564_s8  ;;  %2879 = vrot.lane.b32.xlu1 %v9707_v25, %s13564_s8 }
 0x460   :  { %v10146_v60 = vstv %s9938_s5  ;;  %s13599_s5 = smov 94  }
 0x461   :  { %13559 = sst [smem:[#allocation139_spill]] %s9952_s16  ;;  %s9988_s16 = sld [smem:[#allocation16 + $0x109]]  ;;  %v10036_v48 = vpop.permute.xlu0 %2669  ;;  %13594 = vst [vmem:[#allocation69_spill] sm:$0xff] %v10146_v60  ;;  %v10192_v60 = vstv %s10019_s10 }
 0x462   :  { %2893 = vrot.lane.b32.xlu0 %v9691_v38, %s13575_s26  ;;  %2881 = vrot.lane.b32.xlu1 %v9699_v63, %s13564_s8  ;;  %s10088_s8 = sld [smem:[#allocation16 + $0xc]]  ;;  %s13585_s28 = sld [smem:[#allocation139_spill]]  ;;  %13606 = vst [vmem:[#allocation65_spill] sm:$0xff] %v10192_v60  ;;  %v10213_v60 = vstv %s10061_s27 }
 0x463   :  { %13613 = vst [vmem:[#allocation108_spill] sm:$0xff] %v10213_v60  ;;  %v10243_v60 = vstv %s10118_s21  ;;  %s11044_s10 = sld [smem:[#allocation16 + $0x190]]  ;;  %s11140_s27 = sld [smem:[#allocation16 + $0x12]] }
 0x464   :  { %13621 = vst [vmem:[#allocation37_spill] sm:$0xff] %v10243_v60  ;;  %s11205_s21 = sld [smem:[#allocation16 + $0x113]] }
 0x466   :  { %2899 = vrot.lane.b32.xlu0 %v9701_v2, %s13575_s26  ;;  %2895 = vrot.lane.b32.xlu1 %v9707_v25, %s13575_s26 }
 0x467   :  { %v10175_v43 = vstv %s9988_s16  ;;  %s10303_s16 = sld [smem:[#allocation16 + $0x10f]] }
 0x468   :  { %v2674_v0 = vpop.permute.xlu1 %2673  ;;  %v2676_v32 = vpop.permute.xlu0 %2675  ;;  %v10152_v24 = vstv %s13585_s28  ;;  %13601 = vst [vmem:[#allocation101_spill] sm:$0xff] %v10175_v43  ;;  %v13608_v43 = vld [vmem:[#allocation84_spill] sm:$0xff]  ;;  %s11200_s28 = sld [smem:[#allocation16 + $0x13]] }
 0x469   :  { %13596 = vst [vmem:[#allocation97_spill] sm:$0xff] %v10152_v24  ;;  %v2677_v29 = vsel %vm1501_vm8, %v2674_v0, %v2676_v32  ;;  %v2680_v47 = vsel %vm1501_vm8, %v2676_v32, %v10036_v48  ;;  %v10172_v24 = vstv %s9986_s14  ;;  %v10179_v32 = vmul.f32 %v9995_v15, %v9781_v34  ;;  %s10290_s14 = sld [smem:[#allocation16 + $0xf]] }
 0x46a   :  { %2909 = vrot.lane.b32.xlu0 %v9691_v38, %s13599_s5  ;;  %2897 = vrot.lane.b32.xlu1 %v9699_v63, %s13575_s26  ;;  %13600 = vst [vmem:[#allocation50_spill] sm:$0xff] %v10172_v24  ;;  %v10186_v38 = vstv %s10006_s6  ;;  %v10195_v24 = vstv %s10021_s24  ;;  %v2681_v44 = vmul.f32 %v2680_v47, %v13608_v43  ;;  %v2684_v6 = vmul.f32 %v2677_v29, %v13609_v58  ;;  %s11032_s6 = sld [smem:[#allocation16 + $0x110]]  ;;  %s11072_s24 = sld [smem:[#allocation16 + $0x11]] }
 0x46b   :  { %13602 = vst [vmem:[#allocation41_spill] sm:$0xff] %v10179_v32  ;;  %13604 = vst [vmem:[#allocation82_spill] sm:$0xff] %v10186_v38  ;;  %v10210_v38 = vstv %s10059_s3  ;;  %v10219_v47 = vstv %s10088_s8  ;;  %v10226_v29 = vstv %s10102_s30  ;;  %v10255_v43 = vstv %s10154_s12  ;;  %s13659_s8 = smov 98   ;;  %s11101_s3 = sld [smem:[#allocation16 + $0x191]] }
 0x46c   :  { %13607 = vst [vmem:[#allocation130_spill] sm:$0xff] %v10195_v24  ;;  %v10199_v32 = vpop.permute.xlu1 %2685  ;;  %v10201_v15 = vpop.permute.xlu0 %2689  ;;  %13612 = vst [vmem:[#allocation98_spill] sm:$0xff] %v10210_v38  ;;  %v10216_v24 = vstv %s10086_s29  ;;  %v10233_v38 = vmul.f32 %v9998_v30, %v9781_v34  ;;  %v3186_v50 = vmul.f32 %v9812_v35, %v2684_v6  ;;  %v3552_v60 = vmul.f32 %v9815_v42, %v2684_v6  ;;  %s11142_s29 = sld [smem:[#allocation16 + $0x92]]  ;;  %s11269_s12 = sld [smem:[#allocation16 + $0x114]] }
 0x46d   :  { %13614 = vst [vmem:[#allocation112_spill] sm:$0xff] %v10216_v24  ;;  %13615 = vst [vmem:[#allocation118_spill] sm:$0xff] %v10219_v47  ;;  %v10237_v24 = vmul.f32 %v9998_v30, %v9788_v1  ;;  %v10240_v47 = vstv %s10116_s20  ;;  %v4281_v36 = vmul.f32 %v9828_v59, %v2681_v44  ;;  %v10356_v8 = vstv %s10303_s16  ;;  %s11144_s30 = sld [smem:[#allocation16 + $0x112]]  ;;  %s11203_s20 = sld [smem:[#allocation16 + $0x93]] }
 0x46e   :  { %2915 = vrot.lane.b32.xlu0 %v9701_v2, %s13599_s5  ;;  %2911 = vrot.lane.b32.xlu1 %v9707_v25, %s13599_s5  ;;  %13616 = vst [vmem:[#allocation124_spill] sm:$0xff] %v10226_v29  ;;  %13618 = vst [vmem:[#allocation48_spill] sm:$0xff] %v10233_v38  ;;  %v10246_v2 = vstv %s10138_s23  ;;  %v3183_v25 = vmul.f32 %v9812_v35, %v2681_v44  ;;  %v3549_v29 = vmul.f32 %v9815_v42, %v2681_v44  ;;  %s11264_s23 = sld [smem:[#allocation16 + $0x14]]  ;;  %s11333_s16 = sld [smem:[#allocation16 + $0x115]] }
 0x46f   :  { %13619 = vst [vmem:[#allocation66_spill] sm:$0xff] %v10237_v24  ;;  %13620 = vst [vmem:[#allocation137_spill] sm:$0xff] %v10240_v47  ;;  %v3915_v47 = vmul.f32 %v9825_v37, %v2681_v44 }
 0x470   :  { %13622 = vst [vmem:[#allocation141_spill] sm:$0xff] %v10246_v2  ;;  %v2692_v58 = vpop.permute.xlu1 %2691  ;;  %v2672_v38 = vpop.permute.xlu0 %2671  ;;  %13624 = vst [vmem:[#allocation143_spill] sm:$0xff] %v10255_v43  ;;  %v13625_v43 = vld [vmem:[#allocation74_spill] sm:$0xff] }
 0x471   :  { %v2693_v30 = vsel %vm1539_vm9, %v10201_v15, %v2692_v58  ;;  %v2696_v24 = vsel %vm1539_vm9, %v2692_v58, %v10199_v32  ;;  %v2678_v51 = vsel %vm1501_vm8, %v2672_v38, %v2674_v0  ;;  %v2679_v2 = vsel %vm1501_vm8, %v10036_v48, %v2672_v38  ;;  %v13628_v0 = vld [vmem:[#allocation52_spill] sm:$0xff]  ;;  %13637 = vst [vmem:[#allocation146_spill] sm:$0xff] %v10356_v8 }
 0x472   :  { %v2697_v61 = vmul.f32 %v2696_v24, %v13625_v43  ;;  %v2700_v20 = vmul.f32 %v2693_v30, %v13626_v9  ;;  %2925 = vrot.lane.b32.xlu0 %v9777_v5, %s13627_s13  ;;  %v3918_v58 = vmul.f32 %v9825_v37, %v2684_v6  ;;  %v2682_v4 = vmul.f32 %v2679_v2, %v13628_v0 }
 0x473   :  { %v2683_v41 = vmul.f32 %v2678_v51, %v13629_v18  ;;  %2913 = vrot.lane.b32.xlu1 %v9699_v63, %s13599_s5  ;;  %v4284_v63 = vmul.f32 %v9828_v59, %v2684_v6 }
 0x474   :  { %v3189_v48 = vmul.f32 %v9831_v33, %v2697_v61  ;;  %v3192_v24 = vmul.f32 %v9831_v33, %v2700_v20  ;;  %v3555_v38 = vmul.f32 %v9845_v28, %v2697_v61  ;;  %v3558_v30 = vmul.f32 %v9845_v28, %v2700_v20  ;;  %v2688_v9 = vpop.permute.xlu1 %2687  ;;  %v10284_v43 = vpop.permute.xlu0 %2701 }
 0x475   :  { %v3921_v44 = vmul.f32 %v9905_v26, %v2697_v61  ;;  %v3924_v2 = vmul.f32 %v9905_v26, %v2700_v20  ;;  %v4287_v51 = vmul.f32 %v9971_v10, %v2697_v61  ;;  %v4290_v18 = vmul.f32 %v9971_v10, %v2700_v20 }
 0x476   :  { %v10295_v0 = vadd.f32 %v3189_v48, %v3183_v25  ;;  %v10297_v49 = vadd.f32 %v3192_v24, %v3186_v50  ;;  %v10299_v31 = vadd.f32 %v3555_v38, %v3549_v29  ;;  %2931 = vrot.lane.b32.xlu0 %v9799_v46, %s13627_s13  ;;  %v10307_v61 = vadd.f32 %v3558_v30, %v3552_v60  ;;  %v13631_v30 = vld [vmem:[#allocation93_spill] sm:$0xff] }
 0x477   :  { %v10309_v20 = vadd.f32 %v3921_v44, %v3915_v47  ;;  %v10311_v3 = vadd.f32 %v3924_v2, %v3918_v58  ;;  %v10313_v6 = vadd.f32 %v4287_v51, %v4281_v36  ;;  %2929 = vrot.lane.b32.xlu1 %v9788_v1, %s13627_s13  ;;  %v10317_v50 = vadd.f32 %v4290_v18, %v4284_v63  ;;  %v13633_v51 = vld [vmem:[#allocation42_spill] sm:$0xff] }
 0x478   :  { %v3184_v29 = vmul.f32 %v9812_v35, %v2682_v4  ;;  %v3185_v25 = vmul.f32 %v9812_v35, %v2683_v41  ;;  %v3550_v48 = vmul.f32 %v9815_v42, %v2682_v4  ;;  %v10322_v24 = vpop.permute.xlu1 %2705  ;;  %v2708_v60 = vpop.permute.xlu0 %2707  ;;  %v3551_v47 = vmul.f32 %v9815_v42, %v2683_v41 }
 0x479   :  { %v3916_v58 = vmul.f32 %v9825_v37, %v2682_v4  ;;  %v3917_v36 = vmul.f32 %v9825_v37, %v2683_v41  ;;  %v4282_v18 = vmul.f32 %v9828_v59, %v2682_v4  ;;  %v2694_v35 = vsel %vm1539_vm9, %v2688_v9, %v10201_v15  ;;  %v13632_v15 = vld [vmem:[#allocation94_spill] sm:$0xff] }
 0x47a   :  { %v2695_v38 = vsel %vm1539_vm9, %v10199_v32, %v2688_v9  ;;  %v2709_v42 = vsel %vm1577_vm10, %v10322_v24, %v2708_v60  ;;  %v2712_v37 = vsel %vm1577_vm10, %v2708_v60, %v10284_v43  ;;  %2941 = vrot.lane.b32.xlu0 %v9777_v5, %s13630_s0  ;;  %v4283_v4 = vmul.f32 %v9828_v59, %v2683_v41  ;;  %v13634_v9 = vld [vmem:[#allocation43_spill] sm:$0xff] }
 0x47b   :  { %v2698_v44 = vmul.f32 %v2695_v38, %v13631_v30  ;;  %v2699_v2 = vmul.f32 %v2694_v35, %v13632_v15  ;;  %v2713_v63 = vmul.f32 %v2712_v37, %v13633_v51  ;;  %2927 = vrot.lane.b32.xlu1 %v9781_v34, %s13627_s13  ;;  %v2716_v32 = vmul.f32 %v2709_v42, %v13634_v9 }
 0x47c   :  { %v2704_v17 = vpop.permute.xlu1 %2703  ;;  %v2718_v7 = vpop.permute.xlu0 %2717  ;;  %v10350_v60 = vstv %s10290_s14  ;;  %s11328_s14 = sld [smem:[#allocation16 + $0x15]] }
 0x47d   :  { %13635 = vst [vmem:[#allocation144_spill] sm:$0xff] %v10350_v60  ;;  %v3190_v59 = vmul.f32 %v9831_v33, %v2698_v44  ;;  %v3191_v41 = vmul.f32 %v9831_v33, %v2699_v2  ;;  %v3556_v35 = vmul.f32 %v9845_v28, %v2698_v44  ;;  %v3557_v38 = vmul.f32 %v9845_v28, %v2699_v2 }
 0x47e   :  { %v3922_v37 = vmul.f32 %v9905_v26, %v2698_v44  ;;  %v3923_v42 = vmul.f32 %v9905_v26, %v2699_v2  ;;  %v4288_v9 = vmul.f32 %v9971_v10, %v2698_v44  ;;  %2947 = vrot.lane.b32.xlu0 %v9799_v46, %s13630_s0  ;;  %v4289_v33 = vmul.f32 %v9971_v10, %v2699_v2 }
 0x47f   :  { %v3194_v8 = vadd.f32 %v3190_v59, %v3184_v29  ;;  %v3195_v60 = vadd.f32 %v3191_v41, %v3185_v25  ;;  %v3560_v51 = vadd.f32 %v3556_v35, %v3550_v48  ;;  %2945 = vrot.lane.b32.xlu1 %v9788_v1, %s13630_s0  ;;  %v3561_v28 = vadd.f32 %v3557_v38, %v3551_v47  ;;  %v13642_v38 = vld [vmem:[#allocation85_spill] sm:$0xff] }
 0x480   :  { %v3926_v15 = vadd.f32 %v3922_v37, %v3916_v58  ;;  %v3927_v26 = vadd.f32 %v3923_v42, %v3917_v36  ;;  %v4292_v30 = vadd.f32 %v4288_v9, %v4282_v18  ;;  %v2722_v44 = vpop.permute.xlu1 %2721  ;;  %v2724_v56 = vpop.permute.xlu0 %2723  ;;  %v3199_v57 = vmul.f32 %v10001_v27, %v2713_v63 }
 0x481   :  { %v3202_v23 = vmul.f32 %v10001_v27, %v2716_v32  ;;  %v3565_v29 = vmul.f32 %v10004_v21, %v2713_v63  ;;  %v3568_v25 = vmul.f32 %v10004_v21, %v2716_v32  ;;  %v3931_v10 = vmul.f32 %v10017_v19, %v2713_v63 }
 0x482   :  { %v3934_v48 = vmul.f32 %v10017_v19, %v2716_v32  ;;  %v4297_v47 = vmul.f32 %v10039_v62, %v2713_v63  ;;  %v4300_v58 = vmul.f32 %v10039_v62, %v2716_v32  ;;  %2957 = vrot.lane.b32.xlu0 %v9777_v5, %s13639_s19  ;;  %v4293_v36 = vadd.f32 %v4289_v33, %v4283_v4 }
 0x483   :  { %v3203_v18 = vadd.f32 %v3199_v57, %v10295_v0  ;;  %v3206_v2 = vadd.f32 %v3202_v23, %v10297_v49  ;;  %v3569_v9 = vadd.f32 %v3565_v29, %v10299_v31  ;;  %2943 = vrot.lane.b32.xlu1 %v9781_v34, %s13630_s0  ;;  %v3572_v59 = vadd.f32 %v3568_v25, %v10307_v61  ;;  %v13640_v0 = vld [vmem:[#allocation35_spill] sm:$0xff] }
 0x484   :  { %v3935_v41 = vadd.f32 %v3931_v10, %v10309_v20  ;;  %v3938_v63 = vadd.f32 %v3934_v48, %v10311_v3  ;;  %v4301_v32 = vadd.f32 %v4297_v47, %v10313_v6  ;;  %v2720_v35 = vpop.permute.xlu1 %2719  ;;  %v10396_v4 = vpop.permute.xlu0 %2733  ;;  %v2710_v57 = vsel %vm1577_vm10, %v2704_v17, %v10322_v24  ;;  %v13641_v20 = vld [vmem:[#allocation39_spill] sm:$0xff] }
 0x485   :  { %v2711_v23 = vsel %vm1577_vm10, %v10284_v43, %v2704_v17  ;;  %v2725_v49 = vsel %vm1615_vm11, %v2722_v44, %v2724_v56  ;;  %v2728_v3 = vsel %vm1615_vm11, %v2724_v56, %v2718_v7  ;;  %v4304_v31 = vadd.f32 %v4300_v58, %v10317_v50  ;;  %v13643_v24 = vld [vmem:[#allocation83_spill] sm:$0xff] }
 0x486   :  { %v2714_v61 = vmul.f32 %v2711_v23, %v13640_v0  ;;  %v2715_v6 = vmul.f32 %v2710_v57, %v13641_v20  ;;  %v2729_v37 = vmul.f32 %v2728_v3, %v13642_v38  ;;  %2963 = vrot.lane.b32.xlu0 %v9799_v46, %s13639_s19  ;;  %v2732_v43 = vmul.f32 %v2725_v49, %v13643_v24  ;;  %v13647_v24 = vld [vmem:[#allocation80_spill] sm:$0xff] }
 0x487   :  { %v2726_v17 = vsel %vm1615_vm11, %v2720_v35, %v2722_v44  ;;  %v2727_v56 = vsel %vm1615_vm11, %v2718_v7, %v2720_v35  ;;  %2961 = vrot.lane.b32.xlu1 %v9788_v1, %s13639_s19  ;;  %v10422_v50 = vstv %s10373_s1  ;;  %v10436_v58 = vstv %s10379_s11  ;;  %s11391_s1 = sld [smem:[#allocation16 + $0x97]] }
 0x488   :  { %13644 = vst [vmem:[#allocation35_spill] sm:$0xff] %v10422_v50  ;;  %v3200_v42 = vmul.f32 %v10001_v27, %v2714_v61  ;;  %v3201_v33 = vmul.f32 %v10001_v27, %v2715_v6  ;;  %v3566_v29 = vmul.f32 %v10004_v21, %v2714_v61  ;;  %v3567_v25 = vmul.f32 %v10004_v21, %v2715_v6  ;;  %v10428_v10 = vpop.permute.xlu1 %2735  ;;  %v10430_v48 = vpop.permute.xlu0 %2739  ;;  %s11393_s11 = sld [smem:[#allocation16 + $0x117]] }
 0x489   :  { %v3932_v44 = vmul.f32 %v10017_v19, %v2714_v61  ;;  %v3933_v7 = vmul.f32 %v10017_v19, %v2715_v6  ;;  %v4298_v47 = vmul.f32 %v10039_v62, %v2714_v61  ;;  %13645 = vst [vmem:[#allocation148_spill] sm:$0xff] %v10436_v58  ;;  %v4299_v27 = vmul.f32 %v10039_v62, %v2715_v6 }
 0x48a   :  { %v3204_v35 = vadd.f32 %v3200_v42, %v3194_v8  ;;  %v3205_v57 = vadd.f32 %v3201_v33, %v3195_v60  ;;  %v3570_v23 = vadd.f32 %v3566_v29, %v3560_v51  ;;  %2973 = vrot.lane.b32.xlu0 %v9777_v5, %s13646_s22  ;;  %v3571_v21 = vadd.f32 %v3567_v25, %v3561_v28 }
 0x48b   :  { %v3936_v49 = vadd.f32 %v3932_v44, %v3926_v15  ;;  %v3937_v3 = vadd.f32 %v3933_v7, %v3927_v26  ;;  %v4302_v50 = vadd.f32 %v4298_v47, %v4292_v30  ;;  %2959 = vrot.lane.b32.xlu1 %v9781_v34, %s13639_s19  ;;  %v3209_v19 = vmul.f32 %v10057_v39, %v2729_v37 }
 0x48c   :  { %v3212_v61 = vmul.f32 %v10057_v39, %v2732_v43  ;;  %v3575_v8 = vmul.f32 %v10075_v40, %v2729_v37  ;;  %v3578_v51 = vmul.f32 %v10075_v40, %v2732_v43  ;;  %v10447_v60 = vpop.permute.xlu1 %2737  ;;  %v10449_v62 = vpop.permute.xlu0 %2749  ;;  %v3941_v28 = vmul.f32 %v10078_v11, %v2729_v37 }
 0x48d   :  { %v3944_v15 = vmul.f32 %v10078_v11, %v2732_v43  ;;  %v4307_v30 = vmul.f32 %v10081_v53, %v2729_v37  ;;  %v4310_v26 = vmul.f32 %v10081_v53, %v2732_v43  ;;  %v4303_v6 = vadd.f32 %v4299_v27, %v4293_v36  ;;  %v13648_v37 = vld [vmem:[#allocation47_spill] sm:$0xff] }
 0x48e   :  { %v3213_v42 = vadd.f32 %v3209_v19, %v3203_v18  ;;  %v3216_v33 = vadd.f32 %v3212_v61, %v3206_v2  ;;  %v3579_v29 = vadd.f32 %v3575_v8, %v3569_v9  ;;  %2979 = vrot.lane.b32.xlu0 %v9799_v46, %s13646_s22  ;;  %v3582_v25 = vadd.f32 %v3578_v51, %v3572_v59  ;;  %v13649_v9 = vld [vmem:[#allocation91_spill] sm:$0xff] }
 0x48f   :  { %v3945_v44 = vadd.f32 %v3941_v28, %v3935_v41  ;;  %v3948_v7 = vadd.f32 %v3944_v15, %v3938_v63  ;;  %v4311_v47 = vadd.f32 %v4307_v30, %v4301_v32  ;;  %2977 = vrot.lane.b32.xlu1 %v9788_v1, %s13646_s22  ;;  %v4314_v58 = vadd.f32 %v4310_v26, %v4304_v31  ;;  %v13652_v26 = vld [vmem:[#allocation102_spill] sm:$0xff] }
 0x490   :  { %v2730_v38 = vmul.f32 %v2727_v56, %v13647_v24  ;;  %v2731_v20 = vmul.f32 %v2726_v17, %v13648_v37  ;;  %v2743_v36 = vsel %vm1653_vm12, %v10396_v4, %v10428_v10  ;;  %v10465_v18 = vpop.permute.xlu1 %2751  ;;  %v10467_v2 = vpop.permute.xlu0 %2755  ;;  %v3223_v41 = vadd.f32 %v9822_v12, %v3213_v42 }
 0x491   :  { %v2745_v59 = vmul.f32 %v2743_v36, %v13649_v9  ;;  %v3589_v63 = vadd.f32 %v9838_v14, %v3579_v29  ;;  %v3955_v32 = vadd.f32 %v9852_v45, %v3945_v44  ;;  %v4321_v8 = vadd.f32 %v9855_v13, %v4311_v47  ;;  %v13654_v44 = vld [vmem:[#allocation109_spill] sm:$0xff] }
 0x492   :  { %v3210_v31 = vmul.f32 %v10057_v39, %v2730_v38  ;;  %v3211_v43 = vmul.f32 %v10057_v39, %v2731_v20  ;;  %v3576_v17 = vmul.f32 %v10075_v40, %v2730_v38  ;;  %v3577_v56 = vmul.f32 %v10075_v40, %v2731_v20  ;;  %2989 = vrot.lane.b32.xlu0 %v9777_v5, %s13650_s4 }
 0x493   :  { %v3942_v27 = vmul.f32 %v10078_v11, %v2730_v38  ;;  %v3943_v19 = vmul.f32 %v10078_v11, %v2731_v20  ;;  %v4308_v12 = vmul.f32 %v10081_v53, %v2730_v38  ;;  %v4309_v14 = vmul.f32 %v10081_v53, %v2731_v20  ;;  %2975 = vrot.lane.b32.xlu1 %v9781_v34, %s13646_s22 }
 0x494   :  { %v3214_v45 = vadd.f32 %v3210_v31, %v3204_v35  ;;  %v3215_v39 = vadd.f32 %v3211_v43, %v3205_v57  ;;  %v3580_v61 = vadd.f32 %v3576_v17, %v3570_v23  ;;  %v10486_v40 = vpop.permute.xlu1 %2753  ;;  %v10488_v51 = vpop.permute.xlu0 %2765  ;;  %v3581_v28 = vadd.f32 %v3577_v56, %v3571_v21  ;;  %v13651_v57 = vld [vmem:[#allocation38_spill] sm:$0xff]  ;;  %v13653_v21 = vld [vmem:[#allocation44_spill] sm:$0xff]  ;;  %v13658_v17 = vld [vmem:[#allocation119_spill] sm:$0xff] }
 0x495   :  { %v3946_v15 = vadd.f32 %v3942_v27, %v3936_v49  ;;  %v3947_v30 = vadd.f32 %v3943_v19, %v3937_v3  ;;  %v4312_v11 = vadd.f32 %v4308_v12, %v4302_v50  ;;  %v3229_v38 = vmul.f32 %v10084_v52, %v2745_v59  ;;  %v13657_v31 = vld [vmem:[#allocation64_spill] sm:$0xff]  ;;  %v13661_v19 = vld [vmem:[#allocation53_spill] sm:$0xff]  ;;  %v13662_v12 = vld [vmem:[#allocation78_spill] sm:$0xff] }
 0x496   :  { %v3595_v53 = vmul.f32 %v10091_v55, %v2745_v59  ;;  %v3961_v20 = vmul.f32 %v10094_v22, %v2745_v59  ;;  %v4327_v35 = vmul.f32 %v10097_v54, %v2745_v59  ;;  %2995 = vrot.lane.b32.xlu0 %v9799_v46, %s13650_s4  ;;  %v4313_v13 = vadd.f32 %v4309_v14, %v4303_v6  ;;  %v13655_v59 = vld [vmem:[#allocation60_spill] sm:$0xff] }
 0x497   :  { %v3226_v23 = vadd.f32 %v13651_v57, %v3216_v33  ;;  %v3592_v42 = vadd.f32 %v13652_v26, %v3582_v25  ;;  %v3958_v49 = vadd.f32 %v13653_v21, %v3948_v7  ;;  %2991 = vrot.lane.b32.xlu1 %v9781_v34, %s13650_s4  ;;  %v10501_v50 = vadd.f32 %v3229_v38, %v3223_v41 }
 0x498   :  { %v10503_v3 = vadd.f32 %v3595_v53, %v3589_v63  ;;  %v10505_v29 = vadd.f32 %v3961_v20, %v3955_v32  ;;  %v4324_v47 = vadd.f32 %v13654_v44, %v4314_v58  ;;  %v10508_v36 = vpop.permute.xlu1 %2767  ;;  %v10510_v6 = vpop.permute.xlu0 %2771  ;;  %v10512_v33 = vadd.f32 %v4327_v35, %v4321_v8  ;;  %v13656_v63 = vld [vmem:[#allocation61_spill] sm:$0xff]  ;;  %v13663_v8 = vld [vmem:[#allocation123_spill] sm:$0xff]  ;;  %v13664_v44 = vld [vmem:[#allocation120_spill] sm:$0xff] }
 0x499   :  { %v2744_v25 = vsel %vm1653_vm12, %v10430_v48, %v10396_v4  ;;  %v2741_v7 = vsel %vm1653_vm12, %v10447_v60, %v10430_v48  ;;  %v2742_v58 = vsel %vm1653_vm12, %v10428_v10, %v10447_v60  ;;  %v3224_v56 = vadd.f32 %v13658_v17, %v3214_v45  ;;  %v13660_v4 = vld [vmem:[#allocation95_spill] sm:$0xff] }
 0x49a   :  { %v2748_v41 = vmul.f32 %v2744_v25, %v13655_v59  ;;  %v2746_v32 = vmul.f32 %v2742_v58, %v13656_v63  ;;  %v2747_v43 = vmul.f32 %v2741_v7, %v13657_v31  ;;  %3005 = vrot.lane.b32.xlu0 %v9777_v5, %s13659_s8  ;;  %v3225_v27 = vadd.f32 %v13660_v4, %v3215_v39 }
 0x49b   :  { %v3590_v48 = vadd.f32 %v13661_v19, %v3580_v61  ;;  %v3591_v14 = vadd.f32 %v13662_v12, %v3581_v28  ;;  %v3956_v38 = vadd.f32 %v13663_v8, %v3946_v15  ;;  %2993 = vrot.lane.b32.xlu1 %v9788_v1, %s13650_s4  ;;  %v3957_v25 = vadd.f32 %v13664_v44, %v3947_v30  ;;  %v13665_v30 = vld [vmem:[#allocation63_spill] sm:$0xff] }
 0x49c   :  { %v3232_v10 = vmul.f32 %v10084_v52, %v2748_v41  ;;  %v3598_v60 = vmul.f32 %v10091_v55, %v2748_v41  ;;  %v3964_v45 = vmul.f32 %v10094_v22, %v2748_v41  ;;  %v4330_v53 = vmul.f32 %v10097_v54, %v2748_v41  ;;  %v10542_v20 = vpop.permute.xlu1 %2769  ;;  %v10544_v39 = vpop.permute.xlu0 %2781  ;;  %v13667_v12 = vld [vmem:[#allocation59_spill] sm:$0xff] }
 0x49d   :  { %v3230_v61 = vmul.f32 %v10084_v52, %v2746_v32  ;;  %v3231_v28 = vmul.f32 %v10084_v52, %v2747_v43  ;;  %v3596_v15 = vmul.f32 %v10091_v55, %v2746_v32  ;;  %v3597_v35 = vmul.f32 %v10091_v55, %v2747_v43  ;;  %v13668_v8 = vld [vmem:[#allocation31_spill] sm:$0xff] }
 0x49e   :  { %v3236_v57 = vadd.f32 %v3232_v10, %v3226_v23  ;;  %v3602_v26 = vadd.f32 %v3598_v60, %v3592_v42  ;;  %v3968_v21 = vadd.f32 %v3964_v45, %v3958_v49  ;;  %3011 = vrot.lane.b32.xlu0 %v9799_v46, %s13659_s8  ;;  %v4334_v7 = vadd.f32 %v4330_v53, %v4324_v47  ;;  %v13671_v53 = vld [vmem:[#allocation62_spill] sm:$0xff] }
 0x49f   :  { %v10553_v58 = vadd.f32 %v3230_v61, %v3224_v56  ;;  %v10555_v41 = vadd.f32 %v3231_v28, %v3225_v27  ;;  %v10557_v17 = vadd.f32 %v3596_v15, %v3590_v48  ;;  %3007 = vrot.lane.b32.xlu1 %v9781_v34, %s13659_s8  ;;  %v10561_v52 = vadd.f32 %v3597_v35, %v3591_v14  ;;  %v13666_v56 = vld [vmem:[#allocation121_spill] sm:$0xff]  ;;  %v13672_v28 = vld [vmem:[#allocation55_spill] sm:$0xff] }
 0x4a0   :  { %v3962_v55 = vmul.f32 %v10094_v22, %v2746_v32  ;;  %v3963_v23 = vmul.f32 %v10094_v22, %v2747_v43  ;;  %v4322_v42 = vadd.f32 %v13665_v30, %v4312_v11  ;;  %v10566_v49 = vpop.permute.xlu1 %2783  ;;  %v10568_v47 = vpop.permute.xlu0 %2787  ;;  %v4323_v4 = vadd.f32 %v13666_v56, %v4313_v13 }
 0x4a1   :  { %v4328_v27 = vmul.f32 %v10097_v54, %v2746_v32  ;;  %v2759_v19 = vsel %vm1691_vm13, %v10449_v62, %v10465_v18  ;;  %v2760_v22 = vsel %vm1691_vm13, %v10467_v2, %v10449_v62  ;;  %v4329_v11 = vmul.f32 %v10097_v54, %v2747_v43  ;;  %v13669_v54 = vld [vmem:[#allocation58_spill] sm:$0xff] }
 0x4a2   :  { %v3966_v48 = vadd.f32 %v3962_v55, %v3956_v38  ;;  %v2761_v14 = vmul.f32 %v2759_v19, %v13667_v12  ;;  %v2764_v10 = vmul.f32 %v2760_v22, %v13668_v8  ;;  %3021 = vrot.lane.b32.xlu0 %v9777_v5, %s13575_s26  ;;  %v3967_v13 = vadd.f32 %v3963_v23, %v3957_v25  ;;  %v13670_v38 = vld [vmem:[#allocation89_spill] sm:$0xff]  ;;  %v13682_v8 = vld [vmem:[#allocation106_spill] sm:$0xff] }
 0x4a3   :  { %v4332_v32 = vadd.f32 %v4328_v27, %v4322_v42  ;;  %v2757_v60 = vsel %vm1691_vm13, %v10486_v40, %v10467_v2  ;;  %v2758_v62 = vsel %vm1691_vm13, %v10465_v18, %v10486_v40  ;;  %3009 = vrot.lane.b32.xlu1 %v9788_v1, %s13659_s8  ;;  %v4333_v55 = vadd.f32 %v4329_v11, %v4323_v4  ;;  %v13674_v4 = vld [vmem:[#allocation29_spill] sm:$0xff] }
 0x4a4   :  { %v3239_v43 = vmul.f32 %v13669_v54, %v2761_v14  ;;  %v3605_v45 = vmul.f32 %v13670_v38, %v2761_v14  ;;  %v3971_v61 = vmul.f32 %v13671_v53, %v2761_v14  ;;  %v4337_v15 = vmul.f32 %v13672_v28, %v2761_v14  ;;  %v10599_v35 = vpop.permute.xlu1 %2785  ;;  %v10601_v44 = vpop.permute.xlu0 %2797  ;;  %v13673_v14 = vld [vmem:[#allocation32_spill] sm:$0xff] }
 0x4a5   :  { %v3242_v2 = vmul.f32 %v13669_v54, %v2764_v10  ;;  %v3608_v25 = vmul.f32 %v13670_v38, %v2764_v10  ;;  %v3974_v18 = vmul.f32 %v13671_v53, %v2764_v10  ;;  %v4340_v40 = vmul.f32 %v13672_v28, %v2764_v10 }
 0x4a6   :  { %v3243_v23 = vadd.f32 %v3239_v43, %v10501_v50  ;;  %v3609_v30 = vadd.f32 %v3605_v45, %v10503_v3  ;;  %v3975_v42 = vadd.f32 %v3971_v61, %v10505_v29  ;;  %3027 = vrot.lane.b32.xlu0 %v9799_v46, %s13575_s26  ;;  %v4341_v56 = vadd.f32 %v4337_v15, %v10512_v33 }
 0x4a7   :  { %v3246_v27 = vadd.f32 %v3242_v2, %v3236_v57  ;;  %v3612_v19 = vadd.f32 %v3608_v25, %v3602_v26  ;;  %v3978_v22 = vadd.f32 %v3974_v18, %v3968_v21  ;;  %3023 = vrot.lane.b32.xlu1 %v9781_v34, %s13575_s26  ;;  %v2762_v10 = vmul.f32 %v2758_v62, %v13673_v14  ;;  %v13675_v26 = vld [vmem:[#allocation103_spill] sm:$0xff] }
 0x4a8   :  { %v2763_v11 = vmul.f32 %v2757_v60, %v13674_v4  ;;  %v2775_v50 = vsel %vm1729_vm14, %v10488_v51, %v10508_v36  ;;  %v2776_v3 = vsel %vm1729_vm14, %v10510_v6, %v10488_v51  ;;  %v10625_v29 = vpop.permute.xlu1 %2801  ;;  %v10627_v33 = vpop.permute.xlu0 %2803  ;;  %v4344_v57 = vadd.f32 %v4340_v40, %v4334_v7  ;;  %v13676_v62 = vld [vmem:[#allocation107_spill] sm:$0xff] }
 0x4a9   :  { %v2777_v21 = vmul.f32 %v2775_v50, %v13675_v26  ;;  %v2780_v43 = vmul.f32 %v2776_v3, %v13676_v62  ;;  %v2773_v60 = vsel %vm1729_vm14, %v10542_v20, %v10510_v6  ;;  %v3240_v45 = vmul.f32 %v13669_v54, %v2762_v10  ;;  %v13678_v26 = vld [vmem:[#allocation36_spill] sm:$0xff] }
 0x4aa   :  { %v3241_v61 = vmul.f32 %v13669_v54, %v2763_v11  ;;  %v3606_v51 = vmul.f32 %v13670_v38, %v2762_v10  ;;  %v3607_v15 = vmul.f32 %v13670_v38, %v2763_v11  ;;  %3037 = vrot.lane.b32.xlu0 %v9777_v5, %s13599_s5  ;;  %v3972_v7 = vmul.f32 %v13671_v53, %v2762_v10 }
 0x4ab   :  { %v3973_v2 = vmul.f32 %v13671_v53, %v2763_v11  ;;  %v4338_v25 = vmul.f32 %v13672_v28, %v2762_v10  ;;  %v2774_v6 = vsel %vm1729_vm14, %v10508_v36, %v10542_v20  ;;  %3025 = vrot.lane.b32.xlu1 %v9788_v1, %s13575_s26  ;;  %v3244_v54 = vadd.f32 %v3240_v45, %v10553_v58  ;;  %v13677_v36 = vld [vmem:[#allocation46_spill] sm:$0xff]  ;;  %v13679_v58 = vld [vmem:[#allocation49_spill] sm:$0xff] }
 0x4ac   :  { %v3245_v38 = vadd.f32 %v3241_v61, %v10555_v41  ;;  %v3610_v5 = vadd.f32 %v3606_v51, %v10557_v17  ;;  %v4339_v18 = vmul.f32 %v13672_v28, %v2763_v11  ;;  %v10654_v40 = vpop.permute.xlu1 %2799  ;;  %v3611_v53 = vadd.f32 %v3607_v15, %v10561_v52  ;;  %v10657_v62 = vpop.permute.xlu0 %2813  ;;  %v13680_v41 = vld [vmem:[#allocation51_spill] sm:$0xff] }
 0x4ad   :  { %v3976_v10 = vadd.f32 %v3972_v7, %v3966_v48  ;;  %v3977_v50 = vadd.f32 %v3973_v2, %v3967_v13  ;;  %v4342_v3 = vadd.f32 %v4338_v25, %v4332_v32  ;;  %v3249_v20 = vmul.f32 %v13677_v36, %v2777_v21  ;;  %v13681_v25 = vld [vmem:[#allocation104_spill] sm:$0xff] }
 0x4ae   :  { %v3615_v4 = vmul.f32 %v13678_v26, %v2777_v21  ;;  %v3981_v45 = vmul.f32 %v13679_v58, %v2777_v21  ;;  %v4347_v61 = vmul.f32 %v13680_v41, %v2777_v21  ;;  %3043 = vrot.lane.b32.xlu0 %v9799_v46, %s13599_s5  ;;  %v3252_v17 = vmul.f32 %v13677_v36, %v2780_v43 }
 0x4af   :  { %v3618_v52 = vmul.f32 %v13678_v26, %v2780_v43  ;;  %v3984_v48 = vmul.f32 %v13679_v58, %v2780_v43  ;;  %v4350_v13 = vmul.f32 %v13680_v41, %v2780_v43  ;;  %3039 = vrot.lane.b32.xlu1 %v9781_v34, %s13599_s5  ;;  %v4343_v32 = vadd.f32 %v4339_v18, %v4333_v55  ;;  %v13683_v55 = vld [vmem:[#allocation72_spill] sm:$0xff] }
 0x4b0   :  { %v3253_v28 = vadd.f32 %v3249_v20, %v3243_v23  ;;  %v3619_v11 = vadd.f32 %v3615_v4, %v3609_v30  ;;  %v3985_v51 = vadd.f32 %v3981_v45, %v3975_v42  ;;  %v10671_v15 = vpop.permute.xlu1 %2817  ;;  %v4351_v21 = vadd.f32 %v4347_v61, %v4341_v56  ;;  %v13684_v30 = vld [vmem:[#allocation110_spill] sm:$0xff]  ;;  %v13685_v56 = vld [vmem:[#allocation116_spill] sm:$0xff] }
 0x4b1   :  { %v3256_v7 = vadd.f32 %v3252_v17, %v3246_v27  ;;  %v3622_v46 = vadd.f32 %v3618_v52, %v3612_v19  ;;  %v3988_v2 = vadd.f32 %v3984_v48, %v3978_v22  ;;  %v2778_v14 = vmul.f32 %v2774_v6, %v13681_v25  ;;  %v10691_v22 = vpop.permute.xlu0 %2819  ;;  %v13694_v25 = vld [vmem:[#allocation115_spill] sm:$0xff] }
 0x4b2   :  { %v2779_v12 = vmul.f32 %v2773_v60, %v13682_v8  ;;  %v2791_v43 = vsel %vm1767_vm15, %v10544_v39, %v10566_v49  ;;  %v2792_v34 = vsel %vm1767_vm15, %v10568_v47, %v10544_v39  ;;  %3053 = vrot.lane.b32.xlu0 %v13683_v55, %s13627_s13  ;;  %v4354_v23 = vadd.f32 %v4350_v13, %v4344_v57  ;;  %v13693_v8 = vld [vmem:[#allocation113_spill] sm:$0xff] }
 0x4b3   :  { %v2793_v42 = vmul.f32 %v2791_v43, %v13684_v30  ;;  %v2796_v27 = vmul.f32 %v2792_v34, %v13685_v56  ;;  %v2789_v19 = vsel %vm1767_vm15, %v10599_v35, %v10568_v47  ;;  %3041 = vrot.lane.b32.xlu1 %v9788_v1, %s13599_s5  ;;  %v3250_v39 = vmul.f32 %v13677_v36, %v2778_v14  ;;  %v13689_v56 = vld [vmem:[#allocation70_spill] sm:$0xff] }
 0x4b4   :  { %v3251_v4 = vmul.f32 %v13677_v36, %v2779_v12  ;;  %v3616_v57 = vmul.f32 %v13678_v26, %v2778_v14  ;;  %v3617_v60 = vmul.f32 %v13678_v26, %v2779_v12  ;;  %v10699_v6 = vpop.permute.xlu1 %2815  ;;  %v3982_v18 = vmul.f32 %v13679_v58, %v2778_v14  ;;  %v13686_v26 = vld [vmem:[#allocation100_spill] sm:$0xff] }
 0x4b5   :  { %v3983_v20 = vmul.f32 %v13679_v58, %v2779_v12  ;;  %v4348_v47 = vmul.f32 %v13680_v41, %v2778_v14  ;;  %v2790_v1 = vsel %vm1767_vm15, %v10566_v49, %v10599_v35  ;;  %v3254_v45 = vadd.f32 %v3250_v39, %v3244_v54  ;;  %v13687_v58 = vld [vmem:[#allocation99_spill] sm:$0xff]  ;;  %v13688_v14 = vld [vmem:[#allocation69_spill] sm:$0xff]  ;;  %v13691_v54 = vld [vmem:[#allocation96_spill] sm:$0xff] }
 0x4b6   :  { %v3255_v61 = vadd.f32 %v3251_v4, %v3245_v38  ;;  %v3620_v36 = vadd.f32 %v3616_v57, %v3610_v5  ;;  %v4349_v17 = vmul.f32 %v13680_v41, %v2779_v12  ;;  %3059 = vrot.lane.b32.xlu0 %v13686_v26, %s13627_s13  ;;  %v3621_v52 = vadd.f32 %v3617_v60, %v3611_v53  ;;  %v13690_v49 = vld [vmem:[#allocation97_spill] sm:$0xff] }
 0x4b7   :  { %v3986_v48 = vadd.f32 %v3982_v18, %v3976_v10  ;;  %v3987_v13 = vadd.f32 %v3983_v20, %v3977_v50  ;;  %v4352_v43 = vadd.f32 %v4348_v47, %v4342_v3  ;;  %3057 = vrot.lane.b32.xlu1 %v13687_v58, %s13627_s13  ;;  %v3259_v34 = vmul.f32 %v13688_v14, %v2793_v42  ;;  %v10721_v50 = vpop.permute.xlu0 %2829  ;;  %v13692_v47 = vld [vmem:[#allocation54_spill] sm:$0xff] }
 0x4b8   :  { %v3625_v30 = vmul.f32 %v13689_v56, %v2793_v42  ;;  %v3991_v35 = vmul.f32 %v13690_v49, %v2793_v42  ;;  %v4357_v38 = vmul.f32 %v13691_v54, %v2793_v42  ;;  %v3262_v12 = vmul.f32 %v13688_v14, %v2796_v27  ;;  %v10723_v3 = vpop.permute.xlu1 %2833 }
 0x4b9   :  { %v3628_v5 = vmul.f32 %v13689_v56, %v2796_v27  ;;  %v3994_v53 = vmul.f32 %v13690_v49, %v2796_v27  ;;  %v4360_v10 = vmul.f32 %v13691_v54, %v2796_v27  ;;  %v4353_v41 = vadd.f32 %v4349_v17, %v4343_v32 }
 0x4ba   :  { %v3263_v39 = vadd.f32 %v3259_v34, %v3253_v28  ;;  %v3629_v4 = vadd.f32 %v3625_v30, %v3619_v11  ;;  %v3995_v57 = vadd.f32 %v3991_v35, %v3985_v51  ;;  %3069 = vrot.lane.b32.xlu0 %v13683_v55, %s13630_s0  ;;  %v4361_v42 = vadd.f32 %v4357_v38, %v4351_v21  ;;  %v13695_v51 = vld [vmem:[#allocation84_spill] sm:$0xff] }
 0x4bb   :  { %v3266_v60 = vadd.f32 %v3262_v12, %v3256_v7  ;;  %v3632_v18 = vadd.f32 %v3628_v5, %v3622_v46  ;;  %v3998_v20 = vadd.f32 %v3994_v53, %v3988_v2  ;;  %3055 = vrot.lane.b32.xlu1 %v13692_v47, %s13627_s13  ;;  %v2794_v27 = vmul.f32 %v2790_v1, %v13693_v8  ;;  %v13696_v7 = vld [vmem:[#allocation73_spill] sm:$0xff]  ;;  %v10758_v35 = vpop.permute.xlu0 %2835  ;;  %s11275_s13 = sld [smem:[#allocation16 + $0x194]] }
 0x4bc   :  { %v2795_v31 = vmul.f32 %v2789_v19, %v13694_v25  ;;  %v2805_v32 = vsel %vm1501_vm8, %v10625_v29, %v10627_v33  ;;  %v2808_v28 = vsel %vm1501_vm8, %v10627_v33, %v10601_v44  ;;  %v4364_v11 = vadd.f32 %v4360_v10, %v4354_v23  ;;  %v13701_v25 = vld [vmem:[#allocation52_spill] sm:$0xff] }
 0x4bd   :  { %v2809_v21 = vmul.f32 %v2808_v28, %v13695_v51  ;;  %v2812_v46 = vmul.f32 %v2805_v32, %v13696_v7  ;;  %v2806_v2 = vsel %vm1501_vm8, %v10654_v40, %v10625_v29  ;;  %v3260_v30 = vmul.f32 %v13688_v14, %v2794_v27  ;;  %v13697_v32 = vld [vmem:[#allocation92_spill] sm:$0xff] }
 0x4be   :  { %v3261_v19 = vmul.f32 %v13688_v14, %v2795_v31  ;;  %v3626_v1 = vmul.f32 %v13689_v56, %v2794_v27  ;;  %v3627_v17 = vmul.f32 %v13689_v56, %v2795_v31  ;;  %3075 = vrot.lane.b32.xlu0 %v13686_v26, %s13630_s0  ;;  %v3992_v33 = vmul.f32 %v13690_v49, %v2794_v27  ;;  %v10760_v14 = vpop.permute.xlu1 %2831 }
 0x4bf   :  { %v3993_v23 = vmul.f32 %v13690_v49, %v2795_v31  ;;  %v4358_v34 = vmul.f32 %v13691_v54, %v2794_v27  ;;  %v2807_v29 = vsel %vm1501_vm8, %v10601_v44, %v10654_v40  ;;  %3073 = vrot.lane.b32.xlu1 %v13687_v58, %s13630_s0  ;;  %v3264_v56 = vadd.f32 %v3260_v30, %v3254_v45  ;;  %v13698_v40 = vld [vmem:[#allocation50_spill] sm:$0xff]  ;;  %v13699_v45 = vld [vmem:[#allocation101_spill] sm:$0xff] }
 0x4c0   :  { %v3265_v38 = vadd.f32 %v3261_v19, %v3255_v61  ;;  %v3630_v12 = vadd.f32 %v3626_v1, %v3620_v36  ;;  %v4359_v5 = vmul.f32 %v13691_v54, %v2795_v31  ;;  %v3631_v49 = vadd.f32 %v3627_v17, %v3621_v52  ;;  %v13700_v31 = vld [vmem:[#allocation82_spill] sm:$0xff] }
 0x4c1   :  { %v3996_v53 = vadd.f32 %v3992_v33, %v3986_v48  ;;  %v3997_v10 = vadd.f32 %v3993_v23, %v3987_v13  ;;  %v4362_v27 = vadd.f32 %v4358_v34, %v4352_v43  ;;  %v3269_v28 = vmul.f32 %v13697_v32, %v2809_v21  ;;  %v10777_v23 = vpop.permute.xlu0 %2845 }
 0x4c2   :  { %v3272_v44 = vmul.f32 %v13697_v32, %v2812_v46  ;;  %v3635_v7 = vmul.f32 %v13698_v40, %v2809_v21  ;;  %v3638_v51 = vmul.f32 %v13698_v40, %v2812_v46  ;;  %3085 = vrot.lane.b32.xlu0 %v13683_v55, %s13639_s19  ;;  %v4001_v61 = vmul.f32 %v13699_v45, %v2809_v21  ;;  %v10779_v34 = vpop.permute.xlu1 %2849 }
 0x4c3   :  { %v4004_v36 = vmul.f32 %v13699_v45, %v2812_v46  ;;  %v4367_v52 = vmul.f32 %v13700_v31, %v2809_v21  ;;  %v4370_v48 = vmul.f32 %v13700_v31, %v2812_v46  ;;  %3071 = vrot.lane.b32.xlu1 %v13692_v47, %s13630_s0  ;;  %v4363_v13 = vadd.f32 %v4359_v5, %v4353_v41  ;;  %v13702_v21 = vld [vmem:[#allocation90_spill] sm:$0xff]  ;;  %s11386_s0 = sld [smem:[#allocation16 + $0x17]] }
 0x4c4   :  { %v3273_v43 = vadd.f32 %v3269_v28, %v3263_v39  ;;  %v3276_v54 = vadd.f32 %v3272_v44, %v3266_v60  ;;  %v3639_v30 = vadd.f32 %v3635_v7, %v3629_v4  ;;  %v3642_v19 = vadd.f32 %v3638_v51, %v3632_v18  ;;  %v13704_v60 = vld [vmem:[#allocation75_spill] sm:$0xff] }
 0x4c5   :  { %v4005_v1 = vadd.f32 %v4001_v61, %v3995_v57  ;;  %v4008_v17 = vadd.f32 %v4004_v36, %v3998_v20  ;;  %v4371_v33 = vadd.f32 %v4367_v52, %v4361_v42  ;;  %v2810_v8 = vmul.f32 %v2807_v29, %v13701_v25  ;;  %v13703_v57 = vld [vmem:[#allocation74_spill] sm:$0xff] }
 0x4c6   :  { %v2811_v63 = vmul.f32 %v2806_v2, %v13702_v21  ;;  %v2821_v41 = vsel %vm1539_vm9, %v10671_v15, %v10691_v22  ;;  %v2824_v39 = vsel %vm1539_vm9, %v10691_v22, %v10657_v62  ;;  %3091 = vrot.lane.b32.xlu0 %v13686_v26, %s13639_s19  ;;  %v4374_v4 = vadd.f32 %v4370_v48, %v4364_v11 }
 0x4c7   :  { %v2825_v42 = vmul.f32 %v2824_v39, %v13703_v57  ;;  %v2828_v18 = vmul.f32 %v2821_v41, %v13704_v60  ;;  %v2822_v20 = vsel %vm1539_vm9, %v10699_v6, %v10671_v15  ;;  %3089 = vrot.lane.b32.xlu1 %v13687_v58, %s13639_s19  ;;  %v3270_v51 = vmul.f32 %v13697_v32, %v2810_v8  ;;  %v13710_v57 = vld [vmem:[#allocation94_spill] sm:$0xff] }
 0x4c8   :  { %v3271_v22 = vmul.f32 %v13697_v32, %v2811_v63  ;;  %v3636_v7 = vmul.f32 %v13698_v40, %v2810_v8  ;;  %v3637_v11 = vmul.f32 %v13698_v40, %v2811_v63  ;;  %v4002_v46 = vmul.f32 %v13699_v45, %v2810_v8 }
 0x4c9   :  { %v4003_v2 = vmul.f32 %v13699_v45, %v2811_v63  ;;  %v4368_v29 = vmul.f32 %v13700_v31, %v2810_v8  ;;  %v2823_v15 = vsel %vm1539_vm9, %v10657_v62, %v10699_v6  ;;  %v3274_v5 = vadd.f32 %v3270_v51, %v3264_v56  ;;  %v10815_v45 = vpop.permute.xlu0 %2851  ;;  %v10817_v8 = vpop.permute.xlu1 %2847  ;;  %v13705_v62 = vld [vmem:[#allocation45_spill] sm:$0xff] }
 0x4ca   :  { %v3275_v28 = vadd.f32 %v3271_v22, %v3265_v38  ;;  %v3640_v44 = vadd.f32 %v3636_v7, %v3630_v12  ;;  %v4369_v32 = vmul.f32 %v13700_v31, %v2811_v63  ;;  %3101 = vrot.lane.b32.xlu0 %v13683_v55, %s13646_s22  ;;  %v3641_v40 = vadd.f32 %v3637_v11, %v3631_v49  ;;  %v13706_v38 = vld [vmem:[#allocation65_spill] sm:$0xff]  ;;  %v13707_v31 = vld [vmem:[#allocation130_spill] sm:$0xff] }
 0x4cb   :  { %v4006_v61 = vadd.f32 %v4002_v46, %v3996_v53  ;;  %v4007_v36 = vadd.f32 %v4003_v2, %v3997_v10  ;;  %v4372_v52 = vadd.f32 %v4368_v29, %v4362_v27  ;;  %3087 = vrot.lane.b32.xlu1 %v13692_v47, %s13639_s19  ;;  %v3279_v6 = vmul.f32 %v13705_v62, %v2825_v42  ;;  %v13708_v10 = vld [vmem:[#allocation68_spill] sm:$0xff]  ;;  %v13709_v29 = vld [vmem:[#allocation93_spill] sm:$0xff]  ;;  %s11436_s19 = sld [smem:[#allocation16 + $0x197]] }
 0x4cc   :  { %v3282_v56 = vmul.f32 %v13705_v62, %v2828_v18  ;;  %v3645_v63 = vmul.f32 %v13706_v38, %v2825_v42  ;;  %v3648_v12 = vmul.f32 %v13706_v38, %v2828_v18  ;;  %v4011_v49 = vmul.f32 %v13707_v31, %v2825_v42 }
 0x4cd   :  { %v4014_v53 = vmul.f32 %v13707_v31, %v2828_v18  ;;  %v4377_v27 = vmul.f32 %v13708_v10, %v2825_v42  ;;  %v4380_v48 = vmul.f32 %v13708_v10, %v2828_v18  ;;  %v4373_v41 = vadd.f32 %v4369_v32, %v4363_v13  ;;  %v10849_v18 = vpop.permute.xlu0 %2861 }
 0x4ce   :  { %v3283_v39 = vadd.f32 %v3279_v6, %v3273_v43  ;;  %v3286_v51 = vadd.f32 %v3282_v56, %v3276_v54  ;;  %v3649_v22 = vadd.f32 %v3645_v63, %v3639_v30  ;;  %3107 = vrot.lane.b32.xlu0 %v13686_v26, %s13646_s22  ;;  %v3652_v7 = vadd.f32 %v3648_v12, %v3642_v19  ;;  %v13711_v30 = vld [vmem:[#allocation42_spill] sm:$0xff] }
 0x4cf   :  { %v4015_v11 = vadd.f32 %v4011_v49, %v4005_v1  ;;  %v4018_v46 = vadd.f32 %v4014_v53, %v4008_v17  ;;  %v4381_v2 = vadd.f32 %v4377_v27, %v4371_v33  ;;  %3105 = vrot.lane.b32.xlu1 %v13687_v58, %s13646_s22  ;;  %v2826_v60 = vmul.f32 %v2823_v15, %v13709_v29  ;;  %v13712_v1 = vld [vmem:[#allocation43_spill] sm:$0xff] }
 0x4d0   :  { %v2827_v42 = vmul.f32 %v2822_v20, %v13710_v57  ;;  %v2837_v13 = vsel %vm1577_vm10, %v10723_v3, %v10758_v35  ;;  %v2840_v43 = vsel %vm1577_vm10, %v10758_v35, %v10721_v50  ;;  %v4384_v54 = vadd.f32 %v4380_v48, %v4374_v4  ;;  %v10851_v20 = vpop.permute.xlu1 %2863 }
 0x4d1   :  { %v2841_v19 = vmul.f32 %v2840_v43, %v13711_v30  ;;  %v2844_v17 = vmul.f32 %v2837_v13, %v13712_v1  ;;  %v2838_v33 = vsel %vm1577_vm10, %v10760_v14, %v10723_v3  ;;  %v3280_v15 = vmul.f32 %v13705_v62, %v2826_v60  ;;  %v13714_v1 = vld [vmem:[#allocation98_spill] sm:$0xff] }
 0x4d2   :  { %v3281_v32 = vmul.f32 %v13705_v62, %v2827_v42  ;;  %v3646_v35 = vmul.f32 %v13706_v38, %v2826_v60  ;;  %v3647_v4 = vmul.f32 %v13706_v38, %v2827_v42  ;;  %3117 = vrot.lane.b32.xlu0 %v13683_v55, %s13650_s4  ;;  %v4012_v6 = vmul.f32 %v13707_v31, %v2826_v60 }
 0x4d3   :  { %v4013_v56 = vmul.f32 %v13707_v31, %v2827_v42  ;;  %v4378_v3 = vmul.f32 %v13708_v10, %v2826_v60  ;;  %v2839_v63 = vsel %vm1577_vm10, %v10721_v50, %v10760_v14  ;;  %3103 = vrot.lane.b32.xlu1 %v13692_v47, %s13646_s22  ;;  %v3284_v62 = vadd.f32 %v3280_v15, %v3274_v5  ;;  %v13713_v31 = vld [vmem:[#allocation77_spill] sm:$0xff]  ;;  %v13715_v14 = vld [vmem:[#allocation108_spill] sm:$0xff]  ;;  %s5679_s22 = sld [smem:[#allocation16 + $0x198]] }
 0x4d4   :  { %v3285_v12 = vadd.f32 %v3281_v32, %v3275_v28  ;;  %v3650_v38 = vadd.f32 %v3646_v35, %v3640_v44  ;;  %v4379_v49 = vmul.f32 %v13708_v10, %v2827_v42  ;;  %v3651_v53 = vadd.f32 %v3647_v4, %v3641_v40  ;;  %v13716_v44 = vld [vmem:[#allocation112_spill] sm:$0xff] }
 0x4d5   :  { %v4016_v27 = vadd.f32 %v4012_v6, %v4006_v61  ;;  %v4017_v48 = vadd.f32 %v4013_v56, %v4007_v36  ;;  %v4382_v13 = vadd.f32 %v4378_v3, %v4372_v52  ;;  %v3289_v43 = vmul.f32 %v13713_v31, %v2841_v19  ;;  %v10879_v36 = vpop.permute.xlu0 %2867  ;;  %v10881_v52 = vpop.permute.xlu1 %2865 }
 0x4d6   :  { %v3292_v60 = vmul.f32 %v13713_v31, %v2844_v17  ;;  %v3655_v30 = vmul.f32 %v13714_v1, %v2841_v19  ;;  %v3658_v50 = vmul.f32 %v13714_v1, %v2844_v17  ;;  %3123 = vrot.lane.b32.xlu0 %v13686_v26, %s13650_s4  ;;  %v4021_v5 = vmul.f32 %v13715_v14, %v2841_v19 }
 0x4d7   :  { %v4024_v28 = vmul.f32 %v13715_v14, %v2844_v17  ;;  %v4387_v40 = vmul.f32 %v13716_v44, %v2841_v19  ;;  %v4390_v61 = vmul.f32 %v13716_v44, %v2844_v17  ;;  %3119 = vrot.lane.b32.xlu1 %v13692_v47, %s13650_s4  ;;  %v4383_v10 = vadd.f32 %v4379_v49, %v4373_v41  ;;  %v13717_v19 = vld [vmem:[#allocation39_spill] sm:$0xff] }
 0x4d8   :  { %v3293_v42 = vadd.f32 %v3289_v43, %v3283_v39  ;;  %v3296_v15 = vadd.f32 %v3292_v60, %v3286_v51  ;;  %v3659_v32 = vadd.f32 %v3655_v30, %v3649_v22  ;;  %v3662_v35 = vadd.f32 %v3658_v50, %v3652_v7  ;;  %v13718_v51 = vld [vmem:[#allocation85_spill] sm:$0xff]  ;;  %v13719_v7 = vld [vmem:[#allocation83_spill] sm:$0xff] }
 0x4d9   :  { %v4025_v4 = vadd.f32 %v4021_v5, %v4015_v11  ;;  %v4028_v6 = vadd.f32 %v4024_v28, %v4018_v46  ;;  %v4391_v56 = vadd.f32 %v4387_v40, %v4381_v2  ;;  %v2842_v3 = vmul.f32 %v2839_v63, %v13640_v0  ;;  %v10916_v43 = vpop.permute.xlu0 %2877  ;;  %v10918_v60 = vpop.permute.xlu1 %2879 }
 0x4da   :  { %v2843_v57 = vmul.f32 %v2838_v33, %v13717_v19  ;;  %v2853_v17 = vsel %vm1615_vm11, %v10779_v34, %v10815_v45  ;;  %v2856_v41 = vsel %vm1615_vm11, %v10815_v45, %v10777_v23  ;;  %3133 = vrot.lane.b32.xlu0 %v13683_v55, %s13659_s8  ;;  %v4394_v39 = vadd.f32 %v4390_v61, %v4384_v54 }
 0x4db   :  { %v2857_v22 = vmul.f32 %v2856_v41, %v13718_v51  ;;  %v2860_v11 = vmul.f32 %v2853_v17, %v13719_v7  ;;  %v2854_v46 = vsel %vm1615_vm11, %v10817_v8, %v10779_v34  ;;  %3121 = vrot.lane.b32.xlu1 %v13687_v58, %s13650_s4  ;;  %v3290_v2 = vmul.f32 %v13713_v31, %v2842_v3  ;;  %v13721_v17 = vld [vmem:[#allocation124_spill] sm:$0xff]  ;;  %v13723_v41 = vld [vmem:[#allocation137_spill] sm:$0xff] }
 0x4dc   :  { %v3291_v45 = vmul.f32 %v13713_v31, %v2843_v57  ;;  %v3656_v30 = vmul.f32 %v13714_v1, %v2842_v3  ;;  %v3657_v54 = vmul.f32 %v13714_v1, %v2843_v57  ;;  %v4022_v33 = vmul.f32 %v13715_v14, %v2842_v3 }
 0x4dd   :  { %v4023_v63 = vmul.f32 %v13715_v14, %v2843_v57  ;;  %v4388_v49 = vmul.f32 %v13716_v44, %v2842_v3  ;;  %v2855_v34 = vsel %vm1615_vm11, %v10777_v23, %v10817_v8  ;;  %v3294_v31 = vadd.f32 %v3290_v2, %v3284_v62  ;;  %v13720_v23 = vld [vmem:[#allocation118_spill] sm:$0xff]  ;;  %v10937_v7 = vpop.permute.xlu1 %2881 }
 0x4de   :  { %v3295_v50 = vadd.f32 %v3291_v45, %v3285_v12  ;;  %v3660_v5 = vadd.f32 %v3656_v30, %v3650_v38  ;;  %v4389_v1 = vmul.f32 %v13716_v44, %v2843_v57  ;;  %3139 = vrot.lane.b32.xlu0 %v13686_v26, %s13659_s8  ;;  %v3661_v14 = vadd.f32 %v3657_v54, %v3651_v53  ;;  %v13722_v38 = vld [vmem:[#allocation128_spill] sm:$0xff] }
 0x4df   :  { %v4026_v28 = vadd.f32 %v4022_v33, %v4016_v27  ;;  %v4027_v40 = vadd.f32 %v4023_v63, %v4017_v48  ;;  %v4392_v61 = vadd.f32 %v4388_v49, %v4382_v13  ;;  %3135 = vrot.lane.b32.xlu1 %v13692_v47, %s13659_s8  ;;  %v3299_v8 = vmul.f32 %v13720_v23, %v2857_v22  ;;  %v10935_v49 = vpop.permute.xlu0 %2883 }
 0x4e0   :  { %v3302_v3 = vmul.f32 %v13720_v23, %v2860_v11  ;;  %v3665_v62 = vmul.f32 %v13721_v17, %v2857_v22  ;;  %v3668_v12 = vmul.f32 %v13721_v17, %v2860_v11  ;;  %v4031_v57 = vmul.f32 %v13722_v38, %v2857_v22 }
 0x4e1   :  { %v4034_v44 = vmul.f32 %v13722_v38, %v2860_v11  ;;  %v4397_v53 = vmul.f32 %v13723_v41, %v2857_v22  ;;  %v4400_v27 = vmul.f32 %v13723_v41, %v2860_v11  ;;  %v4393_v48 = vadd.f32 %v4389_v1, %v4383_v10  ;;  %v13726_v11 = vld [vmem:[#allocation34_spill] sm:$0xff] }
 0x4e2   :  { %v3303_v13 = vadd.f32 %v3299_v8, %v3293_v42  ;;  %v3306_v2 = vadd.f32 %v3302_v3, %v3296_v15  ;;  %v3669_v45 = vadd.f32 %v3665_v62, %v3659_v32  ;;  %3149 = vrot.lane.b32.xlu0 %v13683_v55, %s13575_s26  ;;  %v3672_v30 = vadd.f32 %v3668_v12, %v3662_v35  ;;  %v13724_v35 = vld [vmem:[#allocation131_spill] sm:$0xff] }
 0x4e3   :  { %v4035_v54 = vadd.f32 %v4031_v57, %v4025_v4  ;;  %v4038_v33 = vadd.f32 %v4034_v44, %v4028_v6  ;;  %v4401_v63 = vadd.f32 %v4397_v53, %v4391_v56  ;;  %3137 = vrot.lane.b32.xlu1 %v13687_v58, %s13659_s8  ;;  %v4404_v22 = vadd.f32 %v4400_v27, %v4394_v39  ;;  %v13725_v6 = vld [vmem:[#allocation132_spill] sm:$0xff]  ;;  %s5680_s8 = sld [smem:[#allocation16 + $0x199]] }
 0x4e4   :  { %v2858_v10 = vmul.f32 %v2855_v34, %v13647_v24  ;;  %v2859_v42 = vmul.f32 %v2854_v46, %v13648_v37  ;;  %v2871_v15 = vsel %vm1653_vm12, %v10849_v18, %v10851_v20  ;;  %v3313_v4 = vadd.f32 %v13724_v35, %v3303_v13  ;;  %v13727_v27 = vld [vmem:[#allocation76_spill] sm:$0xff]  ;;  %v10964_v35 = vpop.permute.xlu0 %2893  ;;  %v13731_v37 = vld [vmem:[#allocation143_spill] sm:$0xff] }
 0x4e5   :  { %v2873_v32 = vmul.f32 %v2871_v15, %v13649_v9  ;;  %v3679_v56 = vadd.f32 %v13725_v6, %v3669_v45  ;;  %v4045_v1 = vadd.f32 %v13726_v11, %v4035_v54  ;;  %v4411_v13 = vadd.f32 %v13727_v27, %v4401_v63  ;;  %v10966_v6 = vpop.permute.xlu1 %2895  ;;  %v13729_v11 = vld [vmem:[#allocation141_spill] sm:$0xff] }
 0x4e6   :  { %v3300_v8 = vmul.f32 %v13720_v23, %v2858_v10  ;;  %v3301_v39 = vmul.f32 %v13720_v23, %v2859_v42  ;;  %v3666_v34 = vmul.f32 %v13721_v17, %v2858_v10  ;;  %v3667_v46 = vmul.f32 %v13721_v17, %v2859_v42  ;;  %3155 = vrot.lane.b32.xlu0 %v13686_v26, %s13575_s26  ;;  %v13741_v27 = vld [vmem:[#allocation111_spill] sm:$0xff] }
 0x4e7   :  { %v4032_v3 = vmul.f32 %v13722_v38, %v2858_v10  ;;  %v4033_v62 = vmul.f32 %v13722_v38, %v2859_v42  ;;  %v4398_v12 = vmul.f32 %v13723_v41, %v2858_v10  ;;  %v4399_v57 = vmul.f32 %v13723_v41, %v2859_v42  ;;  %3151 = vrot.lane.b32.xlu1 %v13692_v47, %s13575_s26  ;;  %v13728_v38 = vld [vmem:[#allocation37_spill] sm:$0xff]  ;;  %v13730_v42 = vld [vmem:[#allocation142_spill] sm:$0xff] }
 0x4e8   :  { %v3304_v44 = vadd.f32 %v3300_v8, %v3294_v31  ;;  %v3305_v23 = vadd.f32 %v3301_v39, %v3295_v50  ;;  %v3670_v53 = vadd.f32 %v3666_v34, %v3660_v5  ;;  %v3671_v17 = vadd.f32 %v3667_v46, %v3661_v14  ;;  %v13732_v5 = vld [vmem:[#allocation30_spill] sm:$0xff] }
 0x4e9   :  { %v4036_v45 = vadd.f32 %v4032_v3, %v4026_v28  ;;  %v4037_v54 = vadd.f32 %v4033_v62, %v4027_v40  ;;  %v4402_v15 = vadd.f32 %v4398_v12, %v4392_v61  ;;  %v3319_v10 = vmul.f32 %v13728_v38, %v2873_v32  ;;  %v13733_v28 = vld [vmem:[#allocation125_spill] sm:$0xff]  ;;  %v13734_v61 = vld [vmem:[#allocation126_spill] sm:$0xff] }
 0x4ea   :  { %v3685_v41 = vmul.f32 %v13729_v11, %v2873_v32  ;;  %v4051_v9 = vmul.f32 %v13730_v42, %v2873_v32  ;;  %v4417_v31 = vmul.f32 %v13731_v37, %v2873_v32  ;;  %3165 = vrot.lane.b32.xlu0 %v13683_v55, %s13599_s5  ;;  %v4403_v50 = vadd.f32 %v4399_v57, %v4393_v48  ;;  %v13735_v32 = vld [vmem:[#allocation40_spill] sm:$0xff]  ;;  %v13740_v57 = vld [vmem:[#allocation133_spill] sm:$0xff] }
 0x4eb   :  { %v3316_v14 = vadd.f32 %v13732_v5, %v3306_v2  ;;  %v3682_v40 = vadd.f32 %v13733_v28, %v3672_v30  ;;  %v4048_v63 = vadd.f32 %v13734_v61, %v4038_v33  ;;  %3153 = vrot.lane.b32.xlu1 %v13687_v58, %s13575_s26  ;;  %v10979_v8 = vadd.f32 %v3319_v10, %v3313_v4  ;;  %v13736_v33 = vld [vmem:[#allocation61_spill] sm:$0xff]  ;;  %v13737_v4 = vld [vmem:[#allocation64_spill] sm:$0xff] }
 0x4ec   :  { %v10981_v39 = vadd.f32 %v3685_v41, %v3679_v56  ;;  %v10983_v34 = vadd.f32 %v4051_v9, %v4045_v1  ;;  %v4414_v46 = vadd.f32 %v13735_v32, %v4404_v22  ;;  %v10986_v3 = vadd.f32 %v4417_v31, %v4411_v13  ;;  %v13738_v1 = vld [vmem:[#allocation105_spill] sm:$0xff] }
 0x4ed   :  { %v2872_v48 = vsel %vm1653_vm12, %v10879_v36, %v10849_v18  ;;  %v2869_v2 = vsel %vm1653_vm12, %v10881_v52, %v10879_v36  ;;  %v2870_v9 = vsel %vm1653_vm12, %v10851_v20, %v10881_v52  ;;  %v3314_v62 = vadd.f32 %v13738_v1, %v3304_v44  ;;  %v13739_v18 = vld [vmem:[#allocation129_spill] sm:$0xff]  ;;  %v11010_v20 = vpop.permute.xlu0 %2899  ;;  %v11012_v52 = vpop.permute.xlu1 %2897 }
 0x4ee   :  { %v2876_v30 = vmul.f32 %v2872_v48, %v13655_v59  ;;  %v2874_v22 = vmul.f32 %v2870_v9, %v13736_v33  ;;  %v2875_v56 = vmul.f32 %v2869_v2, %v13737_v4  ;;  %3171 = vrot.lane.b32.xlu0 %v13686_v26, %s13599_s5  ;;  %v3315_v12 = vadd.f32 %v13739_v18, %v3305_v23  ;;  %v13742_v10 = vld [vmem:[#allocation117_spill] sm:$0xff]  ;;  %v13743_v2 = vld [vmem:[#allocation136_spill] sm:$0xff] }
 0x4ef   :  { %v3680_v36 = vadd.f32 %v13740_v57, %v3670_v53  ;;  %v3681_v13 = vadd.f32 %v13741_v27, %v3671_v17  ;;  %v4046_v41 = vadd.f32 %v13742_v10, %v4036_v45  ;;  %3167 = vrot.lane.b32.xlu1 %v13692_v47, %s13599_s5  ;;  %v4047_v9 = vadd.f32 %v13743_v2, %v4037_v54  ;;  %v13744_v47 = vld [vmem:[#allocation79_spill] sm:$0xff] }
 0x4f0   :  { %v3322_v44 = vmul.f32 %v13728_v38, %v2876_v30  ;;  %v3688_v31 = vmul.f32 %v13729_v11, %v2876_v30  ;;  %v4054_v5 = vmul.f32 %v13730_v42, %v2876_v30  ;;  %v4420_v23 = vmul.f32 %v13731_v37, %v2876_v30 }
 0x4f1   :  { %v3320_v53 = vmul.f32 %v13728_v38, %v2874_v22  ;;  %v3321_v17 = vmul.f32 %v13728_v38, %v2875_v56  ;;  %v3686_v45 = vmul.f32 %v13729_v11, %v2874_v22  ;;  %v3687_v28 = vmul.f32 %v13729_v11, %v2875_v56 }
 0x4f2   :  { %v3326_v61 = vadd.f32 %v3322_v44, %v3316_v14  ;;  %v3692_v32 = vadd.f32 %v3688_v31, %v3682_v40  ;;  %v4058_v48 = vadd.f32 %v4054_v5, %v4048_v63  ;;  %v4424_v1 = vadd.f32 %v4420_v23, %v4414_v46  ;;  %v13745_v14 = vld [vmem:[#allocation135_spill] sm:$0xff]  ;;  %v13748_v5 = vld [vmem:[#allocation144_spill] sm:$0xff] }
 0x4f3   :  { %v3324_v18 = vadd.f32 %v3320_v53, %v3314_v62  ;;  %v3325_v57 = vadd.f32 %v3321_v17, %v3315_v12  ;;  %v3690_v27 = vadd.f32 %v3686_v45, %v3680_v36  ;;  %3169 = vrot.lane.b32.xlu1 %v13687_v58, %s13599_s5  ;;  %v11027_v30 = vadd.f32 %v3687_v28, %v3681_v13  ;;  %v13747_v12 = vld [vmem:[#allocation31_spill] sm:$0xff]  ;;  %v13751_v17 = vld [vmem:[#allocation147_spill] sm:$0xff] }
 0x4f4   :  { %v4052_v38 = vmul.f32 %v13730_v42, %v2874_v22  ;;  %v4053_v10 = vmul.f32 %v13730_v42, %v2875_v56  ;;  %v4412_v11 = vadd.f32 %v13744_v47, %v4402_v15  ;;  %v4413_v40 = vadd.f32 %v13745_v14, %v4403_v50  ;;  %v11046_v42 = vpop.permute.xlu0 %2909  ;;  %v11048_v47 = vpop.permute.xlu1 %2911  ;;  %v13749_v23 = vld [vmem:[#allocation145_spill] sm:$0xff] }
 0x4f5   :  { %v4418_v54 = vmul.f32 %v13731_v37, %v2874_v22  ;;  %v2887_v63 = vsel %vm1691_vm13, %v10916_v43, %v10918_v60  ;;  %v2888_v46 = vsel %vm1691_vm13, %v10935_v49, %v10916_v43  ;;  %v4419_v50 = vmul.f32 %v13731_v37, %v2875_v56  ;;  %v13746_v22 = vld [vmem:[#allocation59_spill] sm:$0xff]  ;;  %v13750_v56 = vld [vmem:[#allocation146_spill] sm:$0xff] }
 0x4f6   :  { %v4056_v15 = vadd.f32 %v4052_v38, %v4046_v41  ;;  %v2889_v62 = vmul.f32 %v2887_v63, %v13746_v22  ;;  %v2892_v36 = vmul.f32 %v2888_v46, %v13747_v12  ;;  %v4057_v13 = vadd.f32 %v4053_v10, %v4047_v9 }
 0x4f7   :  { %v4422_v44 = vadd.f32 %v4418_v54, %v4412_v11  ;;  %v2885_v43 = vsel %vm1691_vm13, %v10937_v7, %v10935_v49  ;;  %v2886_v31 = vsel %vm1691_vm13, %v10918_v60, %v10937_v7  ;;  %v4423_v38 = vadd.f32 %v4419_v50, %v4413_v40 }
 0x4f8   :  { %v3329_v41 = vmul.f32 %v13748_v5, %v2889_v62  ;;  %v3695_v37 = vmul.f32 %v13749_v23, %v2889_v62  ;;  %v4061_v53 = vmul.f32 %v13750_v56, %v2889_v62  ;;  %v4427_v45 = vmul.f32 %v13751_v17, %v2889_v62  ;;  %v11079_v40 = vpop.permute.xlu0 %2915  ;;  %v11081_v46 = vpop.permute.xlu1 %2913 }
 0x4f9   :  { %v3332_v28 = vmul.f32 %v13748_v5, %v2892_v36  ;;  %v3698_v2 = vmul.f32 %v13749_v23, %v2892_v36  ;;  %v4064_v9 = vmul.f32 %v13750_v56, %v2892_v36  ;;  %v4430_v49 = vmul.f32 %v13751_v17, %v2892_v36 }
 0x4fa   :  { %v3333_v7 = vadd.f32 %v3329_v41, %v10979_v8  ;;  %v3699_v60 = vadd.f32 %v3695_v37, %v10981_v39  ;;  %v4065_v10 = vadd.f32 %v4061_v53, %v10983_v34  ;;  %v4431_v11 = vadd.f32 %v4427_v45, %v10986_v3  ;;  %v13752_v39 = vld [vmem:[#allocation32_spill] sm:$0xff]  ;;  %v13753_v34 = vld [vmem:[#allocation29_spill] sm:$0xff] }
 0x4fb   :  { %v3336_v14 = vadd.f32 %v3332_v28, %v3326_v61  ;;  %v3702_v54 = vadd.f32 %v3698_v2, %v3692_v32  ;;  %v4068_v63 = vadd.f32 %v4064_v9, %v4058_v48  ;;  %v11083_v8 = vadd.f32 %v4430_v49, %v4424_v1 }
 0x4fc   :  { %v2890_v50 = vmul.f32 %v2886_v31, %v13752_v39  ;;  %v2891_v62 = vmul.f32 %v2885_v43, %v13753_v34  ;;  %v4070_v36 = vstv %s11032_s6  ;;  %v4436_v41 = vstv %s11044_s10  ;;  %v11116_v34 = vpop.permute.xlu0 %2925  ;;  %s5576_s6 = sld [smem:[#allocation16 + $0x1f]] }
 0x4fd   :  { %v2903_v3 = vsel %vm1729_vm14, %v10964_v35, %v10966_v6  ;;  %v2904_v61 = vsel %vm1729_vm14, %v11010_v20, %v10964_v35  ;;  %v2902_v32 = vsel %vm1729_vm14, %v10966_v6, %v11012_v52  ;;  %s5612_s10 = sld [smem:[#allocation16 + $0x9f]] }
 0x4fe   :  { %v3330_v48 = vmul.f32 %v13748_v5, %v2890_v50  ;;  %v3331_v1 = vmul.f32 %v13748_v5, %v2891_v62  ;;  %v3696_v43 = vmul.f32 %v13749_v23, %v2890_v50  ;;  %v3697_v31 = vmul.f32 %v13749_v23, %v2891_v62 }
 0x4ff   :  { %v4062_v37 = vmul.f32 %v13750_v56, %v2890_v50  ;;  %v4063_v53 = vmul.f32 %v13750_v56, %v2891_v62  ;;  %v4428_v35 = vmul.f32 %v13751_v17, %v2890_v50  ;;  %v4429_v45 = vmul.f32 %v13751_v17, %v2891_v62  ;;  %v11118_v50 = vpop.permute.xlu1 %2929  ;;  %v13754_v17 = vld [vmem:[#allocation103_spill] sm:$0xff] }
 0x500   :  { %v3334_v6 = vadd.f32 %v3330_v48, %v3324_v18  ;;  %v3335_v28 = vadd.f32 %v3331_v1, %v3325_v57  ;;  %v3700_v2 = vadd.f32 %v3696_v43, %v3690_v27  ;;  %v2901_v5 = vsel %vm1729_vm14, %v11012_v52, %v11010_v20  ;;  %v13755_v62 = vld [vmem:[#allocation107_spill] sm:$0xff]  ;;  %v13756_v48 = vld [vmem:[#allocation104_spill] sm:$0xff]  ;;  %v13757_v43 = vld [vmem:[#allocation106_spill] sm:$0xff]  ;;  %v11146_v26 = vpop.permute.xlu0 %2931 }
 0x501   :  { %v3701_v23 = vadd.f32 %v3697_v31, %v11027_v30  ;;  %v4066_v9 = vadd.f32 %v4062_v37, %v4056_v15  ;;  %v4067_v49 = vadd.f32 %v4063_v53, %v4057_v13  ;;  %v4432_v56 = vadd.f32 %v4428_v35, %v4422_v44  ;;  %v13758_v15 = vld [vmem:[#allocation35_spill] sm:$0xff]  ;;  %v13759_v44 = vld [vmem:[#allocation148_spill] sm:$0xff] }
 0x502   :  { %v4433_v18 = vadd.f32 %v4429_v45, %v4423_v38  ;;  %v2905_v57 = vmul.f32 %v2903_v3, %v13754_v17  ;;  %v2908_v27 = vmul.f32 %v2904_v61, %v13755_v62  ;;  %v2906_v1 = vmul.f32 %v2902_v32, %v13756_v48 }
 0x503   :  { %v2907_v58 = vmul.f32 %v2901_v5, %v13757_v43  ;;  %v11125_v20 = vstv %s11072_s24  ;;  %v11128_v52 = vstv %s11075_s25  ;;  %v11131_v30 = vstv %s11077_s9  ;;  %v11148_v22 = vpop.permute.xlu1 %2927  ;;  %s5649_s24 = sld [smem:[#allocation16 + $0x11f]]  ;;  %s5681_s9 = sld [smem:[#allocation16 + $0x19a]] }
 0x504   :  { %v3339_v13 = vmul.f32 %v13758_v15, %v2905_v57  ;;  %v3705_v31 = vmul.f32 %v13759_v44, %v2905_v57  ;;  %v4071_v37 = vmul.f32 %v4070_v36, %v2905_v57  ;;  %v4437_v38 = vmul.f32 %v4436_v41, %v2905_v57  ;;  %s5686_s25 = sld [smem:[#allocation16 + $0x19f]] }
 0x505   :  { %v3342_v3 = vmul.f32 %v13758_v15, %v2908_v27  ;;  %v3708_v61 = vmul.f32 %v13759_v44, %v2908_v27  ;;  %v4074_v53 = vmul.f32 %v4070_v36, %v2908_v27  ;;  %v11138_v32 = vstv %s11101_s3  ;;  %s5569_s3 = sld [smem:[#allocation16 + $0x18]] }
 0x506   :  { %v3343_v35 = vadd.f32 %v3339_v13, %v3333_v7  ;;  %v3709_v45 = vadd.f32 %v3705_v31, %v3699_v60  ;;  %v4075_v5 = vadd.f32 %v4071_v37, %v4065_v10  ;;  %v4440_v43 = vmul.f32 %v4436_v41, %v2908_v27 }
 0x507   :  { %v4441_v62 = vadd.f32 %v4437_v38, %v4431_v11  ;;  %v3346_v17 = vadd.f32 %v3342_v3, %v3336_v14  ;;  %v3712_v57 = vadd.f32 %v3708_v61, %v3702_v54  ;;  %v4078_v12 = vadd.f32 %v4074_v53, %v4068_v63 }
 0x508   :  { %v3340_v55 = vmul.f32 %v13758_v15, %v2906_v1  ;;  %v3341_v48 = vmul.f32 %v13758_v15, %v2907_v58  ;;  %v3706_v7 = vmul.f32 %v13759_v44, %v2906_v1  ;;  %v3707_v60 = vmul.f32 %v13759_v44, %v2907_v58 }
 0x509   :  { %v4072_v10 = vmul.f32 %v4070_v36, %v2906_v1  ;;  %v4073_v27 = vmul.f32 %v4070_v36, %v2907_v58  ;;  %v4438_v11 = vmul.f32 %v4436_v41, %v2906_v1  ;;  %v4439_v14 = vmul.f32 %v4436_v41, %v2907_v58  ;;  %v13760_v41 = vld [vmem:[#allocation110_spill] sm:$0xff] }
 0x50a   :  { %v4444_v54 = vadd.f32 %v4440_v43, %v11083_v8  ;;  %v3344_v63 = vadd.f32 %v3340_v55, %v3334_v6  ;;  %v3345_v13 = vadd.f32 %v3341_v48, %v3335_v28  ;;  %v3710_v31 = vadd.f32 %v3706_v7, %v3700_v2  ;;  %v13761_v28 = vld [vmem:[#allocation116_spill] sm:$0xff] }
 0x50b   :  { %v3711_v37 = vadd.f32 %v3707_v60, %v3701_v23  ;;  %v4076_v38 = vadd.f32 %v4072_v10, %v4066_v9  ;;  %v4077_v15 = vadd.f32 %v4073_v27, %v4067_v49  ;;  %v4442_v3 = vadd.f32 %v4438_v11, %v4432_v56  ;;  %v13762_v23 = vld [vmem:[#allocation113_spill] sm:$0xff]  ;;  %v11176_v49 = vpop.permute.xlu0 %2941  ;;  %v13763_v56 = vld [vmem:[#allocation115_spill] sm:$0xff] }
 0x50c   :  { %v2919_v44 = vsel %vm1767_vm15, %v11046_v42, %v11048_v47  ;;  %v2920_v58 = vsel %vm1767_vm15, %v11079_v40, %v11046_v42  ;;  %v2917_v55 = vsel %vm1767_vm15, %v11081_v46, %v11079_v40  ;;  %v2918_v8 = vsel %vm1767_vm15, %v11048_v47, %v11081_v46  ;;  %v11178_v42 = vpop.permute.xlu1 %2945 }
 0x50d   :  { %v4443_v36 = vadd.f32 %v4439_v14, %v4433_v18  ;;  %v2921_v6 = vmul.f32 %v2919_v44, %v13760_v41  ;;  %v2924_v2 = vmul.f32 %v2920_v58, %v13761_v28  ;;  %v2922_v9 = vmul.f32 %v2918_v8, %v13762_v23 }
 0x50e   :  { %v2923_v48 = vmul.f32 %v2917_v55, %v13763_v56  ;;  %v11182_v40 = vstv %s11140_s27  ;;  %v11185_v1 = vstv %s11142_s29  ;;  %v11188_v43 = vstv %s11144_s30  ;;  %s5605_s27 = sld [smem:[#allocation16 + $0x98]]  ;;  %s11604_s30 = sld [smem:[#allocation16 + $0x19]] }
 0x50f   :  { %v3349_v47 = vmul.f32 %v11125_v20, %v2921_v6  ;;  %v3715_v46 = vmul.f32 %v11128_v52, %v2921_v6  ;;  %v4081_v18 = vmul.f32 %v11131_v30, %v2921_v6  ;;  %v4447_v61 = vmul.f32 %v11138_v32, %v2921_v6  ;;  %s5642_s29 = sld [smem:[#allocation16 + $0x118]] }
 0x510   :  { %v3352_v53 = vmul.f32 %v11125_v20, %v2924_v2  ;;  %v3718_v7 = vmul.f32 %v11128_v52, %v2924_v2  ;;  %v4084_v60 = vmul.f32 %v11131_v30, %v2924_v2  ;;  %v11198_v10 = vstv %s11154_s7  ;;  %s11635_s7 = sld [smem:[#allocation16 + $0x19b]] }
 0x511   :  { %v3353_v27 = vadd.f32 %v3349_v47, %v3343_v35  ;;  %v3719_v11 = vadd.f32 %v3715_v46, %v3709_v45  ;;  %v4085_v14 = vadd.f32 %v4081_v18, %v4075_v5  ;;  %v4450_v44 = vmul.f32 %v11138_v32, %v2924_v2  ;;  %v11213_v45 = vpop.permute.xlu0 %2947  ;;  %v11215_v5 = vpop.permute.xlu1 %2943 }
 0x512   :  { %v4451_v58 = vadd.f32 %v4447_v61, %v4441_v62  ;;  %v3356_v55 = vadd.f32 %v3352_v53, %v3346_v17  ;;  %v3722_v8 = vadd.f32 %v3718_v7, %v3712_v57  ;;  %v4088_v6 = vadd.f32 %v4084_v60, %v4078_v12 }
 0x513   :  { %v3350_v56 = vmul.f32 %v11125_v20, %v2922_v9  ;;  %v3351_v28 = vmul.f32 %v11125_v20, %v2923_v48  ;;  %v3716_v41 = vmul.f32 %v11128_v52, %v2922_v9  ;;  %v3717_v35 = vmul.f32 %v11128_v52, %v2923_v48 }
 0x514   :  { %v4082_v2 = vmul.f32 %v11131_v30, %v2922_v9  ;;  %v4083_v17 = vmul.f32 %v11131_v30, %v2923_v48  ;;  %v4448_v12 = vmul.f32 %v11138_v32, %v2922_v9  ;;  %v4449_v62 = vmul.f32 %v11138_v32, %v2923_v48 }
 0x515   :  { %v4454_v57 = vadd.f32 %v4450_v44, %v4444_v54  ;;  %v3354_v20 = vadd.f32 %v3350_v56, %v3344_v63  ;;  %v3355_v47 = vadd.f32 %v3351_v28, %v3345_v13  ;;  %v3720_v52 = vadd.f32 %v3716_v41, %v3710_v31  ;;  %v13764_v31 = vld [vmem:[#allocation84_spill] sm:$0xff]  ;;  %v11250_v9 = vpop.permute.xlu0 %2957  ;;  %v11252_v56 = vpop.permute.xlu1 %2961 }
 0x516   :  { %v3721_v46 = vadd.f32 %v3717_v35, %v3711_v37  ;;  %v4086_v18 = vadd.f32 %v4082_v2, %v4076_v38  ;;  %v4087_v61 = vadd.f32 %v4083_v17, %v4077_v15  ;;  %v4452_v53 = vadd.f32 %v4448_v12, %v4442_v3  ;;  %v13765_v38 = vld [vmem:[#allocation73_spill] sm:$0xff] }
 0x517   :  { %v2933_v30 = vsel %vm1501_vm8, %v11118_v50, %v11146_v26  ;;  %v2936_v32 = vsel %vm1501_vm8, %v11146_v26, %v11116_v34  ;;  %v2934_v54 = vsel %vm1501_vm8, %v11148_v22, %v11118_v50  ;;  %v2935_v63 = vsel %vm1501_vm8, %v11116_v34, %v11148_v22 }
 0x518   :  { %v4453_v13 = vadd.f32 %v4449_v62, %v4443_v36  ;;  %v2937_v37 = vmul.f32 %v2936_v32, %v13764_v31  ;;  %v2940_v15 = vmul.f32 %v2933_v30, %v13765_v38  ;;  %v2938_v3 = vmul.f32 %v2935_v63, %v13701_v25 }
 0x519   :  { %v2939_v26 = vmul.f32 %v2934_v54, %v13702_v21  ;;  %v11242_v41 = vstv %s11200_s28  ;;  %v11245_v28 = vstv %s11203_s20  ;;  %v11248_v50 = vstv %s11205_s21  ;;  %s11644_s28 = sld [smem:[#allocation16 + $0x99]]  ;;  %s11703_s21 = sld [smem:[#allocation16 + $0x1a]] }
 0x51a   :  { %v3359_v22 = vmul.f32 %v11182_v40, %v2937_v37  ;;  %v3362_v34 = vmul.f32 %v11182_v40, %v2940_v15  ;;  %v3725_v36 = vmul.f32 %v11185_v1, %v2937_v37  ;;  %v3728_v48 = vmul.f32 %v11185_v1, %v2940_v15  ;;  %s11660_s20 = sld [smem:[#allocation16 + $0x119]] }
 0x51b   :  { %v4091_v7 = vmul.f32 %v11188_v43, %v2937_v37  ;;  %v4094_v60 = vmul.f32 %v11188_v43, %v2940_v15  ;;  %v4457_v44 = vmul.f32 %v11198_v10, %v2937_v37  ;;  %v11262_v35 = vstv %s11211_s2  ;;  %s11705_s2 = sld [smem:[#allocation16 + $0x9a]] }
 0x51c   :  { %v3363_v2 = vadd.f32 %v3359_v22, %v3353_v27  ;;  %v3366_v17 = vadd.f32 %v3362_v34, %v3356_v55  ;;  %v3729_v12 = vadd.f32 %v3725_v36, %v3719_v11  ;;  %v4460_v62 = vmul.f32 %v11198_v10, %v2940_v15 }
 0x51d   :  { %v3732_v30 = vadd.f32 %v3728_v48, %v3722_v8  ;;  %v4095_v32 = vadd.f32 %v4091_v7, %v4085_v14  ;;  %v4098_v54 = vadd.f32 %v4094_v60, %v4088_v6  ;;  %v4461_v63 = vadd.f32 %v4457_v44, %v4451_v58  ;;  %v11281_v8 = vpop.permute.xlu0 %2963  ;;  %v11283_v58 = vpop.permute.xlu1 %2959 }
 0x51e   :  { %v3360_v21 = vmul.f32 %v11182_v40, %v2938_v3  ;;  %v3361_v37 = vmul.f32 %v11182_v40, %v2939_v26  ;;  %v3726_v38 = vmul.f32 %v11185_v1, %v2938_v3  ;;  %v3727_v27 = vmul.f32 %v11185_v1, %v2939_v26 }
 0x51f   :  { %v4092_v11 = vmul.f32 %v11188_v43, %v2938_v3  ;;  %v4093_v55 = vmul.f32 %v11188_v43, %v2939_v26  ;;  %v4458_v15 = vmul.f32 %v11198_v10, %v2938_v3  ;;  %v4459_v14 = vmul.f32 %v11198_v10, %v2939_v26 }
 0x520   :  { %v4464_v6 = vadd.f32 %v4460_v62, %v4454_v57  ;;  %v3364_v40 = vadd.f32 %v3360_v21, %v3354_v20  ;;  %v3365_v22 = vadd.f32 %v3361_v37, %v3355_v47  ;;  %v3730_v1 = vadd.f32 %v3726_v38, %v3720_v52  ;;  %v13766_v47 = vld [vmem:[#allocation74_spill] sm:$0xff] }
 0x521   :  { %v3731_v34 = vadd.f32 %v3727_v27, %v3721_v46  ;;  %v4096_v36 = vadd.f32 %v4092_v11, %v4086_v18  ;;  %v4097_v48 = vadd.f32 %v4093_v55, %v4087_v61  ;;  %v4462_v7 = vadd.f32 %v4458_v15, %v4452_v53  ;;  %v13767_v46 = vld [vmem:[#allocation75_spill] sm:$0xff]  ;;  %v13768_v53 = vld [vmem:[#allocation94_spill] sm:$0xff]  ;;  %v11318_v60 = vpop.permute.xlu0 %2973  ;;  %v11320_v44 = vpop.permute.xlu1 %2977 }
 0x522   :  { %v2949_v43 = vsel %vm1539_vm9, %v11178_v42, %v11213_v45  ;;  %v2952_v10 = vsel %vm1539_vm9, %v11213_v45, %v11176_v49  ;;  %v2950_v21 = vsel %vm1539_vm9, %v11215_v5, %v11178_v42  ;;  %v2951_v57 = vsel %vm1539_vm9, %v11176_v49, %v11215_v5 }
 0x523   :  { %v4463_v20 = vadd.f32 %v4459_v14, %v4453_v13  ;;  %v2953_v52 = vmul.f32 %v2952_v10, %v13766_v47  ;;  %v2956_v18 = vmul.f32 %v2949_v43, %v13767_v46  ;;  %v2954_v61 = vmul.f32 %v2951_v57, %v13709_v29 }
 0x524   :  { %v2955_v45 = vmul.f32 %v2950_v21, %v13768_v53  ;;  %v11306_v38 = vstv %s11264_s23  ;;  %v11309_v3 = vstv %s11267_s18  ;;  %v11312_v42 = vstv %s11269_s12  ;;  %s11727_s23 = sld [smem:[#allocation16 + $0x19c]]  ;;  %s11749_s18 = sld [smem:[#allocation16 + $0x11a]] }
 0x525   :  { %v3369_v26 = vmul.f32 %v11242_v41, %v2953_v52  ;;  %v3372_v49 = vmul.f32 %v11242_v41, %v2956_v18  ;;  %v3735_v5 = vmul.f32 %v11245_v28, %v2953_v52  ;;  %v3738_v13 = vmul.f32 %v11245_v28, %v2956_v18  ;;  %s11767_s12 = sld [smem:[#allocation16 + $0x1b]] }
 0x526   :  { %v4101_v62 = vmul.f32 %v11248_v50, %v2953_v52  ;;  %v4104_v37 = vmul.f32 %v11248_v50, %v2956_v18  ;;  %v4467_v27 = vmul.f32 %v11262_v35, %v2953_v52  ;;  %v11326_v11 = vstv %s11275_s13  ;;  %s11775_s13 = sld [smem:[#allocation16 + $0x9b]] }
 0x527   :  { %v3373_v55 = vadd.f32 %v3369_v26, %v3363_v2  ;;  %v3376_v15 = vadd.f32 %v3372_v49, %v3366_v17  ;;  %v3739_v14 = vadd.f32 %v3735_v5, %v3729_v12  ;;  %v4470_v43 = vmul.f32 %v11262_v35, %v2956_v18  ;;  %v2976_v49 = vpop.permute.xlu1 %2975 }
 0x528   :  { %v3742_v10 = vadd.f32 %v3738_v13, %v3732_v30  ;;  %v4105_v21 = vadd.f32 %v4101_v62, %v4095_v32  ;;  %v4108_v57 = vadd.f32 %v4104_v37, %v4098_v54  ;;  %v4471_v53 = vadd.f32 %v4467_v27, %v4461_v63 }
 0x529   :  { %v3370_v46 = vmul.f32 %v11242_v41, %v2954_v61  ;;  %v3371_v52 = vmul.f32 %v11242_v41, %v2955_v45  ;;  %v3736_v47 = vmul.f32 %v11245_v28, %v2954_v61  ;;  %v3737_v2 = vmul.f32 %v11245_v28, %v2955_v45  ;;  %v2980_v41 = vpop.permute.xlu0 %2979 }
 0x52a   :  { %v4102_v17 = vmul.f32 %v11248_v50, %v2954_v61  ;;  %v4103_v12 = vmul.f32 %v11248_v50, %v2955_v45  ;;  %v4468_v18 = vmul.f32 %v11262_v35, %v2954_v61  ;;  %v4469_v30 = vmul.f32 %v11262_v35, %v2955_v45 }
 0x52b   :  { %v4474_v32 = vadd.f32 %v4470_v43, %v4464_v6  ;;  %v3374_v54 = vadd.f32 %v3370_v46, %v3364_v40  ;;  %v3375_v63 = vadd.f32 %v3371_v52, %v3365_v22  ;;  %v3740_v26 = vadd.f32 %v3736_v47, %v3730_v1  ;;  %v13769_v1 = vld [vmem:[#allocation42_spill] sm:$0xff] }
 0x52c   :  { %v3741_v28 = vadd.f32 %v3737_v2, %v3731_v34  ;;  %v4106_v5 = vadd.f32 %v4102_v17, %v4096_v36  ;;  %v4107_v13 = vadd.f32 %v4103_v12, %v4097_v48  ;;  %v4472_v62 = vadd.f32 %v4468_v18, %v4462_v7  ;;  %v13770_v36 = vld [vmem:[#allocation43_spill] sm:$0xff]  ;;  %v11388_v2 = vpop.permute.xlu1 %2991 }
 0x52d   :  { %v2965_v50 = vsel %vm1577_vm10, %v11252_v56, %v11281_v8  ;;  %v2968_v35 = vsel %vm1577_vm10, %v11281_v8, %v11250_v9  ;;  %v2966_v6 = vsel %vm1577_vm10, %v11283_v58, %v11252_v56  ;;  %v2967_v40 = vsel %vm1577_vm10, %v11250_v9, %v11283_v58  ;;  %v11384_v52 = vpop.permute.xlu0 %2989 }
 0x52e   :  { %v4473_v22 = vadd.f32 %v4469_v30, %v4463_v20  ;;  %v2969_v34 = vmul.f32 %v2968_v35, %v13769_v1  ;;  %v2972_v48 = vmul.f32 %v2965_v50, %v13770_v36  ;;  %v2970_v7 = vmul.f32 %v2967_v40, %v13640_v0 }
 0x52f   :  { %v2971_v8 = vmul.f32 %v2966_v6, %v13717_v19  ;;  %v11366_v47 = vstv %s11328_s14  ;;  %v11369_v46 = vstv %s11331_s15  ;;  %v11372_v56 = vstv %s11333_s16  ;;  %s11777_s14 = sld [smem:[#allocation16 + $0x11b]]  ;;  %s11799_s15 = sld [smem:[#allocation16 + $0x19d]] }
 0x530   :  { %v3379_v61 = vmul.f32 %v11306_v38, %v2969_v34  ;;  %v3382_v9 = vmul.f32 %v11306_v38, %v2972_v48  ;;  %v3745_v58 = vmul.f32 %v11309_v3, %v2969_v34  ;;  %v3748_v20 = vmul.f32 %v11309_v3, %v2972_v48  ;;  %s11837_s16 = sld [smem:[#allocation16 + $0x1c]] }
 0x531   :  { %v4111_v45 = vmul.f32 %v11312_v42, %v2969_v34  ;;  %v4114_v37 = vmul.f32 %v11312_v42, %v2972_v48  ;;  %v4477_v27 = vmul.f32 %v11326_v11, %v2969_v34  ;;  %v11382_v43 = vstv %s11339_s17  ;;  %s11845_s17 = sld [smem:[#allocation16 + $0x9c]] }
 0x532   :  { %v3383_v17 = vadd.f32 %v3379_v61, %v3373_v55  ;;  %v3386_v12 = vadd.f32 %v3382_v9, %v3376_v15  ;;  %v3749_v18 = vadd.f32 %v3745_v58, %v3739_v14  ;;  %v4480_v30 = vmul.f32 %v11326_v11, %v2972_v48 }
 0x533   :  { %v3752_v50 = vadd.f32 %v3748_v20, %v3742_v10  ;;  %v4115_v35 = vadd.f32 %v4111_v45, %v4105_v21  ;;  %v4118_v6 = vadd.f32 %v4114_v37, %v4108_v57  ;;  %v4481_v40 = vadd.f32 %v4477_v27, %v4471_v53  ;;  %v11405_v45 = vpop.permute.xlu1 %2993 }
 0x534   :  { %v3380_v34 = vmul.f32 %v11306_v38, %v2970_v7  ;;  %v3381_v19 = vmul.f32 %v11306_v38, %v2971_v8  ;;  %v3746_v36 = vmul.f32 %v11309_v3, %v2970_v7  ;;  %v3747_v55 = vmul.f32 %v11309_v3, %v2971_v8  ;;  %v11403_v3 = vpop.permute.xlu0 %2995 }
 0x535   :  { %v4112_v15 = vmul.f32 %v11312_v42, %v2970_v7  ;;  %v4113_v14 = vmul.f32 %v11312_v42, %v2971_v8  ;;  %v4478_v48 = vmul.f32 %v11326_v11, %v2970_v7  ;;  %v4479_v61 = vmul.f32 %v11326_v11, %v2971_v8 }
 0x536   :  { %v4484_v10 = vadd.f32 %v4480_v30, %v4474_v32  ;;  %v3384_v21 = vadd.f32 %v3380_v34, %v3374_v54  ;;  %v3385_v57 = vadd.f32 %v3381_v19, %v3375_v63  ;;  %v3750_v53 = vadd.f32 %v3746_v36, %v3740_v26  ;;  %v13771_v26 = vld [vmem:[#allocation83_spill] sm:$0xff] }
 0x537   :  { %v3751_v9 = vadd.f32 %v3747_v55, %v3741_v28  ;;  %v4116_v38 = vadd.f32 %v4112_v15, %v4106_v5  ;;  %v4117_v58 = vadd.f32 %v4113_v14, %v4107_v13  ;;  %v4482_v20 = vadd.f32 %v4478_v48, %v4472_v62  ;;  %v13772_v13 = vld [vmem:[#allocation47_spill] sm:$0xff] }
 0x538   :  { %v2981_v42 = vsel %vm1615_vm11, %v11320_v44, %v2980_v41  ;;  %v2984_v19 = vsel %vm1615_vm11, %v2980_v41, %v11318_v60  ;;  %v2982_v11 = vsel %vm1615_vm11, %v2976_v49, %v11320_v44  ;;  %v2983_v32 = vsel %vm1615_vm11, %v11318_v60, %v2976_v49  ;;  %v11442_v48 = vpop.permute.xlu0 %3005 }
 0x539   :  { %v4483_v54 = vadd.f32 %v4479_v61, %v4473_v22  ;;  %v2985_v63 = vmul.f32 %v2984_v19, %v13718_v51  ;;  %v2988_v28 = vmul.f32 %v2981_v42, %v13771_v26  ;;  %v2986_v5 = vmul.f32 %v2983_v32, %v13647_v24  ;;  %v11444_v61 = vpop.permute.xlu1 %3007 }
 0x53a   :  { %v2987_v62 = vmul.f32 %v2982_v11, %v13772_v13  ;;  %v11424_v36 = vstv %s11386_s0  ;;  %v11427_v41 = vstv %s11391_s1  ;;  %v11430_v7 = vstv %s11393_s11  ;;  %s11847_s0 = sld [smem:[#allocation16 + $0x11c]]  ;;  %s11870_s1 = sld [smem:[#allocation16 + $0x19e]] }
 0x53b   :  { %v3389_v44 = vmul.f32 %v11366_v47, %v2985_v63  ;;  %v3392_v8 = vmul.f32 %v11366_v47, %v2988_v28  ;;  %v3755_v60 = vmul.f32 %v11369_v46, %v2985_v63  ;;  %v3758_v49 = vmul.f32 %v11369_v46, %v2988_v28  ;;  %s11899_s11 = sld [smem:[#allocation16 + $0x1d]] }
 0x53c   :  { %v4121_v22 = vmul.f32 %v11372_v56, %v2985_v63  ;;  %v4124_v37 = vmul.f32 %v11372_v56, %v2988_v28  ;;  %v4487_v27 = vmul.f32 %v11382_v43, %v2985_v63  ;;  %v4490_v30 = vmul.f32 %v11382_v43, %v2988_v28 }
 0x53d   :  { %v3393_v34 = vadd.f32 %v3389_v44, %v3383_v17  ;;  %v3396_v55 = vadd.f32 %v3392_v8, %v3386_v12  ;;  %v3759_v15 = vadd.f32 %v3755_v60, %v3749_v18  ;;  %v3762_v14 = vadd.f32 %v3758_v49, %v3752_v50 }
 0x53e   :  { %v4125_v42 = vadd.f32 %v4121_v22, %v4115_v35  ;;  %v4128_v19 = vadd.f32 %v4124_v37, %v4118_v6  ;;  %v4491_v11 = vadd.f32 %v4487_v27, %v4481_v40  ;;  %v4494_v32 = vadd.f32 %v4490_v30, %v4484_v10  ;;  %v13773_v22 = vld [vmem:[#allocation122_spill] sm:$0xff]  ;;  %v11461_v27 = vpop.permute.xlu0 %3011 }
 0x53f   :  { %v3390_v13 = vmul.f32 %v11366_v47, %v2986_v5  ;;  %v3391_v26 = vmul.f32 %v11366_v47, %v2987_v62  ;;  %v3756_v63 = vmul.f32 %v11369_v46, %v2986_v5  ;;  %v3757_v17 = vmul.f32 %v11369_v46, %v2987_v62  ;;  %v13774_v37 = vld [vmem:[#allocation138_spill] sm:$0xff] }
 0x540   :  { %v4122_v12 = vmul.f32 %v11372_v56, %v2986_v5  ;;  %v4123_v18 = vmul.f32 %v11372_v56, %v2987_v62  ;;  %v4488_v50 = vmul.f32 %v11382_v43, %v2986_v5  ;;  %v4489_v35 = vmul.f32 %v11382_v43, %v2987_v62  ;;  %v11463_v43 = vpop.permute.xlu1 %3009  ;;  %v13780_v62 = vld [vmem:[#allocation88_spill] sm:$0xff] }
 0x541   :  { %v3394_v6 = vadd.f32 %v3390_v13, %v3384_v21  ;;  %v3395_v40 = vadd.f32 %v3391_v26, %v3385_v57  ;;  %v3760_v10 = vadd.f32 %v3756_v63, %v3750_v53  ;;  %v3761_v28 = vadd.f32 %v3757_v17, %v3751_v9  ;;  %v13775_v21 = vld [vmem:[#allocation91_spill] sm:$0xff]  ;;  %v13776_v53 = vld [vmem:[#allocation56_spill] sm:$0xff] }
 0x542   :  { %v4126_v44 = vadd.f32 %v4122_v12, %v4116_v38  ;;  %v4127_v8 = vadd.f32 %v4123_v18, %v4117_v58  ;;  %v4492_v60 = vadd.f32 %v4488_v50, %v4482_v20  ;;  %v4493_v47 = vadd.f32 %v4489_v35, %v4483_v54  ;;  %v13777_v38 = vld [vmem:[#allocation127_spill] sm:$0xff]  ;;  %v13778_v20 = vld [vmem:[#allocation81_spill] sm:$0xff] }
 0x543   :  { %v4506_v49 = vstv %s11436_s19  ;;  %v2999_v46 = vsel %vm1653_vm12, %v11384_v52, %v11388_v2  ;;  %v3403_v56 = vadd.f32 %v13773_v22, %v3393_v34  ;;  %v3769_v5 = vadd.f32 %v13774_v37, %v3759_v15  ;;  %v13779_v26 = vld [vmem:[#allocation71_spill] sm:$0xff]  ;;  %s11901_s19 = sld [smem:[#allocation16 + $0x9d]] }
 0x544   :  { %v3001_v57 = vmul.f32 %v2999_v46, %v13775_v21  ;;  %v4135_v9 = vadd.f32 %v13776_v53, %v4125_v42  ;;  %v4501_v58 = vadd.f32 %v13777_v38, %v4491_v11  ;;  %v3406_v54 = vadd.f32 %v13778_v20, %v3396_v55  ;;  %v13783_v53 = vld [vmem:[#allocation87_spill] sm:$0xff] }
 0x545   :  { %v3772_v13 = vadd.f32 %v13779_v26, %v3762_v14  ;;  %v4138_v30 = vadd.f32 %v13780_v62, %v4128_v19  ;;  %v3000_v34 = vsel %vm1653_vm12, %v11403_v3, %v11384_v52  ;;  %v2997_v15 = vsel %vm1653_vm12, %v11405_v45, %v11403_v3  ;;  %v13781_v14 = vld [vmem:[#allocation134_spill] sm:$0xff]  ;;  %v13803_v21 = vld [vmem:[#allocation31_spill] sm:$0xff] }
 0x546   :  { %v3409_v42 = vmul.f32 %v11424_v36, %v3001_v57  ;;  %v3775_v11 = vmul.f32 %v11427_v41, %v3001_v57  ;;  %v4141_v55 = vmul.f32 %v11430_v7, %v3001_v57  ;;  %v4507_v63 = vmul.f32 %v4506_v49, %v3001_v57  ;;  %v11500_v57 = vpop.permute.xlu0 %3021 }
 0x547   :  { %v4504_v17 = vadd.f32 %v13781_v14, %v4494_v32  ;;  %v3004_v19 = vmul.f32 %v3000_v34, %v13655_v59  ;;  %v2998_v52 = vsel %vm1653_vm12, %v11388_v2, %v11405_v45  ;;  %v3003_v12 = vmul.f32 %v2997_v15, %v13737_v4  ;;  %v11502_v2 = vpop.permute.xlu1 %3023  ;;  %v13801_v59 = vld [vmem:[#allocation100_spill] sm:$0xff] }
 0x548   :  { %v11489_v18 = vadd.f32 %v3409_v42, %v3403_v56  ;;  %v11491_v3 = vadd.f32 %v3775_v11, %v3769_v5  ;;  %v11493_v50 = vadd.f32 %v4141_v55, %v4135_v9  ;;  %v11495_v35 = vadd.f32 %v4507_v63, %v4501_v58  ;;  %v13782_v56 = vld [vmem:[#allocation67_spill] sm:$0xff]  ;;  %v13784_v42 = vld [vmem:[#allocation57_spill] sm:$0xff]  ;;  %v13785_v55 = vld [vmem:[#allocation86_spill] sm:$0xff] }
 0x549   :  { %v3412_v46 = vmul.f32 %v11424_v36, %v3004_v19  ;;  %v3778_v32 = vmul.f32 %v11427_v41, %v3004_v19  ;;  %v4144_v22 = vmul.f32 %v11430_v7, %v3004_v19  ;;  %v4510_v37 = vmul.f32 %v4506_v49, %v3004_v19  ;;  %v13787_v19 = vld [vmem:[#allocation114_spill] sm:$0xff] }
 0x54a   :  { %v3002_v45 = vmul.f32 %v2998_v52, %v13736_v33  ;;  %v3404_v5 = vadd.f32 %v13782_v56, %v3394_v6  ;;  %v3405_v9 = vadd.f32 %v13783_v53, %v3395_v40  ;;  %v3411_v38 = vmul.f32 %v11424_v36, %v3003_v12  ;;  %v13789_v56 = vld [vmem:[#allocation66_spill] sm:$0xff] }
 0x54b   :  { %v11508_v58 = vadd.f32 %v3412_v46, %v3406_v54  ;;  %v11510_v20 = vadd.f32 %v3778_v32, %v3772_v13  ;;  %v11512_v26 = vadd.f32 %v4144_v22, %v4138_v30  ;;  %v11514_v62 = vadd.f32 %v4510_v37, %v4504_v17  ;;  %v13786_v54 = vld [vmem:[#allocation41_spill] sm:$0xff]  ;;  %v13788_v32 = vld [vmem:[#allocation48_spill] sm:$0xff] }
 0x54c   :  { %v3410_v34 = vmul.f32 %v11424_v36, %v3002_v45  ;;  %v11517_v15 = vadd.f32 %v3411_v38, %v3405_v9  ;;  %v3770_v11 = vadd.f32 %v13784_v42, %v3760_v10  ;;  %v3776_v6 = vmul.f32 %v11427_v41, %v3002_v45 }
 0x54d   :  { %v3771_v40 = vadd.f32 %v13785_v55, %v3761_v28  ;;  %v3777_v63 = vmul.f32 %v11427_v41, %v3003_v12  ;;  %v4136_v14 = vadd.f32 %v13786_v54, %v4126_v44  ;;  %v4142_v13 = vmul.f32 %v11430_v7, %v3002_v45  ;;  %v11536_v41 = vpop.permute.xlu0 %3027  ;;  %v11538_v44 = vpop.permute.xlu1 %3025 }
 0x54e   :  { %v11525_v30 = vadd.f32 %v3410_v34, %v3404_v5  ;;  %v11527_v17 = vadd.f32 %v3776_v6, %v3770_v11  ;;  %v4137_v36 = vadd.f32 %v13787_v19, %v4127_v8  ;;  %v4143_v52 = vmul.f32 %v11430_v7, %v3003_v12 }
 0x54f   :  { %v11531_v46 = vadd.f32 %v3777_v63, %v3771_v40  ;;  %v11533_v10 = vadd.f32 %v4142_v13, %v4136_v14  ;;  %v4502_v28 = vadd.f32 %v13788_v32, %v4492_v60  ;;  %v4508_v22 = vmul.f32 %v4506_v49, %v3002_v45  ;;  %v13790_v40 = vld [vmem:[#allocation104_spill] sm:$0xff] }
 0x550   :  { %v11540_v37 = vadd.f32 %v4143_v52, %v4137_v36  ;;  %v4503_v5 = vadd.f32 %v13789_v56, %v4493_v47  ;;  %v4509_v53 = vmul.f32 %v4506_v49, %v3003_v12  ;;  %v3014_v7 = vsel %vm1691_vm13, %v11444_v61, %v11463_v43 }
 0x551   :  { %v4512_v9 = vadd.f32 %v4508_v22, %v4502_v28  ;;  %v11549_v60 = vpop.permute.xlu0 %3037  ;;  %v11551_v45 = vpop.permute.xlu1 %3039  ;;  %v11554_v38 = vmul.f32 %v3014_v7, %v13752_v39  ;;  %v11556_v34 = vstv %s5679_s22  ;;  %v3030_v11 = vsel %vm1729_vm14, %v11502_v2, %v11538_v44  ;;  %s11962_s22 = sld [smem:[#allocation16 + $0x1e]] }
 0x552   :  { %v11543_v8 = vadd.f32 %v4509_v53, %v4503_v5  ;;  %v11573_v63 = vmul.f32 %v3030_v11, %v13790_v40  ;;  %v11575_v54 = vstv %s5680_s8  ;;  %v3488_v32 = vstv %s5576_s6  ;;  %v13797_v11 = vld [vmem:[#allocation59_spill] sm:$0xff]  ;;  %s11975_s8 = sld [smem:[#allocation16 + $0x9e]]  ;;  %s11977_s6 = sld [smem:[#allocation16 + $0x1a0]] }
 0x553   :  { %v4518_v47 = vmul.f32 %v11556_v34, %v11554_v38  ;;  %v3015_v28 = vsel %vm1691_vm13, %v11442_v48, %v11444_v61  ;;  %v3854_v56 = vstv %s5612_s10  ;;  %v4220_v5 = vstv %s5649_s24  ;;  %s12032_s10 = sld [smem:[#allocation16 + $0x20]] }
 0x554   :  { %v4528_v14 = vmul.f32 %v11575_v54, %v11573_v63  ;;  %v11598_v7 = vstv %s5686_s25  ;;  %v3418_v4 = vstv %s5569_s3  ;;  %s12057_s24 = sld [smem:[#allocation16 + $0xa0]]  ;;  %s12076_s25 = sld [smem:[#allocation16 + $0x1a1]] }
 0x555   :  { %v11560_v49 = vpop.permute.xlu0 %3043  ;;  %v11562_v12 = vpop.permute.xlu1 %3041  ;;  %v4522_v42 = vadd.f32 %v4518_v47, %v4512_v9  ;;  %13794 = vst [vmem:[#allocation109_spill] sm:$0xff] %v11598_v7  ;;  %v3016_v47 = vsel %vm1691_vm13, %v11461_v27, %v11442_v48  ;;  %s12123_s3 = sld [smem:[#allocation16 + $0x22]] }
 0x556   :  { %v3046_v52 = vsel %vm1767_vm15, %v11551_v45, %v11562_v12  ;;  %v3020_v51 = vmul.f32 %v3016_v47, %v13803_v21 }
 0x557   :  { %v4532_v36 = vadd.f32 %v4528_v14, %v4522_v42  ;;  %v11592_v22 = vmul.f32 %v3046_v52, %v13762_v23  ;;  %v13795_v42 = vld [vmem:[#allocation72_spill] sm:$0xff]  ;;  %v3017_v14 = vmul.f32 %v3015_v28, %v13797_v11  ;;  %v11610_v52 = vstv %s5681_s9  ;;  %s12099_s9 = sld [smem:[#allocation16 + $0x21]] }
 0x558   :  { %v11607_v61 = vmul.f32 %v3488_v32, %v13795_v42  ;;  %v11613_v23 = vmul.f32 %v3854_v56, %v13795_v42  ;;  %v11616_v40 = vmul.f32 %v4220_v5, %v13795_v42  ;;  %v11622_v48 = vmul.f32 %v11598_v7, %v13795_v42 }
 0x559   :  { %v11568_v6 = vpop.permute.xlu0 %3053  ;;  %v11570_v55 = vpop.permute.xlu1 %3057  ;;  %13792 = vst [vmem:[#allocation102_spill] sm:$0xff] %v11592_v22  ;;  %v4538_v39 = vmul.f32 %v11610_v52, %v11592_v22  ;;  %v3784_v28 = vstv %s5605_s27  ;;  %v4150_v11 = vstv %s5642_s29  ;;  %v11638_v42 = vmul.f32 %v4220_v5, %v13801_v59  ;;  %s12151_s27 = sld [smem:[#allocation16 + $0x23]]  ;;  %s12171_s29 = sld [smem:[#allocation16 + $0xa1]] }
 0x55a   :  { %13796 = vst [vmem:[#allocation119_spill] sm:$0xff] %v11607_v61  ;;  %13798 = vst [vmem:[#allocation95_spill] sm:$0xff] %v11613_v23  ;;  %v11625_v61 = vmul.f32 %v3488_v32, %v13801_v59  ;;  %v11629_v23 = vmul.f32 %v3854_v56, %v13801_v59  ;;  %v4154_v22 = vmul.f32 %v4150_v11, %v3020_v51 }
 0x55b   :  { %13799 = vst [vmem:[#allocation53_spill] sm:$0xff] %v11616_v40  ;;  %13800 = vst [vmem:[#allocation78_spill] sm:$0xff] %v11622_v48  ;;  %v3013_v40 = vsel %vm1691_vm13, %v11463_v43, %v11461_v27  ;;  %v4542_v33 = vadd.f32 %v4538_v39, %v4532_v36  ;;  %v11642_v48 = vmul.f32 %v11598_v7, %v13801_v59  ;;  %v13810_v39 = vld [vmem:[#allocation99_spill] sm:$0xff] }
 0x55c   :  { %13802 = vst [vmem:[#allocation123_spill] sm:$0xff] %v11625_v61  ;;  %13804 = vst [vmem:[#allocation120_spill] sm:$0xff] %v11629_v23  ;;  %v3419_v61 = vmul.f32 %v3418_v4, %v3017_v14  ;;  %v13808_v23 = vld [vmem:[#allocation54_spill] sm:$0xff]  ;;  %v11654_v43 = vmul.f32 %v3488_v32, %v13810_v39  ;;  %v4151_v59 = vmul.f32 %v4150_v11, %v3017_v14 }
 0x55d   :  { %v11579_v13 = vpop.permute.xlu0 %3059  ;;  %v11581_v19 = vpop.permute.xlu1 %3055  ;;  %13805 = vst [vmem:[#allocation63_spill] sm:$0xff] %v11638_v42  ;;  %13806 = vst [vmem:[#allocation121_spill] sm:$0xff] %v11642_v48  ;;  %v11651_v27 = vmul.f32 %v3488_v32, %v13808_v23  ;;  %v11657_v36 = vmul.f32 %v3854_v56, %v13808_v23  ;;  %v3785_v42 = vmul.f32 %v3784_v28, %v3017_v14 }
 0x55e   :  { %13791 = vst [vmem:[#allocation38_spill] sm:$0xff] %v11581_v19  ;;  %13811 = vst [vmem:[#allocation62_spill] sm:$0xff] %v11654_v43  ;;  %v4517_v48 = vmul.f32 %v11556_v34, %v3017_v14  ;;  %v3063_v1 = vsel %vm1501_vm8, %v11568_v6, %v11581_v19  ;;  %v11668_v32 = vmul.f32 %v3854_v56, %v13810_v39  ;;  %v11671_v43 = vstv %s11604_s30  ;;  %s12184_s30 = sld [smem:[#allocation16 + $0xa2]] }
 0x55f   :  { %13809 = vst [vmem:[#allocation89_spill] sm:$0xff] %v11651_v27  ;;  %13812 = vst [vmem:[#allocation55_spill] sm:$0xff] %v11657_v36  ;;  %v13813_v27 = vld [vmem:[#allocation29_spill] sm:$0xff]  ;;  %v11674_v36 = vmul.f32 %v4220_v5, %v13808_v23  ;;  %v11677_v14 = vmul.f32 %v4220_v5, %v13810_v39  ;;  %v11681_v31 = vmul.f32 %v11598_v7, %v13808_v23  ;;  %v4160_v7 = vstv %s11660_s20  ;;  %v13819_v39 = vld [vmem:[#allocation107_spill] sm:$0xff]  ;;  %s12249_s20 = sld [smem:[#allocation16 + $0x1a2]] }
 0x560   :  { %v3019_v24 = vmul.f32 %v3013_v40, %v13813_v27  ;;  %13814 = vst [vmem:[#allocation46_spill] sm:$0xff] %v11668_v32  ;;  %v3423_v19 = vadd.f32 %v3419_v61, %v11489_v18  ;;  %v4520_v40 = vmul.f32 %v11556_v34, %v3020_v51  ;;  %v11686_v56 = vmul.f32 %v3063_v1, %v13701_v25 }
 0x561   :  { %v11594_v53 = vpop.permute.xlu0 %3069  ;;  %v11596_v9 = vpop.permute.xlu1 %3073  ;;  %13815 = vst [vmem:[#allocation36_spill] sm:$0xff] %v11674_v36  ;;  %13816 = vst [vmem:[#allocation49_spill] sm:$0xff] %v11677_v14  ;;  %v3789_v32 = vadd.f32 %v3785_v42, %v11491_v3  ;;  %v4155_v36 = vadd.f32 %v4151_v59, %v11493_v50  ;;  %v4521_v5 = vadd.f32 %v4517_v48, %v11495_v35  ;;  %v3794_v61 = vstv %s11644_s28  ;;  %v13818_v48 = vld [vmem:[#allocation103_spill] sm:$0xff]  ;;  %s12210_s28 = sld [smem:[#allocation17]] }
 0x562   :  { %13793 = vst [vmem:[#allocation44_spill] sm:$0xff] %v11596_v9  ;;  %v3422_v9 = vmul.f32 %v3418_v4, %v3020_v51  ;;  %13817 = vst [vmem:[#allocation51_spill] sm:$0xff] %v11681_v31  ;;  %v3031_v23 = vsel %vm1729_vm14, %v11500_v57, %v11502_v2  ;;  %v3421_v25 = vmul.f32 %v3418_v4, %v3019_v24 }
 0x563   :  { %v3032_v1 = vsel %vm1729_vm14, %v11536_v41, %v11500_v57  ;;  %v3787_v35 = vmul.f32 %v3784_v28, %v3019_v24  ;;  %v4153_v2 = vmul.f32 %v4150_v11, %v3019_v24  ;;  %v3033_v42 = vmul.f32 %v3031_v23, %v13818_v48 }
 0x564   :  { %v3426_v18 = vadd.f32 %v3422_v9, %v11508_v58  ;;  %v4519_v58 = vmul.f32 %v11556_v34, %v3019_v24  ;;  %v4158_v9 = vadd.f32 %v4154_v22, %v11512_v26  ;;  %v3786_v59 = vmul.f32 %v3784_v28, %v11554_v38 }
 0x565   :  { %v11646_v47 = vpop.permute.xlu0 %3075  ;;  %v11648_v21 = vpop.permute.xlu1 %3071  ;;  %v3036_v14 = vmul.f32 %v3032_v1, %v13819_v39  ;;  %v4524_v27 = vadd.f32 %v4520_v40, %v11514_v62  ;;  %v3425_v24 = vadd.f32 %v3421_v25, %v11517_v15  ;;  %v4152_v34 = vmul.f32 %v4150_v11, %v11554_v38  ;;  %v13821_v25 = vld [vmem:[#allocation106_spill] sm:$0xff] }
 0x566   :  { %13807 = vst [vmem:[#allocation58_spill] sm:$0xff] %v11646_v47  ;;  %v3788_v47 = vmul.f32 %v3784_v28, %v3020_v51  ;;  %v3791_v22 = vadd.f32 %v3787_v35, %v11531_v46  ;;  %v4157_v23 = vadd.f32 %v4153_v2, %v11540_v37  ;;  %v3029_v62 = vsel %vm1729_vm14, %v11538_v44, %v11536_v41 }
 0x567   :  { %v3429_v15 = vmul.f32 %v11671_v43, %v3033_v42  ;;  %v3795_v28 = vmul.f32 %v3794_v61, %v3033_v42  ;;  %v3790_v11 = vadd.f32 %v3786_v59, %v11527_v17  ;;  %v4527_v40 = vmul.f32 %v11575_v54, %v3033_v42 }
 0x568   :  { %v11697_v51 = vadd.f32 %v3788_v47, %v11510_v20  ;;  %v11713_v20 = vstv %s11635_s7  ;;  %v3420_v47 = vmul.f32 %v3418_v4, %v11554_v38  ;;  %v4523_v4 = vadd.f32 %v4519_v58, %v11543_v8  ;;  %s12200_s7 = sld [smem:[#allocation16 + $0xa3]] }
 0x569   :  { %v11707_v3 = vpop.permute.xlu0 %3085  ;;  %v11709_v50 = vpop.permute.xlu1 %3089  ;;  %v4548_v57 = vmul.f32 %v11713_v20, %v11686_v56  ;;  %v4161_v38 = vmul.f32 %v4160_v7, %v3033_v42  ;;  %v3432_v41 = vmul.f32 %v11671_v43, %v3036_v14  ;;  %v4156_v44 = vadd.f32 %v4152_v34, %v11533_v10 }
 0x56a   :  { %v3424_v8 = vadd.f32 %v3420_v47, %v11525_v30  ;;  %v3035_v1 = vmul.f32 %v3029_v62, %v13821_v25  ;;  %v11754_v35 = vstv %s11703_s21  ;;  %v11757_v2 = vstv %s11705_s2  ;;  %s12263_s21 = sld [smem:[#allocation16 + $0x1a3]]  ;;  %s12265_s2 = sld [smem:[#allocation17 + $0x1]] }
 0x56b   :  { %v4552_v26 = vadd.f32 %v4548_v57, %v4542_v33  ;;  %v3079_v33 = vsel %vm1539_vm9, %v11594_v53, %v11648_v21  ;;  %v3798_v58 = vmul.f32 %v3794_v61, %v3036_v14  ;;  %v4164_v57 = vmul.f32 %v4160_v7, %v3036_v14 }
 0x56c   :  { %v4530_v30 = vmul.f32 %v11575_v54, %v3036_v14  ;;  %v11761_v17 = vmul.f32 %v3079_v33, %v13709_v29  ;;  %v3433_v42 = vadd.f32 %v3429_v15, %v3423_v19  ;;  %v3799_v47 = vadd.f32 %v3795_v28, %v3789_v32 }
 0x56d   :  { %v11741_v46 = vpop.permute.xlu0 %3091  ;;  %v11743_v37 = vpop.permute.xlu1 %3087  ;;  %v4165_v59 = vadd.f32 %v4161_v38, %v4155_v36  ;;  %v3047_v10 = vsel %vm1767_vm15, %v11549_v60, %v11551_v45  ;;  %v4531_v34 = vadd.f32 %v4527_v40, %v4521_v5  ;;  %v3436_v62 = vadd.f32 %v3432_v41, %v3426_v18 }
 0x56e   :  { %13820 = vst [vmem:[#allocation69_spill] sm:$0xff] %v11743_v37  ;;  %v3430_v25 = vmul.f32 %v11671_v43, %v11573_v63  ;;  %v3048_v29 = vsel %vm1767_vm15, %v11560_v49, %v11549_v60  ;;  %v3431_v19 = vmul.f32 %v11671_v43, %v3035_v1  ;;  %v3796_v45 = vmul.f32 %v3794_v61, %v11573_v63  ;;  %v13822_v60 = vld [vmem:[#allocation110_spill] sm:$0xff] }
 0x56f   :  { %v3797_v36 = vmul.f32 %v3794_v61, %v3035_v1  ;;  %v11782_v32 = vstv %s11727_s23  ;;  %v4162_v18 = vmul.f32 %v4160_v7, %v11573_v63  ;;  %v4163_v15 = vmul.f32 %v4160_v7, %v3035_v1  ;;  %s12267_s23 = sld [smem:[#allocation16 + $0x11d]] }
 0x570   :  { %v3049_v28 = vmul.f32 %v3047_v10, %v13822_v60  ;;  %v4558_v38 = vmul.f32 %v11782_v32, %v11761_v17  ;;  %v3802_v33 = vadd.f32 %v3798_v58, %v11697_v51  ;;  %v4168_v43 = vadd.f32 %v4164_v57, %v4158_v9  ;;  %v13823_v9 = vld [vmem:[#allocation116_spill] sm:$0xff] }
 0x571   :  { %v11784_v14 = vpop.permute.xlu0 %3101  ;;  %v11786_v5 = vpop.permute.xlu1 %3105  ;;  %v4534_v40 = vadd.f32 %v4530_v30, %v4524_v27  ;;  %v4529_v61 = vmul.f32 %v11575_v54, %v3035_v1  ;;  %v3434_v41 = vadd.f32 %v3430_v25, %v3424_v8  ;;  %v4170_v39 = vstv %s11749_s18  ;;  %v13824_v1 = vld [vmem:[#allocation115_spill] sm:$0xff]  ;;  %s12325_s18 = sld [smem:[#allocation16 + $0x11e]] }
 0x572   :  { %v3045_v48 = vsel %vm1767_vm15, %v11562_v12, %v11560_v49  ;;  %v4562_v63 = vadd.f32 %v4558_v38, %v4552_v26  ;;  %v3435_v7 = vadd.f32 %v3431_v19, %v3425_v24  ;;  %v3800_v10 = vadd.f32 %v3796_v45, %v3790_v11 }
 0x573   :  { %v3801_v51 = vadd.f32 %v3797_v36, %v3791_v22  ;;  %v3052_v27 = vmul.f32 %v3048_v29, %v13823_v9  ;;  %v4166_v58 = vadd.f32 %v4162_v18, %v4156_v44  ;;  %v4167_v54 = vadd.f32 %v4163_v15, %v4157_v23 }
 0x574   :  { %v3439_v8 = vmul.f32 %v11754_v35, %v3049_v28  ;;  %v3095_v49 = vsel %vm1577_vm10, %v11707_v3, %v11743_v37  ;;  %v4533_v12 = vadd.f32 %v4529_v61, %v4523_v4  ;;  %v3805_v26 = vmul.f32 %v11757_v2, %v3049_v28 }
 0x575   :  { %v4171_v25 = vmul.f32 %v4170_v39, %v3049_v28  ;;  %v4537_v24 = vmul.f32 %v11610_v52, %v3049_v28  ;;  %v11809_v11 = vpop.permute.xlu0 %3107  ;;  %v11811_v22 = vpop.permute.xlu1 %3103  ;;  %v3051_v44 = vmul.f32 %v3045_v48, %v13824_v1  ;;  %v11815_v23 = vstv %s11767_s12  ;;  %s12373_s12 = sld [smem:[#allocation16 + $0x120]] }
 0x576   :  { %v11818_v57 = vstv %s11775_s13  ;;  %v11821_v30 = vstv %s11777_s14  ;;  %v3442_v29 = vmul.f32 %v11754_v35, %v3052_v27  ;;  %v3808_v4 = vmul.f32 %v11757_v2, %v3052_v27  ;;  %s12402_s13 = sld [smem:[#allocation16 + $0x121]]  ;;  %s12411_s14 = sld [smem:[#allocation16 + $0x122]] }
 0x577   :  { %v4174_v19 = vmul.f32 %v4170_v39, %v3052_v27  ;;  %v11826_v45 = vmul.f32 %v3095_v49, %v13640_v0  ;;  %v3443_v36 = vadd.f32 %v3439_v8, %v3433_v42  ;;  %v4540_v18 = vmul.f32 %v11610_v52, %v3052_v27  ;;  %v13826_v42 = vld [vmem:[#allocation102_spill] sm:$0xff]  ;;  %v13829_v49 = vld [vmem:[#allocation73_spill] sm:$0xff] }
 0x578   :  { %v3061_v48 = vsel %vm1501_vm8, %v11570_v55, %v11579_v13  ;;  %v3064_v15 = vsel %vm1501_vm8, %v11579_v13, %v11568_v6  ;;  %v3809_v28 = vadd.f32 %v3805_v26, %v3799_v47  ;;  %v11839_v38 = vadd.f32 %v4171_v25, %v4165_v59  ;;  %v13828_v59 = vld [vmem:[#allocation84_spill] sm:$0xff] }
 0x579   :  { %13825 = vst [vmem:[#allocation70_spill] sm:$0xff] %v11826_v45  ;;  %v11841_v0 = vadd.f32 %v4537_v24, %v4531_v34  ;;  %v3440_v61 = vmul.f32 %v11754_v35, %v13826_v42  ;;  %v3441_v27 = vmul.f32 %v11754_v35, %v3051_v44  ;;  %v3806_v8 = vmul.f32 %v11757_v2, %v13826_v42  ;;  %v11860_v24 = vpop.permute.xlu0 %3117  ;;  %v11862_v1 = vpop.permute.xlu1 %3119 }
 0x57a   :  { %v3807_v6 = vmul.f32 %v11757_v2, %v3051_v44  ;;  %v11854_v13 = vstv %s11799_s15  ;;  %v3446_v47 = vadd.f32 %v3442_v29, %v3436_v62  ;;  %v3065_v34 = vmul.f32 %v3064_v15, %v13828_v59  ;;  %v13830_v62 = vld [vmem:[#allocation38_spill] sm:$0xff]  ;;  %s12417_s15 = sld [smem:[#allocation16 + $0x123]] }
 0x57b   :  { %13827 = vst [vmem:[#allocation97_spill] sm:$0xff] %v11854_v13  ;;  %v3068_v26 = vmul.f32 %v3061_v48, %v13829_v49  ;;  %v4568_v25 = vmul.f32 %v11854_v13, %v11826_v45  ;;  %v3812_v35 = vadd.f32 %v3808_v4, %v3802_v33  ;;  %v4172_v9 = vmul.f32 %v4170_v39, %v13826_v42 }
 0x57c   :  { %v4173_v60 = vmul.f32 %v4170_v39, %v3051_v44  ;;  %v4539_v2 = vmul.f32 %v11610_v52, %v3051_v44  ;;  %v4178_v31 = vadd.f32 %v4174_v19, %v4168_v43  ;;  %v4544_v37 = vadd.f32 %v4540_v18, %v4534_v40  ;;  %v13831_v19 = vld [vmem:[#allocation90_spill] sm:$0xff] }
 0x57d   :  { %v3062_v29 = vsel %vm1501_vm8, %v13830_v62, %v11570_v55  ;;  %v4572_v48 = vadd.f32 %v4568_v25, %v4562_v63  ;;  %v3444_v15 = vadd.f32 %v3440_v61, %v3434_v41  ;;  %v3445_v33 = vadd.f32 %v3441_v27, %v3435_v7  ;;  %v11888_v61 = vpop.permute.xlu0 %3123  ;;  %v11890_v27 = vpop.permute.xlu1 %3121  ;;  %v13834_v62 = vld [vmem:[#allocation58_spill] sm:$0xff] }
 0x57e   :  { %v3810_v4 = vadd.f32 %v3806_v8, %v3800_v10  ;;  %v3811_v42 = vadd.f32 %v3807_v6, %v3801_v51  ;;  %v3449_v39 = vmul.f32 %v11815_v23, %v3065_v34  ;;  %v3452_v52 = vmul.f32 %v11815_v23, %v3068_v26 }
 0x57f   :  { %v3815_v43 = vmul.f32 %v11818_v57, %v3065_v34  ;;  %v3111_v55 = vsel %vm1615_vm11, %v11784_v14, %v11811_v22  ;;  %v4176_v40 = vadd.f32 %v4172_v9, %v4166_v58  ;;  %v4177_v63 = vadd.f32 %v4173_v60, %v4167_v54  ;;  %v13832_v9 = vld [vmem:[#allocation80_spill] sm:$0xff] }
 0x580   :  { %v4543_v44 = vadd.f32 %v4539_v2, %v4533_v12  ;;  %v3067_v18 = vmul.f32 %v3062_v29, %v13831_v19  ;;  %v3818_v41 = vmul.f32 %v11818_v57, %v3068_v26  ;;  %v3458_v7 = vstv %s11837_s16  ;;  %v13835_v29 = vld [vmem:[#allocation44_spill] sm:$0xff]  ;;  %v13837_v19 = vld [vmem:[#allocation74_spill] sm:$0xff]  ;;  %s12454_s16 = sld [smem:[#allocation17 + $0x2]] }
 0x581   :  { %v11883_v10 = vstv %s11845_s17  ;;  %v11886_v51 = vstv %s11847_s0  ;;  %v4181_v8 = vmul.f32 %v11821_v30, %v3065_v34  ;;  %v4184_v6 = vmul.f32 %v11821_v30, %v3068_v26  ;;  %s12493_s17 = sld [smem:[#allocation17 + $0x3]] }
 0x582   :  { %v4547_v60 = vmul.f32 %v11713_v20, %v3065_v34  ;;  %v11896_v58 = vmul.f32 %v3111_v55, %v13832_v9  ;;  %v3453_v54 = vadd.f32 %v3449_v39, %v3443_v36  ;;  %v3456_v12 = vadd.f32 %v3452_v52, %v3446_v47  ;;  %v13838_v9 = vld [vmem:[#allocation75_spill] sm:$0xff] }
 0x583   :  { %v3819_v59 = vadd.f32 %v3815_v43, %v3809_v28  ;;  %v4550_v49 = vmul.f32 %v11713_v20, %v3068_v26  ;;  %v3450_v25 = vmul.f32 %v11815_v23, %v11686_v56  ;;  %v3451_v2 = vmul.f32 %v11815_v23, %v3067_v18 }
 0x584   :  { %13833 = vst [vmem:[#allocation96_spill] sm:$0xff] %v11896_v58  ;;  %v3077_v34 = vsel %vm1539_vm9, %v13835_v29, %v13834_v62  ;;  %v3080_v36 = vsel %vm1539_vm9, %v13834_v62, %v11594_v53  ;;  %v3816_v28 = vmul.f32 %v11818_v57, %v11686_v56  ;;  %v3817_v47 = vmul.f32 %v11818_v57, %v3067_v18 }
 0x585   :  { %v4182_v26 = vmul.f32 %v11821_v30, %v11686_v56  ;;  %v11920_v39 = vstv %s11870_s1  ;;  %v4183_v23 = vmul.f32 %v11821_v30, %v3067_v18  ;;  %v4549_v52 = vmul.f32 %v11713_v20, %v3067_v18  ;;  %v11937_v30 = vpop.permute.xlu0 %3133  ;;  %v11939_v20 = vpop.permute.xlu1 %3135 }
 0x586   :  { %13836 = vst [vmem:[#allocation92_spill] sm:$0xff] %v11920_v39  ;;  %v3078_v43 = vsel %vm1539_vm9, %v11648_v21, %v13835_v29  ;;  %v4578_v53 = vmul.f32 %v11920_v39, %v11896_v58  ;;  %v3822_v55 = vadd.f32 %v3818_v41, %v3812_v35  ;;  %v11931_v57 = vadd.f32 %v4181_v8, %v11839_v38 }
 0x587   :  { %v3081_v56 = vmul.f32 %v3080_v36, %v13837_v19  ;;  %v11935_v62 = vmul.f32 %v3077_v34, %v13838_v9  ;;  %v11941_v18 = vadd.f32 %v4184_v6, %v4178_v31  ;;  %v11944_v21 = vadd.f32 %v4547_v60, %v11841_v0  ;;  %v13839_v36 = vld [vmem:[#allocation94_spill] sm:$0xff] }
 0x588   :  { %v11946_v35 = vadd.f32 %v4550_v49, %v4544_v37  ;;  %v4582_v38 = vadd.f32 %v4578_v53, %v4572_v48  ;;  %v3454_v41 = vadd.f32 %v3450_v25, %v3444_v15  ;;  %v3455_v8 = vadd.f32 %v3451_v2, %v3445_v33 }
 0x589   :  { %v3820_v29 = vadd.f32 %v3816_v28, %v3810_v4  ;;  %v11949_v34 = vmul.f32 %v3078_v43, %v13839_v36  ;;  %v3821_v19 = vadd.f32 %v3817_v47, %v3811_v42  ;;  %v11951_v9 = vadd.f32 %v4182_v26, %v4176_v40  ;;  %v11988_v60 = vpop.permute.xlu0 %3139  ;;  %v11990_v49 = vpop.permute.xlu1 %3137  ;;  %v13842_v28 = vld [vmem:[#allocation42_spill] sm:$0xff]  ;;  %v13844_v47 = vld [vmem:[#allocation43_spill] sm:$0xff] }
 0x58a   :  { %v11953_v39 = vadd.f32 %v4183_v23, %v4177_v63  ;;  %v11955_v13 = vadd.f32 %v4549_v52, %v4543_v44  ;;  %v3459_v31 = vmul.f32 %v3458_v7, %v3081_v56  ;;  %v3462_v0 = vmul.f32 %v3458_v7, %v11935_v62 }
 0x58b   :  { %v3468_v6 = vstv %s11899_s11  ;;  %v11960_v37 = vstv %s11901_s19  ;;  %v3825_v48 = vmul.f32 %v11883_v10, %v3081_v56  ;;  %v3828_v15 = vmul.f32 %v11883_v10, %v11935_v62 }
 0x58c   :  { %13840 = vst [vmem:[#allocation50_spill] sm:$0xff] %v11953_v39  ;;  %13841 = vst [vmem:[#allocation101_spill] sm:$0xff] %v11955_v13  ;;  %v3093_v33 = vsel %vm1577_vm10, %v11709_v50, %v11741_v46  ;;  %v3096_v4 = vsel %vm1577_vm10, %v11741_v46, %v11707_v3  ;;  %v11980_v42 = vmul.f32 %v11886_v51, %v3081_v56 }
 0x58d   :  { %v11984_v40 = vmul.f32 %v11886_v51, %v11935_v62  ;;  %v3460_v63 = vmul.f32 %v3458_v7, %v11761_v17  ;;  %v3461_v44 = vmul.f32 %v3458_v7, %v11949_v34  ;;  %v11993_v3 = vmul.f32 %v11782_v32, %v3081_v56 }
 0x58e   :  { %v3826_v46 = vmul.f32 %v11883_v10, %v11761_v17  ;;  %v3827_v25 = vmul.f32 %v11883_v10, %v11949_v34  ;;  %v3126_v2 = vsel %vm1653_vm12, %v11862_v1, %v11890_v27  ;;  %v12004_v7 = vmul.f32 %v3096_v4, %v13842_v28 }
 0x58f   :  { %v12007_v26 = vmul.f32 %v3093_v33, %v13844_v47  ;;  %v3109_v23 = vsel %vm1615_vm11, %v11786_v5, %v11809_v11  ;;  %v3112_v10 = vsel %vm1615_vm11, %v11809_v11, %v11784_v14  ;;  %v3463_v52 = vadd.f32 %v3459_v31, %v3453_v54  ;;  %v13846_v33 = vld [vmem:[#allocation69_spill] sm:$0xff] }
 0x590   :  { %13843 = vst [vmem:[#allocation82_spill] sm:$0xff] %v12004_v7  ;;  %v3466_v43 = vadd.f32 %v3462_v0, %v3456_v12  ;;  %v3829_v53 = vadd.f32 %v3825_v48, %v3819_v59  ;;  %v3832_v56 = vadd.f32 %v3828_v15, %v3822_v55  ;;  %v3464_v36 = vadd.f32 %v3460_v63, %v3454_v41  ;;  %v13847_v47 = vld [vmem:[#allocation61_spill] sm:$0xff]  ;;  %v13850_v12 = vld [vmem:[#allocation83_spill] sm:$0xff] }
 0x591   :  { %13845 = vst [vmem:[#allocation52_spill] sm:$0xff] %v12007_v26  ;;  %v3465_v4 = vadd.f32 %v3461_v44, %v3455_v8  ;;  %v3094_v28 = vsel %vm1577_vm10, %v13846_v33, %v11709_v50  ;;  %v12022_v13 = vmul.f32 %v3126_v2, %v13847_v47  ;;  %v12024_v39 = vadd.f32 %v3826_v46, %v3820_v29  ;;  %v13848_v11 = vld [vmem:[#allocation85_spill] sm:$0xff]  ;;  %v12041_v29 = vpop.permute.xlu0 %3149  ;;  %v13852_v0 = vld [vmem:[#allocation39_spill] sm:$0xff] }
 0x592   :  { %v3831_v14 = vadd.f32 %v3827_v25, %v3821_v19  ;;  %v12027_v54 = vmul.f32 %v3112_v10, %v13848_v11  ;;  %v12030_v59 = vmul.f32 %v3109_v23, %v13850_v12  ;;  %v3469_v55 = vmul.f32 %v3468_v6, %v12004_v7  ;;  %v12043_v19 = vpop.permute.xlu1 %3151  ;;  %v13856_v10 = vld [vmem:[#allocation47_spill] sm:$0xff] }
 0x593   :  { %v3472_v41 = vmul.f32 %v3468_v6, %v12007_v26  ;;  %v3478_v50 = vstv %s11962_s22  ;;  %v3110_v8 = vsel %vm1615_vm11, %v11811_v22, %v11786_v5  ;;  %v3835_v31 = vmul.f32 %v11960_v37, %v12004_v7  ;;  %v13855_v5 = vld [vmem:[#allocation51_spill] sm:$0xff] }
 0x594   :  { %13849 = vst [vmem:[#allocation45_spill] sm:$0xff] %v12027_v54  ;;  %13851 = vst [vmem:[#allocation65_spill] sm:$0xff] %v12030_v59  ;;  %v12048_v48 = vmul.f32 %v3094_v28, %v13852_v0  ;;  %v3844_v15 = vstv %s11975_s8  ;;  %v12052_v63 = vstv %s11977_s6  ;;  %v3838_v44 = vmul.f32 %v11960_v37, %v12007_v26 }
 0x595   :  { %13854 = vst [vmem:[#allocation68_spill] sm:$0xff] %v12052_v63  ;;  %v3470_v46 = vmul.f32 %v3468_v6, %v11826_v45  ;;  %v4592_v22 = vadd.f32 %v13855_v5, %v4582_v38  ;;  %v4598_v25 = vmul.f32 %v12052_v63, %v12022_v13  ;;  %v3479_v2 = vmul.f32 %v3478_v50, %v12027_v54 }
 0x596   :  { %13853 = vst [vmem:[#allocation130_spill] sm:$0xff] %v12048_v48  ;;  %v3482_v23 = vmul.f32 %v3478_v50, %v12030_v59  ;;  %v12065_v33 = vmul.f32 %v3110_v8, %v13856_v10  ;;  %v3127_v28 = vsel %vm1653_vm12, %v11860_v24, %v11862_v1  ;;  %v3473_v47 = vadd.f32 %v3469_v55, %v3463_v52  ;;  %v13858_v52 = vld [vmem:[#allocation91_spill] sm:$0xff]  ;;  %v12082_v55 = vpop.permute.xlu0 %3155 }
 0x597   :  { %v3476_v11 = vadd.f32 %v3472_v41, %v3466_v43  ;;  %v3845_v12 = vmul.f32 %v3844_v15, %v12027_v54  ;;  %v4602_v38 = vadd.f32 %v4598_v25, %v4592_v22  ;;  %v3839_v0 = vadd.f32 %v3835_v31, %v3829_v53  ;;  %v3154_v41 = vpop.permute.xlu1 %3153 }
 0x598   :  { %13857 = vst [vmem:[#allocation93_spill] sm:$0xff] %v12065_v33  ;;  %v3471_v5 = vmul.f32 %v3468_v6, %v12048_v48  ;;  %v3837_v63 = vmul.f32 %v11960_v37, %v12048_v48  ;;  %v3848_v8 = vmul.f32 %v3844_v15, %v12030_v59  ;;  %v3842_v10 = vadd.f32 %v3838_v44, %v3832_v56 }
 0x599   :  { %v3474_v26 = vadd.f32 %v3470_v46, %v3464_v36  ;;  %v3480_v1 = vmul.f32 %v3478_v50, %v11896_v58  ;;  %v12080_v43 = vmul.f32 %v3127_v28, %v13858_v52  ;;  %v3483_v53 = vadd.f32 %v3479_v2, %v3473_v47 }
 0x59a   :  { %v3486_v6 = vadd.f32 %v3482_v23, %v3476_v11  ;;  %v3481_v31 = vmul.f32 %v3478_v50, %v12065_v33  ;;  %v3498_v22 = vstv %s12032_s10  ;;  %v3849_v25 = vadd.f32 %v3845_v12, %v3839_v0  ;;  %v13860_v12 = vld [vmem:[#allocation60_spill] sm:$0xff]  ;;  %v3166_v52 = vpop.permute.xlu0 %3165 }
 0x59b   :  { %13859 = vst [vmem:[#allocation77_spill] sm:$0xff] %v12080_v43  ;;  %v3847_v59 = vmul.f32 %v3844_v15, %v12065_v33  ;;  %v3128_v56 = vsel %vm1653_vm12, %v11888_v61, %v11860_v24  ;;  %v3142_v36 = vsel %vm1691_vm13, %v11939_v20, %v11990_v49  ;;  %v3475_v44 = vadd.f32 %v3471_v5, %v3465_v4  ;;  %v13864_v5 = vld [vmem:[#allocation95_spill] sm:$0xff] }
 0x59c   :  { %v12097_v46 = vmul.f32 %v11960_v37, %v11826_v45  ;;  %v3841_v50 = vadd.f32 %v3837_v63, %v3831_v14  ;;  %v3852_v2 = vadd.f32 %v3848_v8, %v3842_v10  ;;  %v3484_v23 = vadd.f32 %v3480_v1, %v3474_v26  ;;  %v13862_v14 = vld [vmem:[#allocation32_spill] sm:$0xff]  ;;  %v13865_v10 = vld [vmem:[#allocation123_spill] sm:$0xff] }
 0x59d   :  { %v12102_v28 = vmul.f32 %v3844_v15, %v11896_v58  ;;  %v12105_v24 = vstv %s12057_s24  ;;  %v3499_v47 = vmul.f32 %v3498_v22, %v12080_v43  ;;  %v3485_v11 = vadd.f32 %v3481_v31, %v3475_v44  ;;  %v13863_v15 = vld [vmem:[#allocation119_spill] sm:$0xff]  ;;  %v3168_v31 = vpop.permute.xlu1 %3167  ;;  %v13866_v44 = vld [vmem:[#allocation120_spill] sm:$0xff]  ;;  %s13912_s24 = sld [smem:[#allocation149_spill]] }
 0x59e   :  { %v12109_v4 = vmul.f32 %v3128_v56, %v13860_v12  ;;  %v3125_v37 = vsel %vm1653_vm12, %v11890_v27, %v11888_v61  ;;  %v12116_v63 = vmul.f32 %v3142_v36, %v13862_v14  ;;  %v12118_v26 = vadd.f32 %v3847_v59, %v3841_v50  ;;  %v13869_v36 = vld [vmem:[#allocation89_spill] sm:$0xff] }
 0x59f   :  { %v3493_v0 = vadd.f32 %v13863_v15, %v3483_v53  ;;  %v3859_v8 = vadd.f32 %v13864_v5, %v3849_v25  ;;  %v3496_v1 = vadd.f32 %v13865_v10, %v3486_v6  ;;  %v3865_v56 = vmul.f32 %v12105_v24, %v12080_v43  ;;  %v13868_v25 = vld [vmem:[#allocation64_spill] sm:$0xff]  ;;  %v13871_v10 = vld [vmem:[#allocation62_spill] sm:$0xff]  ;;  %v13875_v43 = vld [vmem:[#allocation107_spill] sm:$0xff] }
 0x5a0   :  { %13861 = vst [vmem:[#allocation98_spill] sm:$0xff] %v12109_v4  ;;  %v3862_v61 = vadd.f32 %v13866_v44, %v3852_v2  ;;  %v12129_v27 = vstv %s12076_s25  ;;  %v3143_v59 = vsel %vm1691_vm13, %v11937_v30, %v11939_v20  ;;  %v12136_v6 = vmul.f32 %v3125_v37, %v13868_v25  ;;  %v13872_v25 = vld [vmem:[#allocation31_spill] sm:$0xff]  ;;  %s6215_s25 = smov [#allocation20]  }
 0x5a1   :  { %13867 = vst [vmem:[#allocation108_spill] sm:$0xff] %v12129_v27  ;;  %v3503_v53 = vadd.f32 %v3499_v47, %v3493_v0  ;;  %v3494_v50 = vadd.f32 %v13869_v36, %v3484_v23  ;;  %v4608_v12 = vmul.f32 %v12129_v27, %v12116_v63  ;;  %v3502_v14 = vmul.f32 %v3498_v22, %v12109_v4  ;;  %v13870_v23 = vld [vmem:[#allocation59_spill] sm:$0xff] }
 0x5a2   :  { %v3500_v2 = vmul.f32 %v3498_v22, %v12022_v13  ;;  %v3144_v15 = vsel %vm1691_vm13, %v11988_v60, %v11937_v30  ;;  %v3141_v20 = vsel %vm1691_vm13, %v11990_v49, %v11988_v60  ;;  %v12154_v47 = vmul.f32 %v3143_v59, %v13870_v23  ;;  %v13874_v27 = vld [vmem:[#allocation103_spill] sm:$0xff] }
 0x5a3   :  { %v12156_v37 = vadd.f32 %v4608_v12, %v4602_v38  ;;  %v3159_v0 = vsel %vm1729_vm14, %v12041_v29, %v12043_v19  ;;  %v3160_v30 = vsel %vm1729_vm14, %v12082_v55, %v12041_v29  ;;  %v12166_v5 = vadd.f32 %v3865_v56, %v3859_v8  ;;  %v13873_v29 = vld [vmem:[#allocation29_spill] sm:$0xff]  ;;  %v3172_v56 = vpop.permute.xlu0 %3171  ;;  %v3170_v12 = vpop.permute.xlu1 %3169 }
 0x5a4   :  { %v3868_v60 = vmul.f32 %v12105_v24, %v12109_v4  ;;  %v3508_v49 = vstv %s12099_s9  ;;  %v3158_v38 = vsel %vm1729_vm14, %v12043_v19, %v3154_v41  ;;  %v3495_v44 = vadd.f32 %v13871_v10, %v3485_v11  ;;  %v13876_v10 = vld [vmem:[#allocation104_spill] sm:$0xff]  ;;  %s5388_s9 = sshll.u32 %s6215_s25, 4  ;;  %s5389_s9 = int_to_ptr.vmem [resolvable:$true] %s5388_s9 }
 0x5a5   :  { %v3501_v59 = vmul.f32 %v3498_v22, %v12136_v6  ;;  %v12179_v36 = vmul.f32 %v3144_v15, %v13872_v25  ;;  %v12182_v8 = vmul.f32 %v3141_v20, %v13873_v29  ;;  %v3506_v23 = vadd.f32 %v3502_v14, %v3496_v1  ;;  %v13878_v29 = vld [vmem:[#allocation110_spill] sm:$0xff]  ;;  %p6151_p10 = scmp.lt.s32.totalorder %s5389_s9, %s5389_s9 }
 0x5a6   :  { %v12187_v4 = vmul.f32 %v3159_v0, %v13874_v27  ;;  %v12190_v19 = vmul.f32 %v3160_v30, %v13875_v43  ;;  %v3157_v22 = vsel %vm1729_vm14, %v3154_v41, %v12082_v55  ;;  %v3504_v11 = vadd.f32 %v3500_v2, %v3494_v50  ;;  %v13877_v2 = vld [vmem:[#allocation106_spill] sm:$0xff] }
 0x5a7   :  { %v3509_v15 = vmul.f32 %v3508_v49, %v12154_v47  ;;  %v3518_v20 = vstv %s12123_s3  ;;  %v12198_v25 = vmul.f32 %v3158_v38, %v13876_v10  ;;  %v3175_v1 = vsel %vm1767_vm15, %v3166_v52, %v3168_v31  ;;  %s6146_s3 = scalar_lea.vmem %s5389_s9, 32 }
 0x5a8   :  { %v3176_v43 = vsel %vm1767_vm15, %v3172_v56, %v3166_v52  ;;  %v3173_v27 = vsel %vm1767_vm15, %v3170_v12, %v3172_v56  ;;  %v3174_v55 = vsel %vm1767_vm15, %v3168_v31, %v3170_v12  ;;  %v3512_v41 = vmul.f32 %v3508_v49, %v12179_v36  ;;  %v13879_v12 = vld [vmem:[#allocation116_spill] sm:$0xff]  ;;  %p6147_p9 = scmp.ne.s32.totalorder %s5389_s9, %s6146_s3  ;;  %p6152_p11 = scmp.lt.s32.totalorder %s6146_s3, %s6146_s3 }
 0x5a9   :  { %v3510_v50 = vmul.f32 %v3508_v49, %v12116_v63  ;;  %v3511_v14 = vmul.f32 %v3508_v49, %v12182_v8  ;;  %v12216_v0 = vmul.f32 %v3157_v22, %v13877_v2  ;;  %v3519_v52 = vmul.f32 %v3518_v20, %v12187_v4  ;;  %v13881_v49 = vld [vmem:[#allocation115_spill] sm:$0xff] }
 0x5aa   :  { %v3522_v30 = vmul.f32 %v3518_v20, %v12190_v19  ;;  %v3520_v38 = vmul.f32 %v3518_v20, %v12198_v25  ;;  %v3528_v31 = vstv %s12151_s27  ;;  %v12223_v56 = vmul.f32 %v3175_v1, %v13878_v29  ;;  %p6153_p12 = por %p6152_p11, %p6151_p10 }
 0x5ab   :  { %v12226_v10 = vmul.f32 %v3176_v43, %v13879_v12  ;;  %v12229_v33 = vmul.f32 %v3174_v55, %v13880_v16  ;;  %v12232_v22 = vmul.f32 %v3173_v27, %v13881_v49  ;;  %v3872_v2 = vadd.f32 %v3868_v60, %v3862_v61 }
 0x5ac   :  { %v3505_v58 = vadd.f32 %v3501_v59, %v3495_v44  ;;  %v12235_v54 = vstv %s12171_s29  ;;  %v3513_v48 = vadd.f32 %v3509_v15, %v3503_v53  ;;  %v3516_v45 = vadd.f32 %v3512_v41, %v3506_v23  ;;  %v13882_v41 = vld [vmem:[#allocation46_spill] sm:$0xff]  ;;  %p6154_p13 = pnand %p6153_p12, %p6147_p9 }
 0x5ad   :  { %v3514_v7 = vadd.f32 %v3510_v50, %v3504_v11  ;;  %v3521_v1 = vmul.f32 %v3518_v20, %v12216_v0  ;;  %v3529_v43 = vmul.f32 %v3528_v31, %v12223_v56  ;;  %v12240_v12 = vstv %s12184_s30 }
 0x5ae   :  { %v3515_v29 = vadd.f32 %v3511_v14, %v3505_v58  ;;  %v3532_v16 = vmul.f32 %v3528_v31, %v12226_v10  ;;  %v3523_v27 = vadd.f32 %v3519_v52, %v3513_v48  ;;  %v3530_v61 = vmul.f32 %v3528_v31, %v12229_v33 }
 0x5af   :  { %v3531_v60 = vmul.f32 %v3528_v31, %v12232_v22  ;;  %v3526_v44 = vadd.f32 %v3522_v30, %v3516_v45  ;;  %v3524_v53 = vadd.f32 %v3520_v38, %v3514_v7  ;;  %v3875_v59 = vmul.f32 %v12235_v54, %v12154_v47 }
 0x5b0   :  { %v3878_v23 = vmul.f32 %v12235_v54, %v12179_v36  ;;  %v12252_v58 = vstv %s12200_s7  ;;  %v3538_v11 = vstv %s12210_s28  ;;  %v3533_v15 = vadd.f32 %v3529_v43, %v3523_v27 }
 0x5b1   :  { %v3536_v20 = vadd.f32 %v3532_v16, %v3526_v44  ;;  %v3534_v48 = vadd.f32 %v3530_v61, %v3524_v53  ;;  %v3525_v55 = vadd.f32 %v3521_v1, %v3515_v29  ;;  %v3861_v50 = vadd.f32 %v13882_v41, %v12118_v26 }
 0x5b2   :  { %v3867_v45 = vmul.f32 %v12105_v24, %v12136_v6  ;;  %v3885_v7 = vmul.f32 %v12240_v12, %v12187_v4  ;;  %v3888_v14 = vmul.f32 %v12240_v12, %v12190_v19  ;;  %v3539_v52 = vadd.f32 %v3538_v11, %v3533_v15 }
 0x5b3   :  { %v3542_v30 = vadd.f32 %v3538_v11, %v3536_v20  ;;  %v3540_v38 = vadd.f32 %v3538_v11, %v3534_v48  ;;  %v3535_v31 = vadd.f32 %v3531_v60, %v3525_v55  ;;  %v3879_v26 = vadd.f32 %v3875_v59, %v12166_v5 }
 0x5b4   :  { %v3882_v49 = vadd.f32 %v3878_v23, %v3872_v2  ;;  %v3877_v1 = vmul.f32 %v12235_v54, %v12182_v8  ;;  %v3895_v43 = vmul.f32 %v12252_v58, %v12223_v56  ;;  %v3898_v29 = vmul.f32 %v12252_v58, %v12226_v10 }
 0x5b5   :  { %v12276_v16 = vmax.f32 %v3539_v52, 0.0  ;;  %v12278_v27 = vmax.f32 %v3542_v30, 0.0  ;;  %v3541_v61 = vadd.f32 %v3538_v11, %v3535_v31  ;;  %v4560_v60 = vmul.f32 %v11782_v32, %v11935_v62  ;;  %v4886_v31 = vld [vmem:[#allocation19] sm:$0xff] }
 0x5b6   :  { %v3840_v5 = vadd.f32 %v12097_v46, %v12024_v39  ;;  %v3871_v2 = vadd.f32 %v3867_v45, %v3861_v50  ;;  %v3887_v44 = vmul.f32 %v12240_v12, %v12216_v0  ;;  %v12290_v53 = vmax.f32 %v3540_v38, 0.0  ;;  %v4903_v38 = vld [vmem:[#allocation19 + $0x88] sm:$0xff] }
 0x5b7   :  { %4645 = vrot.lane.b32.xlu0 %v12276_v16, %s13650_s4  ;;  %4651 = vrot.lane.b32.xlu1 %v12278_v27, %s13650_s4  ;;  %v12292_v59 = vmax.f32 %v3541_v61, 0.0  ;;  %v3892_v62 = vadd.f32 %v3888_v14, %v3882_v49  ;;  %v3889_v23 = vadd.f32 %v3885_v7, %v3879_v26  ;;  %v12296_v39 = vadd.f32 %v11980_v42, %v11931_v57  ;;  %v4887_v26 = vld [vmem:[#allocation19 + $0x8] sm:$0xff] }
 0x5b8   :  { %v3850_v46 = vadd.f32 %v12102_v28, %v3840_v5  ;;  %v3881_v11 = vadd.f32 %v3877_v1, %v3871_v2  ;;  %v12300_v15 = vstv %s12249_s20  ;;  %v3897_v48 = vmul.f32 %v12252_v58, %v12232_v22  ;;  %v4905_v5 = vld [vmem:[#allocation19 + $0x98] sm:$0xff] }
 0x5b9   :  { %v4618_v20 = vmul.f32 %v12300_v15, %v12198_v25  ;;  %v3902_v55 = vadd.f32 %v3898_v29, %v3892_v62  ;;  %v3899_v41 = vadd.f32 %v3895_v43, %v3889_v23  ;;  %v12308_v50 = vadd.f32 %v11984_v40, %v11941_v18  ;;  %v4902_v40 = vld [vmem:[#allocation19 + $0x80] sm:$0xff]  ;;  %v4889_v62 = vld [vmem:[#allocation19 + $0x18] sm:$0xff] }
 0x5ba   :  { %v3866_v57 = vmul.f32 %v12105_v24, %v12022_v13  ;;  %v12313_v42 = vstv %s12263_s21  ;;  %v12316_v28 = vstv %s12265_s2  ;;  %v12320_v45 = vadd.f32 %v11993_v3, %v11944_v21  ;;  %v13883_v3 = vld [vmem:[#allocation55_spill] sm:$0xff]  ;;  %v4934_v23 = vld [vmem:[#allocation19 + $0x180] sm:$0xff] }
 0x5bb   :  { %v12323_v7 = vstv %s12267_s23  ;;  %v4628_v14 = vmul.f32 %v12313_v42, %v12229_v33  ;;  %4647 = vrot.lane.b32.xlu1 %v12290_v53, %s13650_s4  ;;  %4649 = vrot.lane.b32.xlu0 %v12292_v59, %s13650_s4  ;;  %v3891_v18 = vadd.f32 %v3887_v44, %v3881_v11  ;;  %v12334_v24 = vadd.f32 %v4560_v60, %v11946_v35  ;;  %v4904_v60 = vld [vmem:[#allocation19 + $0x90] sm:$0xff] }
 0x5bc   :  { %v4192_v21 = vmul.f32 %v11886_v51, %v11761_v17  ;;  %v3860_v52 = vadd.f32 %v13883_v3, %v3850_v46  ;;  %v3876_v30 = vmul.f32 %v12235_v54, %v12116_v63  ;;  %v3908_v49 = vadd.f32 %v12316_v28, %v3902_v55  ;;  %v4919_v55 = vld [vmem:[#allocation19 + $0x108] sm:$0xff] }
 0x5bd   :  { %v3905_v1 = vadd.f32 %v12316_v28, %v3899_v41  ;;  %v3901_v43 = vadd.f32 %v3897_v48, %v3891_v18  ;;  %v4622_v29 = vadd.f32 %v4618_v20, %v12156_v37  ;;  %v4193_v35 = vmul.f32 %v11886_v51, %v11949_v34  ;;  %v4888_v51 = vld [vmem:[#allocation19 + $0x10] sm:$0xff]  ;;  %v4935_v20 = vld [vmem:[#allocation19 + $0x188] sm:$0xff]  ;;  %v4918_v48 = vld [vmem:[#allocation19 + $0x100] sm:$0xff] }
 0x5be   :  { %v4559_v17 = vmul.f32 %v11782_v32, %v11949_v34  ;;  %v3870_v61 = vadd.f32 %v3866_v57, %v3860_v52  ;;  %v3886_v54 = vmul.f32 %v12240_v12, %v12198_v25  ;;  %v5850_v37 = vpack.c.bf16 %v4903_v38, %v4902_v40  ;;  %v13885_v34 = vld [vmem:[#allocation82_spill] sm:$0xff]  ;;  %v13887_v38 = vld [vmem:[#allocation97_spill] sm:$0xff] }
 0x5bf   :  { %4667 = vrot.lane.b32.xlu1 %v12278_v27, %s13575_s26  ;;  %4661 = vrot.lane.b32.xlu0 %v12276_v16, %s13575_s26  ;;  %v12354_v2 = vadd.f32 %v4628_v14, %v4622_v29  ;;  %v5852_v44 = vpack.c.bf16 %v4887_v26, %v4886_v31  ;;  %v4196_v32 = vadd.f32 %v4192_v21, %v11951_v9  ;;  %v12361_v41 = vmax.f32 %v3908_v49, 0.0  ;;  %v4906_v9 = vld [vmem:[#allocation19 + $0xa0] sm:$0xff]  ;;  %v4907_v40 = vld [vmem:[#allocation19 + $0xa8] sm:$0xff] }
 0x5c0   :  { %v4201_v12 = vmul.f32 %v12323_v7, %v13885_v34  ;;  %v3880_v46 = vadd.f32 %v3876_v30, %v3870_v61  ;;  %v3896_v11 = vmul.f32 %v12252_v58, %v12229_v33  ;;  %v12363_v57 = vmax.f32 %v3905_v1, 0.0  ;;  %5851 = vmatprep.subr.bf16.mxu0 %v5850_v37  ;;  %v13886_v21 = vld [vmem:[#allocation52_spill] sm:$0xff]  ;;  %v4891_v29 = vld [vmem:[#allocation19 + $0x28] sm:$0xff] }
 0x5c1   :  { %13884 = vst [vmem:[#allocation112_spill] sm:$0xff] %v12354_v2  ;;  %v3907_v14 = vadd.f32 %v12316_v28, %v3901_v43  ;;  %v5854_v18 = vpack.c.bf16 %v4905_v5, %v4904_v60  ;;  %v4204_v3 = vmul.f32 %v12323_v7, %v13886_v21  ;;  %5853 = vmatpush3.bf16.msra.mxu0 %v5852_v44  ;;  %v4210_v49 = vstv %s12325_s18  ;;  %v4890_v43 = vld [vmem:[#allocation19 + $0x20] sm:$0xff]  ;;  %v13888_v61 = vld [vmem:[#allocation50_spill] sm:$0xff] }
 0x5c2   :  { %v5856_v52 = vpack.c.bf16 %v4889_v62, %v4888_v51  ;;  %v5882_v58 = vpack.c.bf16 %v4935_v20, %v4934_v23  ;;  %v5884_v30 = vpack.c.bf16 %v4919_v55, %v4918_v48  ;;  %v4567_v31 = vmul.f32 %v13887_v38, %v13885_v34  ;;  %v13889_v5 = vld [vmem:[#allocation70_spill] sm:$0xff]  ;;  %v13890_v51 = vld [vmem:[#allocation101_spill] sm:$0xff] }
 0x5c3   :  { %v4570_v26 = vmul.f32 %v13887_v38, %v13886_v21  ;;  %4703 = vrot.lane.b32.xlu1 %v12361_v41, %s13650_s4  ;;  %4697 = vrot.lane.b32.xlu0 %v12363_v57, %s13650_s4  ;;  %v3890_v1 = vadd.f32 %v3886_v54, %v3880_v46  ;;  %v4197_v60 = vadd.f32 %v4193_v35, %v13888_v61  ;;  %v12384_v34 = vmax.f32 %v3907_v14, 0.0  ;;  %v4908_v48 = vld [vmem:[#allocation19 + $0xb0] sm:$0xff]  ;;  %v4909_v54 = vld [vmem:[#allocation19 + $0xb8] sm:$0xff]  ;;  %v13892_v21 = vld [vmem:[#allocation45_spill] sm:$0xff] }
 0x5c4   :  { %v4202_v37 = vmul.f32 %v12323_v7, %v13889_v5  ;;  %5855 = vmatprep.subr.bf16.mxu0 %v5854_v18  ;;  %v5858_v44 = vpack.c.bf16 %v4907_v40, %v4906_v9  ;;  %5883 = vmatprep.subr.bf16.mxu1 %v5882_v58  ;;  %v4563_v62 = vadd.f32 %v4559_v17, %v13890_v51  ;;  %v13891_v55 = vld [vmem:[#allocation130_spill] sm:$0xff]  ;;  %v13893_v14 = vld [vmem:[#allocation65_spill] sm:$0xff] }
 0x5c5   :  { %v4205_v23 = vadd.f32 %v4201_v12, %v12296_v39  ;;  %v3900_v20 = vadd.f32 %v3896_v11, %v3890_v1  ;;  %5885 = vmatpush3.bf16.msra.mxu1 %v5884_v30  ;;  %v4208_v46 = vadd.f32 %v4204_v3, %v12308_v50  ;;  %v4203_v35 = vmul.f32 %v12323_v7, %v13891_v55  ;;  %v4892_v50 = vld [vmem:[#allocation19 + $0x30] sm:$0xff]  ;;  %v4893_v12 = vld [vmem:[#allocation19 + $0x38] sm:$0xff] }
 0x5c6   :  { %v4211_v61 = vmul.f32 %v4210_v49, %v13892_v21  ;;  %5857 = vmatpush3.bf16.msra.mxu0 %v5856_v52  ;;  %v5860_v18 = vpack.c.bf16 %v4891_v29, %v4890_v43  ;;  %v4571_v9 = vadd.f32 %v4567_v31, %v12320_v45  ;;  %v4574_v17 = vadd.f32 %v4570_v26, %v12334_v24  ;;  %v4936_v7 = vld [vmem:[#allocation19 + $0x190] sm:$0xff]  ;;  %v13894_v3 = vld [vmem:[#allocation92_spill] sm:$0xff]  ;;  %v4911_v29 = vld [vmem:[#allocation19 + $0xc8] sm:$0xff] }
 0x5c7   :  { %v4569_v39 = vmul.f32 %v13887_v38, %v13891_v55  ;;  %4701 = vrot.lane.b32.xlu1 %v12384_v34, %s13650_s4  ;;  %4665 = vrot.lane.b32.xlu0 %v12292_v59, %s13575_s26  ;;  %v4206_v11 = vadd.f32 %v4202_v37, %v4196_v32  ;;  %v4214_v40 = vmul.f32 %v4210_v49, %v13893_v14  ;;  %v4937_v52 = vld [vmem:[#allocation19 + $0x198] sm:$0xff]  ;;  %v4920_v58 = vld [vmem:[#allocation19 + $0x110] sm:$0xff]  ;;  %v4910_v32 = vld [vmem:[#allocation19 + $0xc0] sm:$0xff] }
 0x5c8   :  { %v4577_v45 = vmul.f32 %v13894_v3, %v13892_v21  ;;  %5859 = vmatprep.subr.bf16.mxu0 %v5858_v44  ;;  %v5862_v24 = vpack.c.bf16 %v4909_v54, %v4908_v48  ;;  %v4921_v30 = vld [vmem:[#allocation19 + $0x118] sm:$0xff]  ;;  %v3906_v26 = vadd.f32 %v12316_v28, %v3900_v20  ;;  %v5886_v1 = vpack.c.bf16 %v4937_v52, %v4936_v7  ;;  %v4894_v48 = vld [vmem:[#allocation19 + $0x40] sm:$0xff]  ;;  %v4939_v55 = vld [vmem:[#allocation19 + $0x1a8] sm:$0xff] }
 0x5c9   :  { %v13895_v38 = vld [vmem:[#allocation96_spill] sm:$0xff]  ;;  %v5888_v43 = vpack.c.bf16 %v4921_v30, %v4920_v58  ;;  %v4207_v5 = vadd.f32 %v4203_v35, %v4197_v60  ;;  %v4215_v37 = vadd.f32 %v4211_v61, %v4205_v23  ;;  %v4580_v44 = vmul.f32 %v13894_v3, %v13893_v14  ;;  %v13896_v21 = vld [vmem:[#allocation93_spill] sm:$0xff] }
 0x5ca   :  { %v4212_v31 = vmul.f32 %v4210_v49, %v13895_v38  ;;  %5861 = vmatpush3.bf16.msra.mxu0 %v5860_v18  ;;  %v5864_v51 = vpack.c.bf16 %v4893_v12, %v4892_v50  ;;  %v4938_v54 = vld [vmem:[#allocation19 + $0x1a0] sm:$0xff]  ;;  %v4213_v38 = vmul.f32 %v4210_v49, %v13896_v21  ;;  %v4579_v2 = vmul.f32 %v13894_v3, %v13896_v21  ;;  %v4895_v60 = vld [vmem:[#allocation19 + $0x48] sm:$0xff]  ;;  %v4912_v3 = vld [vmem:[#allocation19 + $0xd0] sm:$0xff] }
 0x5cb   :  { %v4230_v28 = vstv %s12373_s12  ;;  %4677 = vrot.lane.b32.xlu1 %v12276_v16, %s13599_s5  ;;  %4663 = vrot.lane.b32.xlu0 %v12290_v53, %s13575_s26  ;;  %v5890_v23 = vpack.c.bf16 %v4939_v55, %v4938_v54  ;;  %v4922_v20 = vld [vmem:[#allocation19 + $0x120] sm:$0xff]  ;;  %v4923_v35 = vld [vmem:[#allocation19 + $0x128] sm:$0xff]  ;;  %v4218_v61 = vadd.f32 %v4214_v40, %v4208_v46  ;;  %v4581_v18 = vadd.f32 %v4577_v45, %v4571_v9  ;;  %v4913_v52 = vld [vmem:[#allocation19 + $0xd8] sm:$0xff] }
 0x5cc   :  { %5863 = vmatprep.subr.bf16.mxu0 %v5862_v24  ;;  %5887 = vmatprep.subr.bf16.mxu1 %v5886_v1  ;;  %v5866_v49 = vpack.c.bf16 %v4911_v29, %v4910_v32  ;;  %v4573_v50 = vadd.f32 %v4569_v39, %v4563_v62  ;;  %v4216_v12 = vadd.f32 %v4212_v31, %v4206_v11  ;;  %v12419_v7 = vmax.f32 %v3906_v26, 0.0  ;;  %v13897_v58 = vld [vmem:[#allocation77_spill] sm:$0xff]  ;;  %v13898_v54 = vld [vmem:[#allocation98_spill] sm:$0xff]  ;;  %v4897_v11 = vld [vmem:[#allocation19 + $0x58] sm:$0xff] }
 0x5cd   :  { %5889 = vmatpush3.bf16.msra.mxu1 %v5888_v43  ;;  %v5892_v14 = vpack.c.bf16 %v4923_v35, %v4922_v20  ;;  %v4231_v30 = vmul.f32 %v4230_v28, %v13897_v58  ;;  %v4234_v55 = vmul.f32 %v4230_v28, %v13898_v54  ;;  %v5868_v46 = vpack.c.bf16 %v4895_v60, %v4894_v48  ;;  %v4896_v39 = vld [vmem:[#allocation19 + $0x50] sm:$0xff]  ;;  %v13899_v24 = vld [vmem:[#allocation53_spill] sm:$0xff]  ;;  %v13903_v35 = vld [vmem:[#allocation36_spill] sm:$0xff] }
 0x5ce   :  { %5865 = vmatpush3.bf16.msra.mxu0 %v5864_v51  ;;  %5891 = vmatprep.subr.bf16.mxu1 %v5890_v23  ;;  %v12423_v9 = vadd.f32 %v4580_v44, %v4574_v17  ;;  %v4217_v40 = vadd.f32 %v4213_v38, %v4207_v5  ;;  %v12425_v62 = vadd.f32 %v4579_v2, %v4573_v50  ;;  %v4940_v45 = vld [vmem:[#allocation19 + $0x1b0] sm:$0xff]  ;;  %v4941_v2 = vld [vmem:[#allocation19 + $0x1b8] sm:$0xff]  ;;  %v4240_v48 = vstv %s12402_s13  ;;  %v4915_v60 = vld [vmem:[#allocation19 + $0xe8] sm:$0xff] }
 0x5cf   :  { %4699 = vrot.lane.b32.xlu1 %v12419_v7, %s13650_s4  ;;  %4683 = vrot.lane.b32.xlu0 %v12278_v27, %s13599_s5  ;;  %v4225_v31 = vadd.f32 %v13899_v24, %v4215_v37  ;;  %v13900_v26 = vld [vmem:[#allocation78_spill] sm:$0xff]  ;;  %v13901_v17 = vld [vmem:[#allocation63_spill] sm:$0xff]  ;;  %v5870_v32 = vpack.c.bf16 %v4913_v52, %v4912_v3  ;;  %v13902_v44 = vld [vmem:[#allocation68_spill] sm:$0xff]  ;;  %v5894_v21 = vpack.c.bf16 %v4941_v2, %v4940_v45  ;;  %v4250_v45 = vstv %s12411_s14 }
 0x5d0   :  { %v12433_v1 = vadd.f32 %v13900_v26, %v4581_v18  ;;  %v4228_v43 = vadd.f32 %v13901_v17, %v4218_v61  ;;  %5867 = vmatprep.subr.bf16.mxu0 %v5866_v49  ;;  %v4924_v29 = vld [vmem:[#allocation19 + $0x130] sm:$0xff]  ;;  %v4925_v5 = vld [vmem:[#allocation19 + $0x138] sm:$0xff]  ;;  %v12438_v51 = vmul.f32 %v13902_v44, %v13897_v58  ;;  %v4914_v37 = vld [vmem:[#allocation19 + $0xe0] sm:$0xff]  ;;  %v4226_v61 = vadd.f32 %v13903_v35, %v4216_v12 }
 0x5d1   :  { %5893 = vmatpush3.bf16.msra.mxu1 %v5892_v14  ;;  %v5896_v38 = vpack.c.bf16 %v4925_v5, %v4924_v29  ;;  %v4235_v23 = vadd.f32 %v4231_v30, %v4225_v31  ;;  %v5872_v18 = vpack.c.bf16 %v4897_v11, %v4896_v39  ;;  %v4898_v49 = vld [vmem:[#allocation19 + $0x60] sm:$0xff]  ;;  %v4899_v50 = vld [vmem:[#allocation19 + $0x68] sm:$0xff]  ;;  %v4232_v58 = vmul.f32 %v4230_v28, %v12022_v13  ;;  %v4916_v26 = vld [vmem:[#allocation19 + $0xf0] sm:$0xff] }
 0x5d2   :  { %v4238_v20 = vadd.f32 %v4234_v55, %v4228_v43  ;;  %5869 = vmatpush3.bf16.msra.mxu0 %v5868_v46  ;;  %v4942_v3 = vld [vmem:[#allocation19 + $0x1c0] sm:$0xff]  ;;  %v4233_v14 = vmul.f32 %v4230_v28, %v12136_v6  ;;  %v4943_v12 = vld [vmem:[#allocation19 + $0x1c8] sm:$0xff]  ;;  %v4244_v46 = vmul.f32 %v4240_v48, %v12179_v36  ;;  %5895 = vmatprep.subr.bf16.mxu1 %v5894_v21  ;;  %v4260_v11 = vstv %s12417_s15  ;;  %v4917_v17 = vld [vmem:[#allocation19 + $0xf8] sm:$0xff] }
 0x5d3   :  { %v13904_v52 = vld [vmem:[#allocation49_spill] sm:$0xff]  ;;  %4719 = vrot.lane.b32.xlu1 %v12361_v41, %s13575_s26  ;;  %4713 = vrot.lane.b32.xlu0 %v12363_v57, %s13575_s26  ;;  %v5898_v39 = vpack.c.bf16 %v4943_v12, %v4942_v3  ;;  %v4241_v13 = vmul.f32 %v4240_v48, %v12154_v47  ;;  %v4243_v28 = vmul.f32 %v4240_v48, %v12182_v8 }
 0x5d4   :  { %v4227_v24 = vadd.f32 %v13904_v52, %v4217_v40  ;;  %v4926_v30 = vld [vmem:[#allocation19 + $0x140] sm:$0xff]  ;;  %v4927_v55 = vld [vmem:[#allocation19 + $0x148] sm:$0xff]  ;;  %5871 = vmatprep.subr.bf16.mxu0 %v5870_v32  ;;  %v5874_v40 = vpack.c.bf16 %v4915_v60, %v4914_v37  ;;  %v4242_v43 = vmul.f32 %v4240_v48, %v12116_v63  ;;  %v4254_v2 = vmul.f32 %v4250_v45, %v12190_v19  ;;  %v4901_v37 = vld [vmem:[#allocation19 + $0x78] sm:$0xff] }
 0x5d5   :  { %5897 = vmatpush3.bf16.msra.mxu1 %v5896_v38  ;;  %v5900_v31 = vpack.c.bf16 %v4927_v55, %v4926_v30  ;;  %v5876_v32 = vpack.c.bf16 %v4899_v50, %v4898_v49  ;;  %v4600_v29 = vmul.f32 %v13902_v44, %v13898_v54  ;;  %v4236_v5 = vadd.f32 %v4232_v58, %v4226_v61  ;;  %v4900_v38 = vld [vmem:[#allocation19 + $0x70] sm:$0xff]  ;;  %v4945_v49 = vld [vmem:[#allocation19 + $0x1d8] sm:$0xff] }
 0x5d6   :  { %5873 = vmatpush3.bf16.msra.mxu0 %v5872_v18  ;;  %5899 = vmatprep.subr.bf16.mxu1 %v5898_v39  ;;  %v4251_v21 = vmul.f32 %v4250_v45, %v12187_v4  ;;  %v4944_v63 = vld [vmem:[#allocation19 + $0x1d0] sm:$0xff]  ;;  %v4237_v48 = vadd.f32 %v4233_v14, %v4227_v24  ;;  %v4248_v60 = vadd.f32 %v4244_v46, %v4238_v20  ;;  %v4929_v61 = vld [vmem:[#allocation19 + $0x158] sm:$0xff]  ;;  %v4946_v14 = vld [vmem:[#allocation19 + $0x1e0] sm:$0xff] }
 0x5d7   :  { %4717 = vrot.lane.b32.xlu1 %v12384_v34, %s13575_s26  ;;  %4681 = vrot.lane.b32.xlu0 %v12292_v59, %s13599_s5  ;;  %v4264_v35 = vmul.f32 %v4260_v11, %v12226_v10  ;;  %v5878_v18 = vpack.c.bf16 %v4917_v17, %v4916_v26  ;;  %v4928_v54 = vld [vmem:[#allocation19 + $0x150] sm:$0xff]  ;;  %v4245_v50 = vadd.f32 %v4241_v13, %v4235_v23  ;;  %v4947_v46 = vld [vmem:[#allocation19 + $0x1e8] sm:$0xff] }
 0x5d8   :  { %5875 = vmatprep.subr.bf16.mxu0 %v5874_v40  ;;  %v4261_v3 = vmul.f32 %v4260_v11, %v12223_v56  ;;  %v5902_v52 = vpack.c.bf16 %v4945_v49, %v4944_v63  ;;  %v5904_v58 = vpack.c.bf16 %v4929_v61, %v4928_v54  ;;  %v4246_v12 = vadd.f32 %v4242_v43, %v4236_v5  ;;  %v4930_v40 = vld [vmem:[#allocation19 + $0x160] sm:$0xff]  ;;  %v4948_v26 = vld [vmem:[#allocation19 + $0x1f0] sm:$0xff] }
 0x5d9   :  { %5901 = vmatpush3.bf16.msra.mxu1 %v5900_v31  ;;  %v4247_v30 = vadd.f32 %v4243_v28, %v4237_v48  ;;  %v4258_v55 = vadd.f32 %v4254_v2, %v4248_v60  ;;  %v5880_v39 = vpack.c.bf16 %v4901_v37, %v4900_v38  ;;  %v4252_v20 = vmul.f32 %v4250_v45, %v12198_v25  ;;  %v4931_v25 = vld [vmem:[#allocation19 + $0x168] sm:$0xff]  ;;  %v13906_v38 = vld [vmem:[#allocation108_spill] sm:$0xff]  ;;  %v4932_v63 = vld [vmem:[#allocation19 + $0x170] sm:$0xff] }
 0x5da   :  { %5877 = vmatpush3.bf16.msra.mxu0 %v5876_v32  ;;  %v4253_v24 = vmul.f32 %v4250_v45, %v12216_v0  ;;  %v4255_v23 = vadd.f32 %v4251_v21, %v4245_v50  ;;  %v4262_v13 = vmul.f32 %v4260_v11, %v12229_v33  ;;  %5903 = vmatprep.subr.bf16.mxu1 %v5902_v52  ;;  %v4949_v45 = vld [vmem:[#allocation19 + $0x1f8] sm:$0xff]  ;;  %v4270_v43 = vstv %s12454_s16  ;;  %v13905_v5 = vld [vmem:[#allocation121_spill] sm:$0xff] }
 0x5db   :  { %4715 = vrot.lane.b32.xlu1 %v12419_v7, %s13575_s26  ;;  %4679 = vrot.lane.b32.xlu0 %v12290_v53, %s13599_s5  ;;  %v4268_v28 = vadd.f32 %v4264_v35, %v4258_v55  ;;  %v5906_v31 = vpack.c.bf16 %v4947_v46, %v4946_v14  ;;  %v4263_v17 = vmul.f32 %v4260_v11, %v12232_v22  ;;  %v4933_v48 = vld [vmem:[#allocation19 + $0x178] sm:$0xff]  ;;  %v13908_v49 = vld [vmem:[#allocation109_spill] sm:$0xff] }
 0x5dc   :  { %5879 = vmatprep.subr.bf16.mxu0 %v5878_v18  ;;  %v4265_v2 = vadd.f32 %v4261_v3, %v4255_v23  ;;  %v5908_v32 = vpack.c.bf16 %v4931_v25, %v4930_v40  ;;  %v4594_v21 = vadd.f32 %v13905_v5, %v12423_v9  ;;  %v4607_v37 = vmul.f32 %v13906_v38, %v12154_v47  ;;  %v13907_v18 = vld [vmem:[#allocation99_spill] sm:$0xff] }
 0x5dd   :  { %5905 = vmatpush3.bf16.msra.mxu1 %v5904_v58  ;;  %v5910_v33 = vpack.c.bf16 %v4949_v45, %v4948_v26  ;;  %v4610_v60 = vmul.f32 %v13906_v38, %v12179_v36  ;;  %v4256_v11 = vadd.f32 %v4252_v20, %v4246_v12  ;;  %v4257_v35 = vadd.f32 %v4253_v24, %v4247_v30  ;;  %v4967_v30 = vld [vmem:[#allocation19 + $0x288] sm:$0xff] }
 0x5de   :  { %5881 = vmatpush3.bf16.msra.mxu0 %v5880_v39  ;;  %5907 = vmatprep.subr.bf16.mxu1 %v5906_v31  ;;  %v4601_v9 = vadd.f32 %v12438_v51, %v12433_v1  ;;  %v4604_v47 = vadd.f32 %v4600_v29, %v4594_v21  ;;  %v4589_v54 = vmul.f32 %v13908_v49, %v13907_v18  ;;  %v4636_v26 = vstv %s12493_s17 }
 0x5df   :  { %4735 = vrot.lane.b32.xlu1 %v12361_v41, %s13599_s5  ;;  %4729 = vrot.lane.b32.xlu0 %v12363_v57, %s13599_s5  ;;  %v4274_v61 = vadd.f32 %v4270_v43, %v4268_v28  ;;  %v4271_v50 = vadd.f32 %v4270_v43, %v4265_v2  ;;  %v4266_v3 = vadd.f32 %v4262_v13, %v4256_v11 }
 0x5e0   :  { %v4267_v52 = vadd.f32 %v4263_v17, %v4257_v35  ;;  %v5912_v36 = vpack.c.bf16 %v4933_v48, %v4932_v63  ;;  %v4593_v58 = vadd.f32 %v4589_v54, %v12425_v62  ;;  %v4599_v55 = vmul.f32 %v13902_v44, %v12136_v6  ;;  %v4966_v62 = vld [vmem:[#allocation19 + $0x280] sm:$0xff] }
 0x5e1   :  { %5909 = vmatpush3.bf16.msra.mxu1 %v5908_v32  ;;  %v4611_v12 = vadd.f32 %v4607_v37, %v4601_v9  ;;  %v4614_v1 = vadd.f32 %v4610_v60, %v4604_v47  ;;  %v4617_v51 = vmul.f32 %v12300_v15, %v12187_v4  ;;  %v4620_v29 = vmul.f32 %v12300_v15, %v12190_v19 }
 0x5e2   :  { %5911 = vmatprep.subr.bf16.mxu1 %v5910_v33  ;;  %v4609_v6 = vmul.f32 %v13906_v38, %v12182_v8  ;;  %v4627_v44 = vmul.f32 %v12313_v42, %v12223_v56  ;;  %v4630_v4 = vmul.f32 %v12313_v42, %v12226_v10  ;;  %v5914_v39 = vpack.c.bf16 %v4967_v30, %v4966_v62  ;;  %v13909_v38 = vld [vmem:[#allocation112_spill] sm:$0xff] }
 0x5e3   :  { %4731 = vrot.lane.b32.xlu1 %v12419_v7, %s13599_s5  ;;  %4733 = vrot.lane.b32.xlu0 %v12384_v34, %s13599_s5  ;;  %v12509_v20 = vmax.f32 %v4274_v61, 0.0  ;;  %v12511_v19 = vmax.f32 %v4271_v50, 0.0  ;;  %v4272_v24 = vadd.f32 %v4270_v43, %v4266_v3  ;;  %v4273_v23 = vadd.f32 %v4270_v43, %v4267_v52 }
 0x5e4   :  { %v4603_v14 = vadd.f32 %v4599_v55, %v4593_v58  ;;  %5915 = vmatprep.subr.bf16.mxu0 %v5914_v39  ;;  %v4619_v8 = vmul.f32 %v12300_v15, %v12216_v0  ;;  %v4624_v56 = vadd.f32 %v4620_v29, %v4614_v1  ;;  %v4621_v10 = vadd.f32 %v4617_v51, %v4611_v12 }
 0x5e5   :  { %5913 = vmatpush3.bf16.msra.mxu1 %v5912_v36  ;;  %v4629_v40 = vmul.f32 %v12313_v42, %v12232_v22  ;;  %v12521_v13 = vmax.f32 %v4272_v24, 0.0  ;;  %v12523_v28 = vmax.f32 %v4273_v23, 0.0  ;;  %v4998_v22 = vld [vmem:[#allocation19 + $0x380] sm:$0xff]  ;;  %v4999_v42 = vld [vmem:[#allocation19 + $0x388] sm:$0xff]  ;;  %v4638_v37 = vadd.f32 %v4636_v26, %v13909_v38 }
 0x5e6   :  { %v4613_v46 = vadd.f32 %v4609_v6, %v4603_v14  ;;  %v4634_v31 = vadd.f32 %v4630_v4, %v4624_v56  ;;  %v4631_v25 = vadd.f32 %v4627_v44, %v4621_v10  ;;  %v5946_v5 = vpack.c.bf16 %v4999_v42, %v4998_v22 }
 0x5e7   :  { %4755 = vrot.lane.b32.xlu1 %v12509_v20, %s13650_s4  ;;  %4749 = vrot.lane.b32.xlu0 %v12511_v19, %s13650_s4  ;;  %v12553_v33 = vmax.f32 %v4638_v37, 0.0 }
 0x5e8   :  { %v4623_v0 = vadd.f32 %v4619_v8, %v4613_v46  ;;  %v4640_v15 = vadd.f32 %v4636_v26, %v4634_v31  ;;  %v4637_v45 = vadd.f32 %v4636_v26, %v4631_v25  ;;  %5947 = vmatprep.subr.bf16.mxu1 %v5946_v5 }
 0x5ea   :  { %v4633_v17 = vadd.f32 %v4629_v40, %v4623_v0  ;;  %v12534_v43 = vmax.f32 %v4640_v15, 0.0  ;;  %v12536_v2 = vmax.f32 %v4637_v45, 0.0  ;;  %v4950_v0 = vld [vmem:[#allocation19 + $0x200] sm:$0xff]  ;;  %v4951_v15 = vld [vmem:[#allocation19 + $0x208] sm:$0xff] }
 0x5eb   :  { %4751 = vrot.lane.b32.xlu1 %v12521_v13, %s13650_s4  ;;  %4753 = vrot.lane.b32.xlu0 %v12523_v28, %s13650_s4 }
 0x5ec   :  { %v4639_v32 = vadd.f32 %v4636_v26, %v4633_v17 }
 0x5ee   :  { %v12542_v21 = vmax.f32 %v4639_v32, 0.0 }
 0x5ef   :  { %4771 = vrot.lane.b32.xlu1 %v12509_v20, %s13575_s26  ;;  %4765 = vrot.lane.b32.xlu0 %v12511_v19, %s13575_s26 }
 0x5f3   :  { %4807 = vrot.lane.b32.xlu1 %v12534_v43, %s13650_s4  ;;  %4801 = vrot.lane.b32.xlu0 %v12536_v2, %s13650_s4 }
 0x5f7   :  { %4805 = vrot.lane.b32.xlu1 %v12542_v21, %s13650_s4  ;;  %4769 = vrot.lane.b32.xlu0 %v12523_v28, %s13575_s26 }
 0x5fb   :  { %4781 = vrot.lane.b32.xlu1 %v12511_v19, %s13599_s5  ;;  %4767 = vrot.lane.b32.xlu0 %v12521_v13, %s13575_s26 }
 0x5ff   :  { %4803 = vrot.lane.b32.xlu1 %v12553_v33, %s13650_s4  ;;  %4787 = vrot.lane.b32.xlu0 %v12509_v20, %s13599_s5  ;;  %s13911_s4 = sld [smem:[#allocation150_spill]] }
 0x603   :  { %4823 = vrot.lane.b32.xlu1 %v12534_v43, %s13575_s26  ;;  %4817 = vrot.lane.b32.xlu0 %v12536_v2, %s13575_s26 }
 0x605   :  { %v5303_v3 = vld [vmem:[%s13911_s4 + $0x8] sm:$0xff] }
 0x607   :  { %4821 = vrot.lane.b32.xlu1 %v12542_v21, %s13575_s26  ;;  %4785 = vrot.lane.b32.xlu0 %v12523_v28, %s13599_s5 }
 0x60b   :  { %4819 = vrot.lane.b32.xlu1 %v12553_v33, %s13575_s26  ;;  %4783 = vrot.lane.b32.xlu0 %v12521_v13, %s13599_s5 }
 0x60f   :  { %4839 = vrot.lane.b32.xlu1 %v12534_v43, %s13599_s5  ;;  %4833 = vrot.lane.b32.xlu0 %v12536_v2, %s13599_s5 }
 0x613   :  { %4835 = vrot.lane.b32.xlu1 %v12553_v33, %s13599_s5  ;;  %4837 = vrot.lane.b32.xlu0 %v12542_v21, %s13599_s5 }
 0x629   :  { %v4652_v63 = vpop.permute.xlu1 %4651  ;;  %v4646_v48 = vpop.permute.xlu0 %4645 }
 0x62a   :  { %v4656_v52 = vsel %vm1653_vm12, %v4652_v63, %v4646_v48 }
 0x62b   :  { %v4660_v12 = vadd.f32 %v4656_v52, %v12278_v27 }
 0x62d   :  { %v4648_v60 = vpop.permute.xlu1 %4647  ;;  %v4650_v11 = vpop.permute.xlu0 %4649 }
 0x62e   :  { %v4653_v1 = vsel %vm1653_vm12, %v4650_v11, %v4652_v63  ;;  %v4655_v4 = vsel %vm1653_vm12, %v4646_v48, %v4648_v60  ;;  %v4654_v27 = vsel %vm1653_vm12, %v4648_v60, %v4650_v11  ;;  %v5916_v48 = vpack.c.bf16 %v4951_v15, %v4950_v0  ;;  %v4982_v15 = vld [vmem:[#allocation19 + $0x300] sm:$0xff] }
 0x62f   :  { %v4659_v44 = vadd.f32 %v4653_v1, %v12292_v59  ;;  %v4657_v10 = vadd.f32 %v4655_v4, %v12276_v16  ;;  %v4658_v40 = vadd.f32 %v4654_v27, %v12290_v53  ;;  %v4953_v4 = vld [vmem:[#allocation19 + $0x218] sm:$0xff] }
 0x631   :  { %v4668_v35 = vpop.permute.xlu1 %4667  ;;  %v4662_v9 = vpop.permute.xlu0 %4661 }
 0x632   :  { %v4672_v55 = vsel %vm1729_vm14, %v4668_v35, %v4662_v9 }
 0x633   :  { %v4676_v30 = vadd.f32 %v4672_v55, %v4660_v12 }
 0x635   :  { %v4704_v47 = vpop.permute.xlu1 %4703  ;;  %v4698_v18 = vpop.permute.xlu0 %4697 }
 0x636   :  { %v4708_v31 = vsel %vm1653_vm12, %v4704_v47, %v4698_v18 }
 0x637   :  { %v4712_v38 = vadd.f32 %v4708_v31, %v12361_v41 }
 0x639   :  { %v4702_v49 = vpop.permute.xlu1 %4701  ;;  %v4666_v54 = vpop.permute.xlu0 %4665 }
 0x63a   :  { %v4669_v6 = vsel %vm1729_vm14, %v4666_v54, %v4668_v35  ;;  %v4705_v25 = vsel %vm1653_vm12, %v4702_v49, %v4704_v47 }
 0x63b   :  { %v4675_v24 = vadd.f32 %v4669_v6, %v4659_v44  ;;  %v4711_v37 = vadd.f32 %v4705_v25, %v12384_v34  ;;  %v4969_v34 = vld [vmem:[#allocation19 + $0x298] sm:$0xff]  ;;  %v4952_v44 = vld [vmem:[#allocation19 + $0x210] sm:$0xff]  ;;  %v4954_v25 = vld [vmem:[#allocation19 + $0x220] sm:$0xff] }
 0x63c   :  { %v5920_v31 = vpack.c.bf16 %v4953_v4, %v4952_v44  ;;  %v4986_v44 = vld [vmem:[#allocation19 + $0x320] sm:$0xff]  ;;  %v4987_v4 = vld [vmem:[#allocation19 + $0x328] sm:$0xff] }
 0x63d   :  { %v4678_v61 = vpop.permute.xlu1 %4677  ;;  %v4664_v50 = vpop.permute.xlu0 %4663 }
 0x63e   :  { %v4671_v8 = vsel %vm1729_vm14, %v4662_v9, %v4664_v50  ;;  %v4670_v59 = vsel %vm1729_vm14, %v4664_v50, %v4666_v54 }
 0x63f   :  { %v4673_v45 = vadd.f32 %v4671_v8, %v4657_v10  ;;  %v4674_v16 = vadd.f32 %v4670_v59, %v4658_v40  ;;  %v4970_v8 = vld [vmem:[#allocation19 + $0x2a0] sm:$0xff] }
 0x641   :  { %v4700_v36 = vpop.permute.xlu1 %4699  ;;  %v4684_v58 = vpop.permute.xlu0 %4683 }
 0x642   :  { %v4688_v51 = vsel %vm1767_vm15, %v4684_v58, %v4678_v61  ;;  %v4706_v60 = vsel %vm1653_vm12, %v4700_v36, %v4702_v49  ;;  %v4707_v11 = vsel %vm1653_vm12, %v4698_v18, %v4700_v36 }
 0x643   :  { %v4692_v39 = vadd.f32 %v4688_v51, %v4676_v30  ;;  %v4709_v36 = vadd.f32 %v4707_v11, %v12363_v57  ;;  %v4710_v1 = vadd.f32 %v4706_v60, %v12419_v7 }
 0x645   :  { %v4720_v29 = vpop.permute.xlu1 %4719  ;;  %v4714_v62 = vpop.permute.xlu0 %4713  ;;  %v4696_v26 = vmul.f32 0.25, %v4692_v39 }
 0x646   :  { %v4724_v32 = vsel %vm1729_vm14, %v4720_v29, %v4714_v62 }
 0x647   :  { %v4862_v35 = vrot.slane %v4696_v26, 7  ;;  %v4728_v47 = vadd.f32 %v4724_v32, %v4712_v38  ;;  %v4955_v26 = vld [vmem:[#allocation19 + $0x228] sm:$0xff]  ;;  %v5000_v38 = vld [vmem:[#allocation19 + $0x390] sm:$0xff] }
 0x649   :  { %v4718_v23 = vpop.permute.xlu1 %4717  ;;  %v4682_v14 = vpop.permute.xlu0 %4681 }
 0x64a   :  { %v4685_v56 = vsel %vm1767_vm15, %v4682_v14, %v4684_v58  ;;  %v4721_v54 = vsel %vm1729_vm14, %v4718_v23, %v4720_v29  ;;  %v4968_v58 = vld [vmem:[#allocation19 + $0x290] sm:$0xff] }
 0x64b   :  { %v4691_v46 = vadd.f32 %v4685_v56, %v4675_v24  ;;  %v5918_v6 = vpack.c.bf16 %v4969_v34, %v4968_v58  ;;  %v4727_v39 = vadd.f32 %v4721_v54, %v4711_v37  ;;  %v4971_v56 = vld [vmem:[#allocation19 + $0x2a8] sm:$0xff]  ;;  %v5001_v37 = vld [vmem:[#allocation19 + $0x398] sm:$0xff] }
 0x64c   :  { %v5922_v0 = vpack.c.bf16 %v4971_v56, %v4970_v8  ;;  %v5956_v56 = vpack.c.bf16 %v4987_v4, %v4986_v44  ;;  %v4994_v44 = vld [vmem:[#allocation19 + $0x360] sm:$0xff]  ;;  %v4995_v4 = vld [vmem:[#allocation19 + $0x368] sm:$0xff] }
 0x64d   :  { %v4695_v17 = vmul.f32 0.25, %v4691_v46  ;;  %v4716_v22 = vpop.permute.xlu1 %4715  ;;  %v4680_v42 = vpop.permute.xlu0 %4679 }
 0x64e   :  { %v4686_v53 = vsel %vm1767_vm15, %v4680_v42, %v4682_v14  ;;  %v4687_v5 = vsel %vm1767_vm15, %v4678_v61, %v4680_v42  ;;  %v4722_v55 = vsel %vm1729_vm14, %v4716_v22, %v4718_v23  ;;  %v4723_v49 = vsel %vm1729_vm14, %v4714_v62, %v4716_v22 }
 0x64f   :  { %v4689_v63 = vadd.f32 %v4687_v5, %v4673_v45  ;;  %v4690_v9 = vadd.f32 %v4686_v53, %v4674_v16  ;;  %v4861_v50 = vrot.slane %v4695_v17, 7  ;;  %v4725_v27 = vadd.f32 %v4723_v49, %v4709_v36  ;;  %v4983_v45 = vld [vmem:[#allocation19 + $0x308] sm:$0xff]  ;;  %v4972_v17 = vld [vmem:[#allocation19 + $0x2b0] sm:$0xff]  ;;  %v4973_v5 = vld [vmem:[#allocation19 + $0x2b8] sm:$0xff] }
 0x650   :  { %v4726_v24 = vadd.f32 %v4722_v55, %v4710_v1  ;;  %v5926_v54 = vpack.c.bf16 %v4973_v5, %v4972_v17  ;;  %v4975_v49 = vld [vmem:[#allocation19 + $0x2c8] sm:$0xff] }
 0x651   :  { %v4693_v61 = vmul.f32 0.25, %v4689_v63  ;;  %v4736_v52 = vpop.permute.xlu1 %4735  ;;  %v4730_v41 = vpop.permute.xlu0 %4729  ;;  %v4694_v12 = vmul.f32 0.25, %v4690_v9  ;;  %v5924_v63 = vpack.c.bf16 %v4955_v26, %v4954_v25  ;;  %v4956_v9 = vld [vmem:[#allocation19 + $0x230] sm:$0xff] }
 0x652   :  { %v4740_v18 = vsel %vm1767_vm15, %v4736_v52, %v4730_v41 }
 0x653   :  { %v4744_v51 = vadd.f32 %v4740_v18, %v4728_v47  ;;  %v4878_v29 = vsel %vm4877_vm0, %v4693_v61, %v4861_v50  ;;  %v4879_v30 = vsel %vm4877_vm0, %v4694_v12, %v4862_v35  ;;  %v5948_v35 = vpack.c.bf16 %v4983_v45, %v4982_v15  ;;  %v4957_v47 = vld [vmem:[#allocation19 + $0x238] sm:$0xff]  ;;  %v4984_v61 = vld [vmem:[#allocation19 + $0x310] sm:$0xff]  ;;  %v5002_v12 = vld [vmem:[#allocation19 + $0x3a0] sm:$0xff] }
 0x654   :  { %5085 = vmatprep.mubr.f32.mxu0 %v4879_v30  ;;  %v5950_v50 = vpack.c.bf16 %v5001_v37, %v5000_v38  ;;  %v5003_v18 = vld [vmem:[#allocation19 + $0x3a8] sm:$0xff]  ;;  %v5928_v36 = vpack.c.bf16 %v4957_v47, %v4956_v9  ;;  %v5006_v15 = vld [vmem:[#allocation19 + $0x3c0] sm:$0xff]  ;;  %v5008_v9 = vld [vmem:[#allocation19 + $0x3d0] sm:$0xff] }
 0x655   :  { %v4748_v62 = vmul.f32 0.25, %v4744_v51  ;;  %v4732_v23 = vpop.permute.xlu1 %4731  ;;  %v4734_v14 = vpop.permute.xlu0 %4733  ;;  %5086 = vmatmul.mubr.f32.vlgmr.msra.gmra.mrb[0].mxu0 %v4878_v29  ;;  %v4958_v51 = vld [vmem:[#allocation19 + $0x240] sm:$0xff]  ;;  %v4959_v29 = vld [vmem:[#allocation19 + $0x248] sm:$0xff]  ;;  %v5009_v47 = vld [vmem:[#allocation19 + $0x3d8] sm:$0xff] }
 0x656   :  { %v4739_v57 = vsel %vm1767_vm15, %v4730_v41, %v4732_v23  ;;  %v4737_v7 = vsel %vm1767_vm15, %v4734_v14, %v4736_v52  ;;  %v4738_v10 = vsel %vm1767_vm15, %v4732_v23, %v4734_v14  ;;  %5917 = vmatpush3.bf16.msra.mxu0 %v5916_v48  ;;  %v4985_v52 = vld [vmem:[#allocation19 + $0x318] sm:$0xff]  ;;  %v4974_v41 = vld [vmem:[#allocation19 + $0x2c0] sm:$0xff]  ;;  %v5004_v23 = vld [vmem:[#allocation19 + $0x3b0] sm:$0xff]  ;;  %v5932_v8 = vpack.c.bf16 %v4959_v29, %v4958_v51 }
 0x657   :  { %v4741_v59 = vadd.f32 %v4739_v57, %v4725_v27  ;;  %v4742_v46 = vadd.f32 %v4738_v10, %v4726_v24  ;;  %v4743_v40 = vadd.f32 %v4737_v7, %v4727_v39  ;;  %5919 = vmatprep.subr.bf16.mxu0 %v5918_v6  ;;  %v4864_v22 = vrot.slane %v4748_v62, 7  ;;  %v4976_v39 = vld [vmem:[#allocation19 + $0x2d0] sm:$0xff]  ;;  %v4977_v62 = vld [vmem:[#allocation19 + $0x2d8] sm:$0xff]  ;;  %v5007_v45 = vld [vmem:[#allocation19 + $0x3c8] sm:$0xff] }
 0x658   :  { %v5952_v1 = vpack.c.bf16 %v4985_v52, %v4984_v61  ;;  %v5930_v30 = vpack.c.bf16 %v4975_v49, %v4974_v41  ;;  %v5954_v6 = vpack.c.bf16 %v5003_v18, %v5002_v12  ;;  %v5005_v14 = vld [vmem:[#allocation19 + $0x3b8] sm:$0xff]  ;;  %v4960_v57 = vld [vmem:[#allocation19 + $0x250] sm:$0xff]  ;;  %v5934_v10 = vpack.c.bf16 %v4977_v62, %v4976_v39  ;;  %v4990_v37 = vld [vmem:[#allocation19 + $0x340] sm:$0xff] }
 0x659   :  { %v4746_v42 = vmul.f32 0.25, %v4742_v46  ;;  %v4747_v16 = vmul.f32 0.25, %v4743_v40  ;;  %v12637_v32 = vpop.permute.xlu1 %4755  ;;  %v12639_v53 = vpop.permute.xlu0 %4749  ;;  %v4745_v48 = vmul.f32 0.25, %v4741_v59  ;;  %v4961_v7 = vld [vmem:[#allocation19 + $0x258] sm:$0xff]  ;;  %v5958_v59 = vpack.c.bf16 %v5005_v14, %v5004_v23  ;;  %v4988_v46 = vld [vmem:[#allocation19 + $0x330] sm:$0xff]  ;;  %v5011_v51 = vld [vmem:[#allocation19 + $0x3e8] sm:$0xff] }
 0x65a   :  { %5921 = vmatpush3.bf16.msra.mxu0 %v5920_v31  ;;  %v4989_v40 = vld [vmem:[#allocation19 + $0x338] sm:$0xff]  ;;  %v4978_v31 = vld [vmem:[#allocation19 + $0x2e0] sm:$0xff]  ;;  %v5936_v17 = vpack.c.bf16 %v4961_v7, %v4960_v57  ;;  %v5962_v38 = vpack.c.bf16 %v5007_v45, %v5006_v15  ;;  %v4964_v61 = vld [vmem:[#allocation19 + $0x270] sm:$0xff]  ;;  %v4760_v39 = vsel %vm1653_vm12, %v12637_v32, %v12639_v53  ;;  %v5972_v57 = vpack.c.bf16 %v4995_v4, %v4994_v44 }
 0x65b   :  { %v4863_v60 = vrot.slane %v4747_v16, 7  ;;  %v4881_v11 = vsel %vm4877_vm0, %v4746_v42, %v4864_v22  ;;  %5923 = vmatprep.subr.bf16.mxu0 %v5922_v0  ;;  %v4979_v0 = vld [vmem:[#allocation19 + $0x2e8] sm:$0xff]  ;;  %v5960_v22 = vpack.c.bf16 %v4989_v40, %v4988_v46  ;;  %v4962_v42 = vld [vmem:[#allocation19 + $0x260] sm:$0xff]  ;;  %v4965_v41 = vld [vmem:[#allocation19 + $0x278] sm:$0xff]  ;;  %v4764_v7 = vadd.f32 %v4760_v39, %v12509_v20 }
 0x65c   :  { %5155 = vmatprep.mubr.f32.mxu1 %v4881_v11  ;;  %v4963_v16 = vld [vmem:[#allocation19 + $0x268] sm:$0xff]  ;;  %v5938_v5 = vpack.c.bf16 %v4979_v0, %v4978_v31  ;;  %v4992_v49 = vld [vmem:[#allocation19 + $0x350] sm:$0xff]  ;;  %v4993_v12 = vld [vmem:[#allocation19 + $0x358] sm:$0xff]  ;;  %v5944_v29 = vpack.c.bf16 %v4965_v41, %v4964_v61 }
 0x65d   :  { %v12642_v58 = vpop.permute.xlu1 %4751  ;;  %v12644_v34 = vpop.permute.xlu0 %4753  ;;  %v4880_v55 = vsel %vm4877_vm0, %v4745_v48, %v4863_v60  ;;  %v4980_v48 = vld [vmem:[#allocation19 + $0x2f0] sm:$0xff]  ;;  %v4997_v40 = vld [vmem:[#allocation19 + $0x378] sm:$0xff] }
 0x65e   :  { %5156 = vmatmul.mubr.f32.vlgmr.msra.gmra.mrb[0].mxu1 %v4880_v55  ;;  %5925 = vmatpush3.bf16.msra.mxu0 %v5924_v63  ;;  %v4991_v63 = vld [vmem:[#allocation19 + $0x348] sm:$0xff]  ;;  %v5966_v55 = vpack.c.bf16 %v5009_v47, %v5008_v9  ;;  %v5012_v14 = vld [vmem:[#allocation19 + $0x3f0] sm:$0xff] }
 0x65f   :  { %5949 = vmatpush3.bf16.msra.mxu1 %v5948_v35  ;;  %5927 = vmatprep.subr.bf16.mxu0 %v5926_v54  ;;  %v4981_v35 = vld [vmem:[#allocation19 + $0x2f8] sm:$0xff]  ;;  %v5940_v54 = vpack.c.bf16 %v4963_v16, %v4962_v42  ;;  %v4996_v46 = vld [vmem:[#allocation19 + $0x370] sm:$0xff]  ;;  %v4758_v16 = vsel %vm1653_vm12, %v12642_v58, %v12644_v34 }
 0x660   :  { %5951 = vmatprep.subr.bf16.mxu1 %v5950_v50  ;;  %v5964_v50 = vpack.c.bf16 %v4991_v63, %v4990_v37  ;;  %v5942_v52 = vpack.c.bf16 %v4981_v35, %v4980_v48 }
 0x661   :  { %v12647_v27 = vpop.permute.xlu1 %4771  ;;  %v12649_v24 = vpop.permute.xlu0 %4765 }
 0x662   :  { %5929 = vmatpush3.bf16.msra.mxu0 %v5928_v36 }
 0x663   :  { %5953 = vmatpush3.bf16.msra.mxu1 %v5952_v1  ;;  %5931 = vmatprep.subr.bf16.mxu0 %v5930_v30  ;;  %v5010_v1 = vld [vmem:[#allocation19 + $0x3e0] sm:$0xff]  ;;  %v5968_v30 = vpack.c.bf16 %v4993_v12, %v4992_v49 }
 0x664   :  { %5955 = vmatprep.subr.bf16.mxu1 %v5954_v6  ;;  %v5970_v6 = vpack.c.bf16 %v5011_v51, %v5010_v1 }
 0x665   :  { %v12651_v25 = vpop.permute.xlu1 %4807  ;;  %v12653_v26 = vpop.permute.xlu0 %4801 }
 0x666   :  { %5933 = vmatpush3.bf16.msra.mxu0 %v5932_v8  ;;  %v5013_v8 = vld [vmem:[#allocation19 + $0x3f8] sm:$0xff] }
 0x667   :  { %5957 = vmatpush3.bf16.msra.mxu1 %v5956_v56  ;;  %5935 = vmatprep.subr.bf16.mxu0 %v5934_v10  ;;  %v4776_v56 = vsel %vm1729_vm14, %v12647_v27, %v12649_v24  ;;  %v4757_v10 = vsel %vm1653_vm12, %v12644_v34, %v12637_v32  ;;  %v4759_v32 = vsel %vm1653_vm12, %v12639_v53, %v12642_v58 }
 0x668   :  { %5959 = vmatprep.subr.bf16.mxu1 %v5958_v59  ;;  %v5974_v59 = vpack.c.bf16 %v5013_v8, %v5012_v14  ;;  %v4780_v45 = vadd.f32 %v4776_v56, %v4764_v7  ;;  %v4761_v63 = vadd.f32 %v4759_v32, %v12511_v19  ;;  %v4762_v58 = vadd.f32 %v4758_v16, %v12521_v13  ;;  %v5304_v16 = vld [vmem:[%s13911_s4 + $0x10] sm:$0xff] }
 0x669   :  { %v12655_v60 = vpop.permute.xlu1 %4805  ;;  %v12657_v11 = vpop.permute.xlu0 %4769  ;;  %v4812_v34 = vsel %vm1653_vm12, %v12651_v25, %v12653_v26 }
 0x66a   :  { %5937 = vmatpush3.bf16.msra.mxu0 %v5936_v17  ;;  %v4773_v20 = vsel %vm1729_vm14, %v12657_v11, %v12647_v27  ;;  %v4763_v17 = vadd.f32 %v4757_v10, %v12523_v28 }
 0x66b   :  { %5961 = vmatpush3.bf16.msra.mxu1 %v5960_v22  ;;  %5939 = vmatprep.subr.bf16.mxu0 %v5938_v5  ;;  %v5976_v22 = vpack.c.bf16 %v4997_v40, %v4996_v46 }
 0x66c   :  { %5963 = vmatprep.subr.bf16.mxu1 %v5962_v38  ;;  %v4779_v5 = vadd.f32 %v4773_v20, %v4763_v17 }
 0x66d   :  { %v4782_v18 = vpop.permute.xlu1 %4781  ;;  %v4768_v36 = vpop.permute.xlu0 %4767 }
 0x66e   :  { %5941 = vmatpush3.bf16.msra.mxu0 %v5940_v54  ;;  %v4775_v28 = vsel %vm1729_vm14, %v12649_v24, %v4768_v36  ;;  %v4774_v53 = vsel %vm1729_vm14, %v4768_v36, %v12657_v11  ;;  %v4809_v24 = vsel %vm1653_vm12, %v12655_v60, %v12651_v25 }
 0x66f   :  { %5965 = vmatpush3.bf16.msra.mxu1 %v5964_v50  ;;  %5943 = vmatprep.subr.bf16.mxu0 %v5942_v52  ;;  %v4777_v19 = vadd.f32 %v4775_v28, %v4761_v63  ;;  %v4778_v11 = vadd.f32 %v4774_v53, %v4762_v58  ;;  %v4816_v52 = vadd.f32 %v4812_v34, %v12534_v43  ;;  %v6214_v28 = vmov 0.0   ;;  %v5692_v58 = vld [vmem:[%s13912_s24] ss:$0 sm:$0xff] }
 0x670   :  { %5967 = vmatprep.subr.bf16.mxu1 %v5966_v55  ;;  %v4815_v41 = vadd.f32 %v4809_v24, %v12542_v21 }
 0x671   :  { %v4804_v62 = vpop.permute.xlu1 %4803  ;;  %v4788_v23 = vpop.permute.xlu0 %4787 }
 0x672   :  { %5945 = vmatpush3.bf16.msra.mxu0 %v5944_v29  ;;  %v4792_v31 = vsel %vm1767_vm15, %v4788_v23, %v4782_v18  ;;  %v4810_v55 = vsel %vm1653_vm12, %v4804_v62, %v12655_v60  ;;  %v4811_v49 = vsel %vm1653_vm12, %v12653_v26, %v4804_v62 }
 0x673   :  { %5969 = vmatpush3.bf16.msra.mxu1 %v5968_v30  ;;  %v4796_v42 = vadd.f32 %v4792_v31, %v4780_v45  ;;  %v4813_v44 = vadd.f32 %v4811_v49, %v12536_v2  ;;  %v4814_v4 = vadd.f32 %v4810_v55, %v12553_v33 }
 0x674   :  { %5971 = vmatprep.subr.bf16.mxu1 %v5970_v6 }
 0x675   :  { %v4824_v0 = vpop.permute.xlu1 %4823  ;;  %v4818_v15 = vpop.permute.xlu0 %4817  ;;  %v4800_v35 = vmul.f32 0.25, %v4796_v42  ;;  %v5302_v42 = vld [vmem:[%s13911_s4] sm:$0xff] }
 0x676   :  { %v4828_v50 = vsel %vm1729_vm14, %v4824_v0, %v4818_v15 }
 0x677   :  { %5973 = vmatpush3.bf16.msra.mxu1 %v5972_v57  ;;  %v4866_v12 = vrot.slane %v4800_v35, 7  ;;  %v4832_v1 = vadd.f32 %v4828_v50, %v4816_v52 }
 0x678   :  { %5975 = vmatprep.subr.bf16.mxu1 %v5974_v59 }
 0x679   :  { %v4822_v38 = vpop.permute.xlu1 %4821  ;;  %v4786_v37 = vpop.permute.xlu0 %4785 }
 0x67a   :  { %v4789_v27 = vsel %vm1767_vm15, %v4786_v37, %v4788_v23  ;;  %v4825_v51 = vsel %vm1729_vm14, %v4822_v38, %v4824_v0 }
 0x67b   :  { %v4795_v48 = vadd.f32 %v4789_v27, %v4779_v5  ;;  %5977 = vmatpush3.bf16.msra.mxu1 %v5976_v22  ;;  %v4831_v14 = vadd.f32 %v4825_v51, %v4815_v41  ;;  %v6212_v5 = vmov 0.0|0.0  }
 0x67c   :  { %5978 = vmatprep.subr.bf16.mxu0 %v6212_v5 }
 0x67d   :  { %v4799_v9 = vmul.f32 0.25, %v4795_v48  ;;  %v4820_v47 = vpop.permute.xlu1 %4819  ;;  %v4784_v54 = vpop.permute.xlu0 %4783 }
 0x67e   :  { %v4790_v13 = vsel %vm1767_vm15, %v4784_v54, %v4786_v37  ;;  %v4791_v61 = vsel %vm1767_vm15, %v4782_v18, %v4784_v54  ;;  %v4826_v21 = vsel %vm1729_vm14, %v4820_v47, %v4822_v38  ;;  %v4827_v60 = vsel %vm1729_vm14, %v4818_v15, %v4820_v47  ;;  %v5305_v37 = vld [vmem:[%s13911_s4 + $0x18] sm:$0xff] }
 0x67f   :  { %v4793_v25 = vadd.f32 %v4791_v61, %v4777_v19  ;;  %v4794_v36 = vadd.f32 %v4790_v13, %v4778_v11  ;;  %v4865_v18 = vrot.slane %v4799_v9, 7  ;;  %v4829_v8 = vadd.f32 %v4827_v60, %v4813_v44 }
 0x680   :  { %v4830_v56 = vadd.f32 %v4826_v21, %v4814_v4  ;;  %v5979_v38 = vpack.c.bf16 %v5303_v3, %v5302_v42  ;;  %v5982_v27 = vpack.c.bf16 %v5305_v37, %v5304_v16 }
 0x681   :  { %v4797_v29 = vmul.f32 0.25, %v4793_v25  ;;  %v4840_v43 = vpop.permute.xlu1 %4839  ;;  %v4834_v30 = vpop.permute.xlu0 %4833  ;;  %v4798_v6 = vmul.f32 0.25, %v4794_v36 }
 0x682   :  { %v4844_v26 = vsel %vm1767_vm15, %v4840_v43, %v4834_v30 }
 0x683   :  { %v4848_v39 = vadd.f32 %v4844_v26, %v4832_v1  ;;  %v4882_v62 = vsel %vm4877_vm0, %v4797_v29, %v4865_v18  ;;  %v4883_v23 = vsel %vm4877_vm0, %v4798_v6, %v4866_v12 }
 0x684   :  { %5225 = vmatprep.mubr.f32.mxu0 %v4883_v23 }
 0x685   :  { %v4852_v57 = vmul.f32 0.25, %v4848_v39  ;;  %v4836_v7 = vpop.permute.xlu1 %4835  ;;  %v4838_v10 = vpop.permute.xlu0 %4837  ;;  %5226 = vmatmul.mubr.f32.vlgmr.msra.gmra.mrb[2].mxu0 %v4882_v62 }
 0x686   :  { %v4843_v59 = vsel %vm1767_vm15, %v4834_v30, %v4836_v7  ;;  %v4841_v2 = vsel %vm1767_vm15, %v4838_v10, %v4840_v43  ;;  %v4842_v33 = vsel %vm1767_vm15, %v4836_v7, %v4838_v10  ;;  %5847 = vmatprep.mubr.msk.f32.mxu0 %vm6213_vm1, %v6214_v28  ;;  %5980 = vmatpush3.bf16.msra.mxu0 %v5979_v38 }
 0x687   :  { %v4845_v46 = vadd.f32 %v4843_v59, %v4829_v8  ;;  %v4846_v40 = vadd.f32 %v4842_v33, %v4830_v56  ;;  %v4847_v31 = vadd.f32 %v4841_v2, %v4831_v14  ;;  %v4868_v0 = vrot.slane %v4852_v57, 7  ;;  %5981 = vmatprep.subr.bf16.mxu0 %v6212_v5 }
 0x689   :  { %v4850_v15 = vmul.f32 0.25, %v4846_v40  ;;  %v4851_v45 = vmul.f32 0.25, %v4847_v31  ;;  %v4849_v20 = vmul.f32 0.25, %v4845_v46 }
 0x68a   :  { %5983 = vmatpush3.bf16.msra.mxu0 %v5982_v27 }
 0x68b   :  { %v4867_v17 = vrot.slane %v4851_v45, 7  ;;  %v4885_v22 = vsel %vm4877_vm0, %v4850_v15, %v4868_v0 }
 0x68c   :  { %5295 = vmatprep.mubr.f32.mxu1 %v4885_v22 }
 0x68d   :  { %v4884_v32 = vsel %vm4877_vm0, %v4849_v20, %v4867_v17 }
 0x68e   :  { %5296 = vmatmul.mubr.f32.vlgmr.msra.gmra.mrb[2].mxu1 %v4884_v32 }
 0x728   :  { %v5726_v63 = vpop.f32.mrb[0].mxu0 }
 0x729   :  { %v5727_v53 = vpop.f32.mrb[1].mxu0 }
 0x72a   :  { %v5728_v48 = vadd.f32 %v5727_v53, %v5726_v63 }
 0x72c   :  { %v5088_v35 = vadd.f32 %v5728_v48, %v5692_v58 }
 0x731   :  { %v5761_v34 = vpop.f32.mrb[0].mxu1 }
 0x732   :  { %v5762_v24 = vpop.f32.mrb[1].mxu1 }
 0x733   :  { %v5763_v19 = vadd.f32 %v5762_v24, %v5761_v34 }
 0x735   :  { %v5158_v9 = vadd.f32 %v5763_v19, %v5088_v35 }
 0x758   :  { %v5796_v47 = vpop.f32.mrb[2].mxu0 }
 0x759   :  { %v5797_v54 = vpop.f32.mrb[3].mxu0 }
 0x75a   :  { %v5798_v11 = vadd.f32 %v5797_v54, %v5796_v47 }
 0x75c   :  { %v5228_v50 = vadd.f32 %v5798_v11, %v5158_v9 }
 0x761   :  { %v5831_v13 = vpop.f32.mrb[2].mxu1 }
 0x762   :  { %v5832_v61 = vpop.f32.mrb[3].mxu1 }
 0x763   :  { %v5833_v52 = vadd.f32 %v5832_v61, %v5831_v13 }
 0x765   :  { %v5298_v41 = vadd.f32 %v5833_v52, %v5228_v50 }
 0x767   :  { %6016 = vtanh.f32 %v5298_v41 }
 0x771   :  { %v6017_v25 = vpop.eup %6016 }
 0x772   :  { %5848 = vmatmul.mubr.msk.f32.vlgmr.msra.gmra.mrb[4].mxu0 %vm5306_vm2, %v6017_v25 }
 0x845   :  { %v5376_v55 = vpop.f32.mrb[4].mxu0 }
 0x846   :  { %v5849_v49 = vpop.f32.mrb[5].mxu0  ;;  %5381 = vst.msk [vmem:[#allocation20] sm:$0x3] %vm5380_vm3, %v5376_v55 }
 0x847   :  { %6157 = shalt.err (!%p6154_p13)
}
 0x848   :  { %s13913_s30 = sld [smem:[#allocation151_spill]] }
 0x84e   :  { %s6158_s7 = scalar_lea.hbm %s13913_s30, 32 }
 0x84f   :  { %p6159_p0 = scmp.ne.s32.totalorder %s13913_s30, %s6158_s7  ;;  %p6162_p1 = scmp.lt.u32.totalorder %s6158_s7, %s13913_s30 }
 0x851   :  { %p6164_p2 = pnand %p6162_p1, %p6159_p0 }
 0x853   :  { %6167 = shalt.err (!%p6164_p2)
}
 0x854   :  { %5391 = dma.vmem_to_hbm [thread:$0]  %s5389_s9, 32, %s13913_s30, [#allocation4]  }
 0x855   :  { %6182 = dma.done.wait [#allocation4], 32  }
 0x856   :  { %6183 = vsyncadd [#allocation4], 4294967264 }
 0x857   :  { %5395 = vsyncpa [#allocation3], 1 }
 0x858   :  { %5396 = vsyncpa [#allocation4], 1 }
 0x859   :  { %5397 = vsyncpa [#allocation5], 1 }
 0x85a   :  { %5398 = vsyncpa [#allocation6], 1 }
 0x85b   :  { %5399 = vsyncpa [#allocation9], 1 }
 0x85c   :  { %5400 = vsyncpa [#allocation12], 1 }
 0x85d   :  { %5401 = vsyncpa [#allocation15], 1 }
 0x85e   :  { %5402 = vsyncpa [#allocation18], 1 }

</bundles_post_ra>
